<compile_context>
chip_gen: v7x
topology: tpu7x:2x2x1
jax: 0.10.0
libtpu: 0.0.40
codegen_flags: <defaults>
</compile_context>

<pallas_src>
import functools

import jax
import jax.numpy as jnp
import numpy as np
from jax.experimental import pallas as pl
from jax.experimental.pallas import tpu as pltpu

EPS = 1e-5          # nn.BatchNorm2d default eps
NEG_SLOPE = 0.2     # F.leaky_relu negative_slope

_VMEM_SPEC = pl.BlockSpec(memory_space=pltpu.MemorySpace.VMEM)


def _pick_tile(n, cap):
    """Largest lane-aligned (multiple of 128) tile <= cap dividing n, else full n."""
    if n <= cap:
        return n
    t = (cap // 128) * 128
    while t >= 128:
        if n % t == 0:
            return t
        t -= 128
    return n


# ----------------------------------------------------------------------------
# Kernel 1: centering + global scaling pre-pass (small, gridless).
# Emits keys = [xs ; xx], qry = [-2 xs ; 1], and xx so the feature kernel does
# no per-step concatenation work.
# ----------------------------------------------------------------------------
def _prep_kernel(x_ref, keys_ref, qry_ref, xx_ref):
    c = x_ref.shape[1]
    x = x_ref[...]                                            # (B, C, N)
    xc = x - jnp.mean(x, axis=-1, keepdims=True)
    sq = jnp.sum(xc * xc, axis=1, keepdims=True)              # (B, 1, N)
    max_sq = jnp.max(sq)                                      # global max (couples batches)
    inv_max = 1.0 / max_sq
    xs = xc * jax.lax.rsqrt(max_sq)                           # scaled points
    xxs = sq * inv_max                                        # norms of the scaled points
    keys_ref[:, :c, :] = xs
    keys_ref[:, c:, :] = xxs
    qry_ref[:, :c, :] = -2.0 * xs
    qry_ref[:, c:, :] = jnp.ones_like(xxs)
    xx_ref[...] = xxs


# ----------------------------------------------------------------------------
# Kernel 2: get_graph_feature — tiled pairwise max / argmax / norm gather.
# ----------------------------------------------------------------------------
def _feature_kernel(keys_ref, qry_ref, xxq_ref, feat_ref, rows_ref):
    # keys_ref: (1, C+1, N)  resident per batch  ([x ; xx] keys)
    # qry_ref : (1, C+1, TQ) per-query tile      ([-2x ; 1])
    # xxq_ref : (1, 1, TQ)   per-query norms
    # feat_ref: (1, 3, TQ)   rows = [xx_q, xx[argmax_k s], xx_q + max_k s]
    n = keys_ref.shape[2]
    c = keys_ref.shape[1] - 1

    # Row-index iota hoisted into scratch, written once per batch (q axis is
    # "arbitrary", so every batch sweep starts at q == 0 on its core).
    @pl.when(pl.program_id(1) == 0)
    def _():
        rows_ref[...] = jax.lax.broadcasted_iota(jnp.int32, rows_ref.shape, 0)

    keys = keys_ref[0]                                        # (C+1, N)
    xxk = keys[c:c + 1, :]                                    # (1, N)
    qry = qry_ref[0]                                          # (C+1, TQ)
    xxq = xxq_ref[0]                                          # (1, TQ)

    # s[k, q] = xx_k - 2 <x_k, x_q> from a single augmented MXU matmul.
    s = jax.lax.dot_general(keys, qry, (((0,), (0,)), ((), ())),
                            preferred_element_type=jnp.float32)   # (N, TQ)

    m = jnp.max(s, axis=0, keepdims=True)                     # (1, TQ)
    rows = rows_ref[...]
    # first-index argmax over keys (torch tie-break)
    idx = jnp.min(jnp.where(s == m, rows, n), axis=0, keepdims=True)   # (1, TQ)
    onehot = (rows == idx).astype(jnp.float32)                # (N, TQ)
    # furthest-point norm gather on the MXU: (1,N) @ (N,TQ) -> (1,TQ)
    furthest = jax.lax.dot_general(xxk, onehot, (((1,), (0,)), ((), ())),
                                   preferred_element_type=jnp.float32)
    feat_ref[0] = jnp.concatenate([xxq, furthest, xxq + m], axis=0)    # (3, TQ)


# ----------------------------------------------------------------------------
# Kernels 3..: 1x1 conv -> BatchNorm(train) -> LeakyReLU chain, tiled over
# (batch, point tiles).  Per-batch partial stats + resident scratch accumulator
# (reset at t == 0, written at t == last) keep the batch axis "parallel".
# ----------------------------------------------------------------------------
def _accumulate_stats(y, acc_sum, acc_ssq, ps_sum_ref, ps_ssq_ref):
    t = pl.program_id(1)

    @pl.when(t == 0)
    def _():
        acc_sum[...] = jnp.zeros_like(acc_sum)
        acc_ssq[...] = jnp.zeros_like(acc_ssq)

    acc_sum[...] += jnp.sum(y, axis=1, keepdims=True)
    acc_ssq[...] += jnp.sum(y * y, axis=1, keepdims=True)

    @pl.when(t == pl.num_programs(1) - 1)
    def _():
        ps_sum_ref[0] = acc_sum[...]
        ps_ssq_ref[0] = acc_ssq[...]


def _first_layer_kernel(h_ref, w_ref, y_ref, ps_sum_ref, ps_ssq_ref, acc_sum, acc_ssq):
    # y = W1 @ feature tile (f32); store bf16; accumulate per-batch BN partials.
    y = jnp.dot(w_ref[...], h_ref[0], preferred_element_type=jnp.float32)   # (Cout, TN)
    y_ref[0] = y.astype(y_ref.dtype)
    _accumulate_stats(y, acc_sum, acc_ssq, ps_sum_ref, ps_ssq_ref)


def _mid_layer_kernel(yp_ref, bn_ref, w_ref, y_ref, ps_sum_ref, ps_ssq_ref,
                      acc_sum, acc_ssq):
    # BN(train) + LeakyReLU on the previous layer's (bf16-stored) pre-BN activations
    # using precomputed (mean, inv_std), then the next 1x1 conv on the MXU.
    bn = bn_ref[...]                                          # (Cin, 2)
    mean, inv_std = bn[:, 0:1], bn[:, 1:2]
    h = (yp_ref[0].astype(jnp.float32) - mean) * inv_std      # (Cin, TN) f32
    h = jnp.maximum(h, NEG_SLOPE * h)                         # LeakyReLU(0.2): single vmax
    w = w_ref[...]                                            # bf16 for K >= 64 (pre-cast)
    y = jnp.dot(w, h.astype(w.dtype), preferred_element_type=jnp.float32)
    y_ref[0] = y.astype(y_ref.dtype)
    _accumulate_stats(y, acc_sum, acc_ssq, ps_sum_ref, ps_ssq_ref)


def _final_norm_kernel(y_ref, bn_ref, o_ref):
    bn = bn_ref[...]
    mean, inv_std = bn[:, 0:1], bn[:, 1:2]
    h = (y_ref[0].astype(jnp.float32) - mean) * inv_std
    o_ref[0] = jnp.maximum(h, NEG_SLOPE * h)


def _bn_params(ps_sum, ps_ssq, inv_m):
    """(B, C, 1) partial sums/sum-squares -> (C, 2) [mean, inv_std]; tiny O(C) op."""
    mean = jnp.sum(ps_sum, axis=0) * inv_m                    # (C, 1)
    var = jnp.sum(ps_ssq, axis=0) * inv_m - mean * mean       # biased variance
    return jnp.concatenate([mean, jax.lax.rsqrt(var + EPS)], axis=1)   # (C, 2)


# ----------------------------------------------------------------------------
# Wrapper
# ----------------------------------------------------------------------------
def backbone_forward(x, weights):
    """x: (B, 3, N) f32; weights: 4 conv weights (Cout, Cin) f32 -> (B, emb_dims, N)."""
    B, C, N = x.shape
    emb = weights[-1].shape[0]
    M = B * N
    inv_m = 1.0 / float(M)

    # 1) center + global scale; emit augmented key/query arrays + norms.
    keys, qry, xx = pl.pallas_call(
        _prep_kernel,
        out_shape=(jax.ShapeDtypeStruct((B, C + 1, N), jnp.float32),
                   jax.ShapeDtypeStruct((B, C + 1, N), jnp.float32),
                   jax.ShapeDtypeStruct((B, 1, N), jnp.float32)),
        in_specs=[_VMEM_SPEC],
        out_specs=(_VMEM_SPEC, _VMEM_SPEC, _VMEM_SPEC),
        compiler_params=pltpu.CompilerParams(vmem_limit_bytes=48 * 1024 * 1024),
    )(x)

    # 2) graph feature, tiled over (batch, query tiles).
    #    TQ sized so ~5 live (N, TQ) f32/i32 temporaries stay under ~24 MiB (v7x-safe).
    tq_cap = max(128, min(512, ((24 * 1024 * 1024) // (20 * N)) // 128 * 128))
    TQ = _pick_tile(N, tq_cap)
    feat = pl.pallas_call(
        _feature_kernel,
        out_shape=jax.ShapeDtypeStruct((B, 3, N), jnp.float32),
        grid_spec=pltpu.PrefetchScalarGridSpec(
            num_scalar_prefetch=0,
            grid=(B, N // TQ),
            in_specs=[pl.BlockSpec((1, C + 1, N), lambda b, q: (b, 0, 0)),
                      pl.BlockSpec((1, C + 1, TQ), lambda b, q: (b, 0, q)),
                      pl.BlockSpec((1, 1, TQ), lambda b, q: (b, 0, q))],
            out_specs=pl.BlockSpec((1, 3, TQ), lambda b, q: (b, 0, q)),
            scratch_shapes=[pltpu.VMEM((N, TQ), jnp.int32)]),
        compiler_params=pltpu.CompilerParams(
            dimension_semantics=("parallel", "arbitrary"),
            vmem_limit_bytes=48 * 1024 * 1024),
        cost_estimate=pl.CostEstimate(
            flops=B * N * N * (2 * (C + 1) + 10),
            transcendentals=0,
            bytes_accessed=4 * (2 * B * (C + 1) * N + B * N + 3 * B * N)),
    )(keys, qry, xx)

    # 3) four conv->BN->LeakyReLU layers, tiled over (batch, point tiles).
    TN = _pick_tile(N, 2048)
    grid = (B, N // TN)

    h, y, bn = feat, None, None
    for li, w in enumerate(weights):
        cout, cin = w.shape
        # pre-cast large-K conv weights to bf16 once in the wrapper
        w_in = w.astype(jnp.bfloat16) if cin >= 64 else w
        if li == 0:
            kern = _first_layer_kernel
            operands = (h, w_in)
            in_specs = [pl.BlockSpec((1, cin, TN), lambda b, t: (b, 0, t)),
                        pl.BlockSpec((cout, cin), lambda b, t: (0, 0))]
        else:
            kern = _mid_layer_kernel
            operands = (y, bn, w_in)
            in_specs = [pl.BlockSpec((1, cin, TN), lambda b, t: (b, 0, t)),
                        pl.BlockSpec((cin, 2), lambda b, t: (0, 0)),
                        pl.BlockSpec((cout, cin), lambda b, t: (0, 0))]
        y, ps_sum, ps_ssq = pl.pallas_call(
            kern,
            out_shape=(jax.ShapeDtypeStruct((B, cout, N), jnp.bfloat16),   # bf16 storage
                       jax.ShapeDtypeStruct((B, cout, 1), jnp.float32),
                       jax.ShapeDtypeStruct((B, cout, 1), jnp.float32)),
            grid_spec=pltpu.PrefetchScalarGridSpec(
                num_scalar_prefetch=0,
                grid=grid,
                in_specs=in_specs,
                out_specs=(pl.BlockSpec((1, cout, TN), lambda b, t: (b, 0, t)),
                           pl.BlockSpec((1, cout, 1), lambda b, t: (b, 0, 0)),
                           pl.BlockSpec((1, cout, 1), lambda b, t: (b, 0, 0))),
                scratch_shapes=[pltpu.VMEM((cout, 1), jnp.float32),
                                pltpu.VMEM((cout, 1), jnp.float32)]),
            compiler_params=pltpu.CompilerParams(
                dimension_semantics=("parallel", "arbitrary"),   # batch axis -> 2 TCs on v7x
                vmem_limit_bytes=32 * 1024 * 1024),
            cost_estimate=pl.CostEstimate(
                flops=2 * cout * cin * M + 8 * cout * M,
                transcendentals=0,
                bytes_accessed=2 * cin * M + 2 * cout * M + 4 * cout * cin + 16 * cout),
        )(*operands)
        bn = _bn_params(ps_sum, ps_ssq, inv_m)    # (cout, 2) [mean, inv_std], tiny jnp op

    # final BN + LeakyReLU pass, writes (B, emb, N) f32 directly (== x.view(B, -1, N))
    out = pl.pallas_call(
        _final_norm_kernel,
        out_shape=jax.ShapeDtypeStruct((B, emb, N), jnp.float32),
        grid_spec=pltpu.PrefetchScalarGridSpec(
            num_scalar_prefetch=0,
            grid=grid,
            in_specs=[pl.BlockSpec((1, emb, TN), lambda b, t: (b, 0, t)),
                      pl.BlockSpec((emb, 2), lambda b, t: (0, 0))],
            out_specs=pl.BlockSpec((1, emb, TN), lambda b, t: (b, 0, t))),
        compiler_params=pltpu.CompilerParams(
            dimension_semantics=("parallel", "parallel"),
            vmem_limit_bytes=32 * 1024 * 1024),
        cost_estimate=pl.CostEstimate(
            flops=6 * emb * M, transcendentals=0,
            bytes_accessed=2 * emb * M + 4 * emb * M),
    )(y, bn)
    return out


# ----------------------------------------------------------------------------
# Pure-JAX reference mirroring the PyTorch forward (for verification)
# ----------------------------------------------------------------------------
def reference_forward(x, weights):
    xc = x - x.mean(axis=-1, keepdims=True)
    xx0 = jnp.sum(xc ** 2, axis=1)
    xs = xc * (1.0 / jnp.sqrt(jnp.max(xx0)))
    inner = 2.0 * jnp.einsum("bcn,bcm->bnm", xs, xs)
    xx = jnp.sum(xs ** 2, axis=1)                             # (B, N)
    pair = xx[:, :, None] + xx[:, None, :] - inner
    dist = pair.max(axis=-1)
    idx = pair.argmax(axis=-1)
    furthest = jnp.take_along_axis(xx, idx, axis=1)
    h = jnp.stack([xx, furthest, dist], axis=1)               # (B, 3, N)
    for w in weights:
        h = jnp.einsum("oc,bcn->bon", w, h)
        mean = h.mean(axis=(0, 2), keepdims=True)
        var = ((h - mean) ** 2).mean(axis=(0, 2), keepdims=True)
        h = (h - mean) / jnp.sqrt(var + EPS)
        h = jnp.where(h >= 0, h, NEG_SLOPE * h)
    return h


if __name__ == "__main__":
    B, C, N, emb = 2, 3, 384, 128          # small, exercises multi-batch grids
    key = jax.random.PRNGKey(0)
    kx, k1, k2, k3, k4 = jax.random.split(key, 5)

    x = jax.random.normal(kx, (B, C, N), dtype=jnp.float32)

    def init_w(k, cout, cin):
        bound = 1.0 / np.sqrt(cin)
        return jax.random.uniform(k, (cout, cin), jnp.float32, -bound, bound)

    weights = (init_w(k1, 16, 3),
               init_w(k2, 64, 16),
               init_w(k3, 256, 64),
               init_w(k4, emb, 256))

    fwd = jax.jit(backbone_forward)
    out = jax.block_until_ready(fwd(x, weights))

    ref = reference_forward(x, weights)
    assert out.shape == (B, emb, N), out.shape
    out_np, ref_np = np.asarray(out), np.asarray(ref)
    # Tolerance accounts for bf16 inter-layer activation storage and bf16 MXU
    # operands on the two K>=64 layers.
    rel = np.linalg.norm(out_np - ref_np) / (np.linalg.norm(ref_np) + 1e-12)
    assert rel < 3e-2, f"relative error too high: {rel}"
    assert np.allclose(out_np, ref_np, rtol=2e-1, atol=2e-1)
    print("KERNEL_OK")
</pallas_src>

<mosaic_0001>
module attributes {stable_mosaic.version = 11 : i64} {
  func.func @_prep_kernel(%arg0: memref<2x3x384xf32, #tpu.memory_space<vmem>>, %arg1: memref<2x4x384xf32, #tpu.memory_space<vmem>>, %arg2: memref<2x4x384xf32, #tpu.memory_space<vmem>>, %arg3: memref<2x1x384xf32, #tpu.memory_space<vmem>>) attributes {dimension_semantics = [], scalar_prefetch = 0 : i64, scratch_operands = 0 : i64, tpu.core_type = #tpu.core_type<tc>} {
    %c0 = arith.constant 0 : index
    %c0_0 = arith.constant 0 : index
    %c0_1 = arith.constant 0 : index
    %0 = vector.load %arg0[%c0, %c0_0, %c0_1] : memref<2x3x384xf32, #tpu.memory_space<vmem>>, vector<2x3x384xf32>
    %cst = arith.constant dense<0.000000e+00> : vector<2x3xf32>
    %1 = vector.multi_reduction <add>, %0, %cst [2] : vector<2x3x384xf32> to vector<2x3xf32>
    %2 = vector.shape_cast %1 : vector<2x3xf32> to vector<2x3x1xf32>
    %cst_2 = arith.constant 3.840000e+02 : f32
    %3 = vector.broadcast %cst_2 : f32 to vector<2x3x1xf32>
    %4 = arith.divf %2, %3 : vector<2x3x1xf32>
    %5 = vector.broadcast %4 : vector<2x3x1xf32> to vector<2x3x384xf32>
    %6 = arith.subf %0, %5 : vector<2x3x384xf32>
    %7 = arith.mulf %6, %6 : vector<2x3x384xf32>
    %cst_3 = arith.constant dense<0.000000e+00> : vector<2x384xf32>
    %8 = vector.multi_reduction <add>, %7, %cst_3 [1] : vector<2x3x384xf32> to vector<2x384xf32>
    %9 = vector.shape_cast %8 : vector<2x384xf32> to vector<2x1x384xf32>
    %10 = vector.shape_cast %9 : vector<2x1x384xf32> to vector<1x2x1x384xf32>
    %cst_4 = arith.constant dense<0xFF800000> : vector<1xf32>
    %11 = vector.multi_reduction <maximumf>, %10, %cst_4 [1, 2, 3] : vector<1x2x1x384xf32> to vector<1xf32>
    %12 = vector.shape_cast %11 : vector<1xf32> to vector<1x1x1x1xf32>
    %13 = vector.extract %12[0, 0, 0, 0] : f32 from vector<1x1x1x1xf32>
    %cst_5 = arith.constant 1.000000e+00 : f32
    %14 = arith.divf %cst_5, %13 : f32
    %15 = math.rsqrt %13 : f32
    %16 = vector.broadcast %15 : f32 to vector<2x3x384xf32>
    %17 = arith.mulf %6, %16 : vector<2x3x384xf32>
    %18 = vector.broadcast %14 : f32 to vector<2x1x384xf32>
    %19 = arith.mulf %9, %18 : vector<2x1x384xf32>
    %c0_6 = arith.constant 0 : index
    %c0_7 = arith.constant 0 : index
    %c0_8 = arith.constant 0 : index
    %20 = vector.load %arg1[%c0_6, %c0_7, %c0_8] : memref<2x4x384xf32, #tpu.memory_space<vmem>>, vector<2x3x384xf32>
    tpu.vector_store %arg1[%c0_6, %c0_7, %c0_8], %17 {strides = array<i32>} : memref<2x4x384xf32, #tpu.memory_space<vmem>>, vector<2x3x384xf32>,
    %c0_9 = arith.constant 0 : index
    %c3 = arith.constant 3 : index
    %c0_10 = arith.constant 0 : index
    %21 = vector.load %arg1[%c0_9, %c3, %c0_10] : memref<2x4x384xf32, #tpu.memory_space<vmem>>, vector<2x1x384xf32>
    tpu.vector_store %arg1[%c0_9, %c3, %c0_10], %19 {strides = array<i32>} : memref<2x4x384xf32, #tpu.memory_space<vmem>>, vector<2x1x384xf32>,
    %cst_11 = arith.constant -2.000000e+00 : f32
    %22 = vector.broadcast %cst_11 : f32 to vector<2x3x384xf32>
    %23 = arith.mulf %22, %17 : vector<2x3x384xf32>
    %c0_12 = arith.constant 0 : index
    %c0_13 = arith.constant 0 : index
    %c0_14 = arith.constant 0 : index
    %24 = vector.load %arg2[%c0_12, %c0_13, %c0_14] : memref<2x4x384xf32, #tpu.memory_space<vmem>>, vector<2x3x384xf32>
    tpu.vector_store %arg2[%c0_12, %c0_13, %c0_14], %23 {strides = array<i32>} : memref<2x4x384xf32, #tpu.memory_space<vmem>>, vector<2x3x384xf32>,
    %cst_15 = arith.constant 1.000000e+00 : f32
    %25 = vector.broadcast %cst_15 : f32 to vector<2x1x384xf32>
    %c0_16 = arith.constant 0 : index
    %c3_17 = arith.constant 3 : index
    %c0_18 = arith.constant 0 : index
    %26 = vector.load %arg2[%c0_16, %c3_17, %c0_18] : memref<2x4x384xf32, #tpu.memory_space<vmem>>, vector<2x1x384xf32>
    tpu.vector_store %arg2[%c0_16, %c3_17, %c0_18], %25 {strides = array<i32>} : memref<2x4x384xf32, #tpu.memory_space<vmem>>, vector<2x1x384xf32>,
    %c0_19 = arith.constant 0 : index
    %c0_20 = arith.constant 0 : index
    %c0_21 = arith.constant 0 : index
    %27 = vector.load %arg3[%c0_19, %c0_20, %c0_21] : memref<2x1x384xf32, #tpu.memory_space<vmem>>, vector<2x1x384xf32>
    tpu.vector_store %arg3[%c0_19, %c0_20, %c0_21], %19 {strides = array<i32>} : memref<2x1x384xf32, #tpu.memory_space<vmem>>, vector<2x1x384xf32>,
    return
  }
}

module attributes {stable_mosaic.version = 11 : i64} {
  func.func @_feature_kernel(%arg0: i32, %arg1: i32, %arg2: memref<1x4x384xf32, #tpu.memory_space<vmem>>, %arg3: memref<1x4x384xf32, #tpu.memory_space<vmem>>, %arg4: memref<1x1x384xf32, #tpu.memory_space<vmem>>, %arg5: memref<1x3x384xf32, #tpu.memory_space<vmem>>, %arg6: memref<384x384xi32, #tpu.memory_space<vmem>>) attributes {dimension_semantics = [#tpu.dimension_semantics<parallel>, #tpu.dimension_semantics<arbitrary>], iteration_bounds = array<i64: 2, 1>, scalar_prefetch = 0 : i64, scratch_operands = 1 : i64, tpu.core_type = #tpu.core_type<tc>, window_params = [{transform_indices = @transform_0, window_bounds = array<i64: 1, 4, 384>}, {transform_indices = @transform_1, window_bounds = array<i64: 1, 4, 384>}, {transform_indices = @transform_2, window_bounds = array<i64: 1, 1, 384>}, {transform_indices = @transform_3, window_bounds = array<i64: 1, 3, 384>}]} {
    %c0_i32 = arith.constant 0 : i32
    %0 = arith.cmpi eq, %arg1, %c0_i32 : i32
    %1 = arith.extui %0 : i1 to i32
    %c0_i32_0 = arith.constant 0 : i32
    %2 = arith.cmpi ne, %1, %c0_i32_0 : i32
    scf.if %2 {
      %30 = tpu.iota {dimensions = array<i32: 0>} : vector<384x384xi32>
      %c0_17 = arith.constant 0 : index
      %c0_18 = arith.constant 0 : index
      %31 = vector.load %arg6[%c0_17, %c0_18] : memref<384x384xi32, #tpu.memory_space<vmem>>, vector<384x384xi32>
      tpu.vector_store %arg6[%c0_17, %c0_18], %30 {strides = array<i32>} : memref<384x384xi32, #tpu.memory_space<vmem>>, vector<384x384xi32>,
    } else {
    }
    %c0 = arith.constant 0 : index
    %c0_1 = arith.constant 0 : index
    %c0_2 = arith.constant 0 : index
    %3 = vector.load %arg2[%c0, %c0_1, %c0_2] : memref<1x4x384xf32, #tpu.memory_space<vmem>>, vector<1x4x384xf32>
    %4 = vector.shape_cast %3 : vector<1x4x384xf32> to vector<4x384xf32>
    %5 = vector.extract_strided_slice %4 {offsets = [3, 0], sizes = [1, 384], strides = [1, 1]} : vector<4x384xf32> to vector<1x384xf32>
    %c0_3 = arith.constant 0 : index
    %c0_4 = arith.constant 0 : index
    %c0_5 = arith.constant 0 : index
    %6 = vector.load %arg3[%c0_3, %c0_4, %c0_5] : memref<1x4x384xf32, #tpu.memory_space<vmem>>, vector<1x4x384xf32>
    %7 = vector.shape_cast %6 : vector<1x4x384xf32> to vector<4x384xf32>
    %c0_6 = arith.constant 0 : index
    %c0_7 = arith.constant 0 : index
    %c0_8 = arith.constant 0 : index
    %8 = vector.load %arg4[%c0_6, %c0_7, %c0_8] : memref<1x1x384xf32, #tpu.memory_space<vmem>>, vector<1x1x384xf32>
    %9 = vector.shape_cast %8 : vector<1x1x384xf32> to vector<1x384xf32>
    %cst = arith.constant dense<0.000000e+00> : vector<384x384xf32>
    %10 = tpu.matmul %4, %7, %cst {dimension_numbers = #tpu.dot_dimension_numbers<[0], [0], [1], [1], [0, 1, 1, 1], [], []>} : vector<4x384xf32>, vector<4x384xf32>, vector<384x384xf32> -> vector<384x384xf32>
    %cst_9 = arith.constant dense<0xFF800000> : vector<384xf32>
    %11 = vector.multi_reduction <maximumf>, %10, %cst_9 [0] : vector<384x384xf32> to vector<384xf32>
    %12 = vector.shape_cast %11 : vector<384xf32> to vector<1x384xf32>
    %c0_10 = arith.constant 0 : index
    %c0_11 = arith.constant 0 : index
    %13 = vector.load %arg6[%c0_10, %c0_11] : memref<384x384xi32, #tpu.memory_space<vmem>>, vector<384x384xi32>
    %14 = vector.broadcast %12 : vector<1x384xf32> to vector<384x384xf32>
    %15 = arith.cmpf oeq, %10, %14 : vector<384x384xf32>
    %c384_i32 = arith.constant 384 : i32
    %16 = vector.broadcast %c384_i32 : i32 to vector<384x384xi32>
    %17 = arith.select %15, %13, %16 : vector<384x384xi1>, vector<384x384xi32>
    %cst_12 = arith.constant dense<2147483647> : vector<384xi32>
    %18 = vector.multi_reduction <minsi>, %17, %cst_12 [0] : vector<384x384xi32> to vector<384xi32>
    %19 = vector.shape_cast %18 : vector<384xi32> to vector<1x384xi32>
    %20 = vector.broadcast %19 : vector<1x384xi32> to vector<384x384xi32>
    %21 = arith.cmpi eq, %13, %20 : vector<384x384xi32>
    %22 = arith.extui %21 : vector<384x384xi1> to vector<384x384xi32>
    %23 = arith.sitofp %22 : vector<384x384xi32> to vector<384x384xf32>
    %cst_13 = arith.constant dense<0.000000e+00> : vector<1x384xf32>
    %24 = tpu.matmul %5, %23, %cst_13 {dimension_numbers = #tpu.dot_dimension_numbers<[1], [0], [0], [1], [0, 0, 1, 1], [], []>} : vector<1x384xf32>, vector<384x384xf32>, vector<1x384xf32> -> vector<1x384xf32>
    %25 = arith.addf %9, %12 : vector<1x384xf32>
    %26 = tpu.concatenate %9, %24, %25 in 0 : vector<1x384xf32>, vector<1x384xf32>, vector<1x384xf32> -> vector<3x384xf32>
    %c0_14 = arith.constant 0 : index
    %c0_15 = arith.constant 0 : index
    %c0_16 = arith.constant 0 : index
    %27 = vector.load %arg5[%c0_14, %c0_15, %c0_16] : memref<1x3x384xf32, #tpu.memory_space<vmem>>, vector<1x3x384xf32>
    %28 = vector.shape_cast %27 : vector<1x3x384xf32> to vector<3x384xf32>
    %29 = vector.shape_cast %26 : vector<3x384xf32> to vector<1x3x384xf32>
    tpu.vector_store %arg5[%c0_14, %c0_15, %c0_16], %29 {strides = array<i32>} : memref<1x3x384xf32, #tpu.memory_space<vmem>>, vector<1x3x384xf32>,
    return
  }
  func.func @transform_0(%arg0: i32, %arg1: i32) -> (i32, i32, i32) {
    %c0_i32 = arith.constant 0 : i32
    %c0_i32_0 = arith.constant 0 : i32
    %c0_i32_1 = arith.constant 0 : i32
    return %arg0, %c0_i32, %c0_i32_0 : i32, i32, i32
  }
  func.func @transform_1(%arg0: i32, %arg1: i32) -> (i32, i32, i32) {
    %c0_i32 = arith.constant 0 : i32
    %c0_i32_0 = arith.constant 0 : i32
    return %arg0, %c0_i32, %arg1 : i32, i32, i32
  }
  func.func @transform_2(%arg0: i32, %arg1: i32) -> (i32, i32, i32) {
    %c0_i32 = arith.constant 0 : i32
    %c0_i32_0 = arith.constant 0 : i32
    return %arg0, %c0_i32, %arg1 : i32, i32, i32
  }
  func.func @transform_3(%arg0: i32, %arg1: i32) -> (i32, i32, i32) {
    %c0_i32 = arith.constant 0 : i32
    %c0_i32_0 = arith.constant 0 : i32
    return %arg0, %c0_i32, %arg1 : i32, i32, i32
  }
}

module attributes {stable_mosaic.version = 11 : i64} {
  func.func @_first_layer_kernel(%arg0: i32, %arg1: i32, %arg2: memref<1x3x384xf32, #tpu.memory_space<vmem>>, %arg3: memref<16x3xf32, #tpu.memory_space<vmem>>, %arg4: memref<1x16x384xbf16, #tpu.memory_space<vmem>>, %arg5: memref<1x16x1xf32, #tpu.memory_space<vmem>>, %arg6: memref<1x16x1xf32, #tpu.memory_space<vmem>>, %arg7: memref<16x1xf32, #tpu.memory_space<vmem>>, %arg8: memref<16x1xf32, #tpu.memory_space<vmem>>) attributes {dimension_semantics = [#tpu.dimension_semantics<parallel>, #tpu.dimension_semantics<arbitrary>], iteration_bounds = array<i64: 2, 1>, scalar_prefetch = 0 : i64, scratch_operands = 2 : i64, tpu.core_type = #tpu.core_type<tc>, window_params = [{transform_indices = @transform_0, window_bounds = array<i64: 1, 3, 384>}, {pipeline_mode = #tpu.pipeline_mode<synchronous>, transform_indices = @transform_1, window_bounds = array<i64: 16, 3>}, {transform_indices = @transform_2, window_bounds = array<i64: 1, 16, 384>}, {transform_indices = @transform_3, window_bounds = array<i64: 1, 16, 1>}, {transform_indices = @transform_4, window_bounds = array<i64: 1, 16, 1>}]} {
    %c0 = arith.constant 0 : index
    %c0_0 = arith.constant 0 : index
    %0 = vector.load %arg3[%c0, %c0_0] : memref<16x3xf32, #tpu.memory_space<vmem>>, vector<16x3xf32>
    %c0_1 = arith.constant 0 : index
    %c0_2 = arith.constant 0 : index
    %c0_3 = arith.constant 0 : index
    %1 = vector.load %arg2[%c0_1, %c0_2, %c0_3] : memref<1x3x384xf32, #tpu.memory_space<vmem>>, vector<1x3x384xf32>
    %2 = vector.shape_cast %1 : vector<1x3x384xf32> to vector<3x384xf32>
    %cst = arith.constant dense<0.000000e+00> : vector<16x384xf32>
    %3 = tpu.matmul %0, %2, %cst {dimension_numbers = #tpu.dot_dimension_numbers<[1], [0], [0], [1], [0, 0, 1, 1], [], []>} : vector<16x3xf32>, vector<3x384xf32>, vector<16x384xf32> -> vector<16x384xf32>
    %4 = arith.truncf %3 : vector<16x384xf32> to vector<16x384xbf16>
    %c0_4 = arith.constant 0 : index
    %c0_5 = arith.constant 0 : index
    %c0_6 = arith.constant 0 : index
    %5 = vector.load %arg4[%c0_4, %c0_5, %c0_6] : memref<1x16x384xbf16, #tpu.memory_space<vmem>>, vector<1x16x384xbf16>
    %6 = vector.shape_cast %5 : vector<1x16x384xbf16> to vector<16x384xbf16>
    %7 = vector.shape_cast %4 : vector<16x384xbf16> to vector<1x16x384xbf16>
    tpu.vector_store %arg4[%c0_4, %c0_5, %c0_6], %7 {strides = array<i32>} : memref<1x16x384xbf16, #tpu.memory_space<vmem>>, vector<1x16x384xbf16>,
    %c0_i32 = arith.constant 0 : i32
    %8 = arith.cmpi eq, %arg1, %c0_i32 : i32
    %9 = arith.extui %8 : i1 to i32
    %c0_i32_7 = arith.constant 0 : i32
    %10 = arith.cmpi ne, %9, %c0_i32_7 : i32
    scf.if %10 {
      %cst_20 = arith.constant 0.000000e+00 : f32
      %25 = vector.broadcast %cst_20 : f32 to vector<16x1xf32>
      %c0_21 = arith.constant 0 : index
      %c0_22 = arith.constant 0 : index
      %26 = vector.load %arg7[%c0_21, %c0_22] : memref<16x1xf32, #tpu.memory_space<vmem>>, vector<16x1xf32>
      tpu.vector_store %arg7[%c0_21, %c0_22], %25 {strides = array<i32>} : memref<16x1xf32, #tpu.memory_space<vmem>>, vector<16x1xf32>,
      %cst_23 = arith.constant 0.000000e+00 : f32
      %27 = vector.broadcast %cst_23 : f32 to vector<16x1xf32>
      %c0_24 = arith.constant 0 : index
      %c0_25 = arith.constant 0 : index
      %28 = vector.load %arg8[%c0_24, %c0_25] : memref<16x1xf32, #tpu.memory_space<vmem>>, vector<16x1xf32>
      tpu.vector_store %arg8[%c0_24, %c0_25], %27 {strides = array<i32>} : memref<16x1xf32, #tpu.memory_space<vmem>>, vector<16x1xf32>,
    } else {
    }
    %c0_8 = arith.constant 0 : index
    %c0_9 = arith.constant 0 : index
    %11 = vector.load %arg7[%c0_8, %c0_9] : memref<16x1xf32, #tpu.memory_space<vmem>>, vector<16x1xf32>
    %cst_10 = arith.constant dense<0.000000e+00> : vector<16xf32>
    %12 = vector.multi_reduction <add>, %3, %cst_10 [1] : vector<16x384xf32> to vector<16xf32>
    %13 = vector.shape_cast %12 : vector<16xf32> to vector<16x1xf32>
    %14 = arith.addf %11, %13 : vector<16x1xf32>
    %c0_11 = arith.constant 0 : index
    %c0_12 = arith.constant 0 : index
    %15 = vector.load %arg7[%c0_11, %c0_12] : memref<16x1xf32, #tpu.memory_space<vmem>>, vector<16x1xf32>
    tpu.vector_store %arg7[%c0_11, %c0_12], %14 {strides = array<i32>} : memref<16x1xf32, #tpu.memory_space<vmem>>, vector<16x1xf32>,
    %c0_13 = arith.constant 0 : index
    %c0_14 = arith.constant 0 : index
    %16 = vector.load %arg8[%c0_13, %c0_14] : memref<16x1xf32, #tpu.memory_space<vmem>>, vector<16x1xf32>
    %17 = arith.mulf %3, %3 : vector<16x384xf32>
    %cst_15 = arith.constant dense<0.000000e+00> : vector<16xf32>
    %18 = vector.multi_reduction <add>, %17, %cst_15 [1] : vector<16x384xf32> to vector<16xf32>
    %19 = vector.shape_cast %18 : vector<16xf32> to vector<16x1xf32>
    %20 = arith.addf %16, %19 : vector<16x1xf32>
    %c0_16 = arith.constant 0 : index
    %c0_17 = arith.constant 0 : index
    %21 = vector.load %arg8[%c0_16, %c0_17] : memref<16x1xf32, #tpu.memory_space<vmem>>, vector<16x1xf32>
    tpu.vector_store %arg8[%c0_16, %c0_17], %20 {strides = array<i32>} : memref<16x1xf32, #tpu.memory_space<vmem>>, vector<16x1xf32>,
    %c0_i32_18 = arith.constant 0 : i32
    %22 = arith.cmpi eq, %arg1, %c0_i32_18 : i32
    %23 = arith.extui %22 : i1 to i32
    %c0_i32_19 = arith.constant 0 : i32
    %24 = arith.cmpi ne, %23, %c0_i32_19 : i32
    scf.if %24 {
      %c0_20 = arith.constant 0 : index
      %c0_21 = arith.constant 0 : index
      %25 = vector.load %arg7[%c0_20, %c0_21] : memref<16x1xf32, #tpu.memory_space<vmem>>, vector<16x1xf32>
      %c0_22 = arith.constant 0 : index
      %c0_23 = arith.constant 0 : index
      %c0_24 = arith.constant 0 : index
      %26 = vector.load %arg5[%c0_22, %c0_23, %c0_24] : memref<1x16x1xf32, #tpu.memory_space<vmem>>, vector<1x16x1xf32>
      %27 = vector.shape_cast %26 : vector<1x16x1xf32> to vector<16x1xf32>
      %28 = vector.shape_cast %25 : vector<16x1xf32> to vector<1x16x1xf32>
      tpu.vector_store %arg5[%c0_22, %c0_23, %c0_24], %28 {strides = array<i32>} : memref<1x16x1xf32, #tpu.memory_space<vmem>>, vector<1x16x1xf32>,
      %c0_25 = arith.constant 0 : index
      %c0_26 = arith.constant 0 : index
      %29 = vector.load %arg8[%c0_25, %c0_26] : memref<16x1xf32, #tpu.memory_space<vmem>>, vector<16x1xf32>
      %c0_27 = arith.constant 0 : index
      %c0_28 = arith.constant 0 : index
      %c0_29 = arith.constant 0 : index
      %30 = vector.load %arg6[%c0_27, %c0_28, %c0_29] : memref<1x16x1xf32, #tpu.memory_space<vmem>>, vector<1x16x1xf32>
      %31 = vector.shape_cast %30 : vector<1x16x1xf32> to vector<16x1xf32>
      %32 = vector.shape_cast %29 : vector<16x1xf32> to vector<1x16x1xf32>
      tpu.vector_store %arg6[%c0_27, %c0_28, %c0_29], %32 {strides = array<i32>} : memref<1x16x1xf32, #tpu.memory_space<vmem>>, vector<1x16x1xf32>,
    } else {
    }
    return
  }
  func.func @transform_0(%arg0: i32, %arg1: i32) -> (i32, i32, i32) {
    %c0_i32 = arith.constant 0 : i32
    %c0_i32_0 = arith.constant 0 : i32
    return %arg0, %c0_i32, %arg1 : i32, i32, i32
  }
  func.func @transform_1(%arg0: i32, %arg1: i32) -> (i32, i32) {
    %c0_i32 = arith.constant 0 : i32
    %c0_i32_0 = arith.constant 0 : i32
    %c0_i32_1 = arith.constant 0 : i32
    return %c0_i32, %c0_i32_0 : i32, i32
  }
  func.func @transform_2(%arg0: i32, %arg1: i32) -> (i32, i32, i32) {
    %c0_i32 = arith.constant 0 : i32
    %c0_i32_0 = arith.constant 0 : i32
    return %arg0, %c0_i32, %arg1 : i32, i32, i32
  }
  func.func @transform_3(%arg0: i32, %arg1: i32) -> (i32, i32, i32) {
    %c0_i32 = arith.constant 0 : i32
    %c0_i32_0 = arith.constant 0 : i32
    %c0_i32_1 = arith.constant 0 : i32
    return %arg0, %c0_i32, %c0_i32_0 : i32, i32, i32
  }
  func.func @transform_4(%arg0: i32, %arg1: i32) -> (i32, i32, i32) {
    %c0_i32 = arith.constant 0 : i32
    %c0_i32_0 = arith.constant 0 : i32
    %c0_i32_1 = arith.constant 0 : i32
    return %arg0, %c0_i32, %c0_i32_0 : i32, i32, i32
  }
}

module attributes {stable_mosaic.version = 11 : i64} {
  func.func @_mid_layer_kernel(%arg0: i32, %arg1: i32, %arg2: memref<1x16x384xbf16, #tpu.memory_space<vmem>>, %arg3: memref<16x2xf32, #tpu.memory_space<vmem>>, %arg4: memref<64x16xf32, #tpu.memory_space<vmem>>, %arg5: memref<1x64x384xbf16, #tpu.memory_space<vmem>>, %arg6: memref<1x64x1xf32, #tpu.memory_space<vmem>>, %arg7: memref<1x64x1xf32, #tpu.memory_space<vmem>>, %arg8: memref<64x1xf32, #tpu.memory_space<vmem>>, %arg9: memref<64x1xf32, #tpu.memory_space<vmem>>) attributes {dimension_semantics = [#tpu.dimension_semantics<parallel>, #tpu.dimension_semantics<arbitrary>], iteration_bounds = array<i64: 2, 1>, scalar_prefetch = 0 : i64, scratch_operands = 2 : i64, tpu.core_type = #tpu.core_type<tc>, window_params = [{transform_indices = @transform_0, window_bounds = array<i64: 1, 16, 384>}, {pipeline_mode = #tpu.pipeline_mode<synchronous>, transform_indices = @transform_1, window_bounds = array<i64: 16, 2>}, {pipeline_mode = #tpu.pipeline_mode<synchronous>, transform_indices = @transform_2, window_bounds = array<i64: 64, 16>}, {transform_indices = @transform_3, window_bounds = array<i64: 1, 64, 384>}, {transform_indices = @transform_4, window_bounds = array<i64: 1, 64, 1>}, {transform_indices = @transform_5, window_bounds = array<i64: 1, 64, 1>}]} {
    %c0 = arith.constant 0 : index
    %c0_0 = arith.constant 0 : index
    %0 = vector.load %arg3[%c0, %c0_0] : memref<16x2xf32, #tpu.memory_space<vmem>>, vector<16x2xf32>
    %1 = vector.extract_strided_slice %0 {offsets = [0, 0], sizes = [16, 1], strides = [1, 1]} : vector<16x2xf32> to vector<16x1xf32>
    %2 = vector.extract_strided_slice %0 {offsets = [0, 1], sizes = [16, 1], strides = [1, 1]} : vector<16x2xf32> to vector<16x1xf32>
    %c0_1 = arith.constant 0 : index
    %c0_2 = arith.constant 0 : index
    %c0_3 = arith.constant 0 : index
    %3 = vector.load %arg2[%c0_1, %c0_2, %c0_3] : memref<1x16x384xbf16, #tpu.memory_space<vmem>>, vector<1x16x384xbf16>
    %4 = vector.shape_cast %3 : vector<1x16x384xbf16> to vector<16x384xbf16>
    %5 = arith.extf %4 : vector<16x384xbf16> to vector<16x384xf32>
    %6 = vector.broadcast %1 : vector<16x1xf32> to vector<16x384xf32>
    %7 = arith.subf %5, %6 : vector<16x384xf32>
    %8 = vector.broadcast %2 : vector<16x1xf32> to vector<16x384xf32>
    %9 = arith.mulf %7, %8 : vector<16x384xf32>
    %cst = arith.constant 2.000000e-01 : f32
    %10 = vector.broadcast %cst : f32 to vector<16x384xf32>
    %11 = arith.mulf %10, %9 : vector<16x384xf32>
    %12 = arith.maximumf %9, %11 : vector<16x384xf32>
    %c0_4 = arith.constant 0 : index
    %c0_5 = arith.constant 0 : index
    %13 = vector.load %arg4[%c0_4, %c0_5] : memref<64x16xf32, #tpu.memory_space<vmem>>, vector<64x16xf32>
    %cst_6 = arith.constant dense<0.000000e+00> : vector<64x384xf32>
    %14 = tpu.matmul %13, %12, %cst_6 {dimension_numbers = #tpu.dot_dimension_numbers<[1], [0], [0], [1], [0, 0, 1, 1], [], []>} : vector<64x16xf32>, vector<16x384xf32>, vector<64x384xf32> -> vector<64x384xf32>
    %15 = arith.truncf %14 : vector<64x384xf32> to vector<64x384xbf16>
    %c0_7 = arith.constant 0 : index
    %c0_8 = arith.constant 0 : index
    %c0_9 = arith.constant 0 : index
    %16 = vector.load %arg5[%c0_7, %c0_8, %c0_9] : memref<1x64x384xbf16, #tpu.memory_space<vmem>>, vector<1x64x384xbf16>
    %17 = vector.shape_cast %16 : vector<1x64x384xbf16> to vector<64x384xbf16>
    %18 = vector.shape_cast %15 : vector<64x384xbf16> to vector<1x64x384xbf16>
    tpu.vector_store %arg5[%c0_7, %c0_8, %c0_9], %18 {strides = array<i32>} : memref<1x64x384xbf16, #tpu.memory_space<vmem>>, vector<1x64x384xbf16>,
    %c0_i32 = arith.constant 0 : i32
    %19 = arith.cmpi eq, %arg1, %c0_i32 : i32
    %20 = arith.extui %19 : i1 to i32
    %c0_i32_10 = arith.constant 0 : i32
    %21 = arith.cmpi ne, %20, %c0_i32_10 : i32
    scf.if %21 {
      %cst_23 = arith.constant 0.000000e+00 : f32
      %36 = vector.broadcast %cst_23 : f32 to vector<64x1xf32>
      %c0_24 = arith.constant 0 : index
      %c0_25 = arith.constant 0 : index
      %37 = vector.load %arg8[%c0_24, %c0_25] : memref<64x1xf32, #tpu.memory_space<vmem>>, vector<64x1xf32>
      tpu.vector_store %arg8[%c0_24, %c0_25], %36 {strides = array<i32>} : memref<64x1xf32, #tpu.memory_space<vmem>>, vector<64x1xf32>,
      %cst_26 = arith.constant 0.000000e+00 : f32
      %38 = vector.broadcast %cst_26 : f32 to vector<64x1xf32>
      %c0_27 = arith.constant 0 : index
      %c0_28 = arith.constant 0 : index
      %39 = vector.load %arg9[%c0_27, %c0_28] : memref<64x1xf32, #tpu.memory_space<vmem>>, vector<64x1xf32>
      tpu.vector_store %arg9[%c0_27, %c0_28], %38 {strides = array<i32>} : memref<64x1xf32, #tpu.memory_space<vmem>>, vector<64x1xf32>,
    } else {
    }
    %c0_11 = arith.constant 0 : index
    %c0_12 = arith.constant 0 : index
    %22 = vector.load %arg8[%c0_11, %c0_12] : memref<64x1xf32, #tpu.memory_space<vmem>>, vector<64x1xf32>
    %cst_13 = arith.constant dense<0.000000e+00> : vector<64xf32>
    %23 = vector.multi_reduction <add>, %14, %cst_13 [1] : vector<64x384xf32> to vector<64xf32>
    %24 = vector.shape_cast %23 : vector<64xf32> to vector<64x1xf32>
    %25 = arith.addf %22, %24 : vector<64x1xf32>
    %c0_14 = arith.constant 0 : index
    %c0_15 = arith.constant 0 : index
    %26 = vector.load %arg8[%c0_14, %c0_15] : memref<64x1xf32, #tpu.memory_space<vmem>>, vector<64x1xf32>
    tpu.vector_store %arg8[%c0_14, %c0_15], %25 {strides = array<i32>} : memref<64x1xf32, #tpu.memory_space<vmem>>, vector<64x1xf32>,
    %c0_16 = arith.constant 0 : index
    %c0_17 = arith.constant 0 : index
    %27 = vector.load %arg9[%c0_16, %c0_17] : memref<64x1xf32, #tpu.memory_space<vmem>>, vector<64x1xf32>
    %28 = arith.mulf %14, %14 : vector<64x384xf32>
    %cst_18 = arith.constant dense<0.000000e+00> : vector<64xf32>
    %29 = vector.multi_reduction <add>, %28, %cst_18 [1] : vector<64x384xf32> to vector<64xf32>
    %30 = vector.shape_cast %29 : vector<64xf32> to vector<64x1xf32>
    %31 = arith.addf %27, %30 : vector<64x1xf32>
    %c0_19 = arith.constant 0 : index
    %c0_20 = arith.constant 0 : index
    %32 = vector.load %arg9[%c0_19, %c0_20] : memref<64x1xf32, #tpu.memory_space<vmem>>, vector<64x1xf32>
    tpu.vector_store %arg9[%c0_19, %c0_20], %31 {strides = array<i32>} : memref<64x1xf32, #tpu.memory_space<vmem>>, vector<64x1xf32>,
    %c0_i32_21 = arith.constant 0 : i32
    %33 = arith.cmpi eq, %arg1, %c0_i32_21 : i32
    %34 = arith.extui %33 : i1 to i32
    %c0_i32_22 = arith.constant 0 : i32
    %35 = arith.cmpi ne, %34, %c0_i32_22 : i32
    scf.if %35 {
      %c0_23 = arith.constant 0 : index
      %c0_24 = arith.constant 0 : index
      %36 = vector.load %arg8[%c0_23, %c0_24] : memref<64x1xf32, #tpu.memory_space<vmem>>, vector<64x1xf32>
      %c0_25 = arith.constant 0 : index
      %c0_26 = arith.constant 0 : index
      %c0_27 = arith.constant 0 : index
      %37 = vector.load %arg6[%c0_25, %c0_26, %c0_27] : memref<1x64x1xf32, #tpu.memory_space<vmem>>, vector<1x64x1xf32>
      %38 = vector.shape_cast %37 : vector<1x64x1xf32> to vector<64x1xf32>
      %39 = vector.shape_cast %36 : vector<64x1xf32> to vector<1x64x1xf32>
      tpu.vector_store %arg6[%c0_25, %c0_26, %c0_27], %39 {strides = array<i32>} : memref<1x64x1xf32, #tpu.memory_space<vmem>>, vector<1x64x1xf32>,
      %c0_28 = arith.constant 0 : index
      %c0_29 = arith.constant 0 : index
      %40 = vector.load %arg9[%c0_28, %c0_29] : memref<64x1xf32, #tpu.memory_space<vmem>>, vector<64x1xf32>
      %c0_30 = arith.constant 0 : index
      %c0_31 = arith.constant 0 : index
      %c0_32 = arith.constant 0 : index
      %41 = vector.load %arg7[%c0_30, %c0_31, %c0_32] : memref<1x64x1xf32, #tpu.memory_space<vmem>>, vector<1x64x1xf32>
      %42 = vector.shape_cast %41 : vector<1x64x1xf32> to vector<64x1xf32>
      %43 = vector.shape_cast %40 : vector<64x1xf32> to vector<1x64x1xf32>
      tpu.vector_store %arg7[%c0_30, %c0_31, %c0_32], %43 {strides = array<i32>} : memref<1x64x1xf32, #tpu.memory_space<vmem>>, vector<1x64x1xf32>,
    } else {
    }
    return
  }
  func.func @transform_0(%arg0: i32, %arg1: i32) -> (i32, i32, i32) {
    %c0_i32 = arith.constant 0 : i32
    %c0_i32_0 = arith.constant 0 : i32
    return %arg0, %c0_i32, %arg1 : i32, i32, i32
  }
  func.func @transform_1(%arg0: i32, %arg1: i32) -> (i32, i32) {
    %c0_i32 = arith.constant 0 : i32
    %c0_i32_0 = arith.constant 0 : i32
    %c0_i32_1 = arith.constant 0 : i32
    return %c0_i32, %c0_i32_0 : i32, i32
  }
  func.func @transform_2(%arg0: i32, %arg1: i32) -> (i32, i32) {
    %c0_i32 = arith.constant 0 : i32
    %c0_i32_0 = arith.constant 0 : i32
    %c0_i32_1 = arith.constant 0 : i32
    return %c0_i32, %c0_i32_0 : i32, i32
  }
  func.func @transform_3(%arg0: i32, %arg1: i32) -> (i32, i32, i32) {
    %c0_i32 = arith.constant 0 : i32
    %c0_i32_0 = arith.constant 0 : i32
    return %arg0, %c0_i32, %arg1 : i32, i32, i32
  }
  func.func @transform_4(%arg0: i32, %arg1: i32) -> (i32, i32, i32) {
    %c0_i32 = arith.constant 0 : i32
    %c0_i32_0 = arith.constant 0 : i32
    %c0_i32_1 = arith.constant 0 : i32
    return %arg0, %c0_i32, %c0_i32_0 : i32, i32, i32
  }
  func.func @transform_5(%arg0: i32, %arg1: i32) -> (i32, i32, i32) {
    %c0_i32 = arith.constant 0 : i32
    %c0_i32_0 = arith.constant 0 : i32
    %c0_i32_1 = arith.constant 0 : i32
    return %arg0, %c0_i32, %c0_i32_0 : i32, i32, i32
  }
}

module attributes {stable_mosaic.version = 11 : i64} {
  func.func @_mid_layer_kernel(%arg0: i32, %arg1: i32, %arg2: memref<1x64x384xbf16, #tpu.memory_space<vmem>>, %arg3: memref<64x2xf32, #tpu.memory_space<vmem>>, %arg4: memref<256x64xbf16, #tpu.memory_space<vmem>>, %arg5: memref<1x256x384xbf16, #tpu.memory_space<vmem>>, %arg6: memref<1x256x1xf32, #tpu.memory_space<vmem>>, %arg7: memref<1x256x1xf32, #tpu.memory_space<vmem>>, %arg8: memref<256x1xf32, #tpu.memory_space<vmem>>, %arg9: memref<256x1xf32, #tpu.memory_space<vmem>>) attributes {dimension_semantics = [#tpu.dimension_semantics<parallel>, #tpu.dimension_semantics<arbitrary>], iteration_bounds = array<i64: 2, 1>, scalar_prefetch = 0 : i64, scratch_operands = 2 : i64, tpu.core_type = #tpu.core_type<tc>, window_params = [{transform_indices = @transform_0, window_bounds = array<i64: 1, 64, 384>}, {pipeline_mode = #tpu.pipeline_mode<synchronous>, transform_indices = @transform_1, window_bounds = array<i64: 64, 2>}, {pipeline_mode = #tpu.pipeline_mode<synchronous>, transform_indices = @transform_2, window_bounds = array<i64: 256, 64>}, {transform_indices = @transform_3, window_bounds = array<i64: 1, 256, 384>}, {transform_indices = @transform_4, window_bounds = array<i64: 1, 256, 1>}, {transform_indices = @transform_5, window_bounds = array<i64: 1, 256, 1>}]} {
    %c0 = arith.constant 0 : index
    %c0_0 = arith.constant 0 : index
    %0 = vector.load %arg3[%c0, %c0_0] : memref<64x2xf32, #tpu.memory_space<vmem>>, vector<64x2xf32>
    %1 = vector.extract_strided_slice %0 {offsets = [0, 0], sizes = [64, 1], strides = [1, 1]} : vector<64x2xf32> to vector<64x1xf32>
    %2 = vector.extract_strided_slice %0 {offsets = [0, 1], sizes = [64, 1], strides = [1, 1]} : vector<64x2xf32> to vector<64x1xf32>
    %c0_1 = arith.constant 0 : index
    %c0_2 = arith.constant 0 : index
    %c0_3 = arith.constant 0 : index
    %3 = vector.load %arg2[%c0_1, %c0_2, %c0_3] : memref<1x64x384xbf16, #tpu.memory_space<vmem>>, vector<1x64x384xbf16>
    %4 = vector.shape_cast %3 : vector<1x64x384xbf16> to vector<64x384xbf16>
    %5 = arith.extf %4 : vector<64x384xbf16> to vector<64x384xf32>
    %6 = vector.broadcast %1 : vector<64x1xf32> to vector<64x384xf32>
    %7 = arith.subf %5, %6 : vector<64x384xf32>
    %8 = vector.broadcast %2 : vector<64x1xf32> to vector<64x384xf32>
    %9 = arith.mulf %7, %8 : vector<64x384xf32>
    %cst = arith.constant 2.000000e-01 : f32
    %10 = vector.broadcast %cst : f32 to vector<64x384xf32>
    %11 = arith.mulf %10, %9 : vector<64x384xf32>
    %12 = arith.maximumf %9, %11 : vector<64x384xf32>
    %c0_4 = arith.constant 0 : index
    %c0_5 = arith.constant 0 : index
    %13 = vector.load %arg4[%c0_4, %c0_5] : memref<256x64xbf16, #tpu.memory_space<vmem>>, vector<256x64xbf16>
    %14 = arith.truncf %12 : vector<64x384xf32> to vector<64x384xbf16>
    %cst_6 = arith.constant dense<0.000000e+00> : vector<256x384xf32>
    %15 = tpu.matmul %13, %14, %cst_6 {dimension_numbers = #tpu.dot_dimension_numbers<[1], [0], [0], [1], [0, 0, 1, 1], [], []>} : vector<256x64xbf16>, vector<64x384xbf16>, vector<256x384xf32> -> vector<256x384xf32>
    %16 = arith.truncf %15 : vector<256x384xf32> to vector<256x384xbf16>
    %c0_7 = arith.constant 0 : index
    %c0_8 = arith.constant 0 : index
    %c0_9 = arith.constant 0 : index
    %17 = vector.load %arg5[%c0_7, %c0_8, %c0_9] : memref<1x256x384xbf16, #tpu.memory_space<vmem>>, vector<1x256x384xbf16>
    %18 = vector.shape_cast %17 : vector<1x256x384xbf16> to vector<256x384xbf16>
    %19 = vector.shape_cast %16 : vector<256x384xbf16> to vector<1x256x384xbf16>
    tpu.vector_store %arg5[%c0_7, %c0_8, %c0_9], %19 {strides = array<i32>} : memref<1x256x384xbf16, #tpu.memory_space<vmem>>, vector<1x256x384xbf16>,
    %c0_i32 = arith.constant 0 : i32
    %20 = arith.cmpi eq, %arg1, %c0_i32 : i32
    %21 = arith.extui %20 : i1 to i32
    %c0_i32_10 = arith.constant 0 : i32
    %22 = arith.cmpi ne, %21, %c0_i32_10 : i32
    scf.if %22 {
      %cst_23 = arith.constant 0.000000e+00 : f32
      %37 = vector.broadcast %cst_23 : f32 to vector<256x1xf32>
      %c0_24 = arith.constant 0 : index
      %c0_25 = arith.constant 0 : index
      %38 = vector.load %arg8[%c0_24, %c0_25] : memref<256x1xf32, #tpu.memory_space<vmem>>, vector<256x1xf32>
      tpu.vector_store %arg8[%c0_24, %c0_25], %37 {strides = array<i32>} : memref<256x1xf32, #tpu.memory_space<vmem>>, vector<256x1xf32>,
      %cst_26 = arith.constant 0.000000e+00 : f32
      %39 = vector.broadcast %cst_26 : f32 to vector<256x1xf32>
      %c0_27 = arith.constant 0 : index
      %c0_28 = arith.constant 0 : index
      %40 = vector.load %arg9[%c0_27, %c0_28] : memref<256x1xf32, #tpu.memory_space<vmem>>, vector<256x1xf32>
      tpu.vector_store %arg9[%c0_27, %c0_28], %39 {strides = array<i32>} : memref<256x1xf32, #tpu.memory_space<vmem>>, vector<256x1xf32>,
    } else {
    }
    %c0_11 = arith.constant 0 : index
    %c0_12 = arith.constant 0 : index
    %23 = vector.load %arg8[%c0_11, %c0_12] : memref<256x1xf32, #tpu.memory_space<vmem>>, vector<256x1xf32>
    %cst_13 = arith.constant dense<0.000000e+00> : vector<256xf32>
    %24 = vector.multi_reduction <add>, %15, %cst_13 [1] : vector<256x384xf32> to vector<256xf32>
    %25 = vector.shape_cast %24 : vector<256xf32> to vector<256x1xf32>
    %26 = arith.addf %23, %25 : vector<256x1xf32>
    %c0_14 = arith.constant 0 : index
    %c0_15 = arith.constant 0 : index
    %27 = vector.load %arg8[%c0_14, %c0_15] : memref<256x1xf32, #tpu.memory_space<vmem>>, vector<256x1xf32>
    tpu.vector_store %arg8[%c0_14, %c0_15], %26 {strides = array<i32>} : memref<256x1xf32, #tpu.memory_space<vmem>>, vector<256x1xf32>,
    %c0_16 = arith.constant 0 : index
    %c0_17 = arith.constant 0 : index
    %28 = vector.load %arg9[%c0_16, %c0_17] : memref<256x1xf32, #tpu.memory_space<vmem>>, vector<256x1xf32>
    %29 = arith.mulf %15, %15 : vector<256x384xf32>
    %cst_18 = arith.constant dense<0.000000e+00> : vector<256xf32>
    %30 = vector.multi_reduction <add>, %29, %cst_18 [1] : vector<256x384xf32> to vector<256xf32>
    %31 = vector.shape_cast %30 : vector<256xf32> to vector<256x1xf32>
    %32 = arith.addf %28, %31 : vector<256x1xf32>
    %c0_19 = arith.constant 0 : index
    %c0_20 = arith.constant 0 : index
    %33 = vector.load %arg9[%c0_19, %c0_20] : memref<256x1xf32, #tpu.memory_space<vmem>>, vector<256x1xf32>
    tpu.vector_store %arg9[%c0_19, %c0_20], %32 {strides = array<i32>} : memref<256x1xf32, #tpu.memory_space<vmem>>, vector<256x1xf32>,
    %c0_i32_21 = arith.constant 0 : i32
    %34 = arith.cmpi eq, %arg1, %c0_i32_21 : i32
    %35 = arith.extui %34 : i1 to i32
    %c0_i32_22 = arith.constant 0 : i32
    %36 = arith.cmpi ne, %35, %c0_i32_22 : i32
    scf.if %36 {
      %c0_23 = arith.constant 0 : index
      %c0_24 = arith.constant 0 : index
      %37 = vector.load %arg8[%c0_23, %c0_24] : memref<256x1xf32, #tpu.memory_space<vmem>>, vector<256x1xf32>
      %c0_25 = arith.constant 0 : index
      %c0_26 = arith.constant 0 : index
      %c0_27 = arith.constant 0 : index
      %38 = vector.load %arg6[%c0_25, %c0_26, %c0_27] : memref<1x256x1xf32, #tpu.memory_space<vmem>>, vector<1x256x1xf32>
      %39 = vector.shape_cast %38 : vector<1x256x1xf32> to vector<256x1xf32>
      %40 = vector.shape_cast %37 : vector<256x1xf32> to vector<1x256x1xf32>
      tpu.vector_store %arg6[%c0_25, %c0_26, %c0_27], %40 {strides = array<i32>} : memref<1x256x1xf32, #tpu.memory_space<vmem>>, vector<1x256x1xf32>,
      %c0_28 = arith.constant 0 : index
      %c0_29 = arith.constant 0 : index
      %41 = vector.load %arg9[%c0_28, %c0_29] : memref<256x1xf32, #tpu.memory_space<vmem>>, vector<256x1xf32>
      %c0_30 = arith.constant 0 : index
      %c0_31 = arith.constant 0 : index
      %c0_32 = arith.constant 0 : index
      %42 = vector.load %arg7[%c0_30, %c0_31, %c0_32] : memref<1x256x1xf32, #tpu.memory_space<vmem>>, vector<1x256x1xf32>
      %43 = vector.shape_cast %42 : vector<1x256x1xf32> to vector<256x1xf32>
      %44 = vector.shape_cast %41 : vector<256x1xf32> to vector<1x256x1xf32>
      tpu.vector_store %arg7[%c0_30, %c0_31, %c0_32], %44 {strides = array<i32>} : memref<1x256x1xf32, #tpu.memory_space<vmem>>, vector<1x256x1xf32>,
    } else {
    }
    return
  }
  func.func @transform_0(%arg0: i32, %arg1: i32) -> (i32, i32, i32) {
    %c0_i32 = arith.constant 0 : i32
    %c0_i32_0 = arith.constant 0 : i32
    return %arg0, %c0_i32, %arg1 : i32, i32, i32
  }
  func.func @transform_1(%arg0: i32, %arg1: i32) -> (i32, i32) {
    %c0_i32 = arith.constant 0 : i32
    %c0_i32_0 = arith.constant 0 : i32
    %c0_i32_1 = arith.constant 0 : i32
    return %c0_i32, %c0_i32_0 : i32, i32
  }
  func.func @transform_2(%arg0: i32, %arg1: i32) -> (i32, i32) {
    %c0_i32 = arith.constant 0 : i32
    %c0_i32_0 = arith.constant 0 : i32
    %c0_i32_1 = arith.constant 0 : i32
    return %c0_i32, %c0_i32_0 : i32, i32
  }
  func.func @transform_3(%arg0: i32, %arg1: i32) -> (i32, i32, i32) {
    %c0_i32 = arith.constant 0 : i32
    %c0_i32_0 = arith.constant 0 : i32
    return %arg0, %c0_i32, %arg1 : i32, i32, i32
  }
  func.func @transform_4(%arg0: i32, %arg1: i32) -> (i32, i32, i32) {
    %c0_i32 = arith.constant 0 : i32
    %c0_i32_0 = arith.constant 0 : i32
    %c0_i32_1 = arith.constant 0 : i32
    return %arg0, %c0_i32, %c0_i32_0 : i32, i32, i32
  }
  func.func @transform_5(%arg0: i32, %arg1: i32) -> (i32, i32, i32) {
    %c0_i32 = arith.constant 0 : i32
    %c0_i32_0 = arith.constant 0 : i32
    %c0_i32_1 = arith.constant 0 : i32
    return %arg0, %c0_i32, %c0_i32_0 : i32, i32, i32
  }
}

module attributes {stable_mosaic.version = 11 : i64} {
  func.func @_mid_layer_kernel(%arg0: i32, %arg1: i32, %arg2: memref<1x256x384xbf16, #tpu.memory_space<vmem>>, %arg3: memref<256x2xf32, #tpu.memory_space<vmem>>, %arg4: memref<128x256xbf16, #tpu.memory_space<vmem>>, %arg5: memref<1x128x384xbf16, #tpu.memory_space<vmem>>, %arg6: memref<1x128x1xf32, #tpu.memory_space<vmem>>, %arg7: memref<1x128x1xf32, #tpu.memory_space<vmem>>, %arg8: memref<128x1xf32, #tpu.memory_space<vmem>>, %arg9: memref<128x1xf32, #tpu.memory_space<vmem>>) attributes {dimension_semantics = [#tpu.dimension_semantics<parallel>, #tpu.dimension_semantics<arbitrary>], iteration_bounds = array<i64: 2, 1>, scalar_prefetch = 0 : i64, scratch_operands = 2 : i64, tpu.core_type = #tpu.core_type<tc>, window_params = [{transform_indices = @transform_0, window_bounds = array<i64: 1, 256, 384>}, {pipeline_mode = #tpu.pipeline_mode<synchronous>, transform_indices = @transform_1, window_bounds = array<i64: 256, 2>}, {pipeline_mode = #tpu.pipeline_mode<synchronous>, transform_indices = @transform_2, window_bounds = array<i64: 128, 256>}, {transform_indices = @transform_3, window_bounds = array<i64: 1, 128, 384>}, {transform_indices = @transform_4, window_bounds = array<i64: 1, 128, 1>}, {transform_indices = @transform_5, window_bounds = array<i64: 1, 128, 1>}]} {
    %c0 = arith.constant 0 : index
    %c0_0 = arith.constant 0 : index
    %0 = vector.load %arg3[%c0, %c0_0] : memref<256x2xf32, #tpu.memory_space<vmem>>, vector<256x2xf32>
    %1 = vector.extract_strided_slice %0 {offsets = [0, 0], sizes = [256, 1], strides = [1, 1]} : vector<256x2xf32> to vector<256x1xf32>
    %2 = vector.extract_strided_slice %0 {offsets = [0, 1], sizes = [256, 1], strides = [1, 1]} : vector<256x2xf32> to vector<256x1xf32>
    %c0_1 = arith.constant 0 : index
    %c0_2 = arith.constant 0 : index
    %c0_3 = arith.constant 0 : index
    %3 = vector.load %arg2[%c0_1, %c0_2, %c0_3] : memref<1x256x384xbf16, #tpu.memory_space<vmem>>, vector<1x256x384xbf16>
    %4 = vector.shape_cast %3 : vector<1x256x384xbf16> to vector<256x384xbf16>
    %5 = arith.extf %4 : vector<256x384xbf16> to vector<256x384xf32>
    %6 = vector.broadcast %1 : vector<256x1xf32> to vector<256x384xf32>
    %7 = arith.subf %5, %6 : vector<256x384xf32>
    %8 = vector.broadcast %2 : vector<256x1xf32> to vector<256x384xf32>
    %9 = arith.mulf %7, %8 : vector<256x384xf32>
    %cst = arith.constant 2.000000e-01 : f32
    %10 = vector.broadcast %cst : f32 to vector<256x384xf32>
    %11 = arith.mulf %10, %9 : vector<256x384xf32>
    %12 = arith.maximumf %9, %11 : vector<256x384xf32>
    %c0_4 = arith.constant 0 : index
    %c0_5 = arith.constant 0 : index
    %13 = vector.load %arg4[%c0_4, %c0_5] : memref<128x256xbf16, #tpu.memory_space<vmem>>, vector<128x256xbf16>
    %14 = arith.truncf %12 : vector<256x384xf32> to vector<256x384xbf16>
    %cst_6 = arith.constant dense<0.000000e+00> : vector<128x384xf32>
    %15 = tpu.matmul %13, %14, %cst_6 {dimension_numbers = #tpu.dot_dimension_numbers<[1], [0], [0], [1], [0, 0, 1, 1], [], []>} : vector<128x256xbf16>, vector<256x384xbf16>, vector<128x384xf32> -> vector<128x384xf32>
    %16 = arith.truncf %15 : vector<128x384xf32> to vector<128x384xbf16>
    %c0_7 = arith.constant 0 : index
    %c0_8 = arith.constant 0 : index
    %c0_9 = arith.constant 0 : index
    %17 = vector.load %arg5[%c0_7, %c0_8, %c0_9] : memref<1x128x384xbf16, #tpu.memory_space<vmem>>, vector<1x128x384xbf16>
    %18 = vector.shape_cast %17 : vector<1x128x384xbf16> to vector<128x384xbf16>
    %19 = vector.shape_cast %16 : vector<128x384xbf16> to vector<1x128x384xbf16>
    tpu.vector_store %arg5[%c0_7, %c0_8, %c0_9], %19 {strides = array<i32>} : memref<1x128x384xbf16, #tpu.memory_space<vmem>>, vector<1x128x384xbf16>,
    %c0_i32 = arith.constant 0 : i32
    %20 = arith.cmpi eq, %arg1, %c0_i32 : i32
    %21 = arith.extui %20 : i1 to i32
    %c0_i32_10 = arith.constant 0 : i32
    %22 = arith.cmpi ne, %21, %c0_i32_10 : i32
    scf.if %22 {
      %cst_23 = arith.constant 0.000000e+00 : f32
      %37 = vector.broadcast %cst_23 : f32 to vector<128x1xf32>
      %c0_24 = arith.constant 0 : index
      %c0_25 = arith.constant 0 : index
      %38 = vector.load %arg8[%c0_24, %c0_25] : memref<128x1xf32, #tpu.memory_space<vmem>>, vector<128x1xf32>
      tpu.vector_store %arg8[%c0_24, %c0_25], %37 {strides = array<i32>} : memref<128x1xf32, #tpu.memory_space<vmem>>, vector<128x1xf32>,
      %cst_26 = arith.constant 0.000000e+00 : f32
      %39 = vector.broadcast %cst_26 : f32 to vector<128x1xf32>
      %c0_27 = arith.constant 0 : index
      %c0_28 = arith.constant 0 : index
      %40 = vector.load %arg9[%c0_27, %c0_28] : memref<128x1xf32, #tpu.memory_space<vmem>>, vector<128x1xf32>
      tpu.vector_store %arg9[%c0_27, %c0_28], %39 {strides = array<i32>} : memref<128x1xf32, #tpu.memory_space<vmem>>, vector<128x1xf32>,
    } else {
    }
    %c0_11 = arith.constant 0 : index
    %c0_12 = arith.constant 0 : index
    %23 = vector.load %arg8[%c0_11, %c0_12] : memref<128x1xf32, #tpu.memory_space<vmem>>, vector<128x1xf32>
    %cst_13 = arith.constant dense<0.000000e+00> : vector<128xf32>
    %24 = vector.multi_reduction <add>, %15, %cst_13 [1] : vector<128x384xf32> to vector<128xf32>
    %25 = vector.shape_cast %24 : vector<128xf32> to vector<128x1xf32>
    %26 = arith.addf %23, %25 : vector<128x1xf32>
    %c0_14 = arith.constant 0 : index
    %c0_15 = arith.constant 0 : index
    %27 = vector.load %arg8[%c0_14, %c0_15] : memref<128x1xf32, #tpu.memory_space<vmem>>, vector<128x1xf32>
    tpu.vector_store %arg8[%c0_14, %c0_15], %26 {strides = array<i32>} : memref<128x1xf32, #tpu.memory_space<vmem>>, vector<128x1xf32>,
    %c0_16 = arith.constant 0 : index
    %c0_17 = arith.constant 0 : index
    %28 = vector.load %arg9[%c0_16, %c0_17] : memref<128x1xf32, #tpu.memory_space<vmem>>, vector<128x1xf32>
    %29 = arith.mulf %15, %15 : vector<128x384xf32>
    %cst_18 = arith.constant dense<0.000000e+00> : vector<128xf32>
    %30 = vector.multi_reduction <add>, %29, %cst_18 [1] : vector<128x384xf32> to vector<128xf32>
    %31 = vector.shape_cast %30 : vector<128xf32> to vector<128x1xf32>
    %32 = arith.addf %28, %31 : vector<128x1xf32>
    %c0_19 = arith.constant 0 : index
    %c0_20 = arith.constant 0 : index
    %33 = vector.load %arg9[%c0_19, %c0_20] : memref<128x1xf32, #tpu.memory_space<vmem>>, vector<128x1xf32>
    tpu.vector_store %arg9[%c0_19, %c0_20], %32 {strides = array<i32>} : memref<128x1xf32, #tpu.memory_space<vmem>>, vector<128x1xf32>,
    %c0_i32_21 = arith.constant 0 : i32
    %34 = arith.cmpi eq, %arg1, %c0_i32_21 : i32
    %35 = arith.extui %34 : i1 to i32
    %c0_i32_22 = arith.constant 0 : i32
    %36 = arith.cmpi ne, %35, %c0_i32_22 : i32
    scf.if %36 {
      %c0_23 = arith.constant 0 : index
      %c0_24 = arith.constant 0 : index
      %37 = vector.load %arg8[%c0_23, %c0_24] : memref<128x1xf32, #tpu.memory_space<vmem>>, vector<128x1xf32>
      %c0_25 = arith.constant 0 : index
      %c0_26 = arith.constant 0 : index
      %c0_27 = arith.constant 0 : index
      %38 = vector.load %arg6[%c0_25, %c0_26, %c0_27] : memref<1x128x1xf32, #tpu.memory_space<vmem>>, vector<1x128x1xf32>
      %39 = vector.shape_cast %38 : vector<1x128x1xf32> to vector<128x1xf32>
      %40 = vector.shape_cast %37 : vector<128x1xf32> to vector<1x128x1xf32>
      tpu.vector_store %arg6[%c0_25, %c0_26, %c0_27], %40 {strides = array<i32>} : memref<1x128x1xf32, #tpu.memory_space<vmem>>, vector<1x128x1xf32>,
      %c0_28 = arith.constant 0 : index
      %c0_29 = arith.constant 0 : index
      %41 = vector.load %arg9[%c0_28, %c0_29] : memref<128x1xf32, #tpu.memory_space<vmem>>, vector<128x1xf32>
      %c0_30 = arith.constant 0 : index
      %c0_31 = arith.constant 0 : index
      %c0_32 = arith.constant 0 : index
      %42 = vector.load %arg7[%c0_30, %c0_31, %c0_32] : memref<1x128x1xf32, #tpu.memory_space<vmem>>, vector<1x128x1xf32>
      %43 = vector.shape_cast %42 : vector<1x128x1xf32> to vector<128x1xf32>
      %44 = vector.shape_cast %41 : vector<128x1xf32> to vector<1x128x1xf32>
      tpu.vector_store %arg7[%c0_30, %c0_31, %c0_32], %44 {strides = array<i32>} : memref<1x128x1xf32, #tpu.memory_space<vmem>>, vector<1x128x1xf32>,
    } else {
    }
    return
  }
  func.func @transform_0(%arg0: i32, %arg1: i32) -> (i32, i32, i32) {
    %c0_i32 = arith.constant 0 : i32
    %c0_i32_0 = arith.constant 0 : i32
    return %arg0, %c0_i32, %arg1 : i32, i32, i32
  }
  func.func @transform_1(%arg0: i32, %arg1: i32) -> (i32, i32) {
    %c0_i32 = arith.constant 0 : i32
    %c0_i32_0 = arith.constant 0 : i32
    %c0_i32_1 = arith.constant 0 : i32
    return %c0_i32, %c0_i32_0 : i32, i32
  }
  func.func @transform_2(%arg0: i32, %arg1: i32) -> (i32, i32) {
    %c0_i32 = arith.constant 0 : i32
    %c0_i32_0 = arith.constant 0 : i32
    %c0_i32_1 = arith.constant 0 : i32
    return %c0_i32, %c0_i32_0 : i32, i32
  }
  func.func @transform_3(%arg0: i32, %arg1: i32) -> (i32, i32, i32) {
    %c0_i32 = arith.constant 0 : i32
    %c0_i32_0 = arith.constant 0 : i32
    return %arg0, %c0_i32, %arg1 : i32, i32, i32
  }
  func.func @transform_4(%arg0: i32, %arg1: i32) -> (i32, i32, i32) {
    %c0_i32 = arith.constant 0 : i32
    %c0_i32_0 = arith.constant 0 : i32
    %c0_i32_1 = arith.constant 0 : i32
    return %arg0, %c0_i32, %c0_i32_0 : i32, i32, i32
  }
  func.func @transform_5(%arg0: i32, %arg1: i32) -> (i32, i32, i32) {
    %c0_i32 = arith.constant 0 : i32
    %c0_i32_0 = arith.constant 0 : i32
    %c0_i32_1 = arith.constant 0 : i32
    return %arg0, %c0_i32, %c0_i32_0 : i32, i32, i32
  }
}

module attributes {stable_mosaic.version = 11 : i64} {
  func.func @_final_norm_kernel(%arg0: i32, %arg1: i32, %arg2: memref<1x128x384xbf16, #tpu.memory_space<vmem>>, %arg3: memref<128x2xf32, #tpu.memory_space<vmem>>, %arg4: memref<1x128x384xf32, #tpu.memory_space<vmem>>) attributes {dimension_semantics = [#tpu.dimension_semantics<parallel>, #tpu.dimension_semantics<parallel>], iteration_bounds = array<i64: 2, 1>, scalar_prefetch = 0 : i64, scratch_operands = 0 : i64, tpu.core_type = #tpu.core_type<tc>, window_params = [{transform_indices = @transform_0, window_bounds = array<i64: 1, 128, 384>}, {pipeline_mode = #tpu.pipeline_mode<synchronous>, transform_indices = @transform_1, window_bounds = array<i64: 128, 2>}, {transform_indices = @transform_2, window_bounds = array<i64: 1, 128, 384>}]} {
    %c0 = arith.constant 0 : index
    %c0_0 = arith.constant 0 : index
    %0 = vector.load %arg3[%c0, %c0_0] : memref<128x2xf32, #tpu.memory_space<vmem>>, vector<128x2xf32>
    %1 = vector.extract_strided_slice %0 {offsets = [0, 0], sizes = [128, 1], strides = [1, 1]} : vector<128x2xf32> to vector<128x1xf32>
    %2 = vector.extract_strided_slice %0 {offsets = [0, 1], sizes = [128, 1], strides = [1, 1]} : vector<128x2xf32> to vector<128x1xf32>
    %c0_1 = arith.constant 0 : index
    %c0_2 = arith.constant 0 : index
    %c0_3 = arith.constant 0 : index
    %3 = vector.load %arg2[%c0_1, %c0_2, %c0_3] : memref<1x128x384xbf16, #tpu.memory_space<vmem>>, vector<1x128x384xbf16>
    %4 = vector.shape_cast %3 : vector<1x128x384xbf16> to vector<128x384xbf16>
    %5 = arith.extf %4 : vector<128x384xbf16> to vector<128x384xf32>
    %6 = vector.broadcast %1 : vector<128x1xf32> to vector<128x384xf32>
    %7 = arith.subf %5, %6 : vector<128x384xf32>
    %8 = vector.broadcast %2 : vector<128x1xf32> to vector<128x384xf32>
    %9 = arith.mulf %7, %8 : vector<128x384xf32>
    %cst = arith.constant 2.000000e-01 : f32
    %10 = vector.broadcast %cst : f32 to vector<128x384xf32>
    %11 = arith.mulf %10, %9 : vector<128x384xf32>
    %12 = arith.maximumf %9, %11 : vector<128x384xf32>
    %c0_4 = arith.constant 0 : index
    %c0_5 = arith.constant 0 : index
    %c0_6 = arith.constant 0 : index
    %13 = vector.load %arg4[%c0_4, %c0_5, %c0_6] : memref<1x128x384xf32, #tpu.memory_space<vmem>>, vector<1x128x384xf32>
    %14 = vector.shape_cast %13 : vector<1x128x384xf32> to vector<128x384xf32>
    %15 = vector.shape_cast %12 : vector<128x384xf32> to vector<1x128x384xf32>
    tpu.vector_store %arg4[%c0_4, %c0_5, %c0_6], %15 {strides = array<i32>} : memref<1x128x384xf32, #tpu.memory_space<vmem>>, vector<1x128x384xf32>,
    return
  }
  func.func @transform_0(%arg0: i32, %arg1: i32) -> (i32, i32, i32) {
    %c0_i32 = arith.constant 0 : i32
    %c0_i32_0 = arith.constant 0 : i32
    return %arg0, %c0_i32, %arg1 : i32, i32, i32
  }
  func.func @transform_1(%arg0: i32, %arg1: i32) -> (i32, i32) {
    %c0_i32 = arith.constant 0 : i32
    %c0_i32_0 = arith.constant 0 : i32
    %c0_i32_1 = arith.constant 0 : i32
    return %c0_i32, %c0_i32_0 : i32, i32
  }
  func.func @transform_2(%arg0: i32, %arg1: i32) -> (i32, i32, i32) {
    %c0_i32 = arith.constant 0 : i32
    %c0_i32_0 = arith.constant 0 : i32
    return %arg0, %c0_i32, %arg1 : i32, i32, i32
  }
}

</mosaic_0001>

<bundles_post_ra>
// kernel: backbone_forward.7
= control target key start
LH: loop header
LB: loop body
LE: loop exit
PB: predicated region body
PF: predicated region fallthrough
CT: control target
= control target key end

     0   :  { %vm21_vm0 = vcmask 1042432   ;;  %v250_v16 = vmov 839922192   ;;  %v44_v18 = vlaneseq  ;;  %s381_s0 = inlined_call_operand.vmem [shape: f32[2,3,384], index: 0, kind: input, shape index: {}]   ;;  %s382_s2 = inlined_call_operand.vmem [shape: f32[2,4,384], index: 2, kind: output, shape index: {1}]   ;;  %s383_s1 = inlined_call_operand.vmem [shape: f32[2,4,384], index: 1, kind: output, shape index: {0}]   ;;  %s384_s3 = inlined_call_operand.vmem [shape: f32[2,1,384], index: 3, kind: output, shape index: {2}]  }
   0x1   :  { %v11_v0 = vld [vmem:[%s381_s0] sm:$0x77]  ;;  %v12_v1 = vld [vmem:[%s381_s0 + $0x8] sm:$0x7]  ;;  %v13_v2 = vld [vmem:[%s381_s0 + $0xc] sm:$0x77]  ;;  %v42_v17 = vunpack.c.l.s4 %v250_v16 }
   0x2   :  { %v17_v3 = vcombine.high %v11_v0, %v11_v0  ;;  %v22_v4 = vsel %vm21_vm0, %v11_v0, 0.0  ;;  %v18_v5 = vcombine.high %v13_v2, %v13_v2  ;;  %v14_v6 = vld [vmem:[%s381_s0 + $0x14] sm:$0x7]  ;;  %v29_v7 = vsel %vm21_vm0, %v13_v2, 0.0 }
   0x3   :  { %v25_v9 = vsel %vm21_vm0, %v12_v1, 0.0  ;;  %v32_v13 = vsel %vm21_vm0, %v14_v6, 0.0  ;;  %v43_v19 = vunpack.c.0.s8 %v42_v17  ;;  %v292_v20 = vshrl.u32 %v44_v18, 7 }
   0x4   :  { %v23_v8 = vsel %vm21_vm0, %v17_v3, 0.0  ;;  %v30_v10 = vsel %vm21_vm0, %v18_v5, 0.0  ;;  %vm318_vm1 = vcmp.lt.s32.totalorder %v44_v18, 384 }
   0x5   :  { %v24_v11 = vadd.f32 %v23_v8, %v22_v4  ;;  %v31_v12 = vadd.f32 %v30_v10, %v29_v7  ;;  %v46_v21 = vsub.s32 %v43_v19, %v292_v20 }
   0x7   :  { %v26_v14 = vadd.f32 %v25_v9, %v24_v11  ;;  %v33_v15 = vadd.f32 %v32_v13, %v31_v12 }
   0x9   :  { %27 = vadd.xlane.f32.xlu0 %v26_v14 }
   0xd   :  { %34 = vadd.xlane.f32.xlu0 %v33_v15 }
  0x96   :  { %v28_v22 = vpop.xlane.xlu0 %27 }
  0x97   :  { %v37_v23 = vmul.f32 0.0026041667, %v28_v22 }
  0x99   :  { %v47_v24 = vrot.slane %v37_v23, %v46_v21 }
  0x9a   :  { %v35_v25 = vpop.xlane.xlu0 %34 }
  0x9b   :  { %v295_v26 = vsub.f32 %v11_v0, %v47_v24  ;;  %v297_v27 = vsub.f32 %v12_v1, %v47_v24  ;;  %v38_v28 = vmul.f32 0.0026041667, %v35_v25  ;;  %v251_v24 = vmov 1.0  }
  0x9c   :  { %233 = vst.msk [vmem:[%s382_s2 + $0x3] ss:$4 sm:$0x7] %vm318_vm1, %v251_v24  ;;  %234 = vst.msk [vmem:[%s382_s2 + $0xf] ss:$4 sm:$0x7] %vm318_vm1, %v251_v24 }
  0x9d   :  { %v61_v29 = vmul.f32 %v295_v26, %v295_v26  ;;  %v62_v30 = vmul.f32 %v297_v27, %v297_v27  ;;  %v54_v31 = vrot.slane %v38_v28, %v46_v21 }
  0x9f   :  { %v67_v32 = vcombine.high %v61_v29, %v61_v29  ;;  %v71_v33 = vsel %vm21_vm0, %v61_v29, 0.0  ;;  %v85_v34 = vsel %vm21_vm0, %v62_v30, 0.0  ;;  %v305_v35 = vsub.f32 %v13_v2, %v54_v31 }
  0xa0   :  { %v72_v36 = vrot.slane %v71_v33, 4  ;;  %v86_v37 = vrot.slane %v85_v34, 4  ;;  %v307_v38 = vsub.f32 %v14_v6, %v54_v31  ;;  %v252_v30 = vmov 1966171168  }
  0xa1   :  { %v78_v39 = vsel %vm21_vm0, %v67_v32, 0.0  ;;  %v63_v40 = vmul.f32 %v305_v35, %v305_v35  ;;  %v151_v31 = vunpack.c.l.s4 %v252_v30 }
  0xa2   :  { %v73_v41 = vadd.f32 %v72_v36, %v71_v33  ;;  %v79_v42 = vrot.slane %v78_v39, 4  ;;  %v64_v43 = vmul.f32 %v307_v38, %v307_v38  ;;  %v87_v44 = vadd.f32 %v86_v37, %v85_v34 }
  0xa3   :  { %v68_v45 = vcombine.high %v63_v40, %v63_v40  ;;  %v92_v46 = vsel %vm21_vm0, %v63_v40, 0.0  ;;  %v152_v32 = vunpack.c.0.s8 %v151_v31 }
  0xa4   :  { %v93_v47 = vrot.slane %v92_v46, 4  ;;  %v106_v48 = vsel %vm21_vm0, %v64_v43, 0.0  ;;  %v74_v49 = vrot.slane %v73_v41, 2  ;;  %v80_v50 = vadd.f32 %v79_v42, %v78_v39 }
  0xa5   :  { %v99_v51 = vsel %vm21_vm0, %v68_v45, 0.0  ;;  %v107_v52 = vrot.slane %v106_v48, 4  ;;  %v88_v55 = vrot.slane %v87_v44, 2  ;;  %v155_v33 = vsub.s32 %v152_v32, %v292_v20 }
  0xa6   :  { %v100_v53 = vrot.slane %v99_v51, 4  ;;  %v81_v54 = vrot.slane %v80_v50, 2  ;;  %v94_v56 = vadd.f32 %v93_v47, %v92_v46  ;;  %v75_v58 = vadd.f32 %v74_v49, %v73_v41 }
  0xa7   :  { %v108_v57 = vadd.f32 %v107_v52, %v106_v48  ;;  %v89_v63 = vadd.f32 %v88_v55, %v87_v44 }
  0xa8   :  { %v82_v59 = vadd.f32 %v81_v54, %v80_v50  ;;  %v95_v60 = vrot.slane %v94_v56, 2  ;;  %v101_v61 = vadd.f32 %v100_v53, %v99_v51  ;;  %v76_v3 = vrot.slane %v75_v58, 1 }
  0xa9   :  { %v109_v62 = vrot.slane %v108_v57, 2  ;;  %v90_v8 = vrot.slane %v89_v63, 1 }
  0xaa   :  { %v96_v0 = vadd.f32 %v95_v60, %v94_v56  ;;  %v102_v1 = vrot.slane %v101_v61, 2  ;;  %v83_v4 = vrot.slane %v82_v59, 1  ;;  %v77_v11 = vadd.f32 %v76_v3, %v75_v58 }
  0xab   :  { %v110_v2 = vadd.f32 %v109_v62, %v108_v57  ;;  %v91_v15 = vadd.f32 %v90_v8, %v89_v63 }
  0xac   :  { %v97_v5 = vrot.slane %v96_v0, 1  ;;  %v103_v6 = vadd.f32 %v102_v1, %v101_v61  ;;  %v84_v12 = vadd.f32 %v83_v4, %v82_v59 }
  0xad   :  { %v111_v7 = vrot.slane %v110_v2, 1 }
  0xae   :  { %v104_v9 = vrot.slane %v103_v6, 1  ;;  %v98_v13 = vadd.f32 %v97_v5, %v96_v0 }
  0xaf   :  { %v112_v10 = vadd.f32 %v111_v7, %v110_v2 }
  0xb0   :  { %v105_v14 = vadd.f32 %v104_v9, %v103_v6  ;;  %v116_v21 = vmax.f32 %v91_v15, %v98_v13 }
  0xb1   :  { %v114_v17 = vmax.f32 %v84_v12, %v112_v10 }
  0xb2   :  { %v113_v16 = vmax.f32 %v77_v11, %v105_v14 }
  0xb4   :  { %v115_v19 = vmax.f32 %v113_v16, %v114_v17 }
  0xb6   :  { %v117_v22 = vmax.f32 %v115_v19, %v116_v21 }
  0xb8   :  { %118 = vmax.xlane.f32.xlu1 %v117_v22 }
 0x145   :  { %v119_v25 = vpop.xlane.xlu1 %118 }
 0x146   :  { %235 = vpush %v119_v25 }
 0x177   :  { %s236_s23 = spop %235 }
 0x178   :  { %v121_v18 = vstv %s236_s23 }
 0x179   :  { %246 = vrcp.f32 %v121_v18 }
 0x17a   :  { %248 = vrsqrt.f32 %v121_v18 }
 0x183   :  { %v247_v28 = vpop.eup %246 }
 0x184   :  { %v249_v29 = vpop.eup %248  ;;  %237 = vpush %v247_v28 }
 0x185   :  { %239 = vpush %v249_v29 }
 0x1b5   :  { %s238_s24 = spop %237 }
 0x1b6   :  { %v132_v34 = vstv %s238_s24  ;;  %s240_s25 = spop %239 }
 0x1b7   :  { %v133_v36 = vmul.f32 %v132_v34, %v77_v11  ;;  %v134_v37 = vmul.f32 %v132_v34, %v84_v12  ;;  %v135_v39 = vmul.f32 %v132_v34, %v91_v15  ;;  %v136_v40 = vmul.f32 %v132_v34, %v98_v13 }
 0x1b8   :  { %v137_v41 = vmul.f32 %v132_v34, %v105_v14  ;;  %v138_v42 = vmul.f32 %v132_v34, %v112_v10  ;;  %v127_v43 = vstv %s240_s25 }
 0x1b9   :  { %v149_v44 = vcombine.low %v133_v36, %v134_v37  ;;  %v128_v45 = vmul.f32 %v127_v43, %v295_v26  ;;  %v129_v46 = vmul.f32 %v127_v43, %v297_v27  ;;  %v130_v48 = vmul.f32 %v127_v43, %v305_v35 }
 0x1ba   :  { %v172_v47 = vcombine.low %v136_v40, %v137_v41  ;;  %v131_v49 = vmul.f32 %v127_v43, %v307_v38  ;;  %v163_v50 = vrot.slane %v135_v39, %v155_v33  ;;  %v186_v53 = vrot.slane %v138_v42, %v155_v33 }
 0x1bb   :  { %v156_v20 = vrot.slane %v149_v44, %v155_v33  ;;  %139 = vst [vmem:[%s383_s1] sm:$0x77] %v128_v45  ;;  %140 = vst [vmem:[%s383_s1 + $0x8] sm:$0x7] %v129_v46  ;;  %v205_v51 = vmul.f32 -2.0, %v128_v45  ;;  %v206_v52 = vmul.f32 -2.0, %v129_v46  ;;  %v207_v27 = vmul.f32 -2.0, %v130_v48 }
 0x1bc   :  { %v179_v26 = vrot.slane %v172_v47, %v155_v33  ;;  %141 = vst [vmem:[%s383_s1 + $0xc] sm:$0x77] %v130_v48  ;;  %142 = vst [vmem:[%s383_s1 + $0x14] sm:$0x7] %v131_v49  ;;  %v208_v35 = vmul.f32 -2.0, %v131_v49 }
 0x1bd   :  { %v164_v38 = vcombine.low %v156_v20, %v163_v50  ;;  %209 = vst [vmem:[%s382_s2] sm:$0x77] %v205_v51  ;;  %210 = vst [vmem:[%s382_s2 + $0x8] sm:$0x7] %v206_v52 }
 0x1be   :  { %v187_v54 = vcombine.low %v179_v26, %v186_v53  ;;  %211 = vst [vmem:[%s382_s2 + $0xc] sm:$0x77] %v207_v27  ;;  %212 = vst [vmem:[%s382_s2 + $0x14] sm:$0x7] %v208_v35 }
 0x1bf   :  { %v171_v55 = vrot.slane %v164_v38, %v155_v33 }
 0x1c0   :  { %v194_v56 = vrot.slane %v187_v54, %v155_v33 }
 0x1c1   :  { %217 = vst.msk [vmem:[%s384_s3] sm:$0x7] %vm318_vm1, %v171_v55  ;;  %231 = vst.msk [vmem:[%s383_s1 + $0x3] ss:$4 sm:$0x7] %vm318_vm1, %v171_v55 }
 0x1c2   :  { %218 = vst.msk [vmem:[%s384_s3 + $0x3] sm:$0x7] %vm318_vm1, %v194_v56  ;;  %232 = vst.msk [vmem:[%s383_s1 + $0xf] ss:$4 sm:$0x7] %vm318_vm1, %v194_v56 }

// kernel: backbone_forward.9
= control target key start
LH: loop header
LB: loop body
LE: loop exit
PB: predicated region body
PF: predicated region fallthrough
CT: control target
= control target key end

     0   :  { %s783_s15 = smov 0   ;;  %s785_s16 = smov 0   ;;  %s849_s0 = inlined_call_operand.vmem [shape: f32[2,3,384], index: 0, kind: input, shape index: {}]   ;;  %s850_s1 = inlined_call_operand.vmem [shape: f32[16,3], index: 1, kind: input, shape index: {}]   ;;  %s851_s2 = inlined_call_operand.vmem [shape: bf16[2,16,384], index: 2, kind: output, shape index: {0}]   ;;  %s852_s3 = inlined_call_operand.vmem [shape: f32[2,16,1], index: 3, kind: output, shape index: {1}]   ;;  %s853_s4 = inlined_call_operand.vmem [shape: f32[2,16,1], index: 4, kind: output, shape index: {2}]  }
   0x1   :  { %s787_s17 = smov 0  }
   0x2 LB: > { %s27_s18 = sadd.s32 1, %s751_s16  ;;  %p671_p0 = scmp.ge.s32.totalorder %s755_s17, 1  ;;  %s755_s17 = sphi %s787_s17, %s15_s17   ;;  %s751_s16 = sphi %s785_s16, %s855_s16   ;;  %s747_s15 = sphi %s783_s15, %s854_s15  }
   0x3   : > { %p29_p1 = scmp.ge.s32.totalorder %s27_s18, 2  ;;  %p188_p2 = scmp.lt.s32.totalorder %s755_s17, 3 }
   0x5   : > { %s857_s18 = smov (%p29_p1, %s27_s18), 0  ;;  %p189_p3 = pnand %p671_p0, %p188_p2 }
   0x6   : > { %p233_p4 = scmp.lt.s32.totalorder (!%p189_p3), %s747_s15, 1  ;;  %v262_v0 = vld [vmem:[%s850_s1] sm:$0xff] (!%p189_p3)  ;;  %vm269_vm0 = vcmask (!%p189_p3), 23552   ;;  %v757_v1 = vmov (!%p189_p3), 0.0   ;;  %vm276_vm1 = vcmask (!%p189_p3), 1042432   ;;  %v263_v4 = vld [vmem:[%s850_s1 + $0x8] sm:$0xff] (!%p189_p3) }
   0x7   : > { %192 = sbr.rel (%p189_p3) target bundleno = 399 (0x18f), region = 28  ;;  %347 = vmatprep.mubr.f32.mxu0 (!%p189_p3), %v757_v1  ;;  %702 = vmatprep.mubr.msk.f32.mxu1 (!%p189_p3), %vm269_vm0, %v262_v0  ;;  %vm463_vm2 = vcmask (!%p189_p3), 7168  }
   0x8   : > { %464 = vst.msk [vmem:[#allocation2] sm:$0xff] (!%p189_p3), %vm463_vm2, %v757_v1  ;;  %465 = vst.msk [vmem:[#allocation2 + $0x8] sm:$0xff] (!%p189_p3), %vm463_vm2, %v757_v1 }
   0x9   : > { %466 = vst.msk [vmem:[#allocation3] sm:$0xff] (!%p189_p3), %vm463_vm2, %v757_v1  ;;  %467 = vst.msk [vmem:[#allocation3 + $0x8] sm:$0xff] (!%p189_p3), %vm463_vm2, %v757_v1 }
   0xe   : > { %s859_s15 = smov (!%p233_p4, %s747_s15), 1 }
   0xf   : > { %s705_s21 = smul.u32 12, %s859_s15  ;;  %v468_v30 = vld [vmem:[#allocation2] sm:$0xff]  ;;  %v469_v35 = vld [vmem:[#allocation2 + $0x8] sm:$0xff]  ;;  %s691_s5 = sshll.u32 %s859_s15, 4 }
  0x10   : > { %s706_s27 = smul.u32 24, %s859_s15  ;;  %v483_v32 = vld [vmem:[#allocation3] sm:$0xff]  ;;  %v484_v38 = vld [vmem:[#allocation3 + $0x8] sm:$0xff]  ;;  %s256_s8 = scalar_lea.vmem %s852_s3, %s691_s5 }
  0x11   : > { %s240_s24 = scalar_lea.vmem %s849_s0, %s705_s21  ;;  %s261_s11 = scalar_lea.vmem %s853_s4, %s691_s5 }
  0x12   : > { %v264_v2 = vld [vmem:[%s240_s24] sm:$0x77]  ;;  %v265_v3 = vld [vmem:[%s240_s24 + $0x8] sm:$0x7]  ;;  %s250_s30 = scalar_lea.vmem %s851_s2, %s706_s27 }
  0x13   : > { %v268_v5 = vcombine.high %v264_v2, %v264_v2  ;;  %700 = vmatprep.subr.msk.mxu1 %vm276_vm1, %v265_v3 }
  0x14   : > { %701 = vmatpush3.msk.msra.mxu1 %vm276_vm1, %v265_v3 }
  0x15   : > { %678 = vmatprep.subr.msk.mxu0 %vm276_vm1, %v268_v5  ;;  %703 = vmatmul.mubr.msk.f32.vlgmr.msra.gmra.mrb[0].mxu1 %vm269_vm0, %v263_v4 }
  0x16   : > { %679 = vmatpush1.msk.msra.mxu0 %vm276_vm1, %v264_v2 }
  0x17   : > { %680 = vmatmul.mubr.msk.f32.vlgmr.msra.gmra.mrb[0].mxu0 %vm269_vm0, %v262_v0 }
  0x18   : > { %353 = vmatprep.mubr.f32.mxu0 %v757_v1 }
  0x1b   : > { %681 = vmatmul.mubr.msk.f32.gmra.mrb[2].mxu0 %vm269_vm0, %v263_v4 }
  0xe8   : > { %v704_v6 = vpop.f32.mrb[0].mxu1 }
  0xe9   : > { %v696_v7 = vpack.c.bf16 %v704_v6, %v704_v6  ;;  %v426_v8 = vpop.f32.mrb[1].mxu1  ;;  %v490_v27 = vmul.f32 %v704_v6, %v704_v6 }
  0xea   : > { %v349_v9 = vpop.f32.mrb[0].mxu0  ;;  %v694_v10 = vpack.c.bf16 %v426_v8, %v426_v8  ;;  %v487_v15 = vmul.f32 %v426_v8, %v426_v8 }
  0xeb   : > { %v485_v11 = vmul.f32 %v349_v9, %v349_v9  ;;  %v351_v12 = vpop.f32.mrb[1].mxu0  ;;  %458 = vst [vmem:[%s250_s30 + $0x14] sm:$0xf] %v696_v7 }
  0xec   : > { %v693_v13 = vpack.c.bf16 %v351_v12, %v349_v9  ;;  %v486_v14 = vmul.f32 %v351_v12, %v351_v12  ;;  %456 = vst [vmem:[%s250_s30 + $0x8] sm:$0xf] %v694_v10  ;;  %v470_v16 = vadd.f32 %v351_v12, %v349_v9 }
  0xee   : > { %455 = vst [vmem:[%s250_s30] sm:$0xff] %v693_v13  ;;  %v355_v17 = vpop.f32.mrb[2].mxu0  ;;  %v471_v18 = vadd.f32 %v470_v16, %v426_v8  ;;  %v491_v19 = vadd.f32 %v486_v14, %v485_v11 }
  0xef   : > { %v488_v20 = vmul.f32 %v355_v17, %v355_v17  ;;  %v357_v21 = vpop.f32.mrb[3].mxu0 }
  0xf0   : > { %v695_v22 = vpack.c.bf16 %v357_v21, %v355_v17  ;;  %v474_v23 = vadd.f32 %v357_v21, %v355_v17  ;;  %v489_v24 = vmul.f32 %v357_v21, %v357_v21  ;;  %472 = vadd.xlane.f32.xlu0 %v471_v18  ;;  %v492_v25 = vadd.f32 %v491_v19, %v487_v15 }
  0xf2   : > { %457 = vst [vmem:[%s250_s30 + $0xc] sm:$0xff] %v695_v22  ;;  %493 = vadd.xlane.f32.xlu1 %v492_v25  ;;  %v475_v26 = vadd.f32 %v704_v6, %v474_v23  ;;  %v495_v28 = vadd.f32 %v489_v24, %v488_v20 }
  0xf4   : > { %476 = vadd.xlane.f32.xlu0 %v475_v26  ;;  %v496_v29 = vadd.f32 %v495_v28, %v490_v27 }
  0xf6   : > { %497 = vadd.xlane.f32.xlu1 %v496_v29 }
 0x17d   : > { %v473_v31 = vpop.xlane.xlu0 %472 }
 0x17e   : > { %v478_v33 = vadd.f32 %v473_v31, %v468_v30 }
 0x17f   : > { %v494_v34 = vpop.xlane.xlu1 %493 }
 0x180   : > { %481 = vst.msk [vmem:[#allocation2] sm:$0xff] %vm463_vm2, %v478_v33  ;;  %v499_v36 = vadd.f32 %v494_v34, %v483_v32 }
 0x181   : > { %v477_v37 = vpop.xlane.xlu0 %476 }
 0x182   : > { %501 = vst.msk [vmem:[#allocation3] sm:$0xff] %vm463_vm2, %v499_v36  ;;  %v479_v39 = vadd.f32 %v477_v37, %v469_v35 }
 0x183   : > { %v498_v40 = vpop.xlane.xlu1 %497 }
 0x184   : > { %482 = vst.msk [vmem:[#allocation2 + $0x8] sm:$0xff] %vm463_vm2, %v479_v39  ;;  %v500_v41 = vadd.f32 %v498_v40, %v484_v38 }
 0x186   : > { %502 = vst.msk [vmem:[#allocation3 + $0x8] sm:$0xff] %vm463_vm2, %v500_v41 }
 0x187   : > { %v506_v42 = vld [vmem:[#allocation2] sm:$0xff] }
 0x188   : > { %508 = vst.msk [vmem:[%s256_s8] sm:$0xff] %vm463_vm2, %v506_v42 }
 0x189   : > { %v510_v43 = vld [vmem:[#allocation3] sm:$0xff] }
 0x18a   : > { %512 = vst.msk [vmem:[%s261_s11] sm:$0xff] %vm463_vm2, %v510_v43 }
 0x18b   : > { %v507_v44 = vld [vmem:[#allocation2 + $0x8] sm:$0xff] }
 0x18c   : > { %509 = vst.msk [vmem:[%s256_s8 + $0x8] sm:$0xff] %vm463_vm2, %v507_v44 }
 0x18d   : > { %v511_v45 = vld [vmem:[#allocation3 + $0x8] sm:$0xff] }
 0x18e   : > { %513 = vst.msk [vmem:[%s261_s11 + $0x8] sm:$0xff] %vm463_vm2, %v511_v45 }
 0x18f PF: > { %s15_s17 = sadd.s32 1, %s755_s17   ;;  %s854_s15 = smov %s751_s16 }
 0x190   : > { %p12_p5 = scmp.ge.s32.totalorder %s15_s17, 4   ;;  %s855_s16 = smov %s857_s18 }
 0x192   :  { %14 = sbr.rel (!%p12_p5) target bundleno = 2 (0x2), region = 90 }

// kernel: backbone_forward.10
= control target key start
LH: loop header
LB: loop body
LE: loop exit
PB: predicated region body
PF: predicated region fallthrough
CT: control target
= control target key end

     0   :  { %s1224_s18 = smov 0   ;;  %s1226_s19 = smov 0   ;;  %s1436_s0 = inlined_call_operand.vmem [shape: bf16[2,16,384], index: 0, kind: input, shape index: {}]   ;;  %s1437_s1 = inlined_call_operand.vmem [shape: f32[16,2], index: 1, kind: input, shape index: {}]   ;;  %s1438_s2 = inlined_call_operand.vmem [shape: f32[64,16], index: 2, kind: input, shape index: {}]   ;;  %s1439_s3 = inlined_call_operand.vmem [shape: bf16[2,64,384], index: 3, kind: output, shape index: {0}]   ;;  %s1440_s4 = inlined_call_operand.vmem [shape: f32[2,64,1], index: 4, kind: output, shape index: {1}]   ;;  %s1441_s5 = inlined_call_operand.vmem [shape: f32[2,64,1], index: 5, kind: output, shape index: {2}]  }
   0x1   :  { %s1228_s20 = smov 0  }
   0x2 LB: > { %s28_s21 = sadd.s32 1, %s1185_s19  ;;  %p1040_p0 = scmp.ge.s32.totalorder %s1189_s20, 1  ;;  %s1189_s20 = sphi %s1228_s20, %s16_s20   ;;  %s1185_s19 = sphi %s1226_s19, %s1443_s19   ;;  %s1181_s18 = sphi %s1224_s18, %s1442_s18  }
   0x3   : > { %p30_p1 = scmp.ge.s32.totalorder %s28_s21, 2  ;;  %p213_p2 = scmp.lt.s32.totalorder %s1189_s20, 3 }
   0x5   : > { %s1445_s21 = smov (%p30_p1, %s28_s21), 0  ;;  %p214_p3 = pnand %p1040_p0, %p213_p2 }
   0x6   : > { %v289_v0 = vld [vmem:[%s1437_s1] sm:$0xff] (!%p214_p3)  ;;  %v1191_v1 = vmov (!%p214_p3), 1   ;;  %v1192_v2 = vmov (!%p214_p3), 0   ;;  %v290_v3 = vld [vmem:[%s1437_s1 + $0x8] sm:$0xff] (!%p214_p3)  ;;  %v1193_v4 = vmov (!%p214_p3), 0.0   ;;  %p260_p4 = scmp.lt.s32.totalorder (!%p214_p3), %s1181_s18, 1 }
   0x7   : > { %217 = sbr.rel (%p214_p3) target bundleno = 562 (0x232), region = 32  ;;  %1165 = vset.pattern.permute.xlu1 (!%p214_p3), %v1191_v1  ;;  %1164 = vset.pattern.permute.xlu0 (!%p214_p3), %v1192_v2  ;;  %v349_v45 = vld [vmem:[%s1438_s2 + $0x30] sm:$0xff] (!%p214_p3)  ;;  %vm351_vm0 = vcmask (!%p214_p3), 130048   ;;  %v343_v46 = vld [vmem:[%s1438_s2] sm:$0xff] (!%p214_p3)  ;;  %v350_v47 = vld [vmem:[%s1438_s2 + $0x38] sm:$0xff] (!%p214_p3)  ;;  %vm694_vm1 = vcmask (!%p214_p3), 7168  }
   0x8   : > { %318 = vperm.xlu1 (!%p214_p3), %1165, %v289_v0   ;;  %303 = vperm.xlu0 (!%p214_p3), %1164, %v289_v0   ;;  %v344_v48 = vld [vmem:[%s1438_s2 + $0x8] sm:$0xff] (!%p214_p3)  ;;  %v345_v49 = vld [vmem:[%s1438_s2 + $0x10] sm:$0xff] (!%p214_p3)  ;;  %v346_v50 = vld [vmem:[%s1438_s2 + $0x18] sm:$0xff] (!%p214_p3)  ;;  %696 = vst.msk [vmem:[#allocation2 + $0x8] sm:$0xff] (!%p214_p3), %vm694_vm1, %v1193_v4 }
   0x9   : > { %476 = vmatprep.mubr.f32.mxu1 (!%p214_p3), %v1193_v4  ;;  %440 = vmatprep.mubr.f32.mxu0 (!%p214_p3), %v1193_v4  ;;  %v347_v51 = vld [vmem:[%s1438_s2 + $0x20] sm:$0xff] (!%p214_p3)  ;;  %v348_v52 = vld [vmem:[%s1438_s2 + $0x28] sm:$0xff] (!%p214_p3)  ;;  %695 = vst.msk [vmem:[#allocation2] sm:$0xff] (!%p214_p3), %vm694_vm1, %v1193_v4  ;;  %697 = vst.msk [vmem:[#allocation2 + $0x10] sm:$0xff] (!%p214_p3), %vm694_vm1, %v1193_v4 }
   0xa   : > { %698 = vst.msk [vmem:[#allocation2 + $0x18] sm:$0xff] (!%p214_p3), %vm694_vm1, %v1193_v4  ;;  %699 = vst.msk [vmem:[#allocation2 + $0x20] sm:$0xff] (!%p214_p3), %vm694_vm1, %v1193_v4 }
   0xb   : > { %700 = vst.msk [vmem:[#allocation2 + $0x28] sm:$0xff] (!%p214_p3), %vm694_vm1, %v1193_v4  ;;  %701 = vst.msk [vmem:[#allocation2 + $0x30] sm:$0xff] (!%p214_p3), %vm694_vm1, %v1193_v4 }
   0xc   : > { %322 = vperm.xlu1 (!%p214_p3), %1165, %v290_v3   ;;  %308 = vperm.xlu0 (!%p214_p3), %1164, %v290_v3   ;;  %702 = vst.msk [vmem:[#allocation2 + $0x38] sm:$0xff] (!%p214_p3), %vm694_vm1, %v1193_v4  ;;  %703 = vst.msk [vmem:[#allocation3] sm:$0xff] (!%p214_p3), %vm694_vm1, %v1193_v4 }
   0xd   : > { %704 = vst.msk [vmem:[#allocation3 + $0x8] sm:$0xff] (!%p214_p3), %vm694_vm1, %v1193_v4  ;;  %705 = vst.msk [vmem:[#allocation3 + $0x10] sm:$0xff] (!%p214_p3), %vm694_vm1, %v1193_v4 }
   0xe   : > { %s1447_s18 = smov (!%p260_p4, %s1181_s18), 1  ;;  %706 = vst.msk [vmem:[#allocation3 + $0x18] sm:$0xff] %vm694_vm1, %v1193_v4  ;;  %707 = vst.msk [vmem:[#allocation3 + $0x20] sm:$0xff] %vm694_vm1, %v1193_v4 }
   0xf   : > { %s1135_s26 = smul.u32 24, %s1447_s18  ;;  %708 = vst.msk [vmem:[#allocation3 + $0x28] sm:$0xff] %vm694_vm1, %v1193_v4  ;;  %709 = vst.msk [vmem:[#allocation3 + $0x30] sm:$0xff] %vm694_vm1, %v1193_v4 }
  0x10   : > { %1166 = vset.pattern.permute.xlu0 %v1191_v1  ;;  %710 = vst.msk [vmem:[#allocation3 + $0x38] sm:$0xff] %vm694_vm1, %v1193_v4  ;;  %s1136_s25 = smul.u32 96, %s1447_s18 }
  0x11   : > { %s267_s29 = scalar_lea.vmem %s1436_s0, %s1135_s26 }
  0x12   : > { %v291_v5 = vld [vmem:[%s267_s29] sm:$0xff]  ;;  %v292_v6 = vld [vmem:[%s267_s29 + $0x8] ss:$12 sps:$4 sm:$0xff]   ;;  %v293_v10 = vld [vmem:[%s267_s29 + $0xc] sm:$0xff]  ;;  %s1338_s28 = scalar_lea.vmem %s1439_s3, %s1136_s25  ;;  %s1081_s29 = sshll.u32 %s1447_s18, 6 }
  0x13   : > { %v295_v7 = vunpack.c.l.bf16 %v291_v5  ;;  %v296_v8 = vunpack.c.h.bf16 %v291_v5  ;;  %v297_v9 = vunpack.c.l.bf16 %v292_v6  ;;  %v298_v13 = vunpack.c.l.bf16 %v293_v10  ;;  %s1375_s7 = scalar_lea.vmem %s1440_s4, %s1081_s29  ;;  %s1384_s9 = scalar_lea.vmem %s1441_s5, %s1081_s29 }
  0x14   : > { %v299_v14 = vunpack.c.h.bf16 %v293_v10  ;;  %v300_v18 = vunpack.c.h.bf16 %v292_v6 }
  0x87   : > { %v319_v11 = vpop.permute.xlu1 %318  ;;  %v304_v12 = vpop.permute.xlu0 %303 }
  0x88   : > { %v311_v15 = vsub.f32 %v295_v7, %v304_v12  ;;  %v312_v16 = vsub.f32 %v296_v8, %v304_v12  ;;  %v313_v17 = vsub.f32 %v297_v9, %v304_v12 }
  0x8a   : > { %v326_v19 = vmul.f32 %v319_v11, %v312_v16  ;;  %v325_v20 = vmul.f32 %v319_v11, %v311_v15  ;;  %v327_v21 = vmul.f32 %v319_v11, %v313_v17 }
  0x8b   : > { %v309_v22 = vpop.permute.xlu0 %308  ;;  %v323_v26 = vpop.permute.xlu1 %322 }
  0x8c   : > { %v314_v23 = vsub.f32 %v298_v13, %v309_v22  ;;  %v315_v24 = vsub.f32 %v299_v14, %v309_v22  ;;  %v316_v25 = vsub.f32 %v300_v18, %v309_v22  ;;  %v332_v27 = vmul.f32 0.2, %v326_v19 }
  0x8d   : > { %v331_v31 = vmul.f32 0.2, %v325_v20  ;;  %v333_v32 = vmul.f32 0.2, %v327_v21 }
  0x8e   : > { %v330_v28 = vmul.f32 %v323_v26, %v316_v25  ;;  %v329_v29 = vmul.f32 %v323_v26, %v315_v24  ;;  %v328_v30 = vmul.f32 %v323_v26, %v314_v23  ;;  %v338_v36 = vmax.f32 %v326_v19, %v332_v27 }
  0x8f   : > { %v337_v38 = vmax.f32 %v325_v20, %v331_v31  ;;  %v339_v43 = vmax.f32 %v327_v21, %v333_v32 }
  0x90   : > { %v336_v33 = vmul.f32 0.2, %v330_v28  ;;  %v335_v34 = vmul.f32 0.2, %v329_v29  ;;  %v334_v35 = vmul.f32 0.2, %v328_v30 }
  0x92   : > { %v341_v37 = vmax.f32 %v329_v29, %v335_v34  ;;  %v340_v39 = vmax.f32 %v328_v30, %v334_v35  ;;  %v342_v40 = vmax.f32 %v330_v28, %v336_v33 }
  0x94   : > { %v1125_v41 = vpack.c.bf16 %v341_v37, %v338_v36  ;;  %v1127_v42 = vpack.c.bf16 %v340_v39, %v337_v38  ;;  %v1129_v44 = vpack.c.bf16 %v342_v40, %v339_v43 }
  0x96   : > { %1126 = vmatprep.subr.bf16.mxu0 %v1125_v41  ;;  %1133 = vmatprep.subr.bf16.mxu1 %v1125_v41 }
  0x97   : > { %1128 = vmatpush1.bf16.msra.mxu0 %v1127_v42  ;;  %1134 = vmatpush1.bf16.msra.mxu1 %v1127_v42 }
  0x98   : > { %1130 = vmatprep.subr.bf16.mxu1 %v1129_v44 }
  0x9a   : > { %1053 = vmatmul.mubr.msk.f32.vlgmr.msra.gmra.mrb[0].mxu1 %vm351_vm0, %v349_v45  ;;  %1047 = vmatmul.mubr.msk.f32.vlgmr.msra.gmra.mrb[0].mxu0 %vm351_vm0, %v343_v46 }
  0x9b   : > { %1132 = vmatpush3.bf16.msra.mxu1 %v1129_v44  ;;  %482 = vmatprep.mubr.f32.mxu1 %v1193_v4 }
  0x9c   : > { %446 = vmatprep.mubr.f32.mxu0 %v1193_v4 }
  0x9e   : > { %1054 = vmatmul.mubr.msk.f32.gmra.mrb[2].mxu1 %vm351_vm0, %v350_v47  ;;  %1048 = vmatmul.mubr.msk.f32.gmra.mrb[2].mxu0 %vm351_vm0, %v344_v48 }
  0x9f   : > { %1113 = vmatprep.mubr.msk.f32.mxu1 %vm351_vm0, %v343_v46  ;;  %452 = vmatprep.mubr.f32.mxu0 %v1193_v4 }
  0xa2   : > { %1114 = vmatmul.mubr.msk.f32.vlgmr.msra.gmra.mrb[4].mxu1 %vm351_vm0, %v344_v48  ;;  %1049 = vmatmul.mubr.msk.f32.gmra.mrb[4].mxu0 %vm351_vm0, %v345_v49 }
  0xa3   : > { %1116 = vmatprep.mubr.msk.f32.mxu1 %vm351_vm0, %v345_v49  ;;  %458 = vmatprep.mubr.f32.mxu0 %v1193_v4 }
  0xa6   : > { %1117 = vmatmul.mubr.msk.f32.gmra.mrb[6].mxu1 %vm351_vm0, %v346_v50  ;;  %1050 = vmatmul.mubr.msk.f32.gmra.mrb[6].mxu0 %vm351_vm0, %v346_v50 }
  0xa7   : > { %1119 = vmatprep.mubr.msk.f32.mxu1 %vm351_vm0, %v347_v51  ;;  %464 = vmatprep.mubr.f32.mxu0 %v1193_v4 }
  0xaa   : > { %1120 = vmatmul.mubr.msk.f32.gmra.mrb[8].mxu1 %vm351_vm0, %v348_v52  ;;  %1051 = vmatmul.mubr.msk.f32.gmra.mrb[8].mxu0 %vm351_vm0, %v347_v51 }
  0xab   : > { %1122 = vmatprep.mubr.msk.f32.mxu1 %vm351_vm0, %v349_v45  ;;  %470 = vmatprep.mubr.f32.mxu0 %v1193_v4 }
  0xae   : > { %1123 = vmatmul.mubr.msk.f32.gmra.mrb[10].mxu1 %vm351_vm0, %v350_v47  ;;  %1052 = vmatmul.mubr.msk.f32.gmra.mrb[10].mxu0 %vm351_vm0, %v348_v52 }
 0x16d   : > { %v478_v53 = vpop.f32.mrb[0].mxu1  ;;  %v442_v54 = vpop.f32.mrb[0].mxu0 }
 0x16e   : > { %v794_v55 = vmul.f32 %v478_v53, %v478_v53  ;;  %v480_v56 = vpop.f32.mrb[1].mxu1  ;;  %v776_v57 = vmul.f32 %v442_v54, %v442_v54  ;;  %v444_v58 = vpop.f32.mrb[1].mxu0 }
 0x16f   : > { %v1095_v59 = vpack.c.bf16 %v480_v56, %v478_v53  ;;  %v795_v60 = vmul.f32 %v480_v56, %v480_v56  ;;  %v1083_v61 = vpack.c.bf16 %v444_v58, %v442_v54  ;;  %v777_v62 = vmul.f32 %v444_v58, %v444_v58 }
 0x170   : > { %v719_v63 = vadd.f32 %v444_v58, %v442_v54  ;;  %v1340_v0 = vadd.f32 %v480_v56, %v478_v53 }
 0x171   : > { %686 = vst [vmem:[%s1338_s28 + $0x48] sm:$0xff] %v1095_v59  ;;  %674 = vst [vmem:[%s1338_s28] sm:$0xff] %v1083_v61  ;;  %v484_v1 = vpop.f32.mrb[2].mxu1  ;;  %v448_v2 = vpop.f32.mrb[2].mxu0  ;;  %v800_v3 = vadd.f32 %v777_v62, %v776_v57  ;;  %v1344_v4 = vadd.f32 %v795_v60, %v794_v55 }
 0x172   : > { %v797_v5 = vmul.f32 %v484_v1, %v484_v1  ;;  %v779_v6 = vmul.f32 %v448_v2, %v448_v2  ;;  %v486_v7 = vpop.f32.mrb[3].mxu1  ;;  %v450_v8 = vpop.f32.mrb[3].mxu0 }
 0x173   : > { %v1097_v9 = vpack.c.bf16 %v486_v7, %v484_v1  ;;  %v798_v10 = vmul.f32 %v486_v7, %v486_v7  ;;  %v1085_v11 = vpack.c.bf16 %v450_v8, %v448_v2  ;;  %v780_v12 = vmul.f32 %v450_v8, %v450_v8 }
 0x174   : > { %v723_v13 = vadd.f32 %v450_v8, %v448_v2  ;;  %v1346_v14 = vadd.f32 %v486_v7, %v484_v1 }
 0x175   : > { %688 = vst [vmem:[%s1338_s28 + $0x54] sm:$0xff] %v1097_v9  ;;  %676 = vst [vmem:[%s1338_s28 + $0xc] sm:$0xff] %v1085_v11  ;;  %v1115_v15 = vpop.f32.mrb[4].mxu1  ;;  %v454_v16 = vpop.f32.mrb[4].mxu0  ;;  %v804_v17 = vadd.f32 %v780_v12, %v779_v6  ;;  %v1350_v18 = vadd.f32 %v798_v10, %v797_v5 }
 0x176   : > { %v1086_v19 = vpack.c.bf16 %v1115_v15, %v1115_v15  ;;  %v555_v20 = vpop.f32.mrb[5].mxu1  ;;  %v724_v21 = vadd.f32 %v1115_v15, %v723_v13  ;;  %v782_v22 = vmul.f32 %v454_v16, %v454_v16  ;;  %v456_v23 = vpop.f32.mrb[5].mxu0  ;;  %v781_v24 = vmul.f32 %v1115_v15, %v1115_v15 }
 0x177   : > { %v1084_v25 = vpack.c.bf16 %v555_v20, %v555_v20  ;;  %v720_v26 = vadd.f32 %v719_v63, %v555_v20  ;;  %v1087_v27 = vpack.c.bf16 %v456_v23, %v454_v16  ;;  %v783_v28 = vmul.f32 %v456_v23, %v456_v23 }
 0x178   : > { %677 = vst [vmem:[%s1338_s28 + $0x14] sm:$0xf] %v1086_v19  ;;  %725 = vadd.xlane.f32.xlu1 %v724_v21  ;;  %v778_v29 = vmul.f32 %v555_v20, %v555_v20  ;;  %v805_v30 = vadd.f32 %v804_v17, %v781_v24  ;;  %v727_v31 = vadd.f32 %v456_v23, %v454_v16  ;;  %v711_v24 = vld [vmem:[#allocation2] sm:$0xff] }
 0x179   : > { %675 = vst [vmem:[%s1338_s28 + $0x8] sm:$0xf] %v1084_v25  ;;  %721 = vadd.xlane.f32.xlu0 %v720_v26  ;;  %678 = vst [vmem:[%s1338_s28 + $0x18] sm:$0xff] %v1087_v27  ;;  %v1118_v32 = vpop.f32.mrb[6].mxu1  ;;  %v460_v33 = vpop.f32.mrb[6].mxu0  ;;  %v808_v34 = vadd.f32 %v783_v28, %v782_v22  ;;  %v768_v28 = vld [vmem:[#allocation3] sm:$0xff] }
 0x17a   : > { %v1090_v35 = vpack.c.bf16 %v1118_v32, %v1118_v32  ;;  %v785_v36 = vmul.f32 %v460_v33, %v460_v33  ;;  %v565_v37 = vpop.f32.mrb[7].mxu1  ;;  %v801_v38 = vadd.f32 %v800_v3, %v778_v29  ;;  %v462_v39 = vpop.f32.mrb[7].mxu0  ;;  %v787_v46 = vmul.f32 %v1118_v32, %v1118_v32 }
 0x17b   : > { %v1088_v40 = vpack.c.bf16 %v565_v37, %v565_v37  ;;  %v1089_v41 = vpack.c.bf16 %v462_v39, %v460_v33  ;;  %v786_v42 = vmul.f32 %v462_v39, %v462_v39  ;;  %v784_v43 = vmul.f32 %v565_v37, %v565_v37 }
 0x17c   : > { %681 = vst [vmem:[%s1338_s28 + $0x2c] sm:$0xf] %v1090_v35  ;;  %802 = vadd.xlane.f32.xlu1 %v801_v38  ;;  %v728_v44 = vadd.f32 %v727_v31, %v565_v37  ;;  %v731_v45 = vadd.f32 %v462_v39, %v460_v33  ;;  %v770_v33 = vld [vmem:[#allocation3 + $0x10] sm:$0xff] }
 0x17d   : > { %679 = vst [vmem:[%s1338_s28 + $0x20] sm:$0xf] %v1088_v40  ;;  %680 = vst [vmem:[%s1338_s28 + $0x24] sm:$0xff] %v1089_v41  ;;  %806 = vadd.xlane.f32.xlu0 %v805_v30  ;;  %v466_v47 = vpop.f32.mrb[8].mxu0  ;;  %v1121_v48 = vpop.f32.mrb[8].mxu1  ;;  %v809_v49 = vadd.f32 %v808_v34, %v784_v43  ;;  %v812_v50 = vadd.f32 %v786_v42, %v785_v36  ;;  %v713_v34 = vld [vmem:[#allocation2 + $0x10] sm:$0xff] }
 0x17e   : > { %v788_v51 = vmul.f32 %v466_v47, %v466_v47  ;;  %v468_v52 = vpop.f32.mrb[9].mxu0  ;;  %v1094_v53 = vpack.c.bf16 %v1121_v48, %v1121_v48  ;;  %v575_v54 = vpop.f32.mrb[9].mxu1  ;;  %v732_v55 = vadd.f32 %v1118_v32, %v731_v45  ;;  %v793_v3 = vmul.f32 %v1121_v48, %v1121_v48  ;;  %v715_v40 = vld [vmem:[#allocation2 + $0x20] sm:$0xff]  ;;  %v714_v42 = vld [vmem:[#allocation2 + $0x18] sm:$0xff] }
 0x17f   : > { %v1091_v56 = vpack.c.bf16 %v468_v52, %v466_v47  ;;  %v789_v57 = vmul.f32 %v468_v52, %v468_v52  ;;  %v1092_v58 = vpack.c.bf16 %v575_v54, %v575_v54  ;;  %v735_v59 = vadd.f32 %v468_v52, %v466_v47 }
 0x180   : > { %685 = vst [vmem:[%s1338_s28 + $0x44] sm:$0xf] %v1094_v53  ;;  %810 = vadd.xlane.f32.xlu1 %v809_v49  ;;  %v813_v60 = vadd.f32 %v812_v50, %v787_v46  ;;  %v790_v61 = vmul.f32 %v575_v54, %v575_v54  ;;  %v771_v50 = vld [vmem:[#allocation3 + $0x18] sm:$0xff] }
 0x181   : > { %682 = vst [vmem:[%s1338_s28 + $0x30] sm:$0xff] %v1091_v56  ;;  %683 = vst [vmem:[%s1338_s28 + $0x38] sm:$0xf] %v1092_v58  ;;  %v1124_v62 = vpop.f32.mrb[10].mxu1  ;;  %729 = vadd.xlane.f32.xlu0 %v728_v44  ;;  %v736_v63 = vadd.f32 %v735_v59, %v575_v54  ;;  %v472_v1 = vpop.f32.mrb[10].mxu0  ;;  %v816_v2 = vadd.f32 %v789_v57, %v788_v51  ;;  %v772_v56 = vld [vmem:[#allocation3 + $0x20] sm:$0xff] }
 0x182   : > { %v1098_v5 = vpack.c.bf16 %v1124_v62, %v1124_v62  ;;  %v585_v6 = vpop.f32.mrb[11].mxu1  ;;  %v791_v7 = vmul.f32 %v472_v1, %v472_v1  ;;  %v474_v8 = vpop.f32.mrb[11].mxu0  ;;  %v748_v9 = vadd.f32 %v1124_v62, %v1346_v14  ;;  %v799_v10 = vmul.f32 %v1124_v62, %v1124_v62  ;;  %v718_v58 = vld [vmem:[#allocation2 + $0x38] sm:$0xff] }
 0x183   : > { %v1096_v11 = vpack.c.bf16 %v585_v6, %v585_v6  ;;  %v796_v12 = vmul.f32 %v585_v6, %v585_v6  ;;  %v1093_v13 = vpack.c.bf16 %v474_v8, %v472_v1  ;;  %v739_v15 = vadd.f32 %v474_v8, %v472_v1  ;;  %v774_v1 = vld [vmem:[#allocation3 + $0x30] sm:$0xff] }
 0x184   : > { %689 = vst [vmem:[%s1338_s28 + $0x5c] sm:$0xf] %v1098_v5  ;;  %737 = vadd.xlane.f32.xlu1 %v736_v63  ;;  %v792_v16 = vmul.f32 %v474_v8, %v474_v8  ;;  %v744_v17 = vadd.f32 %v1340_v0, %v585_v6  ;;  %v817_v19 = vadd.f32 %v816_v2, %v790_v61  ;;  %v712_v0 = vld [vmem:[#allocation2 + $0x8] sm:$0xff] }
 0x185   : > { %v829_v20 = vadd.f32 %v1350_v18, %v799_v10  ;;  %687 = vst [vmem:[%s1338_s28 + $0x50] sm:$0xf] %v1096_v11  ;;  %733 = vadd.xlane.f32.xlu0 %v732_v55  ;;  %684 = vst [vmem:[%s1338_s28 + $0x3c] sm:$0xff] %v1093_v13  ;;  %v825_v21 = vadd.f32 %v1344_v4, %v796_v12  ;;  %v740_v22 = vadd.f32 %v1121_v48, %v739_v15  ;;  %v769_v4 = vld [vmem:[#allocation3 + $0x8] sm:$0xff]  ;;  %v717_v48 = vld [vmem:[#allocation2 + $0x30] sm:$0xff] }
 0x186   : > { %v820_v14 = vadd.f32 %v792_v16, %v791_v7  ;;  %v773_v11 = vld [vmem:[#allocation3 + $0x28] sm:$0xff] }
 0x188   : > { %745 = vadd.xlane.f32.xlu1 %v744_v17  ;;  %v821_v23 = vadd.f32 %v820_v14, %v793_v3  ;;  %v716_v3 = vld [vmem:[#allocation2 + $0x28] sm:$0xff]  ;;  %v775_v17 = vld [vmem:[#allocation3 + $0x38] sm:$0xff] }
 0x189   : > { %814 = vadd.xlane.f32.xlu0 %v813_v60 }
 0x18c   : > { %818 = vadd.xlane.f32.xlu1 %v817_v19 }
 0x18d   : > { %749 = vadd.xlane.f32.xlu0 %v748_v9 }
 0x190   : > { %826 = vadd.xlane.f32.xlu1 %v825_v21 }
 0x191   : > { %741 = vadd.xlane.f32.xlu0 %v740_v22 }
 0x195   : > { %822 = vadd.xlane.f32.xlu0 %v821_v23 }
 0x199   : > { %830 = vadd.xlane.f32.xlu0 %v829_v20 }
 0x205   : > { %v726_v18 = vpop.xlane.xlu1 %725 }
 0x206   : > { %v752_v25 = vadd.f32 %v726_v18, %v712_v0  ;;  %v722_v26 = vpop.xlane.xlu0 %721 }
 0x207   : > { %v751_v27 = vadd.f32 %v722_v26, %v711_v24 }
 0x208   : > { %761 = vst.msk [vmem:[#allocation2 + $0x8] sm:$0xff] %vm694_vm1, %v752_v25 }
 0x209   : > { %760 = vst.msk [vmem:[#allocation2] sm:$0xff] %vm694_vm1, %v751_v27  ;;  %v803_v29 = vpop.xlane.xlu1 %802 }
 0x20a   : > { %v832_v30 = vadd.f32 %v803_v29, %v768_v28  ;;  %v807_v31 = vpop.xlane.xlu0 %806 }
 0x20b   : > { %v833_v32 = vadd.f32 %v807_v31, %v769_v4 }
 0x20c   : > { %840 = vst.msk [vmem:[#allocation3] sm:$0xff] %vm694_vm1, %v832_v30 }
 0x20d   : > { %841 = vst.msk [vmem:[#allocation3 + $0x8] sm:$0xff] %vm694_vm1, %v833_v32  ;;  %v811_v35 = vpop.xlane.xlu1 %810 }
 0x20e   : > { %v834_v36 = vadd.f32 %v811_v35, %v770_v33  ;;  %v730_v37 = vpop.xlane.xlu0 %729 }
 0x20f   : > { %v852_v38 = vld [vmem:[#allocation2 + $0x8] sm:$0xff]  ;;  %v753_v39 = vadd.f32 %v730_v37, %v713_v34 }
 0x210   : > { %860 = vst.msk [vmem:[%s1375_s7 + $0x8] sm:$0xff] %vm694_vm1, %v852_v38  ;;  %v851_v41 = vld [vmem:[#allocation2] sm:$0xff]  ;;  %842 = vst.msk [vmem:[#allocation3 + $0x10] sm:$0xff] %vm694_vm1, %v834_v36 }
 0x211   : > { %859 = vst.msk [vmem:[%s1375_s7] sm:$0xff] %vm694_vm1, %v851_v41  ;;  %762 = vst.msk [vmem:[#allocation2 + $0x10] sm:$0xff] %vm694_vm1, %v753_v39  ;;  %v738_v43 = vpop.xlane.xlu1 %737 }
 0x212   : > { %v755_v44 = vadd.f32 %v738_v43, %v715_v40  ;;  %v734_v45 = vpop.xlane.xlu0 %733 }
 0x213   : > { %v867_v46 = vld [vmem:[#allocation3] sm:$0xff]  ;;  %v754_v47 = vadd.f32 %v734_v45, %v714_v42 }
 0x214   : > { %875 = vst.msk [vmem:[%s1384_s9] sm:$0xff] %vm694_vm1, %v867_v46  ;;  %v868_v49 = vld [vmem:[#allocation3 + $0x8] sm:$0xff]  ;;  %764 = vst.msk [vmem:[#allocation2 + $0x20] sm:$0xff] %vm694_vm1, %v755_v44 }
 0x215   : > { %876 = vst.msk [vmem:[%s1384_s9 + $0x8] sm:$0xff] %vm694_vm1, %v868_v49  ;;  %763 = vst.msk [vmem:[#allocation2 + $0x18] sm:$0xff] %vm694_vm1, %v754_v47  ;;  %v746_v51 = vpop.xlane.xlu1 %745 }
 0x216   : > { %v757_v52 = vadd.f32 %v746_v51, %v717_v48  ;;  %v815_v53 = vpop.xlane.xlu0 %814 }
 0x217   : > { %v869_v54 = vld [vmem:[#allocation3 + $0x10] sm:$0xff]  ;;  %v835_v55 = vadd.f32 %v815_v53, %v771_v50 }
 0x218   : > { %877 = vst.msk [vmem:[%s1384_s9 + $0x10] sm:$0xff] %vm694_vm1, %v869_v54  ;;  %v853_v57 = vld [vmem:[#allocation2 + $0x10] sm:$0xff]  ;;  %766 = vst.msk [vmem:[#allocation2 + $0x30] sm:$0xff] %vm694_vm1, %v757_v52 }
 0x219   : > { %861 = vst.msk [vmem:[%s1375_s7 + $0x10] sm:$0xff] %vm694_vm1, %v853_v57  ;;  %843 = vst.msk [vmem:[#allocation3 + $0x18] sm:$0xff] %vm694_vm1, %v835_v55  ;;  %v819_v59 = vpop.xlane.xlu1 %818 }
 0x21a   : > { %v836_v60 = vadd.f32 %v819_v59, %v772_v56  ;;  %v750_v61 = vpop.xlane.xlu0 %749 }
 0x21b   : > { %v855_v62 = vld [vmem:[#allocation2 + $0x20] sm:$0xff]  ;;  %v758_v63 = vadd.f32 %v750_v61, %v718_v58 }
 0x21c   : > { %863 = vst.msk [vmem:[%s1375_s7 + $0x20] sm:$0xff] %vm694_vm1, %v855_v62  ;;  %v854_v2 = vld [vmem:[#allocation2 + $0x18] sm:$0xff]  ;;  %844 = vst.msk [vmem:[#allocation3 + $0x20] sm:$0xff] %vm694_vm1, %v836_v60 }
 0x21d   : > { %862 = vst.msk [vmem:[%s1375_s7 + $0x18] sm:$0xff] %vm694_vm1, %v854_v2  ;;  %767 = vst.msk [vmem:[#allocation2 + $0x38] sm:$0xff] %vm694_vm1, %v758_v63  ;;  %v827_v5 = vpop.xlane.xlu1 %826 }
 0x21e   : > { %v838_v6 = vadd.f32 %v827_v5, %v774_v1  ;;  %v742_v7 = vpop.xlane.xlu0 %741 }
 0x21f   : > { %v857_v8 = vld [vmem:[#allocation2 + $0x30] sm:$0xff]  ;;  %v756_v9 = vadd.f32 %v742_v7, %v716_v3 }
 0x220   : > { %865 = vst.msk [vmem:[%s1375_s7 + $0x30] sm:$0xff] %vm694_vm1, %v857_v8  ;;  %v870_v10 = vld [vmem:[#allocation3 + $0x18] sm:$0xff]  ;;  %846 = vst.msk [vmem:[#allocation3 + $0x30] sm:$0xff] %vm694_vm1, %v838_v6 }
 0x221   : > { %878 = vst.msk [vmem:[%s1384_s9 + $0x18] sm:$0xff] %vm694_vm1, %v870_v10  ;;  %765 = vst.msk [vmem:[#allocation2 + $0x28] sm:$0xff] %vm694_vm1, %v756_v9 }
 0x222   : > { %v823_v12 = vpop.xlane.xlu0 %822 }
 0x223   : > { %v871_v13 = vld [vmem:[#allocation3 + $0x20] sm:$0xff]  ;;  %v837_v15 = vadd.f32 %v823_v12, %v773_v11 }
 0x224   : > { %879 = vst.msk [vmem:[%s1384_s9 + $0x20] sm:$0xff] %vm694_vm1, %v871_v13  ;;  %v858_v16 = vld [vmem:[#allocation2 + $0x38] sm:$0xff] }
 0x225   : > { %866 = vst.msk [vmem:[%s1375_s7 + $0x38] sm:$0xff] %vm694_vm1, %v858_v16  ;;  %845 = vst.msk [vmem:[#allocation3 + $0x28] sm:$0xff] %vm694_vm1, %v837_v15 }
 0x226   : > { %v831_v19 = vpop.xlane.xlu0 %830 }
 0x227   : > { %v873_v20 = vld [vmem:[#allocation3 + $0x30] sm:$0xff]  ;;  %v839_v21 = vadd.f32 %v831_v19, %v775_v17 }
 0x228   : > { %881 = vst.msk [vmem:[%s1384_s9 + $0x30] sm:$0xff] %vm694_vm1, %v873_v20  ;;  %v856_v22 = vld [vmem:[#allocation2 + $0x28] sm:$0xff] }
 0x229   : > { %864 = vst.msk [vmem:[%s1375_s7 + $0x28] sm:$0xff] %vm694_vm1, %v856_v22  ;;  %847 = vst.msk [vmem:[#allocation3 + $0x38] sm:$0xff] %vm694_vm1, %v839_v21 }
 0x22c   : > { %v872_v14 = vld [vmem:[#allocation3 + $0x28] sm:$0xff] }
 0x22d   : > { %880 = vst.msk [vmem:[%s1384_s9 + $0x28] sm:$0xff] %vm694_vm1, %v872_v14 }
 0x230   : > { %v874_v23 = vld [vmem:[#allocation3 + $0x38] sm:$0xff] }
 0x231   : > { %882 = vst.msk [vmem:[%s1384_s9 + $0x38] sm:$0xff] %vm694_vm1, %v874_v23 }
 0x232 PF: > { %s16_s20 = sadd.s32 1, %s1189_s20   ;;  %s1442_s18 = smov %s1185_s19 }
 0x233   : > { %p13_p5 = scmp.ge.s32.totalorder %s16_s20, 4   ;;  %s1443_s19 = smov %s1445_s21 }
 0x235   :  { %15 = sbr.rel (!%p13_p5) target bundleno = 2 (0x2), region = 94 }

// kernel: backbone_forward.8
= control target key start
LH: loop header
LB: loop body
LE: loop exit
PB: predicated region body
PF: predicated region fallthrough
CT: control target
= control target key end

     0   :  { %s4051_s12 = smov 0   ;;  %s4053_s13 = smov 0   ;;  %s6263_s0 = inlined_call_operand.vmem [shape: f32[2,4,384], index: 0, kind: input, shape index: {}]   ;;  %s6264_s1 = inlined_call_operand.vmem [shape: f32[2,4,384], index: 1, kind: input, shape index: {}]   ;;  %s6265_s2 = inlined_call_operand.vmem [shape: f32[2,1,384], index: 2, kind: input, shape index: {}]   ;;  %s6266_s3 = inlined_call_operand.vmem [shape: f32[2,3,384], index: 3, kind: output, shape index: {}]  }
   0x1   :  { %s4055_s14 = smov 0  }
   0x2 LB: > { %s25_s15 = sadd.s32 1, %s4020_s13  ;;  %p3208_p0 = scmp.ge.s32.totalorder %s4024_s14, 1  ;;  %s4024_s14 = sphi %s4055_s14, %s13_s14   ;;  %s4020_s13 = sphi %s4053_s13, %s6879_s13   ;;  %s4016_s12 = sphi %s4051_s12, %s6878_s12  }
   0x3   : > { %p27_p1 = scmp.ge.s32.totalorder %s25_s15, 2  ;;  %p184_p2 = scmp.lt.s32.totalorder %s4024_s14, 3 }
   0x5   : > { %s6881_s15 = smov (%p27_p1, %s25_s15), 0  ;;  %p185_p3 = pnand %p3208_p0, %p184_p2 }
   0x7   : > { %188 = sbr.rel (%p185_p3) target bundleno = 1072 (0x430), region = 32 }
   0xe   : > { %p229_p4 = scmp.lt.s32.totalorder %s4016_s12, 1  ;;  %v6267_v0 = vmov 0.0   ;;  %vm713_vm0 = vcmask 1043456   ;;  %vm568_vm1 = vcmask 31744  }
   0xf   : > { %784 = vmatprep.mubr.f32.mxu0 %v6267_v0  ;;  %1048 = vmatprep.mubr.f32.mxu1 %v6267_v0 }
  0x10   : > { %s6883_s12 = smov (!%p229_p4, %s4016_s12), 1 }
  0x11   : > { %s4074_s16 = smul.u32 12, %s6883_s12 }
  0x12   : > { %s3968_s23 = smul.u32 3, %s6883_s12 }
  0x13   : > { %s4080_s19 = scalar_lea.vmem %s6263_s0, %s4074_s16  ;;  %s242_s22 = scalar_lea.vmem %s6264_s1, %s4074_s16 }
  0x14   : > { %v461_v1 = vld [vmem:[%s4080_s19 + $0x8] sm:$0xf]  ;;  %v460_v2 = vld [vmem:[%s4080_s19] sm:$0xff]  ;;  %s251_s26 = scalar_lea.vmem %s6265_s2, %s3968_s23  ;;  %s261_s29 = scalar_lea.vmem %s6266_s3, %s4074_s16 }
  0x15   : > { %v462_v3 = vld [vmem:[%s242_s22] sm:$0xff]  ;;  %533 = vxpose.xlu1.b32.start.end [1/1] (short) %v461_v1, 128  ;;  %469 = vxpose.xlu0.b32.start.end [1/1] (short) %v460_v2, 128  ;;  %v467_v5 = vcombine.high %v460_v2, %v460_v2  ;;  %v463_v6 = vld [vmem:[%s242_s22 + $0x8] sm:$0xf] }
  0x16   : > { %v567_v4 = vcombine.high %v462_v3, %v462_v3 }
  0x18   : > { %3212 = vmatprep.subr.msk.mxu0 %vm713_vm0, %v567_v4  ;;  %3963 = vmatprep.subr.msk.mxu1 %vm713_vm0, %v567_v4 }
  0x19   : > { %3213 = vmatpush1.msk.msra.mxu0 %vm713_vm0, %v462_v3  ;;  %3964 = vmatpush1.msk.msra.mxu1 %vm713_vm0, %v462_v3 }
  0x1a   : > { %3702 = vmatprep.subr.msk.mxu1 %vm713_vm0, %v463_v6 }
  0x52   : > { %501 = vxpose.xlu0.b32.start.end [1/1] (short) %v467_v5, 128 }
  0x95   : > { %v4093_v7 = vpop.trf.xlu1  ;;  %v4095_v8 = vpop.trf.xlu0 }
  0x96   : > { %3214 = vmatmul.mubr.msk.f32.vlgmr.msra.gmra.mrb[0].mxu0 %vm568_vm1, %v4095_v8 }
  0x97   : > { %790 = vmatprep.mubr.f32.mxu0 %v6267_v0 }
  0x99   : > { %v4100_v9 = vpop.trf.xlu1  ;;  %v4102_v10 = vpop.trf.xlu0 }
  0x9a   : > { %3215 = vmatmul.mubr.msk.f32.gmra.mrb[2].mxu0 %vm568_vm1, %v4102_v10 }
  0x9b   : > { %796 = vmatprep.mubr.f32.mxu0 %v6267_v0 }
  0x9d   : > { %v4107_v11 = vpop.trf.xlu1  ;;  %v4109_v12 = vpop.trf.xlu0 }
  0x9e   : > { %3216 = vmatmul.mubr.msk.f32.gmra.mrb[4].mxu0 %vm568_vm1, %v4109_v12 }
  0x9f   : > { %802 = vmatprep.mubr.f32.mxu0 %v6267_v0 }
  0xa1   : > { %v4114_v13 = vpop.trf.xlu1  ;;  %v4116_v14 = vpop.trf.xlu0 }
  0xa2   : > { %3217 = vmatmul.mubr.msk.f32.gmra.mrb[6].mxu0 %vm568_vm1, %v4116_v14 }
  0xa3   : > { %808 = vmatprep.mubr.f32.mxu0 %v6267_v0 }
  0xa5   : > { %v4121_v15 = vpop.trf.xlu1  ;;  %v4123_v16 = vpop.trf.xlu0 }
  0xa6   : > { %3218 = vmatmul.mubr.msk.f32.gmra.mrb[8].mxu0 %vm568_vm1, %v4123_v16 }
  0xa7   : > { %814 = vmatprep.mubr.f32.mxu0 %v6267_v0 }
  0xa9   : > { %v4128_v17 = vpop.trf.xlu1  ;;  %v4130_v18 = vpop.trf.xlu0 }
  0xaa   : > { %3219 = vmatmul.mubr.msk.f32.gmra.mrb[10].mxu0 %vm568_vm1, %v4130_v18 }
  0xab   : > { %820 = vmatprep.mubr.f32.mxu0 %v6267_v0 }
  0xad   : > { %v4135_v19 = vpop.trf.xlu1  ;;  %v491_v20 = vpop.trf.xlu0 }
  0xae   : > { %3220 = vmatmul.mubr.msk.f32.gmra.mrb[12].mxu0 %vm568_vm1, %v491_v20 }
  0xaf   : > { %826 = vmatprep.mubr.f32.mxu0 %v6267_v0 }
  0xb1   : > { %v4139_v21 = vpop.trf.xlu1  ;;  %v492_v22 = vpop.trf.xlu0 }
  0xb2   : > { %3221 = vmatmul.mubr.msk.f32.gmra.mrb[14].mxu0 %vm568_vm1, %v492_v22 }
  0xb3   : > { %832 = vmatprep.mubr.f32.mxu0 %v6267_v0 }
  0xb5   : > { %v4143_v23 = vpop.trf.xlu1  ;;  %v493_v24 = vpop.trf.xlu0 }
  0xb6   : > { %3222 = vmatmul.mubr.msk.f32.gmra.mrb[16].mxu0 %vm568_vm1, %v493_v24 }
  0xb7   : > { %838 = vmatprep.mubr.f32.mxu0 %v6267_v0 }
  0xb9   : > { %v4147_v25 = vpop.trf.xlu1  ;;  %v494_v26 = vpop.trf.xlu0 }
  0xba   : > { %3223 = vmatmul.mubr.msk.f32.gmra.mrb[18].mxu0 %vm568_vm1, %v494_v26 }
  0xbb   : > { %844 = vmatprep.mubr.f32.mxu0 %v6267_v0 }
  0xbd   : > { %v4151_v27 = vpop.trf.xlu1  ;;  %v495_v28 = vpop.trf.xlu0 }
  0xbe   : > { %3224 = vmatmul.mubr.msk.f32.gmra.mrb[20].mxu0 %vm568_vm1, %v495_v28 }
  0xbf   : > { %850 = vmatprep.mubr.f32.mxu0 %v6267_v0 }
  0xc1   : > { %v4155_v29 = vpop.trf.xlu1  ;;  %v496_v30 = vpop.trf.xlu0 }
  0xc2   : > { %3225 = vmatmul.mubr.msk.f32.gmra.mrb[22].mxu0 %vm568_vm1, %v496_v30 }
  0xc3   : > { %856 = vmatprep.mubr.f32.mxu0 %v6267_v0 }
  0xc5   : > { %v4159_v31 = vpop.trf.xlu1  ;;  %v497_v32 = vpop.trf.xlu0 }
  0xc6   : > { %3226 = vmatmul.mubr.msk.f32.gmra.mrb[24].mxu0 %vm568_vm1, %v497_v32  ;;  %3258 = vmatmul.mubr.msk.f32.vlgmr.msra.gmra.mrb[0].mxu1 %vm568_vm1, %v4159_v31 }
  0xc7   : > { %1054 = vmatprep.mubr.f32.mxu1 %v6267_v0  ;;  %862 = vmatprep.mubr.f32.mxu0 %v6267_v0 }
  0xc8   : > { %3703 = vmatpush3.msk.msra.mxu1 %vm713_vm0, %v463_v6 }
  0xc9   : > { %v4167_v33 = vpop.trf.xlu1  ;;  %v498_v34 = vpop.trf.xlu0 }
  0xca   : > { %3227 = vmatmul.mubr.msk.f32.gmra.mrb[26].mxu0 %vm568_vm1, %v498_v34  ;;  %3259 = vmatmul.mubr.msk.f32.gmra.mrb[2].mxu1 %vm568_vm1, %v4167_v33 }
  0xcb   : > { %1060 = vmatprep.mubr.f32.mxu1 %v6267_v0  ;;  %868 = vmatprep.mubr.f32.mxu0 %v6267_v0 }
  0xcd   : > { %v4174_v35 = vpop.trf.xlu1  ;;  %v499_v36 = vpop.trf.xlu0 }
  0xce   : > { %3228 = vmatmul.mubr.msk.f32.gmra.mrb[28].mxu0 %vm568_vm1, %v499_v36  ;;  %3260 = vmatmul.mubr.msk.f32.gmra.mrb[4].mxu1 %vm568_vm1, %v4174_v35 }
  0xcf   : > { %1066 = vmatprep.mubr.f32.mxu1 %v6267_v0  ;;  %874 = vmatprep.mubr.f32.mxu0 %v6267_v0 }
  0xd1   : > { %v4181_v37 = vpop.trf.xlu1  ;;  %v500_v38 = vpop.trf.xlu0 }
  0xd2   : > { %3229 = vmatmul.mubr.msk.f32.gmra.mrb[30].mxu0 %vm568_vm1, %v500_v38  ;;  %3261 = vmatmul.mubr.msk.f32.gmra.mrb[6].mxu1 %vm568_vm1, %v4181_v37 }
  0xd3   : > { %3704 = vmatprep.mubr.msk.f32.mxu1 %vm568_vm1, %v4095_v8  ;;  %880 = vmatprep.mubr.f32.mxu0 %v6267_v0 }
  0xd5   : > { %v517_v39 = vpop.trf.xlu0 }
  0xd6   : > { %3230 = vmatmul.mubr.msk.f32.gmra.mrb[32].mxu0 %vm568_vm1, %v517_v39  ;;  %3705 = vmatmul.mubr.msk.f32.vlgmr.msra.gmra.mrb[8].mxu1 %vm568_vm1, %v4102_v10 }
  0xd7   : > { %3707 = vmatprep.mubr.msk.f32.mxu1 %vm568_vm1, %v4109_v12  ;;  %886 = vmatprep.mubr.f32.mxu0 %v6267_v0 }
  0xd9   : > { %v518_v40 = vpop.trf.xlu0 }
  0xda   : > { %3231 = vmatmul.mubr.msk.f32.gmra.mrb[34].mxu0 %vm568_vm1, %v518_v40  ;;  %3708 = vmatmul.mubr.msk.f32.gmra.mrb[10].mxu1 %vm568_vm1, %v4116_v14 }
  0xdb   : > { %3710 = vmatprep.mubr.msk.f32.mxu1 %vm568_vm1, %v4123_v16  ;;  %892 = vmatprep.mubr.f32.mxu0 %v6267_v0 }
  0xdd   : > { %v519_v41 = vpop.trf.xlu0 }
  0xde   : > { %3232 = vmatmul.mubr.msk.f32.gmra.mrb[36].mxu0 %vm568_vm1, %v519_v41  ;;  %3711 = vmatmul.mubr.msk.f32.gmra.mrb[12].mxu1 %vm568_vm1, %v4130_v18 }
  0xdf   : > { %3713 = vmatprep.mubr.msk.f32.mxu1 %vm568_vm1, %v491_v20  ;;  %898 = vmatprep.mubr.f32.mxu0 %v6267_v0 }
  0xe1   : > { %v520_v42 = vpop.trf.xlu0 }
  0xe2   : > { %3233 = vmatmul.mubr.msk.f32.gmra.mrb[38].mxu0 %vm568_vm1, %v520_v42  ;;  %3714 = vmatmul.mubr.msk.f32.gmra.mrb[14].mxu1 %vm568_vm1, %v492_v22 }
  0xe3   : > { %3716 = vmatprep.mubr.msk.f32.mxu1 %vm568_vm1, %v493_v24  ;;  %904 = vmatprep.mubr.f32.mxu0 %v6267_v0 }
  0xe5   : > { %v521_v43 = vpop.trf.xlu0 }
  0xe6   : > { %3234 = vmatmul.mubr.msk.f32.gmra.mrb[40].mxu0 %vm568_vm1, %v521_v43  ;;  %3717 = vmatmul.mubr.msk.f32.gmra.mrb[16].mxu1 %vm568_vm1, %v494_v26 }
  0xe7   : > { %3719 = vmatprep.mubr.msk.f32.mxu1 %vm568_vm1, %v495_v28  ;;  %910 = vmatprep.mubr.f32.mxu0 %v6267_v0 }
  0xe9   : > { %v522_v44 = vpop.trf.xlu0 }
  0xea   : > { %3235 = vmatmul.mubr.msk.f32.gmra.mrb[42].mxu0 %vm568_vm1, %v522_v44  ;;  %3720 = vmatmul.mubr.msk.f32.gmra.mrb[18].mxu1 %vm568_vm1, %v496_v30 }
  0xeb   : > { %3722 = vmatprep.mubr.msk.f32.mxu1 %vm568_vm1, %v497_v32  ;;  %916 = vmatprep.mubr.f32.mxu0 %v6267_v0 }
  0xed   : > { %v523_v45 = vpop.trf.xlu0 }
  0xee   : > { %3236 = vmatmul.mubr.msk.f32.gmra.mrb[44].mxu0 %vm568_vm1, %v523_v45  ;;  %3723 = vmatmul.mubr.msk.f32.gmra.mrb[20].mxu1 %vm568_vm1, %v498_v34 }
  0xef   : > { %3725 = vmatprep.mubr.msk.f32.mxu1 %vm568_vm1, %v499_v36  ;;  %922 = vmatprep.mubr.f32.mxu0 %v6267_v0 }
  0xf1   : > { %v524_v46 = vpop.trf.xlu0 }
  0xf2   : > { %3237 = vmatmul.mubr.msk.f32.gmra.mrb[46].mxu0 %vm568_vm1, %v524_v46  ;;  %3726 = vmatmul.mubr.msk.f32.gmra.mrb[22].mxu1 %vm568_vm1, %v500_v38 }
  0xf3   : > { %3728 = vmatprep.mubr.msk.f32.mxu1 %vm568_vm1, %v517_v39  ;;  %928 = vmatprep.mubr.f32.mxu0 %v6267_v0 }
  0xf5   : > { %v525_v47 = vpop.trf.xlu0 }
  0xf6   : > { %3238 = vmatmul.mubr.msk.f32.gmra.mrb[48].mxu0 %vm568_vm1, %v525_v47  ;;  %3729 = vmatmul.mubr.msk.f32.gmra.mrb[24].mxu1 %vm568_vm1, %v518_v40 }
  0xf7   : > { %3731 = vmatprep.mubr.msk.f32.mxu1 %vm568_vm1, %v519_v41  ;;  %934 = vmatprep.mubr.f32.mxu0 %v6267_v0 }
  0xf9   : > { %v526_v48 = vpop.trf.xlu0 }
  0xfa   : > { %3239 = vmatmul.mubr.msk.f32.gmra.mrb[50].mxu0 %vm568_vm1, %v526_v48  ;;  %3732 = vmatmul.mubr.msk.f32.gmra.mrb[26].mxu1 %vm568_vm1, %v520_v42 }
  0xfb   : > { %3734 = vmatprep.mubr.msk.f32.mxu1 %vm568_vm1, %v521_v43  ;;  %940 = vmatprep.mubr.f32.mxu0 %v6267_v0 }
  0xfd   : > { %v527_v49 = vpop.trf.xlu0 }
  0xfe   : > { %3240 = vmatmul.mubr.msk.f32.gmra.mrb[52].mxu0 %vm568_vm1, %v527_v49  ;;  %3735 = vmatmul.mubr.msk.f32.gmra.mrb[28].mxu1 %vm568_vm1, %v522_v44 }
  0xff   : > { %3737 = vmatprep.mubr.msk.f32.mxu1 %vm568_vm1, %v523_v45  ;;  %946 = vmatprep.mubr.f32.mxu0 %v6267_v0 }
 0x101   : > { %v528_v50 = vpop.trf.xlu0 }
 0x102   : > { %3241 = vmatmul.mubr.msk.f32.gmra.mrb[54].mxu0 %vm568_vm1, %v528_v50  ;;  %3738 = vmatmul.mubr.msk.f32.gmra.mrb[30].mxu1 %vm568_vm1, %v524_v46 }
 0x103   : > { %3740 = vmatprep.mubr.msk.f32.mxu1 %vm568_vm1, %v525_v47  ;;  %952 = vmatprep.mubr.f32.mxu0 %v6267_v0 }
 0x105   : > { %v529_v51 = vpop.trf.xlu0 }
 0x106   : > { %3242 = vmatmul.mubr.msk.f32.gmra.mrb[56].mxu0 %vm568_vm1, %v529_v51  ;;  %3741 = vmatmul.mubr.msk.f32.gmra.mrb[32].mxu1 %vm568_vm1, %v526_v48 }
 0x107   : > { %3743 = vmatprep.mubr.msk.f32.mxu1 %vm568_vm1, %v527_v49  ;;  %958 = vmatprep.mubr.f32.mxu0 %v6267_v0 }
 0x109   : > { %v530_v52 = vpop.trf.xlu0 }
 0x10a   : > { %3243 = vmatmul.mubr.msk.f32.gmra.mrb[58].mxu0 %vm568_vm1, %v530_v52  ;;  %3744 = vmatmul.mubr.msk.f32.gmra.mrb[34].mxu1 %vm568_vm1, %v528_v50 }
 0x10b   : > { %3746 = vmatprep.mubr.msk.f32.mxu1 %vm568_vm1, %v529_v51  ;;  %964 = vmatprep.mubr.f32.mxu0 %v6267_v0 }
 0x10d   : > { %v531_v53 = vpop.trf.xlu0 }
 0x10e   : > { %3244 = vmatmul.mubr.msk.f32.gmra.mrb[60].mxu0 %vm568_vm1, %v531_v53  ;;  %3747 = vmatmul.mubr.msk.f32.gmra.mrb[36].mxu1 %vm568_vm1, %v530_v52 }
 0x10f   : > { %3749 = vmatprep.mubr.msk.f32.mxu1 %vm568_vm1, %v531_v53  ;;  %970 = vmatprep.mubr.f32.mxu0 %v6267_v0 }
 0x111   : > { %v532_v54 = vpop.trf.xlu0 }
 0x112   : > { %3245 = vmatmul.mubr.msk.f32.gmra.mrb[62].mxu0 %vm568_vm1, %v532_v54  ;;  %3750 = vmatmul.mubr.msk.f32.gmra.mrb[38].mxu1 %vm568_vm1, %v532_v54 }
 0x113   : > { %3752 = vmatprep.mubr.msk.f32.mxu1 %vm568_vm1, %v4093_v7  ;;  %976 = vmatprep.mubr.f32.mxu0 %v6267_v0 }
 0x116   : > { %3246 = vmatmul.mubr.msk.f32.gmra.mrb[64].mxu0 %vm568_vm1, %v4093_v7  ;;  %3753 = vmatmul.mubr.msk.f32.gmra.mrb[40].mxu1 %vm568_vm1, %v4100_v9 }
 0x117   : > { %3755 = vmatprep.mubr.msk.f32.mxu1 %vm568_vm1, %v4107_v11  ;;  %982 = vmatprep.mubr.f32.mxu0 %v6267_v0 }
 0x11a   : > { %3247 = vmatmul.mubr.msk.f32.gmra.mrb[66].mxu0 %vm568_vm1, %v4100_v9  ;;  %3756 = vmatmul.mubr.msk.f32.gmra.mrb[42].mxu1 %vm568_vm1, %v4114_v13 }
 0x11b   : > { %3758 = vmatprep.mubr.msk.f32.mxu1 %vm568_vm1, %v4121_v15  ;;  %988 = vmatprep.mubr.f32.mxu0 %v6267_v0 }
 0x11e   : > { %3248 = vmatmul.mubr.msk.f32.gmra.mrb[68].mxu0 %vm568_vm1, %v4107_v11  ;;  %3759 = vmatmul.mubr.msk.f32.gmra.mrb[44].mxu1 %vm568_vm1, %v4128_v17 }
 0x11f   : > { %3761 = vmatprep.mubr.msk.f32.mxu1 %vm568_vm1, %v4135_v19  ;;  %994 = vmatprep.mubr.f32.mxu0 %v6267_v0 }
 0x122   : > { %3249 = vmatmul.mubr.msk.f32.gmra.mrb[70].mxu0 %vm568_vm1, %v4114_v13  ;;  %3762 = vmatmul.mubr.msk.f32.gmra.mrb[46].mxu1 %vm568_vm1, %v4139_v21 }
 0x123   : > { %3764 = vmatprep.mubr.msk.f32.mxu1 %vm568_vm1, %v4143_v23  ;;  %1000 = vmatprep.mubr.f32.mxu0 %v6267_v0 }
 0x126   : > { %3250 = vmatmul.mubr.msk.f32.gmra.mrb[72].mxu0 %vm568_vm1, %v4121_v15  ;;  %3765 = vmatmul.mubr.msk.f32.gmra.mrb[48].mxu1 %vm568_vm1, %v4147_v25 }
 0x127   : > { %3767 = vmatprep.mubr.msk.f32.mxu1 %vm568_vm1, %v4151_v27  ;;  %1006 = vmatprep.mubr.f32.mxu0 %v6267_v0 }
 0x12a   : > { %3251 = vmatmul.mubr.msk.f32.gmra.mrb[74].mxu0 %vm568_vm1, %v4128_v17  ;;  %3768 = vmatmul.mubr.msk.f32.gmra.mrb[50].mxu1 %vm568_vm1, %v4155_v29 }
 0x12b   : > { %3770 = vmatprep.mubr.msk.f32.mxu1 %vm568_vm1, %v4159_v31  ;;  %1012 = vmatprep.mubr.f32.mxu0 %v6267_v0 }
 0x12e   : > { %3252 = vmatmul.mubr.msk.f32.gmra.mrb[76].mxu0 %vm568_vm1, %v4135_v19  ;;  %3771 = vmatmul.mubr.msk.f32.gmra.mrb[52].mxu1 %vm568_vm1, %v4167_v33 }
 0x12f   : > { %3773 = vmatprep.mubr.msk.f32.mxu1 %vm568_vm1, %v4174_v35  ;;  %1018 = vmatprep.mubr.f32.mxu0 %v6267_v0 }
 0x132   : > { %3253 = vmatmul.mubr.msk.f32.gmra.mrb[78].mxu0 %vm568_vm1, %v4139_v21  ;;  %3774 = vmatmul.mubr.msk.f32.gmra.mrb[54].mxu1 %vm568_vm1, %v4181_v37 }
 0x133   : > { %1024 = vmatprep.mubr.f32.mxu0 %v6267_v0 }
 0x136   : > { %3254 = vmatmul.mubr.msk.f32.gmra.mrb[80].mxu0 %vm568_vm1, %v4143_v23 }
 0x137   : > { %1030 = vmatprep.mubr.f32.mxu0 %v6267_v0 }
 0x13a   : > { %3255 = vmatmul.mubr.msk.f32.gmra.mrb[82].mxu0 %vm568_vm1, %v4147_v25 }
 0x13b   : > { %1036 = vmatprep.mubr.f32.mxu0 %v6267_v0 }
 0x13e   : > { %3256 = vmatmul.mubr.msk.f32.gmra.mrb[84].mxu0 %vm568_vm1, %v4151_v27 }
 0x13f   : > { %1042 = vmatprep.mubr.f32.mxu0 %v6267_v0 }
 0x142   : > { %3257 = vmatmul.mubr.msk.f32.gmra.mrb[86].mxu0 %vm568_vm1, %v4155_v29 }
 0x169   : > { %v4324_v55 = vpop.f32.mrb[0].mxu0 }
 0x16a   : > { %6528 = vst [vmem:[#allocation3_spill] sm:$0xff] %v4324_v55  ;;  %v4326_v56 = vpop.f32.mrb[1].mxu0 }
 0x16b   : > { %6529 = vst [vmem:[#allocation4_spill] sm:$0xff] %v4326_v56 }
 0x16d   : > { %v4328_v57 = vpop.f32.mrb[2].mxu0 }
 0x16e   : > { %6530 = vst [vmem:[#allocation5_spill] sm:$0xff] %v4328_v57  ;;  %v4330_v58 = vpop.f32.mrb[3].mxu0 }
 0x16f   : > { %6531 = vst [vmem:[#allocation6_spill] sm:$0xff] %v4330_v58 }
 0x171   : > { %v4332_v59 = vpop.f32.mrb[4].mxu0 }
 0x172   : > { %6532 = vst [vmem:[#allocation7_spill] sm:$0xff] %v4332_v59  ;;  %v1378_v60 = vmax.f32 %v4324_v55, %v4332_v59  ;;  %v4336_v61 = vpop.f32.mrb[5].mxu0 }
 0x173   : > { %6533 = vst [vmem:[#allocation8_spill] sm:$0xff] %v4336_v61  ;;  %v1431_v62 = vmax.f32 %v4326_v56, %v4336_v61 }
 0x175   : > { %v4340_v63 = vpop.f32.mrb[6].mxu0 }
 0x176   : > { %6534 = vst [vmem:[#allocation9_spill] sm:$0xff] %v4340_v63  ;;  %v1379_v1 = vmax.f32 %v4328_v57, %v4340_v63  ;;  %v4344_v2 = vpop.f32.mrb[7].mxu0 }
 0x177   : > { %6535 = vst [vmem:[#allocation10_spill] sm:$0xff] %v4344_v2  ;;  %v1432_v3 = vmax.f32 %v4330_v58, %v4344_v2 }
 0x179   : > { %v4348_v4 = vpop.f32.mrb[8].mxu0 }
 0x17a   : > { %6536 = vst [vmem:[#allocation11_spill] sm:$0xff] %v4348_v4  ;;  %v1380_v5 = vmax.f32 %v1378_v60, %v4348_v4  ;;  %v4351_v6 = vpop.f32.mrb[9].mxu0 }
 0x17b   : > { %6537 = vst [vmem:[#allocation12_spill] sm:$0xff] %v4351_v6  ;;  %v1433_v7 = vmax.f32 %v1431_v62, %v4351_v6 }
 0x17d   : > { %v4354_v8 = vpop.f32.mrb[10].mxu0 }
 0x17e   : > { %6538 = vst [vmem:[#allocation13_spill] sm:$0xff] %v4354_v8  ;;  %v1381_v9 = vmax.f32 %v1379_v1, %v4354_v8  ;;  %v4357_v10 = vpop.f32.mrb[11].mxu0 }
 0x17f   : > { %6539 = vst [vmem:[#allocation14_spill] sm:$0xff] %v4357_v10  ;;  %v1434_v11 = vmax.f32 %v1432_v3, %v4357_v10 }
 0x181   : > { %v4360_v12 = vpop.f32.mrb[12].mxu0 }
 0x182   : > { %6540 = vst [vmem:[#allocation15_spill] sm:$0xff] %v4360_v12  ;;  %v1382_v13 = vmax.f32 %v1380_v5, %v4360_v12  ;;  %v4363_v14 = vpop.f32.mrb[13].mxu0 }
 0x183   : > { %6541 = vst [vmem:[#allocation16_spill] sm:$0xff] %v4363_v14  ;;  %v1435_v15 = vmax.f32 %v1433_v7, %v4363_v14 }
 0x185   : > { %v4366_v16 = vpop.f32.mrb[14].mxu0 }
 0x186   : > { %6542 = vst [vmem:[#allocation17_spill] sm:$0xff] %v4366_v16  ;;  %v1383_v17 = vmax.f32 %v1381_v9, %v4366_v16  ;;  %v4369_v18 = vpop.f32.mrb[15].mxu0 }
 0x187   : > { %6543 = vst [vmem:[#allocation18_spill] sm:$0xff] %v4369_v18  ;;  %v1436_v19 = vmax.f32 %v1434_v11, %v4369_v18 }
 0x189   : > { %v4372_v20 = vpop.f32.mrb[16].mxu0 }
 0x18a   : > { %6544 = vst [vmem:[#allocation19_spill] sm:$0xff] %v4372_v20  ;;  %v1384_v21 = vmax.f32 %v1382_v13, %v4372_v20  ;;  %v4375_v22 = vpop.f32.mrb[17].mxu0 }
 0x18b   : > { %6545 = vst [vmem:[#allocation20_spill] sm:$0xff] %v4375_v22  ;;  %v1437_v23 = vmax.f32 %v1435_v15, %v4375_v22 }
 0x18d   : > { %v4378_v24 = vpop.f32.mrb[18].mxu0 }
 0x18e   : > { %6546 = vst [vmem:[#allocation21_spill] sm:$0xff] %v4378_v24  ;;  %v1385_v25 = vmax.f32 %v1383_v17, %v4378_v24  ;;  %v4381_v26 = vpop.f32.mrb[19].mxu0 }
 0x18f   : > { %6547 = vst [vmem:[#allocation22_spill] sm:$0xff] %v4381_v26  ;;  %v1438_v27 = vmax.f32 %v1436_v19, %v4381_v26 }
 0x191   : > { %v4384_v28 = vpop.f32.mrb[20].mxu0 }
 0x192   : > { %6548 = vst [vmem:[#allocation23_spill] sm:$0xff] %v4384_v28  ;;  %v1386_v29 = vmax.f32 %v1384_v21, %v4384_v28  ;;  %v4387_v30 = vpop.f32.mrb[21].mxu0 }
 0x193   : > { %6549 = vst [vmem:[#allocation24_spill] sm:$0xff] %v4387_v30  ;;  %v1439_v31 = vmax.f32 %v1437_v23, %v4387_v30 }
 0x195   : > { %v4390_v32 = vpop.f32.mrb[22].mxu0 }
 0x196   : > { %6550 = vst [vmem:[#allocation25_spill] sm:$0xff] %v4390_v32  ;;  %v1387_v33 = vmax.f32 %v1385_v25, %v4390_v32  ;;  %v4393_v34 = vpop.f32.mrb[23].mxu0 }
 0x197   : > { %6551 = vst [vmem:[#allocation26_spill] sm:$0xff] %v4393_v34  ;;  %v1440_v35 = vmax.f32 %v1438_v27, %v4393_v34 }
 0x199   : > { %v4396_v36 = vpop.f32.mrb[24].mxu0  ;;  %v4398_v37 = vpop.f32.mrb[0].mxu1 }
 0x19a   : > { %6552 = vst [vmem:[#allocation27_spill] sm:$0xff] %v4396_v36  ;;  %6553 = vst [vmem:[#allocation28_spill] sm:$0xff] %v4398_v37  ;;  %v1388_v38 = vmax.f32 %v1386_v29, %v4396_v36  ;;  %v4401_v39 = vpop.f32.mrb[25].mxu0  ;;  %v4403_v40 = vpop.f32.mrb[1].mxu1 }
 0x19b   : > { %6554 = vst [vmem:[#allocation29_spill] sm:$0xff] %v4401_v39  ;;  %6555 = vst [vmem:[#allocation30_spill] sm:$0xff] %v4403_v40  ;;  %v1441_v41 = vmax.f32 %v1439_v31, %v4401_v39 }
 0x19d   : > { %v4406_v42 = vpop.f32.mrb[26].mxu0  ;;  %v4408_v43 = vpop.f32.mrb[2].mxu1 }
 0x19e   : > { %6556 = vst [vmem:[#allocation31_spill] sm:$0xff] %v4406_v42  ;;  %6557 = vst [vmem:[#allocation32_spill] sm:$0xff] %v4408_v43  ;;  %v1389_v44 = vmax.f32 %v1387_v33, %v4406_v42  ;;  %v4411_v45 = vpop.f32.mrb[27].mxu0  ;;  %v4413_v46 = vpop.f32.mrb[3].mxu1 }
 0x19f   : > { %6558 = vst [vmem:[#allocation33_spill] sm:$0xff] %v4411_v45  ;;  %6559 = vst [vmem:[#allocation34_spill] sm:$0xff] %v4413_v46  ;;  %v1442_v47 = vmax.f32 %v1440_v35, %v4411_v45  ;;  %v1469_v48 = vmax.f32 %v4413_v46, %v4403_v40 }
 0x1a1   : > { %v4418_v49 = vpop.f32.mrb[28].mxu0  ;;  %v4420_v50 = vpop.f32.mrb[4].mxu1 }
 0x1a2   : > { %6560 = vst [vmem:[#allocation35_spill] sm:$0xff] %v4418_v49  ;;  %v1390_v51 = vmax.f32 %v1388_v38, %v4418_v49  ;;  %v4423_v52 = vpop.f32.mrb[29].mxu0  ;;  %v4425_v53 = vpop.f32.mrb[5].mxu1 }
 0x1a3   : > { %6561 = vst [vmem:[#allocation36_spill] sm:$0xff] %v4423_v52  ;;  %6562 = vst [vmem:[#allocation37_spill] sm:$0xff] %v4425_v53  ;;  %v1443_v54 = vmax.f32 %v1441_v41, %v4423_v52  ;;  %v4429_v60 = vmax.f32 %v4425_v53, %v1469_v48 }
 0x1a5   : > { %v4431_v62 = vpop.f32.mrb[30].mxu0  ;;  %v4433_v1 = vpop.f32.mrb[6].mxu1 }
 0x1a6   : > { %6563 = vst [vmem:[#allocation38_spill] sm:$0xff] %v4431_v62  ;;  %6564 = vst [vmem:[#allocation39_spill] sm:$0xff] %v4433_v1  ;;  %v1391_v3 = vmax.f32 %v1389_v44, %v4431_v62  ;;  %v4436_v5 = vpop.f32.mrb[31].mxu0  ;;  %v4438_v7 = vpop.f32.mrb[7].mxu1 }
 0x1a7   : > { %6565 = vst [vmem:[#allocation40_spill] sm:$0xff] %v4436_v5  ;;  %6566 = vst [vmem:[#allocation41_spill] sm:$0xff] %v4438_v7  ;;  %v1444_v9 = vmax.f32 %v1442_v47, %v4436_v5 }
 0x1a9   : > { %v4443_v13 = vpop.f32.mrb[32].mxu0  ;;  %v4445_v15 = vpop.f32.mrb[8].mxu1 }
 0x1aa   : > { %6567 = vst [vmem:[#allocation42_spill] sm:$0xff] %v4443_v13  ;;  %v1392_v17 = vmax.f32 %v1390_v51, %v4443_v13  ;;  %v4448_v19 = vpop.f32.mrb[33].mxu0  ;;  %v4450_v21 = vpop.f32.mrb[9].mxu1 }
 0x1ab   : > { %6568 = vst [vmem:[#allocation43_spill] sm:$0xff] %v4448_v19  ;;  %v1445_v23 = vmax.f32 %v1443_v54, %v4448_v19 }
 0x1ad   : > { %v4453_v25 = vpop.f32.mrb[34].mxu0  ;;  %v4455_v27 = vpop.f32.mrb[10].mxu1 }
 0x1ae   : > { %6569 = vst [vmem:[#allocation44_spill] sm:$0xff] %v4453_v25  ;;  %v1393_v29 = vmax.f32 %v1391_v3, %v4453_v25  ;;  %v1485_v31 = vmax.f32 %v4445_v15, %v4455_v27  ;;  %v4460_v33 = vpop.f32.mrb[35].mxu0  ;;  %v4462_v35 = vpop.f32.mrb[11].mxu1 }
 0x1af   : > { %6570 = vst [vmem:[#allocation45_spill] sm:$0xff] %v4460_v33  ;;  %v1446_v38 = vmax.f32 %v1444_v9, %v4460_v33  ;;  %v1484_v41 = vmax.f32 %v4450_v21, %v4462_v35 }
 0x1b1   : > { %v4467_v44 = vpop.f32.mrb[36].mxu0  ;;  %v4469_v47 = vpop.f32.mrb[12].mxu1 }
 0x1b2   : > { %6571 = vst [vmem:[#allocation46_spill] sm:$0xff] %v4467_v44  ;;  %v1394_v48 = vmax.f32 %v1392_v17, %v4467_v44  ;;  %v1487_v51 = vmax.f32 %v1485_v31, %v4469_v47  ;;  %v4473_v54 = vpop.f32.mrb[37].mxu0  ;;  %v4475_v3 = vpop.f32.mrb[13].mxu1 }
 0x1b3   : > { %6572 = vst [vmem:[#allocation47_spill] sm:$0xff] %v4473_v54  ;;  %v1447_v0 = vmax.f32 %v1445_v23, %v4473_v54  ;;  %v1486_v11 = vmax.f32 %v1484_v41, %v4475_v3 }
 0x1b5   : > { %v4479_v9 = vpop.f32.mrb[38].mxu0  ;;  %v4481_v53 = vpop.f32.mrb[14].mxu1 }
 0x1b6   : > { %6573 = vst [vmem:[#allocation48_spill] sm:$0xff] %v4479_v9  ;;  %v1395_v46 = vmax.f32 %v1393_v29, %v4479_v9  ;;  %v1489_v40 = vmax.f32 %v1487_v51, %v4481_v53  ;;  %v4485_v33 = vpop.f32.mrb[39].mxu0  ;;  %v4487_v17 = vpop.f32.mrb[15].mxu1 }
 0x1b7   : > { %6574 = vst [vmem:[#allocation49_spill] sm:$0xff] %v4485_v33  ;;  %v1448_v31 = vmax.f32 %v1446_v38, %v4485_v33  ;;  %v1488_v19 = vmax.f32 %v1486_v11, %v4487_v17 }
 0x1b9   : > { %v4491_v5 = vpop.f32.mrb[40].mxu0  ;;  %v4493_v23 = vpop.f32.mrb[16].mxu1 }
 0x1ba   : > { %6575 = vst [vmem:[#allocation50_spill] sm:$0xff] %v4491_v5  ;;  %v1396_v41 = vmax.f32 %v1394_v48, %v4491_v5  ;;  %v1491_v54 = vmax.f32 %v1489_v40, %v4493_v23  ;;  %v4497_v52 = vpop.f32.mrb[41].mxu0  ;;  %v4499_v29 = vpop.f32.mrb[17].mxu1 }
 0x1bb   : > { %6576 = vst [vmem:[#allocation51_spill] sm:$0xff] %v4497_v52  ;;  %v1449_v51 = vmax.f32 %v1447_v0, %v4497_v52  ;;  %v1490_v45 = vmax.f32 %v1488_v19, %v4499_v29 }
 0x1bd   : > { %v4503_v39 = vpop.f32.mrb[42].mxu0  ;;  %v4505_v38 = vpop.f32.mrb[18].mxu1 }
 0x1be   : > { %6577 = vst [vmem:[#allocation52_spill] sm:$0xff] %v4503_v39  ;;  %v1397_v11 = vmax.f32 %v1395_v46, %v4503_v39  ;;  %v1493_v33 = vmax.f32 %v1491_v54, %v4505_v38  ;;  %v4509_v34 = vpop.f32.mrb[43].mxu0  ;;  %v4511_v48 = vpop.f32.mrb[19].mxu1 }
 0x1bf   : > { %6578 = vst [vmem:[#allocation53_spill] sm:$0xff] %v4509_v34  ;;  %v1450_v40 = vmax.f32 %v1448_v31, %v4509_v34  ;;  %v1492_v30 = vmax.f32 %v1490_v45, %v4511_v48 }
 0x1c1   : > { %v4515_v26 = vpop.f32.mrb[44].mxu0  ;;  %v4517_v0 = vpop.f32.mrb[20].mxu1 }
 0x1c2   : > { %6579 = vst [vmem:[#allocation54_spill] sm:$0xff] %v4515_v26  ;;  %v1398_v19 = vmax.f32 %v1396_v41, %v4515_v26  ;;  %v1495_v52 = vmax.f32 %v1493_v33, %v4517_v0  ;;  %v4521_v22 = vpop.f32.mrb[45].mxu0  ;;  %v4523_v46 = vpop.f32.mrb[21].mxu1 }
 0x1c3   : > { %6580 = vst [vmem:[#allocation55_spill] sm:$0xff] %v4521_v22  ;;  %v1451_v54 = vmax.f32 %v1449_v51, %v4521_v22  ;;  %v1494_v18 = vmax.f32 %v1492_v30, %v4523_v46 }
 0x1c5   : > { %v4527_v14 = vpop.f32.mrb[46].mxu0  ;;  %v4529_v31 = vpop.f32.mrb[22].mxu1 }
 0x1c6   : > { %6581 = vst [vmem:[#allocation56_spill] sm:$0xff] %v4527_v14  ;;  %v1399_v45 = vmax.f32 %v1397_v11, %v4527_v14  ;;  %v1497_v34 = vmax.f32 %v1495_v52, %v4529_v31  ;;  %v4533_v10 = vpop.f32.mrb[47].mxu0  ;;  %v4535_v41 = vpop.f32.mrb[23].mxu1 }
 0x1c7   : > { %6582 = vst [vmem:[#allocation57_spill] sm:$0xff] %v4533_v10  ;;  %v1452_v33 = vmax.f32 %v1450_v40, %v4533_v10  ;;  %v1496_v6 = vmax.f32 %v1494_v18, %v4535_v41 }
 0x1c9   : > { %v4539_v2 = vpop.f32.mrb[48].mxu0  ;;  %v4541_v51 = vpop.f32.mrb[24].mxu1 }
 0x1ca   : > { %6583 = vst [vmem:[#allocation58_spill] sm:$0xff] %v4539_v2  ;;  %v1400_v30 = vmax.f32 %v1398_v19, %v4539_v2  ;;  %v1499_v22 = vmax.f32 %v1497_v34, %v4541_v51  ;;  %v4545_v58 = vpop.f32.mrb[49].mxu0  ;;  %v4547_v11 = vpop.f32.mrb[25].mxu1 }
 0x1cb   : > { %6584 = vst [vmem:[#allocation59_spill] sm:$0xff] %v4545_v58  ;;  %v1453_v52 = vmax.f32 %v1451_v54, %v4545_v58  ;;  %v1498_v61 = vmax.f32 %v1496_v6, %v4547_v11 }
 0x1cd   : > { %v4551_v56 = vpop.f32.mrb[50].mxu0  ;;  %v4553_v40 = vpop.f32.mrb[26].mxu1 }
 0x1ce   : > { %6585 = vst [vmem:[#allocation60_spill] sm:$0xff] %v4551_v56  ;;  %v1401_v18 = vmax.f32 %v1399_v45, %v4551_v56  ;;  %v1501_v10 = vmax.f32 %v1499_v22, %v4553_v40  ;;  %v4557_v14 = vpop.f32.mrb[51].mxu0  ;;  %v4559_v19 = vpop.f32.mrb[27].mxu1 }
 0x1cf   : > { %6586 = vst [vmem:[#allocation61_spill] sm:$0xff] %v4557_v14  ;;  %v1454_v34 = vmax.f32 %v1452_v33, %v4557_v14  ;;  %v1500_v2 = vmax.f32 %v1498_v61, %v4559_v19 }
 0x1d1   : > { %v4563_v26 = vpop.f32.mrb[52].mxu0  ;;  %v4565_v54 = vpop.f32.mrb[28].mxu1 }
 0x1d2   : > { %6587 = vst [vmem:[#allocation62_spill] sm:$0xff] %v4563_v26  ;;  %v1402_v6 = vmax.f32 %v1400_v30, %v4563_v26  ;;  %v1503_v58 = vmax.f32 %v1501_v10, %v4565_v54  ;;  %v4569_v39 = vpop.f32.mrb[53].mxu0  ;;  %v4571_v45 = vpop.f32.mrb[29].mxu1 }
 0x1d3   : > { %6588 = vst [vmem:[#allocation63_spill] sm:$0xff] %v4569_v39  ;;  %v1455_v22 = vmax.f32 %v1453_v52, %v4569_v39  ;;  %v1502_v56 = vmax.f32 %v1500_v2, %v4571_v45 }
 0x1d5   : > { %v4575_v5 = vpop.f32.mrb[54].mxu0  ;;  %v4577_v33 = vpop.f32.mrb[30].mxu1 }
 0x1d6   : > { %6589 = vst [vmem:[#allocation64_spill] sm:$0xff] %v4575_v5  ;;  %v1403_v61 = vmax.f32 %v1401_v18, %v4575_v5  ;;  %v1505_v14 = vmax.f32 %v1503_v58, %v4577_v33  ;;  %v4581_v9 = vpop.f32.mrb[55].mxu0  ;;  %v4583_v30 = vpop.f32.mrb[31].mxu1 }
 0x1d7   : > { %6590 = vst [vmem:[#allocation65_spill] sm:$0xff] %v4581_v9  ;;  %v1456_v10 = vmax.f32 %v1454_v34, %v4581_v9  ;;  %v1504_v26 = vmax.f32 %v1502_v56, %v4583_v30 }
 0x1d9   : > { %v4587_v44 = vpop.f32.mrb[56].mxu0  ;;  %v4589_v52 = vpop.f32.mrb[32].mxu1 }
 0x1da   : > { %6591 = vst [vmem:[#allocation66_spill] sm:$0xff] %v4587_v44  ;;  %v1404_v2 = vmax.f32 %v1402_v6, %v4587_v44  ;;  %v1507_v39 = vmax.f32 %v1505_v14, %v4589_v52  ;;  %v4593_v25 = vpop.f32.mrb[57].mxu0  ;;  %v4595_v18 = vpop.f32.mrb[33].mxu1 }
 0x1db   : > { %6592 = vst [vmem:[#allocation67_spill] sm:$0xff] %v4593_v25  ;;  %v1457_v58 = vmax.f32 %v1455_v22, %v4593_v25  ;;  %v1506_v5 = vmax.f32 %v1504_v26, %v4595_v18 }
 0x1dd   : > { %v4599_v13 = vpop.f32.mrb[58].mxu0  ;;  %v4601_v34 = vpop.f32.mrb[34].mxu1 }
 0x1de   : > { %6593 = vst [vmem:[#allocation68_spill] sm:$0xff] %v4599_v13  ;;  %v1405_v56 = vmax.f32 %v1403_v61, %v4599_v13  ;;  %v1509_v9 = vmax.f32 %v1507_v39, %v4601_v34  ;;  %v4605_v62 = vpop.f32.mrb[59].mxu0  ;;  %v4607_v6 = vpop.f32.mrb[35].mxu1 }
 0x1df   : > { %6594 = vst [vmem:[#allocation69_spill] sm:$0xff] %v4605_v62  ;;  %v1458_v14 = vmax.f32 %v1456_v10, %v4605_v62  ;;  %v1508_v44 = vmax.f32 %v1506_v5, %v4607_v6 }
 0x1e1   : > { %v4611_v49 = vpop.f32.mrb[60].mxu0  ;;  %v4613_v22 = vpop.f32.mrb[36].mxu1 }
 0x1e2   : > { %6595 = vst [vmem:[#allocation70_spill] sm:$0xff] %v4611_v49  ;;  %v1406_v26 = vmax.f32 %v1404_v2, %v4611_v49  ;;  %v1511_v25 = vmax.f32 %v1509_v9, %v4613_v22  ;;  %v4617_v42 = vpop.f32.mrb[61].mxu0  ;;  %v4619_v61 = vpop.f32.mrb[37].mxu1 }
 0x1e3   : > { %6596 = vst [vmem:[#allocation71_spill] sm:$0xff] %v4617_v42  ;;  %v1459_v39 = vmax.f32 %v1457_v58, %v4617_v42  ;;  %v1510_v13 = vmax.f32 %v1508_v44, %v4619_v61 }
 0x1e5   : > { %v4623_v36 = vpop.f32.mrb[62].mxu0  ;;  %v4625_v10 = vpop.f32.mrb[38].mxu1 }
 0x1e6   : > { %6597 = vst [vmem:[#allocation72_spill] sm:$0xff] %v4623_v36  ;;  %v1407_v5 = vmax.f32 %v1405_v56, %v4623_v36  ;;  %v1513_v62 = vmax.f32 %v1511_v25, %v4625_v10  ;;  %v4629_v32 = vpop.f32.mrb[63].mxu0  ;;  %v4631_v2 = vpop.f32.mrb[39].mxu1 }
 0x1e7   : > { %6598 = vst [vmem:[#allocation73_spill] sm:$0xff] %v4629_v32  ;;  %v1460_v9 = vmax.f32 %v1458_v14, %v4629_v32  ;;  %v1512_v49 = vmax.f32 %v1510_v13, %v4631_v2 }
 0x1e9   : > { %v4635_v28 = vpop.f32.mrb[64].mxu0  ;;  %v4637_v58 = vpop.f32.mrb[40].mxu1 }
 0x1ea   : > { %6599 = vst [vmem:[#allocation74_spill] sm:$0xff] %v4635_v28  ;;  %v1408_v44 = vmax.f32 %v1406_v26, %v4635_v28  ;;  %v1515_v42 = vmax.f32 %v1513_v62, %v4637_v58  ;;  %v4641_v24 = vpop.f32.mrb[65].mxu0  ;;  %v4643_v56 = vpop.f32.mrb[41].mxu1 }
 0x1eb   : > { %6600 = vst [vmem:[#allocation75_spill] sm:$0xff] %v4641_v24  ;;  %v1461_v25 = vmax.f32 %v1459_v39, %v4641_v24  ;;  %v1514_v36 = vmax.f32 %v1512_v49, %v4643_v56 }
 0x1ed   : > { %v4647_v20 = vpop.f32.mrb[66].mxu0  ;;  %v4649_v14 = vpop.f32.mrb[42].mxu1 }
 0x1ee   : > { %6601 = vst [vmem:[#allocation76_spill] sm:$0xff] %v4647_v20  ;;  %v1409_v13 = vmax.f32 %v1407_v5, %v4647_v20  ;;  %v1517_v32 = vmax.f32 %v1515_v42, %v4649_v14  ;;  %v4653_v16 = vpop.f32.mrb[67].mxu0  ;;  %v4655_v26 = vpop.f32.mrb[43].mxu1 }
 0x1ef   : > { %6602 = vst [vmem:[#allocation77_spill] sm:$0xff] %v4653_v16  ;;  %v1462_v62 = vmax.f32 %v1460_v9, %v4653_v16  ;;  %v1516_v28 = vmax.f32 %v1514_v36, %v4655_v26 }
 0x1f1   : > { %v4659_v12 = vpop.f32.mrb[68].mxu0  ;;  %v4661_v39 = vpop.f32.mrb[44].mxu1 }
 0x1f2   : > { %6603 = vst [vmem:[#allocation78_spill] sm:$0xff] %v4659_v12  ;;  %6604 = vst [vmem:[#allocation79_spill] sm:$0xff] %v4661_v39  ;;  %v1410_v49 = vmax.f32 %v1408_v44, %v4659_v12  ;;  %v1519_v24 = vmax.f32 %v1517_v32, %v4661_v39  ;;  %v4665_v8 = vpop.f32.mrb[69].mxu0  ;;  %v4667_v5 = vpop.f32.mrb[45].mxu1 }
 0x1f3   : > { %6605 = vst [vmem:[#allocation80_spill] sm:$0xff] %v4665_v8  ;;  %6606 = vst [vmem:[#allocation81_spill] sm:$0xff] %v4667_v5  ;;  %v1463_v42 = vmax.f32 %v1461_v25, %v4665_v8  ;;  %v1518_v20 = vmax.f32 %v1516_v28, %v4667_v5 }
 0x1f5   : > { %v4671_v4 = vpop.f32.mrb[70].mxu0  ;;  %v4673_v9 = vpop.f32.mrb[46].mxu1 }
 0x1f6   : > { %6607 = vst [vmem:[#allocation82_spill] sm:$0xff] %v4671_v4  ;;  %6608 = vst [vmem:[#allocation83_spill] sm:$0xff] %v4673_v9  ;;  %v1411_v36 = vmax.f32 %v1409_v13, %v4671_v4  ;;  %v1521_v16 = vmax.f32 %v1519_v24, %v4673_v9  ;;  %v4677_v63 = vpop.f32.mrb[71].mxu0  ;;  %v4679_v44 = vpop.f32.mrb[47].mxu1 }
 0x1f7   : > { %6609 = vst [vmem:[#allocation84_spill] sm:$0xff] %v4677_v63  ;;  %6610 = vst [vmem:[#allocation85_spill] sm:$0xff] %v4679_v44  ;;  %v1464_v32 = vmax.f32 %v1462_v62, %v4677_v63  ;;  %v1520_v12 = vmax.f32 %v1518_v20, %v4679_v44 }
 0x1f9   : > { %v4683_v59 = vpop.f32.mrb[72].mxu0  ;;  %v4685_v25 = vpop.f32.mrb[48].mxu1 }
 0x1fa   : > { %6611 = vst [vmem:[#allocation86_spill] sm:$0xff] %v4683_v59  ;;  %6612 = vst [vmem:[#allocation87_spill] sm:$0xff] %v4685_v25  ;;  %v1412_v28 = vmax.f32 %v1410_v49, %v4683_v59  ;;  %v1523_v8 = vmax.f32 %v1521_v16, %v4685_v25  ;;  %v4689_v57 = vpop.f32.mrb[73].mxu0  ;;  %v4691_v13 = vpop.f32.mrb[49].mxu1 }
 0x1fb   : > { %6613 = vst [vmem:[#allocation88_spill] sm:$0xff] %v4689_v57  ;;  %6614 = vst [vmem:[#allocation89_spill] sm:$0xff] %v4691_v13  ;;  %v1465_v24 = vmax.f32 %v1463_v42, %v4689_v57  ;;  %v1522_v4 = vmax.f32 %v1520_v12, %v4691_v13  ;;  %v6653_v13 = vld [vmem:[#allocation32_spill] sm:$0xff] }
 0x1fd   : > { %v4695_v55 = vpop.f32.mrb[74].mxu0  ;;  %v4697_v62 = vpop.f32.mrb[50].mxu1 }
 0x1fe   : > { %6615 = vst [vmem:[#allocation90_spill] sm:$0xff] %v4695_v55  ;;  %6616 = vst [vmem:[#allocation91_spill] sm:$0xff] %v4697_v62  ;;  %v1413_v20 = vmax.f32 %v1411_v36, %v4695_v55  ;;  %v1525_v63 = vmax.f32 %v1523_v8, %v4697_v62  ;;  %v4701_v1 = vpop.f32.mrb[75].mxu0  ;;  %v4703_v49 = vpop.f32.mrb[51].mxu1 }
 0x1ff   : > { %6617 = vst [vmem:[#allocation92_spill] sm:$0xff] %v4701_v1  ;;  %6618 = vst [vmem:[#allocation93_spill] sm:$0xff] %v4703_v49  ;;  %v1466_v16 = vmax.f32 %v1464_v32, %v4701_v1  ;;  %v1524_v59 = vmax.f32 %v1522_v4, %v4703_v49  ;;  %v6623_v32 = vmax.f32 %v4438_v7, %v4429_v60 }
 0x201   : > { %v4707_v43 = vpop.f32.mrb[76].mxu0  ;;  %v4709_v42 = vpop.f32.mrb[52].mxu1 }
 0x202   : > { %6619 = vst [vmem:[#allocation94_spill] sm:$0xff] %v4707_v43  ;;  %6620 = vst [vmem:[#allocation95_spill] sm:$0xff] %v4709_v42  ;;  %v1414_v12 = vmax.f32 %v1412_v28, %v4707_v43  ;;  %v1527_v57 = vmax.f32 %v1525_v63, %v4709_v42  ;;  %v4713_v25 = vpop.f32.mrb[77].mxu0  ;;  %v4715_v36 = vpop.f32.mrb[53].mxu1 }
 0x203   : > { %6621 = vst [vmem:[#allocation96_spill] sm:$0xff] %v4713_v25  ;;  %6622 = vst [vmem:[#allocation97_spill] sm:$0xff] %v4715_v36  ;;  %v1467_v8 = vmax.f32 %v1465_v24, %v4713_v25  ;;  %v1526_v55 = vmax.f32 %v1524_v59, %v4715_v36 }
 0x205   : > { %v1473_v4 = vmax.f32 %v6623_v32, %v1467_v8  ;;  %v4722_v1 = vpop.f32.mrb[78].mxu0  ;;  %v4724_v62 = vpop.f32.mrb[54].mxu1 }
 0x206   : > { %6624 = vst [vmem:[#allocation98_spill] sm:$0xff] %v4722_v1  ;;  %6625 = vst [vmem:[#allocation99_spill] sm:$0xff] %v4724_v62  ;;  %v1415_v28 = vmax.f32 %v1413_v20, %v4722_v1  ;;  %v1529_v63 = vmax.f32 %v1527_v57, %v4724_v62  ;;  %v4728_v43 = vpop.f32.mrb[79].mxu0  ;;  %v4730_v42 = vpop.f32.mrb[55].mxu1 }
 0x207   : > { %6626 = vst [vmem:[#allocation100_spill] sm:$0xff] %v4728_v43  ;;  %6627 = vst [vmem:[#allocation101_spill] sm:$0xff] %v4730_v42  ;;  %v1468_v24 = vmax.f32 %v1466_v16, %v4728_v43  ;;  %v1528_v59 = vmax.f32 %v1526_v55, %v4730_v42 }
 0x209   : > { %v1475_v25 = vmax.f32 %v1473_v4, %v1468_v24  ;;  %v1530_v36 = vmax.f32 %v1528_v59, %v1529_v63  ;;  %v4734_v60 = vpop.f32.mrb[80].mxu0 }
 0x20a   : > { %6628 = vst [vmem:[#allocation102_spill] sm:$0xff] %v4734_v60  ;;  %v1416_v8 = vmax.f32 %v1414_v12, %v4734_v60  ;;  %v4737_v32 = vpop.f32.mrb[81].mxu0 }
 0x20b   : > { %6629 = vst [vmem:[#allocation103_spill] sm:$0xff] %v4737_v32  ;;  %v1531_v7 = vrot.slane %v1530_v36, 4  ;;  %v1472_v20 = vmax.f32 %v4737_v32, %v1475_v25 }
 0x20d   : > { %v1532_v57 = vmax.f32 %v1530_v36, %v1531_v7  ;;  %v4740_v1 = vpop.f32.mrb[82].mxu0  ;;  %v6640_v7 = vld [vmem:[#allocation99_spill] sm:$0xff] }
 0x20e   : > { %6630 = vst [vmem:[#allocation104_spill] sm:$0xff] %v4740_v1  ;;  %v4743_v62 = vmax.f32 %v1415_v28, %v4740_v1  ;;  %v4745_v16 = vpop.f32.mrb[83].mxu0 }
 0x20f   : > { %6631 = vst [vmem:[#allocation105_spill] sm:$0xff] %v4745_v16  ;;  %v1533_v55 = vrot.slane %v1532_v57, 2  ;;  %v4748_v4 = vmax.f32 %v1472_v20, %v4745_v16  ;;  %v267_v20 = vlaneseq }
 0x211   : > { %v1534_v63 = vmax.f32 %v1532_v57, %v1533_v55  ;;  %v4750_v24 = vpop.f32.mrb[84].mxu0  ;;  %v6639_v57 = vld [vmem:[#allocation95_spill] sm:$0xff] }
 0x212   : > { %6632 = vst [vmem:[#allocation106_spill] sm:$0xff] %v4750_v24  ;;  %v1418_v12 = vmax.f32 %v1416_v8, %v4750_v24  ;;  %v4753_v59 = vpop.f32.mrb[85].mxu0  ;;  %v4866_v8 = vshrl.u32 %v267_v20, 7 }
 0x213   : > { %6633 = vst [vmem:[#allocation107_spill] sm:$0xff] %v4753_v59  ;;  %v1535_v25 = vrot.slane %v1534_v63, 1 }
 0x214   : > { %v4758_v36 = vmax.f32 %v1418_v12, %v4398_v37  ;;  %v6637_v12 = vld [vmem:[#allocation91_spill] sm:$0xff]  ;;  %6641 = vst [vmem:[#allocation110_spill] sm:$0xff] %v4866_v8  ;;  %v4869_v16 = vadd.s32 8, %v4866_v8  ;;  %v4872_v43 = vadd.s32 16, %v4866_v8  ;;  %v4875_v37 = vadd.s32 24, %v4866_v8 }
 0x215   : > { %v4760_v28 = vmax.f32 %v1534_v63, %v1535_v25  ;;  %v4762_v32 = vpop.f32.mrb[86].mxu0  ;;  %v6636_v63 = vld [vmem:[#allocation87_spill] sm:$0xff]  ;;  %v6638_v25 = vld [vmem:[#allocation97_spill] sm:$0xff]  ;;  %v4878_v24 = vadd.s32 32, %v4866_v8  ;;  %v4881_v1 = vadd.s32 40, %v4866_v8  ;;  %v4884_v60 = vadd.s32 48, %v4866_v8 }
 0x216   : > { %v4768_v55 = vpop.f32.mrb[87].mxu0  ;;  %6642 = vst [vmem:[#allocation111_spill] sm:$0xff] %v4869_v16  ;;  %6643 = vst [vmem:[#allocation112_spill] sm:$0xff] %v4872_v43  ;;  %v4887_v20 = vadd.s32 56, %v4866_v8  ;;  %v6654_v9 = vmax.f32 %v4743_v62, %v4762_v32  ;;  %v6656_v62 = vld [vmem:[#allocation39_spill] sm:$0xff] }
 0x217   : > { %6634 = vst [vmem:[#allocation108_spill] sm:$0xff] %v4760_v28  ;;  %6635 = vst [vmem:[#allocation109_spill] sm:$0xff] %v4768_v55  ;;  %vm1683_vm2 = vcmp.eq.f32.partialorder %v4450_v21, %v4760_v28  ;;  %vm1686_vm3 = vcmp.eq.f32.partialorder %v4445_v15, %v4760_v28  ;;  %vm1689_vm4 = vcmp.eq.f32.partialorder %v4462_v35, %v4760_v28  ;;  %v4912_v21 = vadd.s32 80, %v4866_v8 }
 0x218   : > { %vm1692_vm5 = vcmp.eq.f32.partialorder %v4455_v27, %v4760_v28  ;;  %vm1695_vm6 = vcmp.eq.f32.partialorder %v4475_v3, %v4760_v28  ;;  %vm1698_vm7 = vcmp.eq.f32.partialorder %v4469_v47, %v4760_v28  ;;  %vm1701_vm8 = vcmp.eq.f32.partialorder %v4487_v17, %v4760_v28  ;;  %6644 = vst [vmem:[#allocation113_spill] sm:$0xff] %v4875_v37 }
 0x219   : > { %vm1704_vm9 = vcmp.eq.f32.partialorder %v4481_v53, %v4760_v28  ;;  %vm1707_vm10 = vcmp.eq.f32.partialorder %v4499_v29, %v4760_v28  ;;  %vm1806_vm15 = vcmp.eq.f32.partialorder %v6636_v63, %v4760_v28  ;;  %vm1809_vm0 = vcmp.eq.f32.partialorder %v4703_v49, %v4760_v28  ;;  %6645 = vst [vmem:[#allocation114_spill] sm:$0xff] %v4878_v24 }
 0x21a   : > { %vm1812_vm1 = vcmp.eq.f32.partialorder %v6637_v12, %v4760_v28  ;;  %vm1815_vm11 = vcmp.eq.f32.partialorder %v6638_v25, %v4760_v28  ;;  %vm1818_vm12 = vcmp.eq.f32.partialorder %v6639_v57, %v4760_v28  ;;  %vm1821_vm13 = vcmp.eq.f32.partialorder %v4730_v42, %v4760_v28  ;;  %6646 = vst [vmem:[#allocation115_spill] sm:$0xff] %v4884_v60 }
 0x21b   : > { %vm1824_vm14 = vcmp.eq.f32.partialorder %v6640_v7, %v4760_v28  ;;  %6647 = vst [vmem:[#allocation116_spill] sm:$0xff] %v4887_v20  ;;  %v4890_v7 = vadd.s32 64, %v4866_v8  ;;  %v1827_v42 = vsel %vm1683_vm2, %v4866_v8, 384  ;;  %v1830_v57 = vsel %vm1686_vm3, %v4869_v16, 384 }
 0x21c   : > { %v1833_v25 = vsel %vm1689_vm4, %v4872_v43, 384  ;;  %v1836_v12 = vsel %vm1692_vm5, %v4875_v37, 384  ;;  %v4909_v49 = vadd.s32 72, %v4866_v8  ;;  %v4915_v63 = vadd.s32 88, %v4866_v8 }
 0x21d   : > { %6648 = vst [vmem:[#allocation117_spill] sm:$0xff] %v4890_v7  ;;  %v4918_v15 = vadd.s32 96, %v4866_v8  ;;  %v4921_v35 = vadd.s32 104, %v4866_v8  ;;  %v4924_v43 = vadd.s32 352, %v4866_v8  ;;  %v4927_v27 = vadd.s32 112, %v4866_v8 }
 0x21e   : > { %6649 = vst [vmem:[#allocation118_spill] sm:$0xff] %v4909_v49  ;;  %v4930_v37 = vadd.s32 360, %v4866_v8  ;;  %v1839_v16 = vsel %vm1695_vm6, %v4878_v24, 384  ;;  %vm2175_vm2 = vcmp.lt.s32.totalorder %v1827_v42, %v1833_v25  ;;  %vm2177_vm3 = vcmp.lt.s32.totalorder %v1830_v57, %v1836_v12 }
 0x21f   : > { %6650 = vst [vmem:[#allocation119_spill] sm:$0xff] %v4921_v35  ;;  %6651 = vst [vmem:[#allocation120_spill] sm:$0xff] %v4924_v43  ;;  %v1421_v44 = vmax.f32 %v6654_v9, %v6653_v13  ;;  %v1842_v43 = vsel %vm1698_vm7, %v4881_v1, 384  ;;  %v2176_v39 = vsel %vm2175_vm2, %v1827_v42, %v1833_v25  ;;  %v2178_v5 = vsel %vm2177_vm3, %v1830_v57, %v1836_v12 }
 0x220   : > { %6652 = vst [vmem:[#allocation121_spill] sm:$0xff] %v4930_v37  ;;  %v6655_v37 = vmax.f32 %v4748_v4, %v4753_v59  ;;  %v4951_v24 = vadd.s32 120, %v4866_v8  ;;  %vm2179_vm4 = vcmp.lt.s32.totalorder %v2176_v39, %v1839_v16  ;;  %vm2181_vm5 = vcmp.lt.s32.totalorder %v2178_v5, %v1842_v43 }
 0x221   : > { %v1423_v9 = vmax.f32 %v1421_v44, %v6656_v62  ;;  %v1845_v47 = vsel %vm1701_vm8, %v4884_v60, 384  ;;  %v1848_v42 = vsel %vm1704_vm9, %v4887_v20, 384  ;;  %v2180_v4 = vsel %vm2179_vm4, %v2176_v39, %v1839_v16 }
 0x222   : > { %v4948_v3 = vmax.f32 %v4768_v55, %v6655_v37  ;;  %v2182_v37 = vsel %vm2181_vm5, %v2178_v5, %v1842_v43  ;;  %v4963_v57 = vadd.s32 128, %v4866_v8  ;;  %vm2183_vm6 = vcmp.lt.s32.totalorder %v2180_v4, %v1845_v47 }
 0x223   : > { %vm2185_vm7 = vcmp.lt.s32.totalorder %v2182_v37, %v1848_v42  ;;  %v6657_v44 = vmax.f32 %v4758_v36, %v4420_v50  ;;  %v1851_v17 = vsel %vm1707_vm10, %v4890_v7, 384  ;;  %vm6658_vm8 = vcmp.eq.f32.partialorder %v4493_v23, %v4760_v28 }
 0x224   : > { %v1854_v43 = vsel %vm6658_vm8, %v4909_v49, 384  ;;  %v2184_v53 = vsel %vm2183_vm6, %v2180_v4, %v1845_v47  ;;  %v2186_v39 = vsel %vm2185_vm7, %v2182_v37, %v1848_v42  ;;  %v4979_v5 = vadd.s32 136, %v4866_v8 }
 0x225   : > { %v4968_v12 = vmax.f32 %v6657_v44, %v1423_v9  ;;  %v4982_v16 = vadd.s32 144, %v4866_v8  ;;  %vm2187_vm9 = vcmp.lt.s32.totalorder %v2184_v53, %v1851_v17  ;;  %vm2189_vm2 = vcmp.lt.s32.totalorder %v2186_v39, %v1854_v43 }
 0x226   : > { %vm6659_vm3 = vcmp.eq.f32.partialorder %v4511_v48, %v4760_v28  ;;  %vm6660_vm10 = vcmp.eq.f32.partialorder %v4505_v38, %v4760_v28  ;;  %v2188_v36 = vsel %vm2187_vm9, %v2184_v53, %v1851_v17  ;;  %v2190_v25 = vsel %vm2189_vm2, %v2186_v39, %v1854_v43 }
 0x227   : > { %v1857_v29 = vsel %vm6659_vm3, %v4912_v21, 384  ;;  %v1860_v23 = vsel %vm6660_vm10, %v4915_v63, 384  ;;  %v4993_v9 = vadd.s32 152, %v4866_v8  ;;  %v4996_v47 = vadd.s32 160, %v4866_v8 }
 0x228   : > { %vm2191_vm4 = vcmp.lt.s32.totalorder %v2188_v36, %v1857_v29  ;;  %vm2193_vm5 = vcmp.lt.s32.totalorder %v2190_v25, %v1860_v23  ;;  %vm6662_vm6 = vcmp.eq.f32.partialorder %v4523_v46, %v4760_v28  ;;  %vm6663_vm7 = vcmp.eq.f32.partialorder %v4517_v0, %v4760_v28 }
 0x229   : > { %6661 = vst [vmem:[#allocation32_spill] sm:$0xff] %v4993_v9  ;;  %v1863_v48 = vsel %vm6662_vm6, %v4918_v15, 384  ;;  %v1866_v38 = vsel %vm6663_vm7, %v4921_v35, 384  ;;  %v2192_v42 = vsel %vm2191_vm4, %v2188_v36, %v1857_v29  ;;  %v2194_v4 = vsel %vm2193_vm5, %v2190_v25, %v1860_v23 }
 0x22a   : > { %v5007_v37 = vadd.s32 168, %v4866_v8  ;;  %v5010_v44 = vadd.s32 176, %v4866_v8  ;;  %vm2195_vm8 = vcmp.lt.s32.totalorder %v2192_v42, %v1863_v48  ;;  %vm2197_vm9 = vcmp.lt.s32.totalorder %v2194_v4, %v1866_v38 }
 0x22b   : > { %vm6665_vm2 = vcmp.eq.f32.partialorder %v4535_v41, %v4760_v28  ;;  %vm6666_vm3 = vcmp.eq.f32.partialorder %v4529_v31, %v4760_v28  ;;  %v2196_v17 = vsel %vm2195_vm8, %v2192_v42, %v1863_v48  ;;  %v2198_v43 = vsel %vm2197_vm9, %v2194_v4, %v1866_v38 }
 0x22c   : > { %6664 = vst [vmem:[#allocation39_spill] sm:$0xff] %v5007_v37  ;;  %v1869_v46 = vsel %vm6665_vm2, %v4927_v27, 384  ;;  %v1872_v0 = vsel %vm6666_vm3, %v4951_v24, 384  ;;  %v5021_v53 = vadd.s32 184, %v4866_v8  ;;  %v5024_v39 = vadd.s32 192, %v4866_v8 }
 0x22d   : > { %vm2199_vm10 = vcmp.lt.s32.totalorder %v2196_v17, %v1869_v46  ;;  %vm2201_vm4 = vcmp.lt.s32.totalorder %v2198_v43, %v1872_v0  ;;  %vm6667_vm5 = vcmp.eq.f32.partialorder %v4547_v11, %v4760_v28  ;;  %vm6668_vm6 = vcmp.eq.f32.partialorder %v4541_v51, %v4760_v28 }
 0x22e   : > { %v1875_v41 = vsel %vm6667_vm5, %v4963_v57, 384  ;;  %v1878_v31 = vsel %vm6668_vm6, %v4979_v5, 384  ;;  %v2200_v29 = vsel %vm2199_vm10, %v2196_v17, %v1869_v46  ;;  %v2202_v23 = vsel %vm2201_vm4, %v2198_v43, %v1872_v0 }
 0x22f   : > { %v5035_v36 = vadd.s32 200, %v4866_v8  ;;  %v5038_v25 = vadd.s32 208, %v4866_v8  ;;  %vm2203_vm7 = vcmp.lt.s32.totalorder %v2200_v29, %v1875_v41  ;;  %vm2205_vm8 = vcmp.lt.s32.totalorder %v2202_v23, %v1878_v31 }
 0x230   : > { %vm6671_vm9 = vcmp.eq.f32.partialorder %v4559_v19, %v4760_v28  ;;  %vm6672_vm2 = vcmp.eq.f32.partialorder %v4553_v40, %v4760_v28  ;;  %v2204_v48 = vsel %vm2203_vm7, %v2200_v29, %v1875_v41  ;;  %v2206_v38 = vsel %vm2205_vm8, %v2202_v23, %v1878_v31 }
 0x231   : > { %6669 = vst [vmem:[#allocation122_spill] sm:$0xff] %v5035_v36  ;;  %6670 = vst [vmem:[#allocation123_spill] sm:$0xff] %v5038_v25  ;;  %v1881_v11 = vsel %vm6671_vm9, %v4982_v16, 384  ;;  %v1884_v51 = vsel %vm6672_vm2, %v4993_v9, 384  ;;  %v5049_v42 = vadd.s32 216, %v4866_v8  ;;  %v5052_v4 = vadd.s32 224, %v4866_v8 }
 0x232   : > { %vm2207_vm3 = vcmp.lt.s32.totalorder %v2204_v48, %v1881_v11  ;;  %vm2209_vm10 = vcmp.lt.s32.totalorder %v2206_v38, %v1884_v51  ;;  %vm6674_vm4 = vcmp.eq.f32.partialorder %v4571_v45, %v4760_v28  ;;  %vm6675_vm5 = vcmp.eq.f32.partialorder %v4565_v54, %v4760_v28 }
 0x233   : > { %6673 = vst [vmem:[#allocation124_spill] sm:$0xff] %v5052_v4  ;;  %v1887_v19 = vsel %vm6674_vm4, %v4996_v47, 384  ;;  %v1890_v40 = vsel %vm6675_vm5, %v5007_v37, 384  ;;  %v2208_v46 = vsel %vm2207_vm3, %v2204_v48, %v1881_v11  ;;  %v2210_v0 = vsel %vm2209_vm10, %v2206_v38, %v1884_v51 }
 0x234   : > { %v5063_v17 = vadd.s32 232, %v4866_v8  ;;  %v5066_v43 = vadd.s32 240, %v4866_v8  ;;  %vm2211_vm6 = vcmp.lt.s32.totalorder %v2208_v46, %v1887_v19  ;;  %vm2213_vm7 = vcmp.lt.s32.totalorder %v2210_v0, %v1890_v40 }
 0x235   : > { %vm6678_vm8 = vcmp.eq.f32.partialorder %v4583_v30, %v4760_v28  ;;  %vm6679_vm9 = vcmp.eq.f32.partialorder %v4577_v33, %v4760_v28  ;;  %v2212_v41 = vsel %vm2211_vm6, %v2208_v46, %v1887_v19  ;;  %v2214_v31 = vsel %vm2213_vm7, %v2210_v0, %v1890_v40 }
 0x236   : > { %6676 = vst [vmem:[#allocation125_spill] sm:$0xff] %v5063_v17  ;;  %6677 = vst [vmem:[#allocation126_spill] sm:$0xff] %v5066_v43  ;;  %v1893_v45 = vsel %vm6678_vm8, %v5010_v44, 384  ;;  %v1896_v54 = vsel %vm6679_vm9, %v5021_v53, 384  ;;  %v5077_v29 = vadd.s32 248, %v4866_v8  ;;  %v5080_v23 = vadd.s32 256, %v4866_v8 }
 0x237   : > { %vm2215_vm2 = vcmp.lt.s32.totalorder %v2212_v41, %v1893_v45  ;;  %vm2217_vm3 = vcmp.lt.s32.totalorder %v2214_v31, %v1896_v54  ;;  %vm6681_vm10 = vcmp.eq.f32.partialorder %v4595_v18, %v4760_v28  ;;  %vm6682_vm4 = vcmp.eq.f32.partialorder %v4589_v52, %v4760_v28 }
 0x238   : > { %6680 = vst [vmem:[#allocation127_spill] sm:$0xff] %v5077_v29  ;;  %v1899_v30 = vsel %vm6681_vm10, %v5024_v39, 384  ;;  %v1902_v33 = vsel %vm6682_vm4, %v5035_v36, 384  ;;  %v2216_v11 = vsel %vm2215_vm2, %v2212_v41, %v1893_v45  ;;  %v2218_v51 = vsel %vm2217_vm3, %v2214_v31, %v1896_v54 }
 0x239   : > { %v5091_v48 = vadd.s32 264, %v4866_v8  ;;  %v5094_v38 = vadd.s32 280, %v4866_v8  ;;  %vm2219_vm5 = vcmp.lt.s32.totalorder %v2216_v11, %v1899_v30  ;;  %vm2221_vm6 = vcmp.lt.s32.totalorder %v2218_v51, %v1902_v33 }
 0x23a   : > { %vm6683_vm7 = vcmp.eq.f32.partialorder %v4607_v6, %v4760_v28  ;;  %vm6684_vm8 = vcmp.eq.f32.partialorder %v4601_v34, %v4760_v28  ;;  %v2220_v19 = vsel %vm2219_vm5, %v2216_v11, %v1899_v30  ;;  %v2222_v40 = vsel %vm2221_vm6, %v2218_v51, %v1902_v33 }
 0x23b   : > { %v1905_v18 = vsel %vm6683_vm7, %v5038_v25, 384  ;;  %v1908_v52 = vsel %vm6684_vm8, %v5049_v42, 384  ;;  %v5105_v46 = vadd.s32 272, %v4866_v8  ;;  %v5108_v0 = vadd.s32 296, %v4866_v8 }
 0x23c   : > { %vm2223_vm9 = vcmp.lt.s32.totalorder %v2220_v19, %v1905_v18  ;;  %vm2225_vm2 = vcmp.lt.s32.totalorder %v2222_v40, %v1908_v52  ;;  %vm6685_vm3 = vcmp.eq.f32.partialorder %v4619_v61, %v4760_v28  ;;  %vm6686_vm10 = vcmp.eq.f32.partialorder %v4613_v22, %v4760_v28 }
 0x23d   : > { %v1911_v6 = vsel %vm6685_vm3, %v5052_v4, 384  ;;  %v1914_v34 = vsel %vm6686_vm10, %v5063_v17, 384  ;;  %v2224_v45 = vsel %vm2223_vm9, %v2220_v19, %v1905_v18  ;;  %v2226_v54 = vsel %vm2225_vm2, %v2222_v40, %v1908_v52 }
 0x23e   : > { %v5119_v41 = vadd.s32 288, %v4866_v8  ;;  %v5122_v31 = vadd.s32 312, %v4866_v8  ;;  %vm2227_vm4 = vcmp.lt.s32.totalorder %v2224_v45, %v1911_v6  ;;  %vm2229_vm5 = vcmp.lt.s32.totalorder %v2226_v54, %v1914_v34 }
 0x23f   : > { %vm6688_vm6 = vcmp.eq.f32.partialorder %v4631_v2, %v4760_v28  ;;  %vm6689_vm7 = vcmp.eq.f32.partialorder %v4625_v10, %v4760_v28  ;;  %v2228_v30 = vsel %vm2227_vm4, %v2224_v45, %v1911_v6  ;;  %v2230_v33 = vsel %vm2229_vm5, %v2226_v54, %v1914_v34 }
 0x240   : > { %6687 = vst [vmem:[#allocation128_spill] sm:$0xff] %v5122_v31  ;;  %v1917_v61 = vsel %vm6688_vm6, %v5066_v43, 384  ;;  %v1920_v22 = vsel %vm6689_vm7, %v5077_v29, 384  ;;  %v5133_v11 = vadd.s32 304, %v4866_v8  ;;  %v1425_v51 = vrot.slane %v4968_v12, 4 }
 0x241   : > { %vm2231_vm8 = vcmp.lt.s32.totalorder %v2228_v30, %v1917_v61  ;;  %vm2233_vm9 = vcmp.lt.s32.totalorder %v2230_v33, %v1920_v22  ;;  %vm6691_vm2 = vcmp.eq.f32.partialorder %v4643_v56, %v4760_v28  ;;  %vm6692_vm3 = vcmp.eq.f32.partialorder %v4637_v58, %v4760_v28 }
 0x242   : > { %6690 = vst [vmem:[#allocation129_spill] sm:$0xff] %v5133_v11  ;;  %v1923_v2 = vsel %vm6691_vm2, %v5080_v23, 384  ;;  %v1926_v10 = vsel %vm6692_vm3, %v5091_v48, 384  ;;  %v2232_v18 = vsel %vm2231_vm8, %v2228_v30, %v1917_v61  ;;  %v2234_v52 = vsel %vm2233_vm9, %v2230_v33, %v1920_v22  ;;  %v6697_v61 = vld [vmem:[#allocation81_spill] sm:$0xff]  ;;  %v6699_v22 = vld [vmem:[#allocation79_spill] sm:$0xff] }
 0x243   : > { %v5145_v19 = vadd.s32 328, %v4866_v8  ;;  %v5148_v40 = vadd.s32 320, %v4866_v8  ;;  %vm2235_vm10 = vcmp.lt.s32.totalorder %v2232_v18, %v1923_v2  ;;  %vm2237_vm4 = vcmp.lt.s32.totalorder %v2234_v52, %v1926_v10 }
 0x244   : > { %vm6695_vm5 = vcmp.eq.f32.partialorder %v4655_v26, %v4760_v28  ;;  %vm6696_vm6 = vcmp.eq.f32.partialorder %v4649_v14, %v4760_v28  ;;  %v2236_v6 = vsel %vm2235_vm10, %v2232_v18, %v1923_v2  ;;  %v2238_v34 = vsel %vm2237_vm4, %v2234_v52, %v1926_v10  ;;  %v6704_v18 = vld [vmem:[#allocation83_spill] sm:$0xff] }
 0x245   : > { %6693 = vst [vmem:[#allocation130_spill] sm:$0xff] %v5145_v19  ;;  %6694 = vst [vmem:[#allocation131_spill] sm:$0xff] %v5148_v40  ;;  %v1929_v56 = vsel %vm6695_vm5, %v5105_v46, 384  ;;  %v1932_v58 = vsel %vm6696_vm6, %v5094_v38, 384  ;;  %v5159_v45 = vadd.s32 344, %v4866_v8  ;;  %v1426_v54 = vmax.f32 %v4968_v12, %v1425_v51  ;;  %v6702_v12 = vld [vmem:[#allocation85_spill] sm:$0xff] }
 0x246   : > { %vm2239_vm7 = vcmp.lt.s32.totalorder %v2236_v6, %v1929_v56  ;;  %vm2241_vm8 = vcmp.lt.s32.totalorder %v2238_v34, %v1932_v58  ;;  %vm6698_vm9 = vcmp.eq.f32.partialorder %v6697_v61, %v4760_v28  ;;  %vm6700_vm2 = vcmp.eq.f32.partialorder %v6699_v22, %v4760_v28 }
 0x247   : > { %v1935_v26 = vsel %vm6698_vm9, %v5119_v41, 384  ;;  %v1938_v14 = vsel %vm6700_vm2, %v5108_v0, 384  ;;  %v2240_v30 = vsel %vm2239_vm7, %v2236_v6, %v1929_v56  ;;  %v2242_v33 = vsel %vm2241_vm8, %v2238_v34, %v1932_v58  ;;  %v6707_v34 = vld [vmem:[#allocation89_spill] sm:$0xff] }
 0x248   : > { %v5171_v2 = vadd.s32 336, %v4866_v8  ;;  %vm2243_vm3 = vcmp.lt.s32.totalorder %v2240_v30, %v1935_v26  ;;  %vm2245_vm10 = vcmp.lt.s32.totalorder %v2242_v33, %v1938_v14  ;;  %v1478_v10 = vrot.slane %v4948_v3, 4 }
 0x249   : > { %vm6703_vm4 = vcmp.eq.f32.partialorder %v6702_v12, %v4760_v28  ;;  %vm6705_vm5 = vcmp.eq.f32.partialorder %v6704_v18, %v4760_v28  ;;  %v2244_v61 = vsel %vm2243_vm3, %v2240_v30, %v1935_v26  ;;  %v2246_v56 = vsel %vm2245_vm10, %v2242_v33, %v1938_v14 }
 0x24a   : > { %6701 = vst [vmem:[#allocation81_spill] sm:$0xff] %v5171_v2  ;;  %v1941_v51 = vsel %vm6703_vm4, %v5133_v11, 384  ;;  %v1944_v52 = vsel %vm6705_vm5, %v5122_v31, 384  ;;  %v5183_v58 = vadd.s32 368, %v4866_v8  ;;  %v1427_v6 = vrot.slane %v1426_v54, 2 }
 0x24b   : > { %vm2247_vm6 = vcmp.lt.s32.totalorder %v2244_v61, %v1941_v51  ;;  %vm2249_vm7 = vcmp.lt.s32.totalorder %v2246_v56, %v1944_v52  ;;  %vm6708_vm8 = vcmp.eq.f32.partialorder %v6707_v34, %v4760_v28  ;;  %v1950_v55 = vsel %vm1806_vm15, %v5145_v19, 384  ;;  %v6738_v28 = vld [vmem:[#allocation38_spill] sm:$0xff] }
 0x24c   : > { %6706 = vst [vmem:[#allocation79_spill] sm:$0xff] %v5183_v58  ;;  %v1947_v22 = vsel %vm6708_vm8, %v5148_v40, 384  ;;  %v2248_v18 = vsel %vm2247_vm6, %v2244_v61, %v1941_v51  ;;  %v2250_v59 = vsel %vm2249_vm7, %v2246_v56, %v1944_v52  ;;  %v5194_v26 = vadd.s32 376, %v4866_v8  ;;  %v6713_v61 = vld [vmem:[#allocation120_spill] sm:$0xff] }
 0x24d   : > { %vm2251_vm9 = vcmp.lt.s32.totalorder %v2248_v18, %v1947_v22  ;;  %vm2253_vm2 = vcmp.lt.s32.totalorder %v2250_v59, %v1950_v55  ;;  %v1479_v14 = vmax.f32 %v4948_v3, %v1478_v10  ;;  %v1953_v33 = vsel %vm1809_vm0, %v5171_v2, 384  ;;  %v6715_v10 = vld [vmem:[#allocation121_spill] sm:$0xff] }
 0x24e   : > { %6710 = vst [vmem:[#allocation85_spill] sm:$0xff] %v5194_v26  ;;  %v1956_v12 = vsel %vm1812_vm1, %v5159_v45, 384  ;;  %v2252_v19 = vsel %vm2251_vm9, %v2248_v18, %v1947_v22  ;;  %v2254_v51 = vsel %vm2253_vm2, %v2250_v59, %v1950_v55  ;;  %v1428_v52 = vmax.f32 %v1426_v54, %v1427_v6  ;;  %v6720_v6 = vld [vmem:[#allocation3_spill] sm:$0xff] }
 0x24f   : > { %vm2255_vm15 = vcmp.lt.s32.totalorder %v2252_v19, %v1953_v33  ;;  %vm2257_vm3 = vcmp.lt.s32.totalorder %v2254_v51, %v1956_v12  ;;  %v1959_v3 = vsel %vm1815_vm11, %v6713_v61, 384  ;;  %v1962_v30 = vsel %vm1818_vm12, %v6715_v10, 384  ;;  %v6741_v61 = vld [vmem:[#allocation44_spill] sm:$0xff] }
 0x250   : > { %v2256_v2 = vsel %vm2255_vm15, %v2252_v19, %v1953_v33  ;;  %v2258_v31 = vsel %vm2257_vm3, %v2254_v51, %v1956_v12  ;;  %v4027_v11 = vmov 1966171168   ;;  %v1480_v59 = vrot.slane %v1479_v14, 2 }
 0x251   : > { %v3012_v34 = vunpack.c.l.s4 %v4027_v11  ;;  %vm2259_vm0 = vcmp.lt.s32.totalorder %v2256_v2, %v1959_v3  ;;  %vm2261_vm1 = vcmp.lt.s32.totalorder %v2258_v31, %v1962_v30  ;;  %v1965_v54 = vsel %vm1821_vm13, %v5183_v58, 384 }
 0x252   : > { %v1968_v22 = vsel %vm1824_vm14, %v5194_v26, 384  ;;  %v2260_v18 = vsel %vm2259_vm0, %v2256_v2, %v1959_v3  ;;  %v2262_v40 = vsel %vm2261_vm1, %v2258_v31, %v1962_v30  ;;  %v1429_v19 = vrot.slane %v1428_v52, 1  ;;  %v6721_v31 = vld [vmem:[#allocation5_spill] sm:$0xff]  ;;  %v6722_v2 = vld [vmem:[#allocation7_spill] sm:$0xff]  ;;  %v6740_v26 = vld [vmem:[#allocation42_spill] sm:$0xff] }
 0x253   : > { %vm2263_vm11 = vcmp.lt.s32.totalorder %v2260_v18, %v1965_v54  ;;  %vm2265_vm12 = vcmp.lt.s32.totalorder %v2262_v40, %v1968_v22  ;;  %v3013_v12 = vunpack.c.0.s8 %v3012_v34  ;;  %v1481_v51 = vmax.f32 %v1479_v14, %v1480_v59  ;;  %v6723_v3 = vld [vmem:[#allocation9_spill] sm:$0xff]  ;;  %v6737_v14 = vld [vmem:[#allocation35_spill] sm:$0xff] }
 0x254   : > { %v2264_v33 = vsel %vm2263_vm11, %v2260_v18, %v1965_v54  ;;  %v2266_v11 = vsel %vm2265_vm12, %v2262_v40, %v1968_v22  ;;  %v5223_v10 = vmax.f32 %v1428_v52, %v1429_v19  ;;  %v6724_v52 = vld [vmem:[#allocation11_spill] sm:$0xff]  ;;  %v6725_v30 = vld [vmem:[#allocation13_spill] sm:$0xff]  ;;  %v6727_v18 = vld [vmem:[#allocation112_spill] sm:$0xff] }
 0x255   : > { %vm2267_vm10 = vcmp.lt.s32.totalorder %v2264_v33, %v2266_v11  ;;  %v5226_v55 = vsub.s32 %v3013_v12, %v4866_v8  ;;  %v1482_v58 = vrot.slane %v1481_v51, 1  ;;  %v6726_v54 = vld [vmem:[#allocation111_spill] sm:$0xff]  ;;  %v6728_v19 = vld [vmem:[#allocation113_spill] sm:$0xff] }
 0x256   : > { %v5221_v56 = vsel %vm2267_vm10, %v2264_v33, %v2266_v11  ;;  %vm1681_vm13 = vcmp.eq.f32.partialorder %v6720_v6, %v5223_v10  ;;  %vm1684_vm14 = vcmp.eq.f32.partialorder %v6721_v31, %v5223_v10  ;;  %vm1687_vm4 = vcmp.eq.f32.partialorder %v6722_v2, %v5223_v10  ;;  %v6729_v11 = vld [vmem:[#allocation15_spill] sm:$0xff]  ;;  %v6730_v12 = vld [vmem:[#allocation17_spill] sm:$0xff] }
 0x257   : > { %6719 = vst [vmem:[#allocation83_spill] sm:$0xff] %v5226_v55  ;;  %vm1690_vm5 = vcmp.eq.f32.partialorder %v6723_v3, %v5223_v10  ;;  %vm1693_vm6 = vcmp.eq.f32.partialorder %v6724_v52, %v5223_v10  ;;  %vm1696_vm7 = vcmp.eq.f32.partialorder %v6725_v30, %v5223_v10  ;;  %v5242_v34 = vmax.f32 %v1481_v51, %v1482_v58  ;;  %v6731_v6 = vld [vmem:[#allocation19_spill] sm:$0xff]  ;;  %v6732_v58 = vld [vmem:[#allocation21_spill] sm:$0xff]  ;;  %v6739_v55 = vld [vmem:[#allocation114_spill] sm:$0xff] }
 0x258   : > { %v1825_v59 = vsel %vm1681_vm13, %v4866_v8, 384  ;;  %v1828_v22 = vsel %vm1684_vm14, %v6726_v54, 384  ;;  %v1831_v40 = vsel %vm1687_vm4, %v6727_v18, 384  ;;  %v1834_v33 = vsel %vm1690_vm5, %v6728_v19, 384  ;;  %v6733_v51 = vld [vmem:[#allocation23_spill] sm:$0xff]  ;;  %v6734_v31 = vld [vmem:[#allocation25_spill] sm:$0xff] }
 0x259   : > { %vm1699_vm8 = vcmp.eq.f32.partialorder %v6729_v11, %v5223_v10  ;;  %vm1702_vm9 = vcmp.eq.f32.partialorder %v6730_v12, %v5223_v10  ;;  %vm1705_vm2 = vcmp.eq.f32.partialorder %v6731_v6, %v5223_v10  ;;  %vm1708_vm15 = vcmp.eq.f32.partialorder %v6732_v58, %v5223_v10  ;;  %v6735_v2 = vld [vmem:[#allocation27_spill] sm:$0xff] }
 0x25a   : > { %vm1711_vm3 = vcmp.eq.f32.partialorder %v6733_v51, %v5223_v10  ;;  %vm1714_vm0 = vcmp.eq.f32.partialorder %v6734_v31, %v5223_v10  ;;  %vm1717_vm1 = vcmp.eq.f32.partialorder %v6735_v2, %v5223_v10  ;;  %v6736_v3 = vld [vmem:[#allocation31_spill] sm:$0xff]  ;;  %vm1969_vm13 = vcmp.lt.s32.totalorder %v1825_v59, %v1831_v40 }
 0x25b   : > { %vm1720_vm11 = vcmp.eq.f32.partialorder %v6736_v3, %v5223_v10  ;;  %vm1971_vm14 = vcmp.lt.s32.totalorder %v1828_v22, %v1834_v33  ;;  %v1837_v19 = vsel %vm1693_vm6, %v6739_v55, 384  ;;  %v1840_v54 = vsel %vm1696_vm7, %v4881_v1, 384 }
 0x25c   : > { %v1970_v18 = vsel %vm1969_vm13, %v1825_v59, %v1831_v40  ;;  %v1972_v8 = vsel %vm1971_vm14, %v1828_v22, %v1834_v33  ;;  %vm1729_vm4 = vcmp.eq.f32.partialorder %v6740_v26, %v5223_v10  ;;  %vm1732_vm5 = vcmp.eq.f32.partialorder %v6741_v61, %v5223_v10  ;;  %v6742_v40 = vld [vmem:[#allocation46_spill] sm:$0xff]  ;;  %v6743_v33 = vld [vmem:[#allocation48_spill] sm:$0xff] }
 0x25d   : > { %vm1973_vm10 = vcmp.lt.s32.totalorder %v1970_v18, %v1837_v19  ;;  %vm1975_vm12 = vcmp.lt.s32.totalorder %v1972_v8, %v1840_v54  ;;  %v1843_v52 = vsel %vm1699_vm8, %v4884_v60, 384  ;;  %v1846_v30 = vsel %vm1702_vm9, %v4887_v20, 384 }
 0x25e   : > { %v1974_v59 = vsel %vm1973_vm10, %v1970_v18, %v1837_v19  ;;  %v1976_v22 = vsel %vm1975_vm12, %v1972_v8, %v1840_v54  ;;  %vm1735_vm6 = vcmp.eq.f32.partialorder %v6742_v40, %v5223_v10  ;;  %vm1738_vm7 = vcmp.eq.f32.partialorder %v6743_v33, %v5223_v10  ;;  %v6744_v54 = vld [vmem:[#allocation50_spill] sm:$0xff]  ;;  %v6745_v19 = vld [vmem:[#allocation52_spill] sm:$0xff] }
 0x25f   : > { %vm1977_vm13 = vcmp.lt.s32.totalorder %v1974_v59, %v1843_v52  ;;  %vm1979_vm14 = vcmp.lt.s32.totalorder %v1976_v22, %v1846_v30  ;;  %v1849_v11 = vsel %vm1705_vm2, %v4890_v7, 384  ;;  %v1852_v12 = vsel %vm1708_vm15, %v4909_v49, 384  ;;  %v6758_v40 = vld [vmem:[#allocation74_spill] sm:$0xff] }
 0x260   : > { %v1978_v18 = vsel %vm1977_vm13, %v1974_v59, %v1843_v52  ;;  %v1980_v8 = vsel %vm1979_vm14, %v1976_v22, %v1846_v30  ;;  %vm1741_vm8 = vcmp.eq.f32.partialorder %v6744_v54, %v5223_v10  ;;  %vm1744_vm9 = vcmp.eq.f32.partialorder %v6745_v19, %v5223_v10  ;;  %v6746_v59 = vld [vmem:[#allocation54_spill] sm:$0xff]  ;;  %v6747_v22 = vld [vmem:[#allocation56_spill] sm:$0xff] }
 0x261   : > { %vm1981_vm12 = vcmp.lt.s32.totalorder %v1978_v18, %v1849_v11  ;;  %vm1983_vm10 = vcmp.lt.s32.totalorder %v1980_v8, %v1852_v12  ;;  %v1855_v6 = vsel %vm1711_vm3, %v4912_v21, 384  ;;  %v1858_v58 = vsel %vm1714_vm0, %v4915_v63, 384 }
 0x262   : > { %v1982_v52 = vsel %vm1981_vm12, %v1978_v18, %v1849_v11  ;;  %v1984_v30 = vsel %vm1983_vm10, %v1980_v8, %v1852_v12  ;;  %vm1747_vm2 = vcmp.eq.f32.partialorder %v6746_v59, %v5223_v10  ;;  %v1861_v51 = vsel %vm1717_vm1, %v4918_v15, 384  ;;  %v6748_v18 = vld [vmem:[#allocation58_spill] sm:$0xff]  ;;  %v6749_v8 = vld [vmem:[#allocation60_spill] sm:$0xff] }
 0x263   : > { %vm1985_vm13 = vcmp.lt.s32.totalorder %v1982_v52, %v1855_v6  ;;  %vm1987_vm14 = vcmp.lt.s32.totalorder %v1984_v30, %v1858_v58  ;;  %v1864_v31 = vsel %vm1720_vm11, %v4921_v35, 384  ;;  %vm1753_vm3 = vcmp.eq.f32.partialorder %v6748_v18, %v5223_v10  ;;  %v6753_v35 = vld [vmem:[#allocation64_spill] sm:$0xff]  ;;  %v6767_v18 = vld [vmem:[#allocation98_spill] sm:$0xff] }
 0x264   : > { %v1986_v11 = vsel %vm1985_vm13, %v1982_v52, %v1855_v6  ;;  %v1988_v12 = vsel %vm1987_vm14, %v1984_v30, %v1858_v58  ;;  %vm6750_vm15 = vcmp.eq.f32.partialorder %v6737_v14, %v5223_v10  ;;  %vm6751_vm1 = vcmp.eq.f32.partialorder %v6738_v28, %v5223_v10  ;;  %v6752_v30 = vld [vmem:[#allocation62_spill] sm:$0xff] }
 0x265   : > { %vm1989_vm12 = vcmp.lt.s32.totalorder %v1986_v11, %v1861_v51  ;;  %vm1991_vm10 = vcmp.lt.s32.totalorder %v1988_v12, %v1864_v31  ;;  %v1867_v2 = vsel %vm6750_vm15, %v4927_v27, 384  ;;  %v1870_v3 = vsel %vm6751_vm1, %v4951_v24, 384 }
 0x266   : > { %v1990_v6 = vsel %vm1989_vm12, %v1986_v11, %v1861_v51  ;;  %v1992_v58 = vsel %vm1991_vm10, %v1988_v12, %v1864_v31  ;;  %v2269_v52 = vrot.slane %v5221_v56, 4  ;;  %vm1759_vm11 = vcmp.eq.f32.partialorder %v6752_v30, %v5223_v10  ;;  %v6754_v11 = vld [vmem:[#allocation66_spill] sm:$0xff]  ;;  %v6755_v12 = vld [vmem:[#allocation68_spill] sm:$0xff] }
 0x267   : > { %vm1762_vm13 = vcmp.eq.f32.partialorder %v6753_v35, %v5223_v10  ;;  %vm1993_vm14 = vcmp.lt.s32.totalorder %v1990_v6, %v1867_v2  ;;  %vm1995_vm0 = vcmp.lt.s32.totalorder %v1992_v58, %v1870_v3  ;;  %v1873_v14 = vsel %vm1729_vm4, %v4963_v57, 384 }
 0x268   : > { %v1876_v28 = vsel %vm1732_vm5, %v4979_v5, 384  ;;  %v1994_v51 = vsel %vm1993_vm14, %v1990_v6, %v1867_v2  ;;  %v1996_v31 = vsel %vm1995_vm0, %v1992_v58, %v1870_v3  ;;  %vm1765_vm15 = vcmp.eq.f32.partialorder %v6754_v11, %v5223_v10  ;;  %v6756_v6 = vld [vmem:[#allocation70_spill] sm:$0xff]  ;;  %v6757_v58 = vld [vmem:[#allocation72_spill] sm:$0xff] }
 0x269   : > { %vm1997_vm10 = vcmp.lt.s32.totalorder %v1994_v51, %v1873_v14  ;;  %vm1999_vm1 = vcmp.lt.s32.totalorder %v1996_v31, %v1876_v28  ;;  %v1879_v26 = vsel %vm1735_vm6, %v4982_v16, 384  ;;  %v1882_v61 = vsel %vm1738_vm7, %v4993_v9, 384 }
 0x26a   : > { %v1998_v2 = vsel %vm1997_vm10, %v1994_v51, %v1873_v14  ;;  %v2000_v3 = vsel %vm1999_vm1, %v1996_v31, %v1876_v28  ;;  %vm2270_vm4 = vcmp.lt.s32.totalorder %v5221_v56, %v2269_v52  ;;  %vm1771_vm5 = vcmp.eq.f32.partialorder %v6756_v6, %v5223_v10  ;;  %v6759_v31 = vld [vmem:[#allocation76_spill] sm:$0xff] }
 0x26b   : > { %vm1774_vm0 = vcmp.eq.f32.partialorder %v6757_v58, %v5223_v10  ;;  %vm2001_vm14 = vcmp.lt.s32.totalorder %v1998_v2, %v1879_v26  ;;  %vm2003_vm12 = vcmp.lt.s32.totalorder %v2000_v3, %v1882_v61  ;;  %vm1777_vm6 = vcmp.eq.f32.partialorder %v6758_v40, %v5223_v10 }
 0x26c   : > { %v1885_v33 = vsel %vm1741_vm8, %v4996_v47, 384  ;;  %v1888_v14 = vsel %vm1744_vm9, %v5007_v37, 384  ;;  %v2002_v28 = vsel %vm2001_vm14, %v1998_v2, %v1879_v26  ;;  %v2004_v51 = vsel %vm2003_vm12, %v2000_v3, %v1882_v61  ;;  %v6761_v61 = vld [vmem:[#allocation78_spill] sm:$0xff] }
 0x26d   : > { %v1891_v9 = vsel %vm1747_vm2, %v5010_v44, 384  ;;  %vm2005_vm10 = vcmp.lt.s32.totalorder %v2002_v28, %v1885_v33  ;;  %vm2007_vm1 = vcmp.lt.s32.totalorder %v2004_v51, %v1888_v14  ;;  %v2271_v54 = vsel %vm2270_vm4, %v5221_v56, %v2269_v52  ;;  %v6762_v2 = vld [vmem:[#allocation82_spill] sm:$0xff] }
 0x26e   : > { %vm6760_vm8 = vcmp.eq.f32.partialorder %v6747_v22, %v5223_v10  ;;  %v2006_v37 = vsel %vm2005_vm10, %v2002_v28, %v1885_v33  ;;  %v2008_v26 = vsel %vm2007_vm1, %v2004_v51, %v1888_v14  ;;  %vm1783_vm9 = vcmp.eq.f32.partialorder %v6761_v61, %v5223_v10  ;;  %v6764_v33 = vld [vmem:[#allocation86_spill] sm:$0xff] }
 0x26f   : > { %v1894_v19 = vsel %vm6760_vm8, %v5021_v53, 384  ;;  %vm2009_vm14 = vcmp.lt.s32.totalorder %v2006_v37, %v1891_v9  ;;  %v1897_v56 = vsel %vm1753_vm3, %v5024_v39, 384  ;;  %vm6763_vm2 = vcmp.eq.f32.partialorder %v6749_v8, %v5223_v10  ;;  %v6765_v14 = vld [vmem:[#allocation90_spill] sm:$0xff] }
 0x270   : > { %vm2011_vm7 = vcmp.lt.s32.totalorder %v2008_v26, %v1894_v19  ;;  %v1900_v59 = vsel %vm6763_vm2, %v5035_v36, 384  ;;  %v2010_v22 = vsel %vm2009_vm14, %v2006_v37, %v1891_v9  ;;  %v2272_v3 = vrot.slane %v2271_v54, 2  ;;  %v6766_v28 = vld [vmem:[#allocation94_spill] sm:$0xff] }
 0x271   : > { %v2012_v52 = vsel %vm2011_vm7, %v2008_v26, %v1894_v19  ;;  %vm1789_vm4 = vcmp.eq.f32.partialorder %v6764_v33, %v5223_v10  ;;  %vm1792_vm10 = vcmp.eq.f32.partialorder %v6765_v14, %v5223_v10  ;;  %vm2013_vm1 = vcmp.lt.s32.totalorder %v2010_v22, %v1897_v56  ;;  %v6768_v19 = vld [vmem:[#allocation102_spill] sm:$0xff]  ;;  %v6769_v26 = vld [vmem:[#allocation104_spill] sm:$0xff] }
 0x272   : > { %vm2015_vm8 = vcmp.lt.s32.totalorder %v2012_v52, %v1900_v59  ;;  %v1903_v9 = vsel %vm1759_vm11, %v5038_v25, 384  ;;  %v1906_v37 = vsel %vm1762_vm13, %v5049_v42, 384  ;;  %v2014_v8 = vsel %vm2013_vm1, %v2010_v22, %v1897_v56  ;;  %v6770_v36 = vld [vmem:[#allocation106_spill] sm:$0xff]  ;;  %v6781_v33 = vld [vmem:[#allocation128_spill] sm:$0xff] }
 0x273   : > { %v2016_v51 = vsel %vm2015_vm8, %v2012_v52, %v1900_v59  ;;  %vm1801_vm7 = vcmp.eq.f32.partialorder %v6768_v19, %v5223_v10  ;;  %vm2017_vm2 = vcmp.lt.s32.totalorder %v2014_v8, %v1903_v9  ;;  %vm1807_vm12 = vcmp.eq.f32.partialorder %v6770_v36, %v5223_v10  ;;  %v6783_v14 = vld [vmem:[#allocation12_spill] sm:$0xff] }
 0x274   : > { %vm2019_vm3 = vcmp.lt.s32.totalorder %v2016_v51, %v1906_v37  ;;  %v1909_v30 = vsel %vm1765_vm15, %v5052_v4, 384  ;;  %vm6771_vm11 = vcmp.eq.f32.partialorder %v6755_v12, %v5223_v10  ;;  %v2018_v56 = vsel %vm2017_vm2, %v2014_v8, %v1903_v9  ;;  %v6772_v9 = vld [vmem:[#allocation28_spill] sm:$0xff] }
 0x275   : > { %v1912_v35 = vsel %vm6771_vm11, %v5063_v17, 384  ;;  %v2020_v59 = vsel %vm2019_vm3, %v2016_v51, %v1906_v37  ;;  %vm2273_vm13 = vcmp.lt.s32.totalorder %v2271_v54, %v2272_v3  ;;  %vm1810_vm1 = vcmp.eq.f32.partialorder %v4762_v32, %v5223_v10  ;;  %v6792_v17 = vld [vmem:[#allocation85_spill] sm:$0xff] }
 0x276   : > { %vm2021_vm8 = vcmp.lt.s32.totalorder %v2018_v56, %v1909_v30  ;;  %vm2023_vm14 = vcmp.lt.s32.totalorder %v2020_v59, %v1912_v35  ;;  %v1915_v22 = vsel %vm1771_vm5, %v5066_v43, 384  ;;  %v1918_v11 = vsel %vm1774_vm0, %v5077_v29, 384  ;;  %v6788_v29 = vld [vmem:[#allocation120_spill] sm:$0xff] }
 0x277   : > { %v2022_v12 = vsel %vm2021_vm8, %v2018_v56, %v1909_v30  ;;  %v2024_v52 = vsel %vm2023_vm14, %v2020_v59, %v1912_v35  ;;  %vm1813_vm15 = vcmp.eq.f32.partialorder %v6772_v9, %v5223_v10  ;;  %v1921_v37 = vsel %vm1777_vm6, %v5080_v23, 384  ;;  %v6775_v35 = vld [vmem:[#allocation4_spill] sm:$0xff] }
 0x278   : > { %vm2025_vm3 = vcmp.lt.s32.totalorder %v2022_v12, %v1915_v22  ;;  %vm2027_vm2 = vcmp.lt.s32.totalorder %v2024_v52, %v1918_v11  ;;  %v2274_v8 = vsel %vm2273_vm13, %v2271_v54, %v2272_v3  ;;  %vm6773_vm5 = vcmp.eq.f32.partialorder %v6759_v31, %v5223_v10  ;;  %v6776_v56 = vld [vmem:[#allocation8_spill] sm:$0xff] }
 0x279   : > { %v1924_v6 = vsel %vm6773_vm5, %v5091_v48, 384  ;;  %v2026_v58 = vsel %vm2025_vm3, %v2022_v12, %v1915_v22  ;;  %v2028_v51 = vsel %vm2027_vm2, %v2024_v52, %v1918_v11  ;;  %vm1816_vm0 = vcmp.eq.f32.partialorder %v6653_v13, %v5223_v10  ;;  %v6777_v11 = vld [vmem:[#allocation6_spill] sm:$0xff]  ;;  %v6779_v52 = vld [vmem:[#allocation129_spill] sm:$0xff] }
 0x27a   : > { %vm2029_vm11 = vcmp.lt.s32.totalorder %v2026_v58, %v1921_v37  ;;  %vm2031_vm8 = vcmp.lt.s32.totalorder %v2028_v51, %v1924_v6  ;;  %v1927_v40 = vsel %vm1783_vm9, %v5105_v46, 384  ;;  %vm6774_vm6 = vcmp.eq.f32.partialorder %v6762_v2, %v5223_v10  ;;  %v6778_v12 = vld [vmem:[#allocation10_spill] sm:$0xff] }
 0x27b   : > { %v1930_v31 = vsel %vm6774_vm6, %v5094_v38, 384  ;;  %v2030_v54 = vsel %vm2029_vm11, %v2026_v58, %v1921_v37  ;;  %v2032_v3 = vsel %vm2031_vm8, %v2028_v51, %v1924_v6  ;;  %v2275_v30 = vrot.slane %v2274_v8, 1  ;;  %v6784_v58 = vld [vmem:[#allocation131_spill] sm:$0xff]  ;;  %v6793_v13 = vld [vmem:[#allocation14_spill] sm:$0xff] }
 0x27c   : > { %vm1822_vm13 = vcmp.eq.f32.partialorder %v6656_v62, %v5223_v10  ;;  %vm2033_vm3 = vcmp.lt.s32.totalorder %v2030_v54, %v1927_v40  ;;  %vm2035_vm2 = vcmp.lt.s32.totalorder %v2032_v3, %v1930_v31  ;;  %vm1682_vm5 = vcmp.eq.f32.partialorder %v6775_v35, %v5242_v34  ;;  %v6797_v62 = vld [vmem:[#allocation22_spill] sm:$0xff] }
 0x27d   : > { %vm1688_vm14 = vcmp.eq.f32.partialorder %v6776_v56, %v5242_v34  ;;  %v1933_v61 = vsel %vm1789_vm4, %v5119_v41, 384  ;;  %v1936_v2 = vsel %vm1792_vm10, %v5108_v0, 384  ;;  %v2034_v59 = vsel %vm2033_vm3, %v2030_v54, %v1927_v40  ;;  %v6785_v40 = vld [vmem:[#allocation130_spill] sm:$0xff]  ;;  %v6805_v56 = vld [vmem:[#allocation33_spill] sm:$0xff] }
 0x27e   : > { %v2036_v22 = vsel %vm2035_vm2, %v2032_v3, %v1930_v31  ;;  %vm1685_vm9 = vcmp.eq.f32.partialorder %v6777_v11, %v5242_v34  ;;  %vm1691_vm11 = vcmp.eq.f32.partialorder %v6778_v12, %v5242_v34  ;;  %vm6780_vm8 = vcmp.eq.f32.partialorder %v6766_v28, %v5223_v10  ;;  %v6807_v11 = vld [vmem:[#allocation36_spill] sm:$0xff] }
 0x27f   : > { %v1939_v37 = vsel %vm6780_vm8, %v6779_v52, 384  ;;  %vm6782_vm4 = vcmp.eq.f32.partialorder %v6767_v18, %v5223_v10  ;;  %vm2037_vm6 = vcmp.lt.s32.totalorder %v2034_v59, %v1933_v61  ;;  %vm2039_vm10 = vcmp.lt.s32.totalorder %v2036_v22, %v1936_v2  ;;  %v6787_v18 = vld [vmem:[#allocation81_spill] sm:$0xff] }
 0x280   : > { %v1942_v6 = vsel %vm6782_vm4, %v6781_v33, 384  ;;  %v1945_v51 = vsel %vm1801_vm7, %v6784_v58, 384  ;;  %vm6786_vm2 = vcmp.eq.f32.partialorder %v6769_v26, %v5223_v10  ;;  %v2038_v31 = vsel %vm2037_vm6, %v2034_v59, %v1933_v61  ;;  %v6789_v59 = vld [vmem:[#allocation121_spill] sm:$0xff] }
 0x281   : > { %v1948_v28 = vsel %vm6786_vm2, %v6785_v40, 384  ;;  %v2040_v54 = vsel %vm2039_vm10, %v2036_v22, %v1936_v2  ;;  %vm2276_vm8 = vcmp.lt.s32.totalorder %v2274_v8, %v2275_v30  ;;  %v1951_v3 = vsel %vm1807_vm12, %v6787_v18, 384  ;;  %v6790_v22 = vld [vmem:[#allocation79_spill] sm:$0xff] }
 0x282   : > { %vm2041_vm4 = vcmp.lt.s32.totalorder %v2038_v31, %v1939_v37  ;;  %vm2043_vm3 = vcmp.lt.s32.totalorder %v2040_v54, %v1942_v6  ;;  %v1954_v19 = vsel %vm1810_vm1, %v5159_v45, 384  ;;  %v1957_v26 = vsel %vm1813_vm15, %v6788_v29, 384 }
 0x283   : > { %v2042_v61 = vsel %vm2041_vm4, %v2038_v31, %v1939_v37  ;;  %v2044_v2 = vsel %vm2043_vm3, %v2040_v54, %v1942_v6  ;;  %v1960_v36 = vsel %vm1816_vm0, %v6789_v59, 384  ;;  %vm6791_vm12 = vcmp.eq.f32.partialorder %v4420_v50, %v5223_v10  ;;  %v6794_v31 = vld [vmem:[#allocation16_spill] sm:$0xff] }
 0x284   : > { %v1963_v43 = vsel %vm6791_vm12, %v6790_v22, 384  ;;  %vm2045_vm7 = vcmp.lt.s32.totalorder %v2042_v61, %v1945_v51  ;;  %vm2047_vm6 = vcmp.lt.s32.totalorder %v2044_v2, %v1948_v28  ;;  %v5517_v32 = vsel %vm2276_vm8, %v2274_v8, %v2275_v30  ;;  %v6795_v8 = vld [vmem:[#allocation18_spill] sm:$0xff]  ;;  %v6796_v30 = vld [vmem:[#allocation20_spill] sm:$0xff] }
 0x285   : > { %v1966_v9 = vsel %vm1822_vm13, %v6792_v17, 384  ;;  %v2046_v37 = vsel %vm2045_vm7, %v2042_v61, %v1945_v51  ;;  %v2048_v6 = vsel %vm2047_vm6, %v2044_v2, %v1948_v28  ;;  %vm1697_vm0 = vcmp.eq.f32.partialorder %v6793_v13, %v5242_v34  ;;  %v6798_v51 = vld [vmem:[#allocation24_spill] sm:$0xff]  ;;  %v6802_v17 = vld [vmem:[#allocation29_spill] sm:$0xff] }
 0x286   : > { %vm2049_vm1 = vcmp.lt.s32.totalorder %v2046_v37, %v1951_v3  ;;  %vm2051_vm15 = vcmp.lt.s32.totalorder %v2048_v6, %v1954_v19  ;;  %vm1700_vm10 = vcmp.eq.f32.partialorder %v6794_v31, %v5242_v34  ;;  %vm1703_vm3 = vcmp.eq.f32.partialorder %v6795_v8, %v5242_v34  ;;  %v6810_v13 = vld [vmem:[#allocation45_spill] sm:$0xff] }
 0x287   : > { %v2050_v50 = vsel %vm2049_vm1, %v2046_v37, %v1951_v3  ;;  %v2052_v54 = vsel %vm2051_vm15, %v2048_v6, %v1954_v19  ;;  %vm1706_vm2 = vcmp.eq.f32.partialorder %v6796_v30, %v5242_v34  ;;  %vm1709_vm4 = vcmp.eq.f32.partialorder %v6797_v62, %v5242_v34  ;;  %v6799_v3 = vld [vmem:[#allocation26_spill] sm:$0xff]  ;;  %v6801_v37 = vld [vmem:[#allocation112_spill] sm:$0xff]  ;;  %v6815_v30 = vld [vmem:[#allocation53_spill] sm:$0xff] }
 0x288   : > { %vm2053_vm8 = vcmp.lt.s32.totalorder %v2050_v50, %v1957_v26  ;;  %vm2055_vm13 = vcmp.lt.s32.totalorder %v2052_v54, %v1960_v36  ;;  %vm1712_vm12 = vcmp.eq.f32.partialorder %v6798_v51, %v5242_v34  ;;  %vm1715_vm7 = vcmp.eq.f32.partialorder %v6799_v3, %v5242_v34  ;;  %v6800_v19 = vld [vmem:[#allocation110_spill] sm:$0xff]  ;;  %v6816_v62 = vld [vmem:[#allocation108_spill] sm:$0xff]  ;;  %v6820_v51 = vld [vmem:[#allocation55_spill] sm:$0xff] }
 0x289   : > { %v2054_v28 = vsel %vm2053_vm8, %v2050_v50, %v1957_v26  ;;  %v2056_v61 = vsel %vm2055_vm13, %v2052_v54, %v1960_v36  ;;  %v1826_v2 = vsel %vm1682_vm5, %v6800_v19, 384  ;;  %v1832_v6 = vsel %vm1688_vm14, %v6801_v37, 384  ;;  %v6803_v26 = vld [vmem:[#allocation111_spill] sm:$0xff]  ;;  %v6804_v50 = vld [vmem:[#allocation113_spill] sm:$0xff] }
 0x28a   : > { %vm2057_vm6 = vcmp.lt.s32.totalorder %v2054_v28, %v1963_v43  ;;  %vm2059_vm1 = vcmp.lt.s32.totalorder %v2056_v61, %v1966_v9  ;;  %vm1718_vm15 = vcmp.eq.f32.partialorder %v6802_v17, %v5242_v34  ;;  %v1829_v36 = vsel %vm1685_vm9, %v6803_v26, 384  ;;  %v6823_v3 = vld [vmem:[#allocation59_spill] sm:$0xff] }
 0x28b   : > { %v1835_v35 = vsel %vm1691_vm11, %v6804_v50, 384  ;;  %v2058_v54 = vsel %vm2057_vm6, %v2054_v28, %v1963_v43  ;;  %v2060_v19 = vsel %vm2059_vm1, %v2056_v61, %v1966_v9  ;;  %vm1721_vm14 = vcmp.eq.f32.partialorder %v6805_v56, %v5242_v34 }
 0x28c   : > { %vm6806_vm5 = vcmp.eq.f32.partialorder %v6783_v14, %v5242_v34  ;;  %vm2061_vm8 = vcmp.lt.s32.totalorder %v2058_v54, %v2060_v19  ;;  %vm1724_vm9 = vcmp.eq.f32.partialorder %v6807_v11, %v5242_v34  ;;  %v1841_v12 = vsel %vm1697_vm0, %v4881_v1, 384  ;;  %v6808_v14 = vld [vmem:[#allocation40_spill] sm:$0xff]  ;;  %v6828_v11 = vld [vmem:[#allocation65_spill] sm:$0xff] }
 0x28d   : > { %v1838_v37 = vsel %vm6806_vm5, %v6739_v55, 384  ;;  %v1844_v43 = vsel %vm1700_vm10, %v4884_v60, 384  ;;  %vm2072_vm11 = vcmp.lt.s32.totalorder %v1826_v2, %v1832_v6  ;;  %v5572_v9 = vsel %vm2061_vm8, %v2058_v54, %v2060_v19  ;;  %v6809_v55 = vld [vmem:[#allocation43_spill] sm:$0xff] }
 0x28e   : > { %vm1727_vm13 = vcmp.eq.f32.partialorder %v6808_v14, %v5242_v34  ;;  %v2073_v28 = vsel %vm2072_vm11, %v1826_v2, %v1832_v6  ;;  %vm2074_vm6 = vcmp.lt.s32.totalorder %v1829_v36, %v1835_v35  ;;  %v3010_v61 = vcombine.low %v5223_v10, %v5242_v34  ;;  %v6811_v6 = vld [vmem:[#allocation83_spill] sm:$0xff] }
 0x28f   : > { %v1847_v31 = vsel %vm1703_vm3, %v4887_v20, 384  ;;  %v2075_v19 = vsel %vm2074_vm6, %v1829_v36, %v1835_v35  ;;  %vm2076_vm10 = vcmp.lt.s32.totalorder %v2073_v28, %v1838_v37  ;;  %v6511_v2 = vmov 0.0|0.0   ;;  %v6812_v60 = vld [vmem:[#allocation47_spill] sm:$0xff]  ;;  %v6813_v36 = vld [vmem:[#allocation49_spill] sm:$0xff] }
 0x290   : > { %v2077_v54 = vsel %vm2076_vm10, %v2073_v28, %v1838_v37  ;;  %vm2078_vm5 = vcmp.lt.s32.totalorder %v2075_v19, %v1841_v12  ;;  %3939 = vmatprep.subr.bf16.mxu0 %v6511_v2  ;;  %v3017_v10 = vrot.slane %v3010_v61, %v6811_v6  ;;  %vm2376_vm8 = vcmp.eq.s32.totalorder %v5080_v23, %v5517_v32  ;;  %v6814_v61 = vld [vmem:[#allocation51_spill] sm:$0xff] }
 0x291   : > { %v1850_v8 = vsel %vm1706_vm2, %v4890_v7, 384  ;;  %v2079_v37 = vsel %vm2078_vm5, %v2075_v19, %v1841_v12  ;;  %vm2080_vm3 = vcmp.lt.s32.totalorder %v2077_v54, %v1844_v43  ;;  %vm2379_vm6 = vcmp.eq.s32.totalorder %v5091_v48, %v5517_v32  ;;  %v6831_v14 = vld [vmem:[#allocation67_spill] sm:$0xff] }
 0x292   : > { %vm1739_vm10 = vcmp.eq.f32.partialorder %v6813_v36, %v5242_v34  ;;  %v1853_v35 = vsel %vm1709_vm4, %v4909_v49, 384  ;;  %v2081_v28 = vsel %vm2080_vm3, %v2077_v54, %v1844_v43  ;;  %vm2082_vm11 = vcmp.lt.s32.totalorder %v2079_v37, %v1847_v31  ;;  %vm3940_vm0 = vmpackc.low %vm2379_vm6, %vm2376_vm8  ;;  %v5619_v49 = vld [vmem:[%s251_s26] sm:$0x7] }
 0x293   : > { %vm1742_vm1 = vcmp.eq.f32.partialorder %v6814_v61, %v5242_v34  ;;  %vm1745_vm2 = vcmp.eq.f32.partialorder %v6815_v30, %v5242_v34  ;;  %v1856_v12 = vsel %vm1712_vm12, %v4912_v21, 384  ;;  %v2083_v19 = vsel %vm2082_vm11, %v2079_v37, %v1847_v31  ;;  %6818 = vst [vmem:[#allocation89_spill] sm:$0xff] %v5619_v49  ;;  %v6821_v37 = vld [vmem:[#allocation57_spill] sm:$0xff]  ;;  %v6838_v36 = vld [vmem:[#allocation75_spill] sm:$0xff] }
 0x294   : > { %vm2084_vm5 = vcmp.lt.s32.totalorder %v2081_v28, %v1850_v8  ;;  %v6519_v2 = vmov 1.0|1.0   ;;  %v6817_v43 = vrot.slane %v6816_v62, %v6811_v6  ;;  %vm2086_vm4 = vcmp.lt.s32.totalorder %v2083_v19, %v1853_v35  ;;  %v6822_v62 = vld [vmem:[#allocation119_spill] sm:$0xff]  ;;  %v6839_v61 = vld [vmem:[#allocation77_spill] sm:$0xff] }
 0x295   : > { %3941 = vmatpush3.bf16.msk.msra.mxu0 %vm3940_vm0, %v6519_v2  ;;  %v2085_v7 = vsel %vm2084_vm5, %v2081_v28, %v1850_v8  ;;  %v6819_v20 = vmov 0.0|0.0   ;;  %vm2382_vm8 = vcmp.eq.s32.totalorder %v5105_v46, %v5517_v32  ;;  %vm2385_vm12 = vcmp.eq.s32.totalorder %v5094_v38, %v5517_v32 }
 0x296   : > { %v3025_v54 = vcombine.low %v3017_v10, %v6817_v43  ;;  %3942 = vmatprep.subr.bf16.mxu0 %v6819_v20  ;;  %vm1748_vm11 = vcmp.eq.f32.partialorder %v6820_v51, %v5242_v34  ;;  %v1859_v31 = vsel %vm1715_vm7, %v4915_v63, 384  ;;  %v2087_v10 = vsel %vm2086_vm4, %v2083_v19, %v1853_v35  ;;  %vm3943_vm7 = vmpackc.low %vm2385_vm12, %vm2382_vm8 }
 0x297   : > { %vm2088_vm0 = vcmp.lt.s32.totalorder %v2085_v7, %v1856_v12  ;;  %v1862_v28 = vsel %vm1718_vm15, %v4918_v15, 384  ;;  %v1865_v43 = vsel %vm1721_vm14, %v6822_v62, 384  ;;  %vm2090_vm6 = vcmp.lt.s32.totalorder %v2087_v10, %v1859_v31 }
 0x298   : > { %v3032_v8 = vrot.slane %v3025_v54, %v6811_v6  ;;  %v2089_v2 = vsel %vm2088_vm0, %v2085_v7, %v1856_v12  ;;  %vm1754_vm5 = vcmp.eq.f32.partialorder %v6823_v3, %v5242_v34  ;;  %v6824_v6 = vld [vmem:[#allocation61_spill] sm:$0xff]  ;;  %v2091_v35 = vsel %vm2090_vm6, %v2087_v10, %v1859_v31  ;;  %v6827_v12 = vld [vmem:[#allocation63_spill] sm:$0xff]  ;;  %v6845_v3 = vld [vmem:[#allocation92_spill] sm:$0xff] }
 0x299   : > { %vm1757_vm4 = vcmp.eq.f32.partialorder %v6824_v6, %v5242_v34  ;;  %vm2092_vm3 = vcmp.lt.s32.totalorder %v2089_v2, %v1862_v28  ;;  %v6825_v19 = vmov 1.0|1.0   ;;  %vm2388_vm15 = vcmp.eq.s32.totalorder %v5119_v41, %v5517_v32 }
 0x29a   : > { %3944 = vmatpush3.bf16.msk.msra.mxu0 %vm3943_vm7, %v6825_v19  ;;  %v5649_v17 = vadd.f32 %v3032_v8, %v5619_v49  ;;  %v1868_v7 = vsel %vm1724_vm9, %v4927_v27, 384  ;;  %v2093_v56 = vsel %vm2092_vm3, %v2089_v2, %v1862_v28  ;;  %vm2094_vm14 = vcmp.lt.s32.totalorder %v2091_v35, %v1865_v43 }
 0x29b   : > { %3945 = vmatprep.subr.bf16.mxu0 %v6819_v20  ;;  %vm2391_vm8 = vcmp.eq.s32.totalorder %v5108_v0, %v5517_v32  ;;  %v1871_v54 = vsel %vm1727_vm13, %v4951_v24, 384  ;;  %v2095_v31 = vsel %vm2094_vm14, %v2091_v35, %v1865_v43  ;;  %vm2096_vm0 = vcmp.lt.s32.totalorder %v2093_v56, %v1868_v7  ;;  %v6834_v35 = vld [vmem:[#allocation71_spill] sm:$0xff] }
 0x29c   : > { %6826 = vst [vmem:[#allocation87_spill] sm:$0xff] %v5649_v17  ;;  %vm6829_vm3 = vcmp.eq.f32.partialorder %v6809_v55, %v5242_v34  ;;  %vm6830_vm6 = vcmp.eq.f32.partialorder %v6810_v13, %v5242_v34  ;;  %v2097_v8 = vsel %vm2096_vm0, %v2093_v56, %v1868_v7  ;;  %vm2098_vm7 = vcmp.lt.s32.totalorder %v2095_v31, %v1871_v54  ;;  %vm3946_vm13 = vmpackc.low %vm2391_vm8, %vm2388_vm15  ;;  %v6832_v55 = vld [vmem:[#allocation69_spill] sm:$0xff]  ;;  %v6835_v7 = vld [vmem:[#allocation32_spill] sm:$0xff] }
 0x29d   : > { %v1874_v2 = vsel %vm6829_vm3, %v4963_v57, 384  ;;  %v1877_v10 = vsel %vm6830_vm6, %v4979_v5, 384  ;;  %vm1766_vm14 = vcmp.eq.f32.partialorder %v6831_v14, %v5242_v34  ;;  %v2099_v28 = vsel %vm2098_vm7, %v2095_v31, %v1871_v54  ;;  %v6836_v31 = vld [vmem:[#allocation73_spill] sm:$0xff] }
 0x29e   : > { %vm2100_vm9 = vcmp.lt.s32.totalorder %v2097_v8, %v1874_v2  ;;  %3947 = vmatpush3.bf16.msk.msra.mxu0 %vm3946_vm13, %v6825_v19  ;;  %vm2394_vm3 = vcmp.eq.s32.totalorder %v6779_v52, %v5517_v32  ;;  %vm2397_vm12 = vcmp.eq.s32.totalorder %v6781_v33, %v5517_v32  ;;  %vm1769_vm0 = vcmp.eq.f32.partialorder %v6832_v55, %v5242_v34  ;;  %v6852_v14 = vld [vmem:[#allocation105_spill] sm:$0xff]  ;;  %v6853_v55 = vld [vmem:[#allocation126_spill] sm:$0xff] }
 0x29f   : > { %vm6833_vm15 = vcmp.eq.f32.partialorder %v6812_v60, %v5242_v34  ;;  %v2101_v43 = vsel %vm2100_vm9, %v2097_v8, %v1874_v2  ;;  %vm2102_vm8 = vcmp.lt.s32.totalorder %v2099_v28, %v1877_v10  ;;  %3948 = vmatprep.subr.bf16.mxu0 %v6819_v20  ;;  %vm1772_vm6 = vcmp.eq.f32.partialorder %v6834_v35, %v5242_v34  ;;  %v6837_v2 = vld [vmem:[#allocation39_spill] sm:$0xff] }
 0x2a0   : > { %v1880_v13 = vsel %vm6833_vm15, %v4982_v16, 384  ;;  %v1883_v56 = vsel %vm1739_vm10, %v6835_v7, 384  ;;  %v2103_v54 = vsel %vm2102_vm8, %v2099_v28, %v1877_v10  ;;  %vm1775_vm13 = vcmp.eq.f32.partialorder %v6836_v31, %v5242_v34  ;;  %vm3949_vm10 = vmpackc.low %vm2397_vm12, %vm2394_vm3 }
 0x2a1   : > { %vm2104_vm7 = vcmp.lt.s32.totalorder %v2101_v43, %v1880_v13  ;;  %v1886_v60 = vsel %vm1742_vm1, %v4996_v47, 384  ;;  %v1889_v8 = vsel %vm1745_vm2, %v6837_v2, 384  ;;  %vm2106_vm9 = vcmp.lt.s32.totalorder %v2103_v54, %v1883_v56 }
 0x2a2   : > { %v2105_v17 = vsel %vm2104_vm7, %v2101_v43, %v1880_v13  ;;  %vm1778_vm15 = vcmp.eq.f32.partialorder %v6838_v36, %v5242_v34  ;;  %v2107_v10 = vsel %vm2106_vm9, %v2103_v54, %v1883_v56  ;;  %3950 = vmatpush3.bf16.msk.msra.mxu0 %vm3949_vm10, %v6825_v19  ;;  %vm2400_vm1 = vcmp.eq.s32.totalorder %v6784_v58, %v5517_v32  ;;  %v6840_v13 = vld [vmem:[#allocation80_spill] sm:$0xff]  ;;  %v6856_v36 = vld [vmem:[#allocation85_spill] sm:$0xff] }
 0x2a3   : > { %vm2108_vm8 = vcmp.lt.s32.totalorder %v2105_v17, %v1886_v60  ;;  %vm2403_vm2 = vcmp.eq.s32.totalorder %v6785_v40, %v5517_v32  ;;  %v1892_v30 = vsel %vm1748_vm11, %v5010_v44, 384  ;;  %vm2110_vm12 = vcmp.lt.s32.totalorder %v2107_v10, %v1889_v8  ;;  %3951 = vmatprep.subr.bf16.mxu0 %v6819_v20  ;;  %v6842_v54 = vld [vmem:[#allocation84_spill] sm:$0xff] }
 0x2a4   : > { %v2109_v28 = vsel %vm2108_vm8, %v2105_v17, %v1886_v60  ;;  %vm1784_vm3 = vcmp.eq.f32.partialorder %v6840_v13, %v5242_v34  ;;  %vm6841_vm9 = vcmp.eq.f32.partialorder %v6821_v37, %v5242_v34  ;;  %v2111_v56 = vsel %vm2110_vm12, %v2107_v10, %v1889_v8  ;;  %v6843_v17 = vld [vmem:[#allocation122_spill] sm:$0xff]  ;;  %vm3952_vm8 = vmpackc.low %vm2403_vm2, %vm2400_vm1  ;;  %v6844_v37 = vld [vmem:[#allocation88_spill] sm:$0xff] }
 0x2a5   : > { %v1895_v43 = vsel %vm6841_vm9, %v5021_v53, 384  ;;  %vm2112_vm10 = vcmp.lt.s32.totalorder %v2109_v28, %v1892_v30  ;;  %vm1787_vm7 = vcmp.eq.f32.partialorder %v6842_v54, %v5242_v34  ;;  %v1898_v51 = vsel %vm1754_vm5, %v5024_v39, 384 }
 0x2a6   : > { %v1901_v60 = vsel %vm1757_vm4, %v6843_v17, 384  ;;  %v2113_v49 = vsel %vm2112_vm10, %v2109_v28, %v1892_v30  ;;  %vm2114_vm11 = vcmp.lt.s32.totalorder %v2111_v56, %v1895_v43  ;;  %3953 = vmatpush3.bf16.msk.msra.mxu0 %vm3952_vm8, %v6825_v19  ;;  %vm2406_vm5 = vcmp.eq.s32.totalorder %v6787_v18, %v5517_v32  ;;  %v6847_v30 = vld [vmem:[#allocation96_spill] sm:$0xff] }
 0x2a7   : > { %v2115_v8 = vsel %vm2114_vm11, %v2111_v56, %v1895_v43  ;;  %vm2116_vm9 = vcmp.lt.s32.totalorder %v2113_v49, %v1898_v51  ;;  %vm2409_vm4 = vcmp.eq.s32.totalorder %v5159_v45, %v5517_v32  ;;  %vm6846_vm1 = vcmp.eq.f32.partialorder %v6827_v12, %v5242_v34  ;;  %3954 = vmatprep.subr.bf16.mxu0 %v6819_v20  ;;  %v6849_v56 = vld [vmem:[#allocation100_spill] sm:$0xff]  ;;  %v6850_v12 = vld [vmem:[#allocation125_spill] sm:$0xff] }
 0x2a8   : > { %v1904_v6 = vsel %vm6846_vm1, %v5038_v25, 384  ;;  %v2117_v10 = vsel %vm2116_vm9, %v2113_v49, %v1898_v51  ;;  %vm2118_vm2 = vcmp.lt.s32.totalorder %v2115_v8, %v1901_v60  ;;  %vm1796_vm11 = vcmp.eq.f32.partialorder %v6847_v30, %v5242_v34  ;;  %vm3955_vm1 = vmpackc.low %vm2409_vm4, %vm2406_vm5 }
 0x2a9   : > { %vm6848_vm8 = vcmp.eq.f32.partialorder %v6828_v11, %v5242_v34  ;;  %v2119_v43 = vsel %vm2118_vm2, %v2115_v8, %v1901_v60  ;;  %vm2120_vm12 = vcmp.lt.s32.totalorder %v2117_v10, %v1904_v6  ;;  %vm1799_vm10 = vcmp.eq.f32.partialorder %v6849_v56, %v5242_v34  ;;  %v6851_v11 = vld [vmem:[#allocation103_spill] sm:$0xff] }
 0x2aa   : > { %v1907_v28 = vsel %vm6848_vm8, %v5049_v42, 384  ;;  %v1910_v49 = vsel %vm1766_vm14, %v5052_v4, 384  ;;  %v1913_v51 = vsel %vm1769_vm0, %v6850_v12, 384  ;;  %v2121_v25 = vsel %vm2120_vm12, %v2117_v10, %v1904_v6  ;;  %3956 = vmatpush3.bf16.msk.msra.mxu0 %vm3955_vm1, %v6825_v19 }
 0x2ab   : > { %vm2122_vm9 = vcmp.lt.s32.totalorder %v2119_v43, %v1907_v28  ;;  %vm1802_vm2 = vcmp.eq.f32.partialorder %v6851_v11, %v5242_v34  ;;  %vm2124_vm8 = vcmp.lt.s32.totalorder %v2121_v25, %v1910_v49  ;;  %vm2412_vm14 = vcmp.eq.s32.totalorder %v6788_v29, %v5517_v32  ;;  %3957 = vmatprep.subr.bf16.mxu0 %v6819_v20 }
 0x2ac   : > { %v2123_v60 = vsel %vm2122_vm9, %v2119_v43, %v1907_v28  ;;  %vm2415_vm0 = vcmp.eq.s32.totalorder %v6789_v59, %v5517_v32  ;;  %vm1805_vm12 = vcmp.eq.f32.partialorder %v6852_v14, %v5242_v34  ;;  %v1916_v8 = vsel %vm1772_vm6, %v6853_v55, 384  ;;  %v6854_v28 = vld [vmem:[#allocation127_spill] sm:$0xff] }
 0x2ad   : > { %v2125_v6 = vsel %vm2124_vm8, %v2121_v25, %v1910_v49  ;;  %vm2126_vm5 = vcmp.lt.s32.totalorder %v2123_v60, %v1913_v51  ;;  %v2063_v10 = vrot.slane %v5572_v9, 4  ;;  %v1919_v43 = vsel %vm1775_vm13, %v6854_v28, 384  ;;  %vm3958_vm1 = vmpackc.low %vm2415_vm0, %vm2412_vm14  ;;  %v6857_v49 = vld [vmem:[#allocation107_spill] sm:$0xff] }
 0x2ae   : > { %v2127_v12 = vsel %vm2126_vm5, %v2123_v60, %v1913_v51  ;;  %vm2128_vm4 = vcmp.lt.s32.totalorder %v2125_v6, %v1916_v8  ;;  %v1922_v4 = vsel %vm1778_vm15, %v5080_v23, 384  ;;  %vm6855_vm6 = vcmp.eq.f32.partialorder %v6839_v61, %v5242_v34  ;;  %3959 = vmatpush3.bf16.msk.msra.mxu0 %vm3958_vm1, %v6825_v19 }
 0x2af   : > { %v1925_v25 = vsel %vm6855_vm6, %v5091_v48, 384  ;;  %v2129_v35 = vsel %vm2128_vm4, %v2125_v6, %v1916_v8  ;;  %vm2130_vm9 = vcmp.lt.s32.totalorder %v2127_v12, %v1919_v43  ;;  %vm2418_vm8 = vcmp.eq.s32.totalorder %v6790_v22, %v5517_v32  ;;  %3960 = vmatprep.subr.bf16.mxu0 %v6819_v20 }
 0x2b0   : > { %v2131_v31 = vsel %vm2130_vm9, %v2127_v12, %v1919_v43  ;;  %vm2132_vm13 = vcmp.lt.s32.totalorder %v2129_v35, %v1922_v4  ;;  %vm2421_vm15 = vcmp.eq.s32.totalorder %v6856_v36, %v5517_v32  ;;  %vm1808_vm5 = vcmp.eq.f32.partialorder %v6857_v49, %v5242_v34 }
 0x2b1   : > { %v1928_v61 = vsel %vm1784_vm3, %v5105_v46, 384  ;;  %v2133_v51 = vsel %vm2132_vm13, %v2129_v35, %v1922_v4  ;;  %vm2134_vm14 = vcmp.lt.s32.totalorder %v2131_v31, %v1925_v25  ;;  %vm2064_vm0 = vcmp.lt.s32.totalorder %v5572_v9, %v2063_v10  ;;  %vm3961_vm9 = vmpackc.low %vm2421_vm15, %vm2418_vm8  ;;  %v6859_v4 = vld [vmem:[#allocation110_spill] sm:$0xff]  ;;  %v5850_v35 = vld [vmem:[%s4080_s19] sm:$0xff] }
 0x2b2   : > { %v1931_v12 = vsel %vm1787_vm7, %v5094_v38, 384  ;;  %v2135_v60 = vsel %vm2134_vm14, %v2131_v31, %v1925_v25  ;;  %vm2136_vm4 = vcmp.lt.s32.totalorder %v2133_v51, %v1928_v61  ;;  %vm6858_vm6 = vcmp.eq.f32.partialorder %v6844_v37, %v5242_v34  ;;  %3962 = vmatpush3.bf16.msk.msra.mxu0 %vm3961_vm9, %v6825_v19 }
 0x2b3   : > { %v1934_v13 = vsel %vm6858_vm6, %v5119_v41, 384  ;;  %v2137_v8 = vsel %vm2136_vm4, %v2133_v51, %v1928_v61  ;;  %vm2138_vm3 = vcmp.lt.s32.totalorder %v2135_v60, %v1931_v12  ;;  %v2716_v20 = vsub.s32 7, %v6859_v4  ;;  %v6862_v51 = vld [vmem:[#allocation30_spill] sm:$0xff] }
 0x2b4   : > { %vm6860_vm1 = vcmp.eq.f32.partialorder %v6845_v3, %v5242_v34  ;;  %v1940_v54 = vsel %vm1796_vm11, %v6779_v52, 384  ;;  %v2139_v43 = vsel %vm2138_vm3, %v2135_v60, %v1931_v12  ;;  %vm2140_vm7 = vcmp.lt.s32.totalorder %v2137_v8, %v1934_v13  ;;  %v6861_v3 = vld [vmem:[#allocation109_spill] sm:$0xff] }
 0x2b5   : > { %v1937_v6 = vsel %vm6860_vm1, %v5108_v0, 384  ;;  %v2065_v37 = vsel %vm2064_vm0, %v5572_v9, %v2063_v10  ;;  %v2141_v25 = vsel %vm2140_vm7, %v2137_v8, %v1934_v13  ;;  %v5853_v31 = vrot.slane %v5850_v35, %v2716_v20  ;;  %v6863_v13 = vld [vmem:[#allocation34_spill] sm:$0xff]  ;;  %v6864_v20 = vld [vmem:[#allocation37_spill] sm:$0xff] }
 0x2b6   : > { %vm2142_vm13 = vcmp.lt.s32.totalorder %v2139_v43, %v1937_v6  ;;  %vm1811_vm8 = vcmp.eq.f32.partialorder %v6861_v3, %v5242_v34  ;;  %v1943_v30 = vsel %vm1799_vm10, %v6781_v33, 384  ;;  %vm2144_vm11 = vcmp.lt.s32.totalorder %v2141_v25, %v1940_v54 }
 0x2b7   : > { %v2143_v61 = vsel %vm2142_vm13, %v2139_v43, %v1937_v6  ;;  %vm1814_vm15 = vcmp.eq.f32.partialorder %v6862_v51, %v5242_v34  ;;  %v1946_v9 = vsel %vm1802_vm2, %v6784_v58, 384  ;;  %v2145_v10 = vsel %vm2144_vm11, %v2141_v25, %v1940_v54  ;;  %2789 = vmatprep.mubr.f32.mxu1 %v5853_v31  ;;  %v6865_v54 = vld [vmem:[#allocation41_spill] sm:$0xff] }
 0x2b8   : > { %vm2146_vm14 = vcmp.lt.s32.totalorder %v2143_v61, %v1943_v30  ;;  %v2066_v12 = vrot.slane %v2065_v37, 2  ;;  %v1949_v56 = vsel %vm1805_vm12, %v6785_v40, 384  ;;  %vm2148_vm10 = vcmp.lt.s32.totalorder %v2145_v10, %v1946_v9 }
 0x2b9   : > { %v2147_v60 = vsel %vm2146_vm14, %v2143_v61, %v1943_v30  ;;  %vm1817_vm0 = vcmp.eq.f32.partialorder %v6863_v13, %v5242_v34  ;;  %v1952_v11 = vsel %vm1808_vm5, %v6787_v18, 384  ;;  %v2149_v8 = vsel %vm2148_vm10, %v2145_v10, %v1946_v9 }
 0x2ba   : > { %vm2150_vm2 = vcmp.lt.s32.totalorder %v2147_v60, %v1949_v56  ;;  %vm1820_vm4 = vcmp.eq.f32.partialorder %v6864_v20, %v5242_v34  ;;  %v1955_v14 = vsel %vm1811_vm8, %v5159_v45, 384  ;;  %vm2152_vm12 = vcmp.lt.s32.totalorder %v2149_v8, %v1952_v11 }
 0x2bb   : > { %v2151_v6 = vsel %vm2150_vm2, %v2147_v60, %v1949_v56  ;;  %vm1823_vm6 = vcmp.eq.f32.partialorder %v6865_v54, %v5242_v34  ;;  %v1958_v49 = vsel %vm1814_vm15, %v6788_v29, 384  ;;  %v2153_v43 = vsel %vm2152_vm12, %v2149_v8, %v1952_v11 }
 0x2bc   : > { %vm2154_vm5 = vcmp.lt.s32.totalorder %v2151_v6, %v1955_v14  ;;  %vm2067_vm3 = vcmp.lt.s32.totalorder %v2065_v37, %v2066_v12  ;;  %v1961_v25 = vsel %vm1817_vm0, %v6789_v59, 384  ;;  %vm2156_vm9 = vcmp.lt.s32.totalorder %v2153_v43, %v1958_v49 }
 0x2bd   : > { %v2155_v30 = vsel %vm2154_vm5, %v2151_v6, %v1955_v14  ;;  %v1964_v3 = vsel %vm1820_vm4, %v6790_v22, 384  ;;  %v2157_v61 = vsel %vm2156_vm9, %v2153_v43, %v1958_v49  ;;  %v1967_v9 = vsel %vm1823_vm6, %v6856_v36, 384  ;;  %v6867_v49 = vld [vmem:[#allocation114_spill] sm:$0xff]  ;;  %v6868_v43 = vld [vmem:[#allocation115_spill] sm:$0xff] }
 0x2be   : > { %vm2158_vm1 = vcmp.lt.s32.totalorder %v2155_v30, %v1961_v25  ;;  %vm2160_vm7 = vcmp.lt.s32.totalorder %v2157_v61, %v1964_v3  ;;  %v2068_v56 = vsel %vm2067_vm3, %v2065_v37, %v2066_v12  ;;  %v6866_v12 = vld [vmem:[#allocation112_spill] sm:$0xff] }
 0x2bf   : > { %v2159_v10 = vsel %vm2158_vm1, %v2155_v30, %v1961_v25  ;;  %v2161_v60 = vsel %vm2160_vm7, %v2157_v61, %v1964_v3  ;;  %v2069_v51 = vrot.slane %v2068_v56, 1  ;;  %v6869_v25 = vld [vmem:[#allocation116_spill] sm:$0xff]  ;;  %v2712_v30 = vsub.s32 3, %v6859_v4 }
 0x2c0   : > { %vm2162_vm13 = vcmp.lt.s32.totalorder %v2159_v10, %v1967_v9  ;;  %v4001_v3 = vld [vmem:[%s4080_s19 + $0x8] sm:$0xf] }
 0x2c1   : > { %v2163_v34 = vsel %vm2162_vm13, %v2159_v10, %v1967_v9  ;;  %vm2070_vm15 = vcmp.lt.s32.totalorder %v2068_v56, %v2069_v51  ;;  %v5939_v61 = vrot.slane %v4001_v3, %v2712_v30  ;;  %v6870_v9 = vld [vmem:[#allocation117_spill] sm:$0xff]  ;;  %v6871_v10 = vld [vmem:[#allocation118_spill] sm:$0xff] }
 0x2c2   : > { %vm2164_vm8 = vcmp.lt.s32.totalorder %v2161_v60, %v2163_v34  ;;  %v5893_v14 = vsel %vm2070_vm15, %v2068_v56, %v2069_v51  ;;  %v6872_v56 = vmov 0.0   ;;  %v6875_v51 = vld [vmem:[#allocation125_spill] sm:$0xff] }
 0x2c3   : > { %v2165_v13 = vsel %vm2164_vm8, %v2161_v60, %v2163_v34  ;;  %vm2278_vm10 = vcmp.eq.s32.totalorder %v6859_v4, %v5893_v14  ;;  %vm2281_vm0 = vcmp.eq.s32.totalorder %v6803_v26, %v5893_v14  ;;  %vm2284_vm7 = vcmp.eq.s32.totalorder %v6866_v12, %v5893_v14  ;;  %v6873_v60 = vld [vmem:[#allocation123_spill] sm:$0xff]  ;;  %v6874_v34 = vld [vmem:[#allocation124_spill] sm:$0xff] }
 0x2c4   : > { %v2166_v11 = vrot.slane %v2165_v13, 4  ;;  %vm3813_vm6 = vmpackc.low %vm2281_vm0, %vm2278_vm10  ;;  %vm2287_vm13 = vcmp.eq.s32.totalorder %v6804_v50, %v5893_v14  ;;  %vm2290_vm10 = vcmp.eq.s32.totalorder %v6867_v49, %v5893_v14  ;;  %vm2293_vm0 = vcmp.eq.s32.totalorder %v4881_v1, %v5893_v14 }
 0x2c5   : > { %vm3817_vm15 = vmpackc.low %vm2287_vm13, %vm2284_vm7  ;;  %vm4030_vm7 = vmmov 0  }
 0x2c6   : > { %vm2167_vm11 = vcmp.lt.s32.totalorder %v2165_v13, %v2166_v11  ;;  %3808 = vmatprep.mubr.msk.f32.mxu0 %vm4030_vm7, %v6872_v56  ;;  %vm2317_vm7 = vcmp.eq.s32.totalorder %v6822_v62, %v5893_v14 }
 0x2c7   : > { %v2168_v8 = vsel %vm2167_vm11, %v2165_v13, %v2166_v11  ;;  %3809 = vmatmul.mubr.f32.vlgmr.msra.gmra.mrb[88].mxu0 %v5939_v61  ;;  %v6071_v13 = vrot.slane %v5850_v35, %v2712_v30 }
 0x2c8   : > { %v2169_v20 = vrot.slane %v2168_v8, 2 }
 0x2ca   : > { %vm2170_vm14 = vcmp.lt.s32.totalorder %v2168_v8, %v2169_v20 }
 0x2cb   : > { %v2171_v6 = vsel %vm2170_vm14, %v2168_v8, %v2169_v20 }
 0x2cc   : > { %v2172_v54 = vrot.slane %v2171_v6, 1 }
 0x2ce   : > { %vm2173_vm2 = vcmp.lt.s32.totalorder %v2171_v6, %v2172_v54 }
 0x2cf   : > { %v5899_v37 = vsel %vm2173_vm2, %v2171_v6, %v2172_v54 }
 0x2d0   : > { %vm2279_vm4 = vcmp.eq.s32.totalorder %v6859_v4, %v5899_v37  ;;  %vm2282_vm12 = vcmp.eq.s32.totalorder %v6803_v26, %v5899_v37  ;;  %vm2285_vm5 = vcmp.eq.s32.totalorder %v6866_v12, %v5899_v37  ;;  %vm2288_vm3 = vcmp.eq.s32.totalorder %v6804_v50, %v5899_v37 }
 0x2d1   : > { %vm3811_vm9 = vmpackc.low %vm2282_vm12, %vm2279_vm4  ;;  %vm2291_vm8 = vcmp.eq.s32.totalorder %v6867_v49, %v5899_v37  ;;  %vm2294_vm11 = vcmp.eq.s32.totalorder %v4881_v1, %v5899_v37  ;;  %vm2297_vm2 = vcmp.eq.s32.totalorder %v6868_v43, %v5899_v37  ;;  %vm2300_vm4 = vcmp.eq.s32.totalorder %v6869_v25, %v5899_v37 }
 0x2d2   : > { %3812 = vmatprep.subr.msk.bf16.mxu1 %vm3811_vm9, %v6825_v19  ;;  %vm3815_vm1 = vmpackc.low %vm2288_vm3, %vm2285_vm5  ;;  %vm2296_vm5 = vcmp.eq.s32.totalorder %v6868_v43, %v5893_v14  ;;  %vm2299_vm3 = vcmp.eq.s32.totalorder %v6869_v25, %v5893_v14  ;;  %vm2303_vm9 = vcmp.eq.s32.totalorder %v6870_v9, %v5899_v37 }
 0x2d3   : > { %3814 = vmatpush1.bf16.msk.msra.mxu1 %vm3813_vm6, %v6825_v19  ;;  %vm3819_vm14 = vmpackc.low %vm2294_vm11, %vm2291_vm8  ;;  %vm2302_vm11 = vcmp.eq.s32.totalorder %v6870_v9, %v5893_v14 }
 0x2d4   : > { %3816 = vmatprep.subr.msk.bf16.mxu1 %vm3815_vm1, %v6825_v19  ;;  %vm3821_vm12 = vmpackc.low %vm2293_vm0, %vm2290_vm10  ;;  %vm2306_vm1 = vcmp.eq.s32.totalorder %v6871_v10, %v5899_v37  ;;  %vm2312_vm10 = vcmp.eq.s32.totalorder %v4915_v63, %v5899_v37 }
 0x2d5   : > { %vm3823_vm6 = vmpackc.low %vm2300_vm4, %vm2297_vm2  ;;  %vm2308_vm4 = vcmp.eq.s32.totalorder %v4912_v21, %v5893_v14 }
 0x2d6   : > { %vm3825_vm13 = vmpackc.low %vm2299_vm3, %vm2296_vm5  ;;  %vm2318_vm5 = vcmp.eq.s32.totalorder %v6822_v62, %v5899_v37 }
 0x2d7   : > { %3818 = vmatpush1.bf16.msk.msra.mxu1 %vm3817_vm15, %v6825_v19  ;;  %vm3827_vm8 = vmpackc.low %vm2306_vm1, %vm2303_vm9  ;;  %vm2305_vm15 = vcmp.eq.s32.totalorder %v6871_v10, %v5893_v14  ;;  %vm2314_vm1 = vcmp.eq.s32.totalorder %v4918_v15, %v5893_v14 }
 0x2d8   : > { %3820 = vmatprep.subr.msk.bf16.mxu1 %vm3819_vm14, %v6825_v19  ;;  %vm2309_vm14 = vcmp.eq.s32.totalorder %v4912_v21, %v5899_v37  ;;  %vm3829_vm0 = vmpackc.low %vm2305_vm15, %vm2302_vm11 }
 0x2d9   : > { %vm3831_vm2 = vmpackc.low %vm2312_vm10, %vm2309_vm14  ;;  %vm2320_vm14 = vcmp.eq.s32.totalorder %v4927_v27, %v5893_v14  ;;  %vm2323_vm10 = vcmp.eq.s32.totalorder %v4951_v24, %v5893_v14 }
 0x2da   : > { %vm3837_vm11 = vmpackc.low %vm2317_vm7, %vm2314_vm1 }
 0x2db   : > { %3822 = vmatpush1.bf16.msk.msra.mxu1 %vm3821_vm12, %v6825_v19  ;;  %vm2311_vm12 = vcmp.eq.s32.totalorder %v4915_v63, %v5893_v14 }
 0x2dc   : > { %3824 = vmatprep.subr.msk.bf16.mxu1 %vm3823_vm6, %v6825_v19  ;;  %vm2315_vm6 = vcmp.eq.s32.totalorder %v4918_v15, %v5899_v37  ;;  %vm3833_vm3 = vmpackc.low %vm2311_vm12, %vm2308_vm4 }
 0x2dd   : > { %vm3835_vm9 = vmpackc.low %vm2318_vm5, %vm2315_vm6  ;;  %vm2326_vm6 = vcmp.eq.s32.totalorder %v4963_v57, %v5893_v14  ;;  %vm2329_vm5 = vcmp.eq.s32.totalorder %v4979_v5, %v5893_v14 }
 0x2de   : > { %vm3841_vm4 = vmpackc.low %vm2323_vm10, %vm2320_vm14 }
 0x2df   : > { %3826 = vmatpush1.bf16.msk.msra.mxu1 %vm3825_vm13, %v6825_v19  ;;  %vm2321_vm13 = vcmp.eq.s32.totalorder %v4927_v27, %v5899_v37  ;;  %vm3845_vm1 = vmpackc.low %vm2329_vm5, %vm2326_vm6 }
 0x2e0   : > { %3828 = vmatprep.subr.msk.bf16.mxu1 %vm3827_vm8, %v6825_v19  ;;  %vm2324_vm8 = vcmp.eq.s32.totalorder %v4951_v24, %v5899_v37 }
 0x2e1   : > { %vm3839_vm15 = vmpackc.low %vm2324_vm8, %vm2321_vm13  ;;  %vm2332_vm13 = vcmp.eq.s32.totalorder %v4982_v16, %v5893_v14  ;;  %vm2335_vm8 = vcmp.eq.s32.totalorder %v6835_v7, %v5893_v14 }
 0x2e2   : > { %vm3849_vm14 = vmpackc.low %vm2335_vm8, %vm2332_vm13 }
 0x2e3   : > { %3830 = vmatpush1.bf16.msk.msra.mxu1 %vm3829_vm0, %v6825_v19  ;;  %vm2327_vm0 = vcmp.eq.s32.totalorder %v4963_v57, %v5899_v37 }
 0x2e4   : > { %3832 = vmatprep.subr.msk.bf16.mxu1 %vm3831_vm2, %v6825_v19  ;;  %vm2330_vm2 = vcmp.eq.s32.totalorder %v4979_v5, %v5899_v37 }
 0x2e5   : > { %vm3843_vm12 = vmpackc.low %vm2330_vm2, %vm2327_vm0  ;;  %vm2338_vm0 = vcmp.eq.s32.totalorder %v4996_v47, %v5893_v14  ;;  %vm2341_vm2 = vcmp.eq.s32.totalorder %v6837_v2, %v5893_v14 }
 0x2e6   : > { %vm3853_vm6 = vmpackc.low %vm2341_vm2, %vm2338_vm0 }
 0x2e7   : > { %3834 = vmatpush1.bf16.msk.msra.mxu1 %vm3833_vm3, %v6825_v19  ;;  %vm2333_vm3 = vcmp.eq.s32.totalorder %v4982_v16, %v5899_v37 }
 0x2e8   : > { %3836 = vmatprep.subr.msk.bf16.mxu1 %vm3835_vm9, %v6825_v19  ;;  %vm2336_vm9 = vcmp.eq.s32.totalorder %v6835_v7, %v5899_v37 }
 0x2e9   : > { %vm3847_vm7 = vmpackc.low %vm2336_vm9, %vm2333_vm3  ;;  %vm2344_vm3 = vcmp.eq.s32.totalorder %v5010_v44, %v5893_v14  ;;  %vm2347_vm9 = vcmp.eq.s32.totalorder %v5021_v53, %v5893_v14 }
 0x2ea   : > { %vm3857_vm13 = vmpackc.low %vm2347_vm9, %vm2344_vm3 }
 0x2eb   : > { %3838 = vmatpush1.bf16.msk.msra.mxu1 %vm3837_vm11, %v6825_v19  ;;  %vm2339_vm11 = vcmp.eq.s32.totalorder %v4996_v47, %v5899_v37 }
 0x2ec   : > { %3840 = vmatprep.subr.msk.bf16.mxu1 %vm3839_vm15, %v6825_v19  ;;  %vm2342_vm15 = vcmp.eq.s32.totalorder %v6837_v2, %v5899_v37 }
 0x2ed   : > { %vm3851_vm10 = vmpackc.low %vm2342_vm15, %vm2339_vm11  ;;  %vm2350_vm11 = vcmp.eq.s32.totalorder %v5024_v39, %v5893_v14  ;;  %vm2353_vm15 = vcmp.eq.s32.totalorder %v6843_v17, %v5893_v14 }
 0x2ee   : > { %vm3861_vm0 = vmpackc.low %vm2353_vm15, %vm2350_vm11 }
 0x2ef   : > { %3842 = vmatpush1.bf16.msk.msra.mxu1 %vm3841_vm4, %v6825_v19  ;;  %vm2345_vm4 = vcmp.eq.s32.totalorder %v5010_v44, %v5899_v37 }
 0x2f0   : > { %3844 = vmatprep.subr.msk.bf16.mxu1 %vm3843_vm12, %v6825_v19  ;;  %vm2348_vm12 = vcmp.eq.s32.totalorder %v5021_v53, %v5899_v37 }
 0x2f1   : > { %vm3855_vm5 = vmpackc.low %vm2348_vm12, %vm2345_vm4  ;;  %vm2356_vm4 = vcmp.eq.s32.totalorder %v6873_v60, %v5893_v14  ;;  %vm2359_vm12 = vcmp.eq.s32.totalorder %v5049_v42, %v5893_v14 }
 0x2f2   : > { %vm3865_vm3 = vmpackc.low %vm2359_vm12, %vm2356_vm4 }
 0x2f3   : > { %3846 = vmatpush1.bf16.msk.msra.mxu1 %vm3845_vm1, %v6825_v19  ;;  %vm2351_vm1 = vcmp.eq.s32.totalorder %v5024_v39, %v5899_v37 }
 0x2f4   : > { %3848 = vmatprep.subr.msk.bf16.mxu1 %vm3847_vm7, %v6825_v19  ;;  %vm2354_vm7 = vcmp.eq.s32.totalorder %v6843_v17, %v5899_v37 }
 0x2f5   : > { %vm3859_vm8 = vmpackc.low %vm2354_vm7, %vm2351_vm1  ;;  %vm2362_vm1 = vcmp.eq.s32.totalorder %v6874_v34, %v5893_v14  ;;  %vm2365_vm7 = vcmp.eq.s32.totalorder %v6875_v51, %v5893_v14 }
 0x2f6   : > { %vm3869_vm11 = vmpackc.low %vm2365_vm7, %vm2362_vm1 }
 0x2f7   : > { %3850 = vmatpush1.bf16.msk.msra.mxu1 %vm3849_vm14, %v6825_v19  ;;  %vm2357_vm14 = vcmp.eq.s32.totalorder %v6873_v60, %v5899_v37 }
 0x2f8   : > { %3852 = vmatprep.subr.msk.bf16.mxu1 %vm3851_vm10, %v6825_v19  ;;  %vm2360_vm10 = vcmp.eq.s32.totalorder %v5049_v42, %v5899_v37 }
 0x2f9   : > { %vm3863_vm2 = vmpackc.low %vm2360_vm10, %vm2357_vm14  ;;  %vm2368_vm14 = vcmp.eq.s32.totalorder %v6853_v55, %v5893_v14  ;;  %vm2371_vm10 = vcmp.eq.s32.totalorder %v6854_v28, %v5893_v14 }
 0x2fa   : > { %vm3873_vm4 = vmpackc.low %vm2371_vm10, %vm2368_vm14 }
 0x2fb   : > { %3854 = vmatpush1.bf16.msk.msra.mxu1 %vm3853_vm6, %v6825_v19  ;;  %vm2363_vm6 = vcmp.eq.s32.totalorder %v6874_v34, %v5899_v37 }
 0x2fc   : > { %3856 = vmatprep.subr.msk.bf16.mxu1 %vm3855_vm5, %v6825_v19  ;;  %vm2366_vm5 = vcmp.eq.s32.totalorder %v6875_v51, %v5899_v37 }
 0x2fd   : > { %vm3867_vm9 = vmpackc.low %vm2366_vm5, %vm2363_vm6  ;;  %vm2374_vm6 = vcmp.eq.s32.totalorder %v5080_v23, %v5893_v14  ;;  %vm2377_vm5 = vcmp.eq.s32.totalorder %v5091_v48, %v5893_v14 }
 0x2fe   : > { %vm3877_vm1 = vmpackc.low %vm2377_vm5, %vm2374_vm6 }
 0x2ff   : > { %3858 = vmatpush1.bf16.msk.msra.mxu1 %vm3857_vm13, %v6825_v19  ;;  %vm2369_vm13 = vcmp.eq.s32.totalorder %v6853_v55, %v5899_v37 }
 0x300   : > { %3860 = vmatprep.subr.msk.bf16.mxu1 %vm3859_vm8, %v6825_v19  ;;  %vm2372_vm8 = vcmp.eq.s32.totalorder %v6854_v28, %v5899_v37 }
 0x301   : > { %vm3871_vm15 = vmpackc.low %vm2372_vm8, %vm2369_vm13  ;;  %vm2380_vm13 = vcmp.eq.s32.totalorder %v5105_v46, %v5893_v14  ;;  %vm2383_vm8 = vcmp.eq.s32.totalorder %v5094_v38, %v5893_v14 }
 0x302   : > { %vm3881_vm14 = vmpackc.low %vm2383_vm8, %vm2380_vm13 }
 0x303   : > { %3862 = vmatpush1.bf16.msk.msra.mxu1 %vm3861_vm0, %v6825_v19  ;;  %vm2375_vm0 = vcmp.eq.s32.totalorder %v5080_v23, %v5899_v37 }
 0x304   : > { %3864 = vmatprep.subr.msk.bf16.mxu1 %vm3863_vm2, %v6825_v19  ;;  %vm2378_vm2 = vcmp.eq.s32.totalorder %v5091_v48, %v5899_v37 }
 0x305   : > { %vm3875_vm12 = vmpackc.low %vm2378_vm2, %vm2375_vm0  ;;  %vm2386_vm0 = vcmp.eq.s32.totalorder %v5119_v41, %v5893_v14  ;;  %vm2389_vm2 = vcmp.eq.s32.totalorder %v5108_v0, %v5893_v14 }
 0x306   : > { %vm3885_vm6 = vmpackc.low %vm2389_vm2, %vm2386_vm0 }
 0x307   : > { %3866 = vmatpush1.bf16.msk.msra.mxu1 %vm3865_vm3, %v6825_v19  ;;  %vm2381_vm3 = vcmp.eq.s32.totalorder %v5105_v46, %v5899_v37 }
 0x308   : > { %3868 = vmatprep.subr.msk.bf16.mxu1 %vm3867_vm9, %v6825_v19  ;;  %vm2384_vm9 = vcmp.eq.s32.totalorder %v5094_v38, %v5899_v37 }
 0x309   : > { %vm3879_vm7 = vmpackc.low %vm2384_vm9, %vm2381_vm3  ;;  %vm2392_vm3 = vcmp.eq.s32.totalorder %v6779_v52, %v5893_v14  ;;  %vm2395_vm9 = vcmp.eq.s32.totalorder %v6781_v33, %v5893_v14 }
 0x30a   : > { %vm3889_vm13 = vmpackc.low %vm2395_vm9, %vm2392_vm3 }
 0x30b   : > { %3870 = vmatpush1.bf16.msk.msra.mxu1 %vm3869_vm11, %v6825_v19  ;;  %vm2387_vm11 = vcmp.eq.s32.totalorder %v5119_v41, %v5899_v37 }
 0x30c   : > { %3872 = vmatprep.subr.msk.bf16.mxu1 %vm3871_vm15, %v6825_v19  ;;  %vm2390_vm15 = vcmp.eq.s32.totalorder %v5108_v0, %v5899_v37 }
 0x30d   : > { %vm3883_vm10 = vmpackc.low %vm2390_vm15, %vm2387_vm11  ;;  %vm2398_vm11 = vcmp.eq.s32.totalorder %v6784_v58, %v5893_v14  ;;  %vm2401_vm15 = vcmp.eq.s32.totalorder %v6785_v40, %v5893_v14 }
 0x30e   : > { %vm3893_vm0 = vmpackc.low %vm2401_vm15, %vm2398_vm11 }
 0x30f   : > { %3874 = vmatpush1.bf16.msk.msra.mxu1 %vm3873_vm4, %v6825_v19  ;;  %vm2393_vm4 = vcmp.eq.s32.totalorder %v6779_v52, %v5899_v37  ;;  %v3046_v52 = vsub.s32 2, %v6859_v4 }
 0x310   : > { %3876 = vmatprep.subr.msk.bf16.mxu1 %vm3875_vm12, %v6825_v19  ;;  %vm2396_vm12 = vcmp.eq.s32.totalorder %v6781_v33, %v5899_v37 }
 0x311   : > { %vm3887_vm5 = vmpackc.low %vm2396_vm12, %vm2393_vm4  ;;  %vm2404_vm4 = vcmp.eq.s32.totalorder %v6787_v18, %v5893_v14  ;;  %vm2407_vm12 = vcmp.eq.s32.totalorder %v5159_v45, %v5893_v14 }
 0x312   : > { %2790 = vmatmul.mubr.f32.vlgmr.msra.gmra.mrb[56].mxu1 %v6071_v13  ;;  %vm3897_vm3 = vmpackc.low %vm2407_vm12, %vm2404_vm4 }
 0x313   : > { %3878 = vmatpush1.bf16.msk.msra.mxu1 %vm3877_vm1, %v6825_v19  ;;  %2860 = vmatprep.mubr.f32.mxu1 %v6872_v56  ;;  %vm2399_vm1 = vcmp.eq.s32.totalorder %v6784_v58, %v5899_v37 }
 0x314   : > { %3880 = vmatprep.subr.msk.bf16.mxu1 %vm3879_vm7, %v6825_v19  ;;  %vm2402_vm7 = vcmp.eq.s32.totalorder %v6785_v40, %v5899_v37 }
 0x315   : > { %vm3891_vm8 = vmpackc.low %vm2402_vm7, %vm2399_vm1  ;;  %vm2410_vm1 = vcmp.eq.s32.totalorder %v6788_v29, %v5893_v14  ;;  %vm2413_vm7 = vcmp.eq.s32.totalorder %v6789_v59, %v5893_v14 }
 0x316   : > { %vm3901_vm11 = vmpackc.low %vm2413_vm7, %vm2410_vm1 }
 0x317   : > { %3882 = vmatpush1.bf16.msk.msra.mxu1 %vm3881_vm14, %v6825_v19  ;;  %vm2405_vm14 = vcmp.eq.s32.totalorder %v6787_v18, %v5899_v37 }
 0x318   : > { %3884 = vmatprep.subr.msk.bf16.mxu1 %vm3883_vm10, %v6825_v19  ;;  %vm2408_vm10 = vcmp.eq.s32.totalorder %v5159_v45, %v5899_v37 }
 0x319   : > { %vm3895_vm2 = vmpackc.low %vm2408_vm10, %vm2405_vm14  ;;  %vm2416_vm14 = vcmp.eq.s32.totalorder %v6790_v22, %v5893_v14  ;;  %vm2419_vm10 = vcmp.eq.s32.totalorder %v6856_v36, %v5893_v14 }
 0x31a   : > { %vm3905_vm4 = vmpackc.low %vm2419_vm10, %vm2416_vm14 }
 0x31b   : > { %3886 = vmatpush1.bf16.msk.msra.mxu1 %vm3885_vm6, %v6825_v19  ;;  %vm2411_vm6 = vcmp.eq.s32.totalorder %v6788_v29, %v5899_v37 }
 0x31c   : > { %3888 = vmatprep.subr.msk.bf16.mxu1 %vm3887_vm5, %v6825_v19  ;;  %vm2414_vm5 = vcmp.eq.s32.totalorder %v6789_v59, %v5899_v37 }
 0x31d   : > { %vm3899_vm9 = vmpackc.low %vm2414_vm5, %vm2411_vm6  ;;  %vm2280_vm6 = vcmp.eq.s32.totalorder %v6859_v4, %v5517_v32  ;;  %vm2283_vm5 = vcmp.eq.s32.totalorder %v6803_v26, %v5517_v32 }
 0x31e   : > { %vm3909_vm1 = vmpackc.low %vm2283_vm5, %vm2280_vm6 }
 0x31f   : > { %3890 = vmatpush1.bf16.msk.msra.mxu1 %vm3889_vm13, %v6825_v19  ;;  %vm2417_vm13 = vcmp.eq.s32.totalorder %v6790_v22, %v5899_v37 }
 0x320   : > { %3892 = vmatprep.subr.msk.bf16.mxu1 %vm3891_vm8, %v6825_v19  ;;  %vm2420_vm8 = vcmp.eq.s32.totalorder %v6856_v36, %v5899_v37 }
 0x321   : > { %vm3903_vm15 = vmpackc.low %vm2420_vm8, %vm2417_vm13  ;;  %vm2286_vm13 = vcmp.eq.s32.totalorder %v6866_v12, %v5517_v32  ;;  %vm2289_vm8 = vcmp.eq.s32.totalorder %v6804_v50, %v5517_v32 }
 0x322   : > { %vm3913_vm14 = vmpackc.low %vm2289_vm8, %vm2286_vm13 }
 0x323   : > { %3894 = vmatpush1.bf16.msk.msra.mxu1 %vm3893_vm0, %v6825_v19  ;;  %vm2328_vm0 = vcmp.eq.s32.totalorder %v4963_v57, %v5517_v32  ;;  %v6876_v57 = vld [vmem:[#allocation89_spill] sm:$0xff] }
 0x324   : > { %3896 = vmatprep.subr.msk.bf16.mxu1 %vm3895_vm2, %v6825_v19  ;;  %vm2331_vm2 = vcmp.eq.s32.totalorder %v4979_v5, %v5517_v32  ;;  %v3047_v58 = vrot.slane %v6876_v57, %v3046_v52 }
 0x325   : > { %vm3907_vm12 = vmpackc.low %vm2331_vm2, %vm2328_vm0  ;;  %vm2292_vm0 = vcmp.eq.s32.totalorder %v6867_v49, %v5517_v32  ;;  %vm2295_vm2 = vcmp.eq.s32.totalorder %v4881_v1, %v5517_v32 }
 0x326   : > { %vm3917_vm6 = vmpackc.low %vm2295_vm2, %vm2292_vm0 }
 0x327   : > { %3898 = vmatpush1.bf16.msk.msra.mxu1 %vm3897_vm3, %v6825_v19  ;;  %vm2334_vm3 = vcmp.eq.s32.totalorder %v4982_v16, %v5517_v32 }
 0x328   : > { %3900 = vmatprep.subr.msk.bf16.mxu1 %vm3899_vm9, %v6825_v19  ;;  %vm2337_vm9 = vcmp.eq.s32.totalorder %v6835_v7, %v5517_v32 }
 0x329   : > { %vm3911_vm7 = vmpackc.low %vm2337_vm9, %vm2334_vm3  ;;  %vm2298_vm3 = vcmp.eq.s32.totalorder %v6868_v43, %v5517_v32  ;;  %vm2301_vm9 = vcmp.eq.s32.totalorder %v6869_v25, %v5517_v32 }
 0x32a   : > { %vm3921_vm13 = vmpackc.low %vm2301_vm9, %vm2298_vm3 }
 0x32b   : > { %3902 = vmatpush1.bf16.msk.msra.mxu1 %vm3901_vm11, %v6825_v19  ;;  %vm2340_vm11 = vcmp.eq.s32.totalorder %v4996_v47, %v5517_v32 }
 0x32c   : > { %3904 = vmatprep.subr.msk.bf16.mxu1 %vm3903_vm15, %v6825_v19  ;;  %vm2343_vm15 = vcmp.eq.s32.totalorder %v6837_v2, %v5517_v32 }
 0x32d   : > { %vm3915_vm10 = vmpackc.low %vm2343_vm15, %vm2340_vm11  ;;  %vm2304_vm11 = vcmp.eq.s32.totalorder %v6870_v9, %v5517_v32  ;;  %vm2307_vm15 = vcmp.eq.s32.totalorder %v6871_v10, %v5517_v32 }
 0x32e   : > { %vm3925_vm0 = vmpackc.low %vm2307_vm15, %vm2304_vm11 }
 0x32f   : > { %3906 = vmatpush1.bf16.msk.msra.mxu1 %vm3905_vm4, %v6825_v19  ;;  %vm2346_vm4 = vcmp.eq.s32.totalorder %v5010_v44, %v5517_v32  ;;  %v6877_v44 = vld [vmem:[#allocation87_spill] sm:$0xff] }
 0x330   : > { %3908 = vmatprep.subr.msk.bf16.mxu1 %vm3907_vm12, %v6825_v19  ;;  %vm2349_vm12 = vcmp.eq.s32.totalorder %v5021_v53, %v5517_v32  ;;  %v3072_v18 = vrot.slane %v6877_v44, %v3046_v52 }
 0x331   : > { %vm3919_vm5 = vmpackc.low %vm2349_vm12, %vm2346_vm4  ;;  %vm2310_vm4 = vcmp.eq.s32.totalorder %v4912_v21, %v5517_v32  ;;  %vm2313_vm12 = vcmp.eq.s32.totalorder %v4915_v63, %v5517_v32  ;;  %v3038_v21 = vsub.s32 0, %v6859_v4 }
 0x332   : > { %2861 = vmatmul.mubr.f32.vlgmr.msra.gmra.mrb[56].mxu1 %v5939_v61  ;;  %vm3929_vm3 = vmpackc.low %vm2313_vm12, %vm2310_vm4  ;;  %vm3080_vm4 = vcmask 1041408  }
 0x333   : > { %3910 = vmatpush3.bf16.msk.msra.mxu1 %vm3909_vm1, %v6825_v19  ;;  %2931 = vmatprep.mubr.f32.mxu1 %v5853_v31  ;;  %vm2352_vm1 = vcmp.eq.s32.totalorder %v5024_v39, %v5517_v32  ;;  %v3039_v5 = vrot.slane %v6876_v57, %v3038_v21  ;;  %v3064_v53 = vrot.slane %v6877_v44, %v3038_v21 }
 0x334   : > { %3912 = vmatprep.subr.msk.bf16.mxu1 %vm3911_vm7, %v6825_v19  ;;  %vm2355_vm7 = vcmp.eq.s32.totalorder %v6843_v17, %v5517_v32 }
 0x335   : > { %vm3923_vm8 = vmpackc.low %vm2355_vm7, %vm2352_vm1  ;;  %vm2316_vm1 = vcmp.eq.s32.totalorder %v4918_v15, %v5517_v32  ;;  %vm2319_vm7 = vcmp.eq.s32.totalorder %v6822_v62, %v5517_v32  ;;  %v3042_v15 = vsub.s32 1, %v6859_v4 }
 0x336   : > { %vm3933_vm11 = vmpackc.low %vm2319_vm7, %vm2316_vm1 }
 0x337   : > { %3914 = vmatpush3.bf16.msk.msra.mxu1 %vm3913_vm14, %v6825_v19  ;;  %vm2358_vm14 = vcmp.eq.s32.totalorder %v6873_v60, %v5517_v32  ;;  %v3068_v29 = vrot.slane %v6877_v44, %v3042_v15 }
 0x338   : > { %3916 = vmatprep.subr.msk.bf16.mxu1 %vm3915_vm10, %v6825_v19  ;;  %vm2361_vm10 = vcmp.eq.s32.totalorder %v5049_v42, %v5517_v32 }
 0x339   : > { %vm3927_vm2 = vmpackc.low %vm2361_vm10, %vm2358_vm14  ;;  %vm2322_vm14 = vcmp.eq.s32.totalorder %v4927_v27, %v5517_v32  ;;  %vm2325_vm10 = vcmp.eq.s32.totalorder %v4951_v24, %v5517_v32  ;;  %v3043_v24 = vrot.slane %v6876_v57, %v3042_v15 }
 0x33b   : > { %3918 = vmatpush3.bf16.msk.msra.mxu1 %vm3917_vm6, %v6825_v19  ;;  %vm2364_vm6 = vcmp.eq.s32.totalorder %v6874_v34, %v5517_v32 }
 0x33c   : > { %3920 = vmatprep.subr.msk.bf16.mxu1 %vm3919_vm5, %v6825_v19  ;;  %vm2367_vm5 = vcmp.eq.s32.totalorder %v6875_v51, %v5517_v32 }
 0x33d   : > { %vm3931_vm9 = vmpackc.low %vm2367_vm5, %vm2364_vm6 }
 0x33f   : > { %3922 = vmatpush3.bf16.msk.msra.mxu1 %vm3921_vm13, %v6825_v19  ;;  %vm2370_vm13 = vcmp.eq.s32.totalorder %v6853_v55, %v5517_v32 }
 0x340   : > { %3924 = vmatprep.subr.msk.bf16.mxu1 %vm3923_vm8, %v6825_v19  ;;  %vm2373_vm8 = vcmp.eq.s32.totalorder %v6854_v28, %v5517_v32 }
 0x341   : > { %vm3935_vm15 = vmpackc.low %vm2373_vm8, %vm2370_vm13 }
 0x343   : > { %3926 = vmatpush3.bf16.msk.msra.mxu1 %vm3925_vm0, %v6825_v19  ;;  %vm3937_vm0 = vmpackc.low %vm2325_vm10, %vm2322_vm14 }
 0x344   : > { %3928 = vmatprep.subr.msk.bf16.mxu1 %vm3927_vm2, %v6825_v19  ;;  %vm3076_vm2 = vcmask 1040384  }
 0x347   : > { %3930 = vmatpush3.bf16.msk.msra.mxu1 %vm3929_vm3, %v6825_v19 }
 0x348   : > { %3932 = vmatprep.subr.msk.bf16.mxu1 %vm3931_vm9, %v6825_v19 }
 0x34b   : > { %3934 = vmatpush3.bf16.msk.msra.mxu1 %vm3933_vm11, %v6825_v19 }
 0x34c   : > { %3936 = vmatprep.subr.msk.bf16.mxu1 %vm3935_vm15, %v6825_v19 }
 0x34f   : > { %3938 = vmatpush3.bf16.msk.msra.mxu1 %vm3937_vm0, %v6825_v19 }
 0x352   : > { %2932 = vmatmul.mubr.f32.vlgmr.msra.gmra.mrb[58].mxu1 %v6071_v13 }
 0x39a   : > { %v3003_v1 = vpop.f32.mrb[88].mxu0 }
 0x39b   : > { %v3810_v63 = vpop.f32.mrb[89].mxu0 }
 0x405   : > { %v2862_v27 = vpop.f32.mrb[56].mxu1 }
 0x406   : > { %v3054_v16 = vrot.slane %v2862_v27, 7  ;;  %v2864_v47 = vpop.f32.mrb[57].mxu1 }
 0x407   : > { %v3055_v39 = vrot.slane %v2864_v47, 7 }
 0x408   : > { %v3077_v42 = vsel %vm3076_vm2, %v3039_v5, %v3054_v16 }
 0x409   : > { %v3081_v23 = vsel %vm3080_vm4, %v3077_v42, %v3064_v53  ;;  %v3078_v48 = vsel %vm3076_vm2, %v3043_v24, %v3055_v39 }
 0x40a   : > { %v3082_v38 = vsel %vm3080_vm4, %v3078_v48, %v3068_v29 }
 0x40b   : > { %v3086_v46 = vcombine.low %v3081_v23, %v3082_v38 }
 0x40d   : > { %3088 = vst [vmem:[%s261_s29] sm:$0x77] %v3086_v46 }
 0x425   : > { %v3682_v0 = vpop.f32.mrb[58].mxu1 }
 0x426   : > { %v3683_v41 = vpop.f32.mrb[59].mxu1 }
 0x427   : > { %v3684_v45 = vadd.f32 %v3683_v41, %v3682_v0 }
 0x429   : > { %v3004_v33 = vadd.f32 %v3684_v45, %v3003_v1 }
 0x42b   : > { %v3056_v40 = vrot.slane %v3004_v33, 7 }
 0x42d   : > { %v3079_v59 = vsel %vm3076_vm2, %v3047_v58, %v3056_v40 }
 0x42e   : > { %v3083_v22 = vsel %vm3080_vm4, %v3079_v59, %v3072_v18 }
 0x42f   : > { %3089 = vst [vmem:[%s261_s29 + $0x8] sm:$0x7] %v3083_v22 }
 0x430 PF: > { %s13_s14 = sadd.s32 1, %s4024_s14   ;;  %s6878_s12 = smov %s4020_s13 }
 0x431   : > { %p10_p5 = scmp.ge.s32.totalorder %s13_s14, 4   ;;  %s6879_s13 = smov %s6881_s15 }
 0x433   :  { %12 = sbr.rel (!%p10_p5) target bundleno = 2 (0x2), region = 72 }

// kernel: backbone_forward.11
= control target key start
LH: loop header
LB: loop body
LE: loop exit
PB: predicated region body
PF: predicated region fallthrough
CT: control target
= control target key end

     0   :  { %s2686_s18 = smov 0   ;;  %s2688_s19 = smov 0   ;;  %s3644_s0 = inlined_call_operand.vmem [shape: bf16[2,64,384], index: 0, kind: input, shape index: {}]   ;;  %s3645_s1 = inlined_call_operand.vmem [shape: f32[64,2], index: 1, kind: input, shape index: {}]   ;;  %s3646_s2 = inlined_call_operand.vmem [shape: bf16[256,64], index: 2, kind: input, shape index: {}]   ;;  %s3647_s3 = inlined_call_operand.vmem [shape: bf16[2,256,384], index: 3, kind: output, shape index: {0}]   ;;  %s3648_s4 = inlined_call_operand.vmem [shape: f32[2,256,1], index: 4, kind: output, shape index: {1}]   ;;  %s3649_s5 = inlined_call_operand.vmem [shape: f32[2,256,1], index: 5, kind: output, shape index: {2}]  }
   0x1   :  { %s2690_s20 = smov 0  }
   0x2 LB: > { %s28_s21 = sadd.s32 1, %s2647_s19  ;;  %p2319_p0 = scmp.ge.s32.totalorder %s2651_s20, 1  ;;  %s2651_s20 = sphi %s2690_s20, %s16_s20   ;;  %s2647_s19 = sphi %s2688_s19, %s3651_s19   ;;  %s2643_s18 = sphi %s2686_s18, %s3650_s18  }
   0x3   : > { %p30_p1 = scmp.ge.s32.totalorder %s28_s21, 2  ;;  %p213_p2 = scmp.lt.s32.totalorder %s2651_s20, 3 }
   0x5   : > { %s3653_s21 = smov (%p30_p1, %s28_s21), 0  ;;  %p214_p3 = pnand %p2319_p0, %p213_p2 }
   0x6   : > { %v292_v0 = vld [vmem:[%s3645_s1 + $0x10] sm:$0xff] (!%p214_p3)  ;;  %v290_v1 = vld [vmem:[%s3645_s1] sm:$0xff] (!%p214_p3)  ;;  %v2653_v2 = vmov (!%p214_p3), 1   ;;  %v291_v3 = vld [vmem:[%s3645_s1 + $0x8] sm:$0xff] (!%p214_p3)  ;;  %v2654_v4 = vmov (!%p214_p3), 0   ;;  %p260_p4 = scmp.lt.s32.totalorder (!%p214_p3), %s2643_s18, 1 }
   0x7   : > { %217 = sbr.rel (%p214_p3) target bundleno = 718 (0x2ce), region = 32  ;;  %2605 = vset.pattern.permute.xlu0 (!%p214_p3), %v2653_v2  ;;  %2603 = vset.pattern.permute.xlu1 (!%p214_p3), %v2653_v2  ;;  %v293_v5 = vld [vmem:[%s3645_s1 + $0x18] sm:$0xff] (!%p214_p3)  ;;  %v295_v6 = vld [vmem:[%s3645_s1 + $0x28] sm:$0xff] (!%p214_p3)  ;;  %v294_v7 = vld [vmem:[%s3645_s1 + $0x20] sm:$0xff] (!%p214_p3)  ;;  %vm630_vm0 = vcmask (!%p214_p3), 523264   ;;  %vm1421_vm1 = vcmask (!%p214_p3), 7168  }
   0x8   : > { %411 = vperm.xlu0 (!%p214_p3), %2605, %v292_v0   ;;  %403 = vperm.xlu1 (!%p214_p3), %2603, %v290_v1   ;;  %v296_v8 = vld [vmem:[%s3645_s1 + $0x30] sm:$0xff] (!%p214_p3)  ;;  %v297_v9 = vld [vmem:[%s3645_s1 + $0x38] sm:$0xff] (!%p214_p3) }
   0x9   : > { %831 = vmatprep.mubr.bf16.mxu1 (!%p214_p3), %v2654_v4  ;;  %711 = vmatprep.mubr.bf16.mxu0 (!%p214_p3), %v2654_v4 }
   0xc   : > { %2606 = vset.pattern.permute.xlu0 (!%p214_p3), %v2654_v4  ;;  %407 = vperm.xlu1 (!%p214_p3), %2603, %v291_v3  }
   0xd   : > { %340 = vperm.xlu0 (!%p214_p3), %2606, %v290_v1  }
   0xe   : > { %s3655_s18 = smov (!%p260_p4, %s2643_s18), 1 }
   0xf   : > { %s2574_s13 = smul.u32 96, %s3655_s18  ;;  %s2440_s11 = sshll.u32 %s3655_s18, 8 }
  0x10   : > { %2604 = vset.pattern.permute.xlu1 %v2654_v4  ;;  %s2575_s7 = smul.u32 384, %s3655_s18  ;;  %s3439_s14 = scalar_lea.vmem %s3648_s4, %s2440_s11 }
  0x11   : > { %345 = vperm.xlu0 %2606, %v291_v3   ;;  %355 = vperm.xlu1 %2604, %v293_v5   ;;  %s2744_s16 = scalar_lea.vmem %s3644_s0, %s2574_s13 }
  0x12   : > { %v298_v12 = vld [vmem:[%s2744_s16] sm:$0xff]  ;;  %v300_v14 = vld [vmem:[%s2744_s16 + $0xc] sm:$0xff]  ;;  %v302_v22 = vld [vmem:[%s2744_s16 + $0x18] sm:$0xff]  ;;  %s2930_s10 = scalar_lea.vmem %s3647_s3, %s2575_s7 }
  0x13   : > { %v315_v13 = vunpack.c.h.bf16 %v298_v12  ;;  %v314_v16 = vunpack.c.l.bf16 %v298_v12  ;;  %v317_v18 = vunpack.c.l.bf16 %v300_v14  ;;  %v318_v19 = vunpack.c.h.bf16 %v300_v14  ;;  %v304_v20 = vld [vmem:[%s2744_s16 + $0x24] sm:$0xff]  ;;  %v306_v48 = vld [vmem:[%s2744_s16 + $0x30] sm:$0xff]  ;;  %v308_v63 = vld [vmem:[%s2744_s16 + $0x3c] sm:$0xff] }
  0x14   : > { %v323_v26 = vunpack.c.l.bf16 %v304_v20  ;;  %v324_v27 = vunpack.c.h.bf16 %v304_v20  ;;  %v320_v30 = vunpack.c.l.bf16 %v302_v22  ;;  %v321_v31 = vunpack.c.h.bf16 %v302_v22 }
  0x15   : > { %350 = vperm.xlu0 %2606, %v292_v0   ;;  %2607 = vset.pattern.permute.xlu1 %v2653_v2  ;;  %v326_v61 = vunpack.c.l.bf16 %v306_v48  ;;  %v327_v62 = vunpack.c.h.bf16 %v306_v48  ;;  %v330_v12 = vunpack.c.h.bf16 %v308_v63 }
  0x16   : > { %415 = vperm.xlu1 %2607, %v293_v5  }
  0x19   : > { %365 = vperm.xlu0 %2606, %v295_v6  }
  0x1a   : > { %2608 = vset.pattern.permute.xlu1 %v2654_v4 }
  0x1b   : > { %360 = vperm.xlu1 %2608, %v294_v7  }
  0x1d   : > { %370 = vperm.xlu0 %2606, %v296_v8  }
  0x1f   : > { %2609 = vset.pattern.permute.xlu1 %v2653_v2 }
  0x20   : > { %419 = vperm.xlu1 %2609, %v294_v7  }
  0x21   : > { %2611 = vset.pattern.permute.xlu0 %v2653_v2 }
  0x22   : > { %427 = vperm.xlu0 %2611, %v296_v8   ;;  %v299_v8 = vld [vmem:[%s2744_s16 + $0x8] ss:$12 sps:$4 sm:$0xff]  }
  0x23   : > { %v319_v20 = vunpack.c.h.bf16 %v299_v8 }
  0x24   : > { %423 = vperm.xlu1 %2609, %v295_v6  }
  0x28   : > { %2610 = vset.pattern.permute.xlu1 %v2654_v4 }
  0x29   : > { %375 = vperm.xlu1 %2610, %v297_v9  }
  0x2d   : > { %2612 = vset.pattern.permute.xlu1 %v2653_v2 }
  0x2e   : > { %431 = vperm.xlu1 %2612, %v297_v9   ;;  %v329_v9 = vunpack.c.l.bf16 %v308_v63 }
  0x87   : > { %v2746_v10 = vpop.permute.xlu1 %403  ;;  %v2748_v11 = vpop.permute.xlu0 %411 }
  0x8b   : > { %v2752_v15 = vpop.permute.xlu1 %407 }
  0x8c   : > { %v2754_v17 = vpop.permute.xlu0 %340 }
  0x8d   : > { %v379_v21 = vsub.f32 %v315_v13, %v2754_v17  ;;  %v378_v23 = vsub.f32 %v314_v16, %v2754_v17 }
  0x8f   : > { %v435_v32 = vmul.f32 %v2746_v10, %v379_v21  ;;  %v434_v34 = vmul.f32 %v2746_v10, %v378_v23 }
  0x90   : > { %v2760_v24 = vpop.permute.xlu0 %345  ;;  %v2762_v25 = vpop.permute.xlu1 %355 }
  0x91   : > { %v381_v28 = vsub.f32 %v317_v18, %v2760_v24  ;;  %v382_v29 = vsub.f32 %v318_v19, %v2760_v24  ;;  %v387_v35 = vsub.f32 %v323_v26, %v2762_v25  ;;  %v388_v36 = vsub.f32 %v324_v27, %v2762_v25  ;;  %v310_v18 = vld [vmem:[%s2744_s16 + $0x48] sm:$0xff] }
  0x92   : > { %v459_v44 = vmul.f32 0.2, %v435_v32  ;;  %v458_v49 = vmul.f32 0.2, %v434_v34  ;;  %v332_v26 = vunpack.c.l.bf16 %v310_v18  ;;  %v316_v27 = vunpack.c.l.bf16 %v299_v8 }
  0x93   : > { %v438_v33 = vmul.f32 %v2752_v15, %v382_v29  ;;  %v437_v38 = vmul.f32 %v2752_v15, %v381_v28  ;;  %v305_v28 = vld [vmem:[%s2744_s16 + $0x20] ss:$12 sps:$4 sm:$0xff]  }
  0x94   : > { %v2771_v37 = vpop.permute.xlu0 %350  ;;  %v483_v59 = vmax.f32 %v435_v32, %v459_v44  ;;  %v482_v1 = vmax.f32 %v434_v34, %v458_v49  ;;  %v312_v32 = vld [vmem:[%s2744_s16 + $0x54] sm:$0xff]  ;;  %v322_v34 = vunpack.c.l.bf16 %v305_v28 }
  0x95   : > { %v384_v39 = vsub.f32 %v320_v30, %v2771_v37  ;;  %v385_v40 = vsub.f32 %v321_v31, %v2771_v37  ;;  %v2776_v41 = vpop.permute.xlu1 %415  ;;  %v462_v45 = vmul.f32 0.2, %v438_v33  ;;  %v461_v53 = vmul.f32 0.2, %v437_v38 }
  0x96   : > { %v443_v42 = vmul.f32 %v2776_v41, %v387_v35  ;;  %v444_v43 = vmul.f32 %v2776_v41, %v388_v36  ;;  %v333_v35 = vunpack.c.h.bf16 %v310_v18  ;;  %v336_v48 = vunpack.c.h.bf16 %v312_v32 }
  0x97   : > { %v440_v46 = vmul.f32 %v2748_v11, %v384_v39  ;;  %v441_v47 = vmul.f32 %v2748_v11, %v385_v40  ;;  %v486_v52 = vmax.f32 %v438_v33, %v462_v45  ;;  %v485_v2 = vmax.f32 %v437_v38, %v461_v53 }
  0x98   : > { %v467_v50 = vmul.f32 0.2, %v443_v42  ;;  %v468_v51 = vmul.f32 0.2, %v444_v43  ;;  %v2783_v56 = vpop.permute.xlu0 %365  ;;  %v383_v33 = vsub.f32 %v319_v20, %v2760_v24  ;;  %v335_v45 = vunpack.c.l.bf16 %v312_v32 }
  0x99   : > { %v464_v54 = vmul.f32 0.2, %v440_v46  ;;  %v465_v55 = vmul.f32 0.2, %v441_v47  ;;  %v539_v0 = vpack.c.bf16 %v486_v52, %v483_v59  ;;  %v538_v6 = vpack.c.bf16 %v485_v2, %v482_v1  ;;  %v311_v1 = vld [vmem:[%s2744_s16 + $0x50] ss:$12 sps:$4 sm:$0xff]  }
  0x9a   : > { %v492_v57 = vmax.f32 %v444_v43, %v468_v51  ;;  %v2785_v58 = vpop.permute.xlu1 %360  ;;  %v491_v60 = vmax.f32 %v443_v42, %v467_v50  ;;  %v393_v29 = vsub.f32 %v329_v9, %v2783_v56  ;;  %v394_v30 = vsub.f32 %v330_v12, %v2783_v56 }
  0x9b   : > { %v489_v3 = vmax.f32 %v441_v47, %v465_v55  ;;  %v488_v5 = vmax.f32 %v440_v46, %v464_v54  ;;  %679 = vmatprep.subr.bf16.mxu0 %v539_v0  ;;  %2566 = vmatprep.subr.bf16.mxu1 %v539_v0  ;;  %v390_v13 = vsub.f32 %v326_v61, %v2785_v58  ;;  %v325_v43 = vunpack.c.h.bf16 %v305_v28  ;;  %v309_v54 = vld [vmem:[%s2744_s16 + $0x38] ss:$12 sps:$4 sm:$0xff]   ;;  %s3450_s16 = scalar_lea.vmem %s3649_s5, %s2440_s11 }
  0x9c   : > { %v391_v14 = vsub.f32 %v327_v62, %v2785_v58  ;;  %v2791_v16 = vpop.permute.xlu0 %370  ;;  %680 = vmatpush1.bf16.msra.mxu0 %v538_v6  ;;  %2570 = vmatpush1.bf16.msra.mxu1 %v538_v6  ;;  %v380_v46 = vsub.f32 %v316_v27, %v2754_v17  ;;  %v439_v49 = vmul.f32 %v2752_v15, %v383_v33  ;;  %v331_v0 = vunpack.c.h.bf16 %v309_v54 }
  0x9d   : > { %v542_v7 = vpack.c.bf16 %v492_v57, %v489_v3  ;;  %v541_v21 = vpack.c.bf16 %v491_v60, %v488_v5  ;;  %v396_v44 = vsub.f32 %v332_v26, %v2791_v16  ;;  %v386_v50 = vsub.f32 %v322_v34, %v2771_v37 }
  0x9e   : > { %v397_v51 = vsub.f32 %v333_v35, %v2791_v16  ;;  %v389_v17 = vsub.f32 %v325_v43, %v2762_v25  ;;  %v436_v62 = vmul.f32 %v2746_v10, %v380_v46  ;;  %v463_v5 = vmul.f32 0.2, %v439_v49 }
  0x9f   : > { %v2794_v19 = vpop.permute.xlu1 %419  ;;  %681 = vmatprep.subr.bf16.mxu0 %v542_v7  ;;  %2567 = vmatprep.subr.bf16.mxu1 %v542_v7  ;;  %v442_v6 = vmul.f32 %v2748_v11, %v386_v50  ;;  %v328_v7 = vunpack.c.l.bf16 %v309_v54  ;;  %v395_v20 = vsub.f32 %v331_v0, %v2783_v56  ;;  %v2627_v0 = vld [vmem:[%s3646_s2 + $0x50] sm:$0xff]  }
  0xa0   : > { %v446_v22 = vmul.f32 %v2794_v19, %v390_v13  ;;  %v447_v23 = vmul.f32 %v2794_v19, %v391_v14  ;;  %682 = vmatpush1.bf16.msra.mxu0 %v541_v21  ;;  %2571 = vmatpush1.bf16.msra.mxu1 %v541_v21  ;;  %v445_v37 = vmul.f32 %v2776_v41, %v389_v17  ;;  %v460_v10 = vmul.f32 0.2, %v436_v62  ;;  %v2621_v17 = vld [vmem:[%s3646_s2 + $0x20] sm:$0xff]  }
  0xa1   : > { %v2805_v39 = vpop.permute.xlu0 %427  ;;  %v334_v14 = vunpack.c.l.bf16 %v311_v1  ;;  %v337_v41 = vunpack.c.h.bf16 %v311_v1  ;;  %v392_v11 = vsub.f32 %v328_v7, %v2785_v58  ;;  %v487_v27 = vmax.f32 %v439_v49, %v463_v5  ;;  %v2628_v1 = vld [vmem:[%s3646_s2 + $0x58] sm:$0xff]  }
  0xa2   : > { %v470_v36 = vmul.f32 0.2, %v446_v22  ;;  %v471_v38 = vmul.f32 0.2, %v447_v23  ;;  %v452_v52 = vmul.f32 %v2805_v39, %v396_v44  ;;  %v453_v61 = vmul.f32 %v2805_v39, %v397_v51 }
  0xa3   : > { %v2801_v31 = vpop.permute.xlu1 %423  ;;  %v469_v18 = vmul.f32 0.2, %v445_v37  ;;  %v484_v33 = vmax.f32 %v436_v62, %v460_v10  ;;  %v448_v34 = vmul.f32 %v2794_v19, %v392_v11  ;;  %v398_v56 = vsub.f32 %v334_v14, %v2791_v16  ;;  %v2615_v19 = vld [vmem:[%s3646_s2] sm:$0xff]   ;;  %v2623_v62 = vld [vmem:[%s3646_s2 + $0x30] sm:$0xff]  }
  0xa4   : > { %v449_v40 = vmul.f32 %v2801_v31, %v393_v29  ;;  %v450_v42 = vmul.f32 %v2801_v31, %v394_v30  ;;  %v494_v55 = vmax.f32 %v446_v22, %v470_v36  ;;  %v495_v57 = vmax.f32 %v447_v23, %v471_v38 }
  0xa5   : > { %v476_v8 = vmul.f32 0.2, %v452_v52  ;;  %v477_v9 = vmul.f32 0.2, %v453_v61  ;;  %v466_v23 = vmul.f32 0.2, %v442_v6  ;;  %v451_v29 = vmul.f32 %v2801_v31, %v395_v20 }
  0xa6   : > { %v473_v24 = vmul.f32 0.2, %v449_v40  ;;  %v474_v47 = vmul.f32 0.2, %v450_v42  ;;  %v540_v58 = vpack.c.bf16 %v487_v27, %v484_v33  ;;  %v2830_v31 = vld [vmem:[%s3646_s2 + $0x60] sm:$0xff]   ;;  %v454_v16 = vmul.f32 %v2805_v39, %v398_v56  ;;  %v2614_v39 = vld [vmem:[%s3646_s2 + $0x68] sm:$0xff]  }
  0xa7   : > { %v500_v26 = vmax.f32 %v452_v52, %v476_v8  ;;  %v501_v28 = vmax.f32 %v453_v61, %v477_v9  ;;  %v490_v44 = vmax.f32 %v442_v6, %v466_v23  ;;  %v2617_v52 = vld [vmem:[%s3646_s2 + $0x8] sm:$0xff]  }
  0xa8   : > { %v376_v53 = vpop.permute.xlu1 %375  ;;  %v497_v59 = vmax.f32 %v449_v40, %v473_v24  ;;  %v498_v60 = vmax.f32 %v450_v42, %v474_v47  ;;  %v493_v40 = vmax.f32 %v445_v37, %v469_v18  ;;  %v475_v42 = vmul.f32 0.2, %v451_v29  ;;  %v2622_v61 = vld [vmem:[%s3646_s2 + $0x28] sm:$0xff]  }
  0xa9   : > { %v399_v2 = vsub.f32 %v335_v45, %v376_v53  ;;  %v400_v3 = vsub.f32 %v336_v48, %v376_v53  ;;  %v401_v35 = vsub.f32 %v337_v41, %v376_v53  ;;  %v472_v45 = vmul.f32 0.2, %v448_v34  ;;  %v2626_v37 = vld [vmem:[%s3646_s2 + $0x48] sm:$0xff]  }
  0xaa   : > { %v545_v15 = vpack.c.bf16 %v498_v60, %v495_v57  ;;  %v544_v63 = vpack.c.bf16 %v497_v59, %v494_v55  ;;  %v499_v46 = vmax.f32 %v451_v29, %v475_v42  ;;  %v543_v47 = vpack.c.bf16 %v493_v40, %v490_v44  ;;  %v2616_v55 = vld [vmem:[%s3646_s2 + $0x70] sm:$0xff]   ;;  %v2618_v59 = vld [vmem:[%s3646_s2 + $0x78] sm:$0xff]  }
  0xab   : > { %v496_v48 = vmax.f32 %v448_v34, %v472_v45  ;;  %v478_v49 = vmul.f32 0.2, %v454_v16  ;;  %v2619_v57 = vld [vmem:[%s3646_s2 + $0x10] sm:$0xff]   ;;  %v2620_v60 = vld [vmem:[%s3646_s2 + $0x18] sm:$0xff]  }
  0xac   : > { %683 = vmatprep.subr.bf16.mxu0 %v545_v15  ;;  %2568 = vmatprep.subr.bf16.mxu1 %v545_v15  ;;  %v2624_v15 = vld [vmem:[%s3646_s2 + $0x38] sm:$0xff]  }
  0xad   : > { %v432_v25 = vpop.permute.xlu1 %431  ;;  %684 = vmatpush1.bf16.msra.mxu0 %v544_v63  ;;  %2572 = vmatpush1.bf16.msra.mxu1 %v544_v63  ;;  %v546_v51 = vpack.c.bf16 %v499_v46, %v496_v48  ;;  %v502_v53 = vmax.f32 %v454_v16, %v478_v49  ;;  %v2625_v63 = vld [vmem:[%s3646_s2 + $0x40] sm:$0xff]  }
  0xae   : > { %v455_v12 = vmul.f32 %v432_v25, %v399_v2  ;;  %v456_v13 = vmul.f32 %v432_v25, %v400_v3  ;;  %v457_v43 = vmul.f32 %v432_v25, %v401_v35 }
  0xb0   : > { %v479_v21 = vmul.f32 0.2, %v455_v12  ;;  %v480_v22 = vmul.f32 0.2, %v456_v13  ;;  %v481_v24 = vmul.f32 0.2, %v457_v43 }
  0xb2   : > { %v503_v30 = vmax.f32 %v455_v12, %v479_v21  ;;  %v504_v32 = vmax.f32 %v456_v13, %v480_v22  ;;  %v505_v50 = vmax.f32 %v457_v43, %v481_v24 }
  0xb4   : > { %v548_v36 = vpack.c.bf16 %v504_v32, %v501_v28  ;;  %v547_v38 = vpack.c.bf16 %v503_v30, %v500_v26  ;;  %v549_v54 = vpack.c.bf16 %v505_v50, %v502_v53 }
  0xb6   : > { %685 = vmatprep.subr.bf16.mxu0 %v548_v36  ;;  %2569 = vmatprep.subr.bf16.mxu1 %v548_v36 }
  0xb7   : > { %686 = vmatpush1.bf16.msra.mxu0 %v547_v38  ;;  %2573 = vmatpush1.bf16.msra.mxu1 %v547_v38 }
  0xb8   : > { %2526 = vmatprep.subr.bf16.mxu1 %v540_v58 }
  0xba   : > { %2354 = vmatmul.mubr.msk.bf16.vlgmr.msra.gmra.mrb[0].mxu1 %vm630_vm0, %v2830_v31  ;;  %2342 = vmatmul.mubr.msk.bf16.vlgmr.msra.gmra.mrb[0].mxu0 %vm630_vm0, %v2615_v19 }
  0xbb   : > { %2527 = vmatpush3.bf16.msra.mxu1 %v540_v58  ;;  %841 = vmatprep.mubr.bf16.mxu1 %v2654_v4 }
  0xbc   : > { %2528 = vmatprep.subr.bf16.mxu1 %v543_v47  ;;  %721 = vmatprep.mubr.bf16.mxu0 %v2654_v4 }
  0xbf   : > { %2529 = vmatpush3.bf16.msra.mxu1 %v543_v47 }
  0xc0   : > { %2530 = vmatprep.subr.bf16.mxu1 %v546_v51 }
  0xc2   : > { %2355 = vmatmul.mubr.msk.bf16.gmra.mrb[4].mxu1 %vm630_vm0, %v2614_v39  ;;  %2343 = vmatmul.mubr.msk.bf16.gmra.mrb[4].mxu0 %vm630_vm0, %v2617_v52 }
  0xc3   : > { %2531 = vmatpush3.bf16.msra.mxu1 %v546_v51  ;;  %851 = vmatprep.mubr.bf16.mxu1 %v2654_v4 }
  0xc4   : > { %2532 = vmatprep.subr.bf16.mxu1 %v549_v54  ;;  %731 = vmatprep.mubr.bf16.mxu0 %v2654_v4 }
  0xc7   : > { %2533 = vmatpush3.bf16.msra.mxu1 %v549_v54 }
  0xca   : > { %2356 = vmatmul.mubr.msk.bf16.gmra.mrb[8].mxu1 %vm630_vm0, %v2616_v55  ;;  %2344 = vmatmul.mubr.msk.bf16.gmra.mrb[8].mxu0 %vm630_vm0, %v2619_v57 }
  0xcb   : > { %861 = vmatprep.mubr.bf16.mxu1 %v2654_v4  ;;  %741 = vmatprep.mubr.bf16.mxu0 %v2654_v4 }
  0xd2   : > { %2357 = vmatmul.mubr.msk.bf16.gmra.mrb[12].mxu1 %vm630_vm0, %v2618_v59  ;;  %2345 = vmatmul.mubr.msk.bf16.gmra.mrb[12].mxu0 %vm630_vm0, %v2620_v60 }
  0xd3   : > { %2534 = vmatprep.mubr.msk.bf16.mxu1 %vm630_vm0, %v2615_v19  ;;  %751 = vmatprep.mubr.bf16.mxu0 %v2654_v4 }
  0xda   : > { %2535 = vmatmul.mubr.msk.bf16.vlgmr.msra.gmra.mrb[16].mxu1 %vm630_vm0, %v2617_v52  ;;  %2346 = vmatmul.mubr.msk.bf16.gmra.mrb[16].mxu0 %vm630_vm0, %v2621_v17 }
  0xdb   : > { %2538 = vmatprep.mubr.msk.bf16.mxu1 %vm630_vm0, %v2619_v57  ;;  %761 = vmatprep.mubr.bf16.mxu0 %v2654_v4 }
  0xe2   : > { %2539 = vmatmul.mubr.msk.bf16.gmra.mrb[20].mxu1 %vm630_vm0, %v2620_v60  ;;  %2347 = vmatmul.mubr.msk.bf16.gmra.mrb[20].mxu0 %vm630_vm0, %v2622_v61 }
  0xe3   : > { %2542 = vmatprep.mubr.msk.bf16.mxu1 %vm630_vm0, %v2621_v17  ;;  %771 = vmatprep.mubr.bf16.mxu0 %v2654_v4 }
  0xea   : > { %2543 = vmatmul.mubr.msk.bf16.gmra.mrb[24].mxu1 %vm630_vm0, %v2622_v61  ;;  %2348 = vmatmul.mubr.msk.bf16.gmra.mrb[24].mxu0 %vm630_vm0, %v2623_v62 }
  0xeb   : > { %2546 = vmatprep.mubr.msk.bf16.mxu1 %vm630_vm0, %v2623_v62  ;;  %781 = vmatprep.mubr.bf16.mxu0 %v2654_v4 }
  0xf2   : > { %2547 = vmatmul.mubr.msk.bf16.gmra.mrb[28].mxu1 %vm630_vm0, %v2624_v15  ;;  %2349 = vmatmul.mubr.msk.bf16.gmra.mrb[28].mxu0 %vm630_vm0, %v2624_v15 }
  0xf3   : > { %2550 = vmatprep.mubr.msk.bf16.mxu1 %vm630_vm0, %v2625_v63  ;;  %791 = vmatprep.mubr.bf16.mxu0 %v2654_v4 }
  0xfa   : > { %2551 = vmatmul.mubr.msk.bf16.gmra.mrb[32].mxu1 %vm630_vm0, %v2626_v37  ;;  %2350 = vmatmul.mubr.msk.bf16.gmra.mrb[32].mxu0 %vm630_vm0, %v2625_v63 }
  0xfb   : > { %2554 = vmatprep.mubr.msk.bf16.mxu1 %vm630_vm0, %v2627_v0  ;;  %801 = vmatprep.mubr.bf16.mxu0 %v2654_v4 }
 0x102   : > { %2555 = vmatmul.mubr.msk.bf16.gmra.mrb[36].mxu1 %vm630_vm0, %v2628_v1  ;;  %2351 = vmatmul.mubr.msk.bf16.gmra.mrb[36].mxu0 %vm630_vm0, %v2626_v37 }
 0x103   : > { %2558 = vmatprep.mubr.msk.bf16.mxu1 %vm630_vm0, %v2830_v31  ;;  %811 = vmatprep.mubr.bf16.mxu0 %v2654_v4 }
 0x10a   : > { %2559 = vmatmul.mubr.msk.bf16.gmra.mrb[40].mxu1 %vm630_vm0, %v2614_v39  ;;  %2352 = vmatmul.mubr.msk.bf16.gmra.mrb[40].mxu0 %vm630_vm0, %v2627_v0 }
 0x10b   : > { %2562 = vmatprep.mubr.msk.bf16.mxu1 %vm630_vm0, %v2616_v55  ;;  %821 = vmatprep.mubr.bf16.mxu0 %v2654_v4 }
 0x112   : > { %2563 = vmatmul.mubr.msk.bf16.gmra.mrb[44].mxu1 %vm630_vm0, %v2618_v59  ;;  %2353 = vmatmul.mubr.msk.bf16.gmra.mrb[44].mxu0 %vm630_vm0, %v2628_v1 }
 0x18d   : > { %v833_v2 = vpop.f32.mrb[0].mxu1  ;;  %v713_v3 = vpop.f32.mrb[0].mxu0 }
 0x18e   : > { %v1815_v5 = vmul.f32 %v833_v2, %v833_v2  ;;  %v835_v6 = vpop.f32.mrb[1].mxu1  ;;  %v1743_v7 = vmul.f32 %v713_v3, %v713_v3  ;;  %v715_v8 = vpop.f32.mrb[1].mxu0 }
 0x18f   : > { %v2490_v25 = vpack.c.bf16 %v835_v6, %v833_v2  ;;  %v1816_v4 = vmul.f32 %v835_v6, %v835_v6  ;;  %v837_v9 = vpop.f32.mrb[2].mxu1  ;;  %v2442_v12 = vpack.c.bf16 %v715_v8, %v713_v3  ;;  %v1744_v13 = vmul.f32 %v715_v8, %v715_v8  ;;  %v717_v10 = vpop.f32.mrb[2].mxu0 }
 0x190   : > { %v1818_v14 = vmul.f32 %v837_v9, %v837_v9  ;;  %v839_v41 = vpop.f32.mrb[3].mxu1  ;;  %v1746_v18 = vmul.f32 %v717_v10, %v717_v10  ;;  %v719_v20 = vpop.f32.mrb[3].mxu0  ;;  %v2932_v21 = vadd.f32 %v715_v8, %v713_v3  ;;  %v2934_v22 = vadd.f32 %v835_v6, %v833_v2 }
 0x191   : > { %1401 = vst [vmem:[%s2930_s10 + $0x120] sm:$0xff] %v2490_v25  ;;  %v2492_v23 = vpack.c.bf16 %v839_v41, %v837_v9  ;;  %v1819_v11 = vmul.f32 %v839_v41, %v839_v41  ;;  %1353 = vst [vmem:[%s2930_s10] sm:$0xff] %v2442_v12  ;;  %v2444_v26 = vpack.c.bf16 %v719_v20, %v717_v10 }
 0x192   : > { %v1747_v27 = vmul.f32 %v719_v20, %v719_v20  ;;  %v2938_v28 = vadd.f32 %v719_v20, %v717_v10  ;;  %v2940_v29 = vadd.f32 %v1744_v13, %v1743_v7  ;;  %v2942_v30 = vadd.f32 %v839_v41, %v837_v9 }
 0x193   : > { %v2944_v32 = vadd.f32 %v1816_v4, %v1815_v5  ;;  %1403 = vst [vmem:[%s2930_s10 + $0x12c] sm:$0xff] %v2492_v23  ;;  %1355 = vst [vmem:[%s2930_s10 + $0xc] sm:$0xff] %v2444_v26  ;;  %v2950_v34 = vadd.f32 %v1819_v11, %v1818_v14 }
 0x194   : > { %v2948_v33 = vadd.f32 %v1747_v27, %v1746_v18 }
 0x195   : > { %v843_v35 = vpop.f32.mrb[4].mxu1  ;;  %v723_v36 = vpop.f32.mrb[4].mxu0 }
 0x196   : > { %v1821_v38 = vmul.f32 %v843_v35, %v843_v35  ;;  %v845_v40 = vpop.f32.mrb[5].mxu1  ;;  %v1749_v56 = vmul.f32 %v723_v36, %v723_v36  ;;  %v725_v42 = vpop.f32.mrb[5].mxu0 }
 0x197   : > { %v2494_v43 = vpack.c.bf16 %v845_v40, %v843_v35  ;;  %v1822_v58 = vmul.f32 %v845_v40, %v845_v40  ;;  %v847_v31 = vpop.f32.mrb[6].mxu1  ;;  %v2446_v44 = vpack.c.bf16 %v725_v42, %v723_v36  ;;  %v1750_v19 = vmul.f32 %v725_v42, %v725_v42  ;;  %v727_v45 = vpop.f32.mrb[6].mxu0 }
 0x198   : > { %v1824_v16 = vmul.f32 %v847_v31, %v847_v31  ;;  %v849_v46 = vpop.f32.mrb[7].mxu1  ;;  %v1752_v24 = vmul.f32 %v727_v45, %v727_v45  ;;  %v729_v47 = vpop.f32.mrb[7].mxu0  ;;  %v2952_v48 = vadd.f32 %v725_v42, %v723_v36  ;;  %v2954_v49 = vadd.f32 %v845_v40, %v843_v35 }
 0x199   : > { %1405 = vst [vmem:[%s2930_s10 + $0x138] sm:$0xff] %v2494_v43  ;;  %v2496_v50 = vpack.c.bf16 %v849_v46, %v847_v31  ;;  %v1825_v51 = vmul.f32 %v849_v46, %v849_v46  ;;  %1357 = vst [vmem:[%s2930_s10 + $0x18] sm:$0xff] %v2446_v44  ;;  %v2448_v39 = vpack.c.bf16 %v729_v47, %v727_v45 }
 0x19a   : > { %v1753_v52 = vmul.f32 %v729_v47, %v729_v47  ;;  %v2958_v53 = vadd.f32 %v1750_v19, %v1749_v56  ;;  %v2960_v54 = vadd.f32 %v729_v47, %v727_v45  ;;  %v2962_v55 = vadd.f32 %v849_v46, %v847_v31 }
 0x19b   : > { %v2964_v57 = vadd.f32 %v1822_v58, %v1821_v38  ;;  %1407 = vst [vmem:[%s2930_s10 + $0x144] sm:$0xff] %v2496_v50  ;;  %1359 = vst [vmem:[%s2930_s10 + $0x24] sm:$0xff] %v2448_v39  ;;  %v2970_v60 = vadd.f32 %v1825_v51, %v1824_v16 }
 0x19c   : > { %v2968_v59 = vadd.f32 %v1753_v52, %v1752_v24 }
 0x19d   : > { %v853_v17 = vpop.f32.mrb[8].mxu1  ;;  %v733_v61 = vpop.f32.mrb[8].mxu0 }
 0x19e   : > { %v1827_v62 = vmul.f32 %v853_v17, %v853_v17  ;;  %v855_v15 = vpop.f32.mrb[9].mxu1  ;;  %v1755_v63 = vmul.f32 %v733_v61, %v733_v61  ;;  %v735_v37 = vpop.f32.mrb[9].mxu0 }
 0x19f   : > { %v2498_v0 = vpack.c.bf16 %v855_v15, %v853_v17  ;;  %v1828_v1 = vmul.f32 %v855_v15, %v855_v15  ;;  %v857_v2 = vpop.f32.mrb[10].mxu1  ;;  %v2450_v3 = vpack.c.bf16 %v735_v37, %v733_v61  ;;  %v1756_v5 = vmul.f32 %v735_v37, %v735_v37  ;;  %v737_v6 = vpop.f32.mrb[10].mxu0 }
 0x1a0   : > { %v1830_v7 = vmul.f32 %v857_v2, %v857_v2  ;;  %v859_v8 = vpop.f32.mrb[11].mxu1  ;;  %v1758_v25 = vmul.f32 %v737_v6, %v737_v6  ;;  %v739_v4 = vpop.f32.mrb[11].mxu0  ;;  %v2972_v9 = vadd.f32 %v735_v37, %v733_v61  ;;  %v2974_v12 = vadd.f32 %v855_v15, %v853_v17 }
 0x1a1   : > { %1409 = vst [vmem:[%s2930_s10 + $0x150] sm:$0xff] %v2498_v0  ;;  %v2500_v13 = vpack.c.bf16 %v859_v8, %v857_v2  ;;  %v1831_v10 = vmul.f32 %v859_v8, %v859_v8  ;;  %1361 = vst [vmem:[%s2930_s10 + $0x30] sm:$0xff] %v2450_v3  ;;  %v2452_v14 = vpack.c.bf16 %v739_v4, %v737_v6 }
 0x1a2   : > { %v1759_v41 = vmul.f32 %v739_v4, %v739_v4  ;;  %v2978_v18 = vadd.f32 %v739_v4, %v737_v6  ;;  %v2980_v20 = vadd.f32 %v1756_v5, %v1755_v63  ;;  %v2982_v23 = vadd.f32 %v859_v8, %v857_v2 }
 0x1a3   : > { %v2984_v11 = vadd.f32 %v1828_v1, %v1827_v62  ;;  %1411 = vst [vmem:[%s2930_s10 + $0x15c] sm:$0xff] %v2500_v13  ;;  %1363 = vst [vmem:[%s2930_s10 + $0x3c] sm:$0xff] %v2452_v14  ;;  %v2990_v27 = vadd.f32 %v1831_v10, %v1830_v7  ;;  %v2655_v13 = vmov 0.0  }
 0x1a4   : > { %v2988_v26 = vadd.f32 %v1759_v41, %v1758_v25  ;;  %1424 = vst.msk [vmem:[#allocation2 + $0x10] sm:$0xff] %vm1421_vm1, %v2655_v13  ;;  %1422 = vst.msk [vmem:[#allocation2] sm:$0xff] %vm1421_vm1, %v2655_v13 }
 0x1a5   : > { %v863_v35 = vpop.f32.mrb[12].mxu1  ;;  %v743_v36 = vpop.f32.mrb[12].mxu0  ;;  %1423 = vst.msk [vmem:[#allocation2 + $0x8] sm:$0xff] %vm1421_vm1, %v2655_v13  ;;  %1425 = vst.msk [vmem:[#allocation2 + $0x18] sm:$0xff] %vm1421_vm1, %v2655_v13 }
 0x1a6   : > { %v1833_v38 = vmul.f32 %v863_v35, %v863_v35  ;;  %v865_v40 = vpop.f32.mrb[13].mxu1  ;;  %v1761_v56 = vmul.f32 %v743_v36, %v743_v36  ;;  %v745_v42 = vpop.f32.mrb[13].mxu0  ;;  %1426 = vst.msk [vmem:[#allocation2 + $0x20] sm:$0xff] %vm1421_vm1, %v2655_v13  ;;  %1427 = vst.msk [vmem:[#allocation2 + $0x28] sm:$0xff] %vm1421_vm1, %v2655_v13 }
 0x1a7   : > { %v2502_v43 = vpack.c.bf16 %v865_v40, %v863_v35  ;;  %v1834_v58 = vmul.f32 %v865_v40, %v865_v40  ;;  %v867_v31 = vpop.f32.mrb[14].mxu1  ;;  %v2454_v44 = vpack.c.bf16 %v745_v42, %v743_v36  ;;  %v1762_v19 = vmul.f32 %v745_v42, %v745_v42  ;;  %v747_v45 = vpop.f32.mrb[14].mxu0  ;;  %1428 = vst.msk [vmem:[#allocation2 + $0x30] sm:$0xff] %vm1421_vm1, %v2655_v13 }
 0x1a8   : > { %v1836_v16 = vmul.f32 %v867_v31, %v867_v31  ;;  %v869_v46 = vpop.f32.mrb[15].mxu1  ;;  %v1764_v24 = vmul.f32 %v747_v45, %v747_v45  ;;  %v749_v47 = vpop.f32.mrb[15].mxu0  ;;  %v2992_v50 = vadd.f32 %v745_v42, %v743_v36  ;;  %v2994_v51 = vadd.f32 %v865_v40, %v863_v35  ;;  %1429 = vst.msk [vmem:[#allocation2 + $0x38] sm:$0xff] %vm1421_vm1, %v2655_v13 }
 0x1a9   : > { %1413 = vst [vmem:[%s2930_s10 + $0x168] sm:$0xff] %v2502_v43  ;;  %v2504_v39 = vpack.c.bf16 %v869_v46, %v867_v31  ;;  %v1837_v52 = vmul.f32 %v869_v46, %v869_v46  ;;  %1365 = vst [vmem:[%s2930_s10 + $0x48] sm:$0xff] %v2454_v44  ;;  %v2456_v17 = vpack.c.bf16 %v749_v47, %v747_v45 }
 0x1aa   : > { %v1765_v61 = vmul.f32 %v749_v47, %v749_v47  ;;  %v2998_v62 = vadd.f32 %v749_v47, %v747_v45  ;;  %v3000_v15 = vadd.f32 %v1762_v19, %v1761_v56  ;;  %v3002_v63 = vadd.f32 %v869_v46, %v867_v31  ;;  %1430 = vst.msk [vmem:[#allocation2 + $0x40] sm:$0xff] %vm1421_vm1, %v2655_v13 }
 0x1ab   : > { %v3004_v37 = vadd.f32 %v1834_v58, %v1833_v38  ;;  %1415 = vst [vmem:[%s2930_s10 + $0x174] sm:$0xff] %v2504_v39  ;;  %1367 = vst [vmem:[%s2930_s10 + $0x54] sm:$0xff] %v2456_v17  ;;  %v3010_v1 = vadd.f32 %v1837_v52, %v1836_v16 }
 0x1ac   : > { %v3008_v0 = vadd.f32 %v1765_v61, %v1764_v24  ;;  %1431 = vst.msk [vmem:[#allocation2 + $0x48] sm:$0xff] %vm1421_vm1, %v2655_v13  ;;  %1432 = vst.msk [vmem:[#allocation2 + $0x50] sm:$0xff] %vm1421_vm1, %v2655_v13 }
 0x1ad   : > { %v3012_v2 = vpop.f32.mrb[16].mxu1  ;;  %v3014_v3 = vpop.f32.mrb[16].mxu0  ;;  %1433 = vst.msk [vmem:[#allocation2 + $0x58] sm:$0xff] %vm1421_vm1, %v2655_v13  ;;  %1434 = vst.msk [vmem:[#allocation2 + $0x60] sm:$0xff] %vm1421_vm1, %v2655_v13 }
 0x1ae   : > { %v2447_v5 = vpack.c.bf16 %v3012_v2, %v3012_v2  ;;  %v3018_v6 = vpop.f32.mrb[17].mxu1  ;;  %v3022_v7 = vadd.f32 %v3012_v2, %v2952_v48  ;;  %v3026_v8 = vmul.f32 %v3012_v2, %v3012_v2  ;;  %v3030_v25 = vmul.f32 %v3014_v3, %v3014_v3  ;;  %v3032_v4 = vpop.f32.mrb[17].mxu0  ;;  %1435 = vst.msk [vmem:[#allocation2 + $0x68] sm:$0xff] %vm1421_vm1, %v2655_v13 }
 0x1af   : > { %1436 = vst.msk [vmem:[#allocation2 + $0x70] sm:$0xff] %vm1421_vm1, %v2655_v13  ;;  %1437 = vst.msk [vmem:[#allocation2 + $0x78] sm:$0xff] %vm1421_vm1, %v2655_v13  ;;  %v2443_v48 = vpack.c.bf16 %v3018_v6, %v3018_v6  ;;  %v2537_v10 = vpop.f32.mrb[18].mxu1  ;;  %v1519_v14 = vadd.f32 %v2932_v21, %v3018_v6  ;;  %v1745_v41 = vmul.f32 %v3018_v6, %v3018_v6  ;;  %v757_v36 = vpop.f32.mrb[18].mxu0 }
 0x1b0   : > { %1438 = vst.msk [vmem:[#allocation2 + $0x80] sm:$0xff] %vm1421_vm1, %v2655_v13  ;;  %1439 = vst.msk [vmem:[#allocation2 + $0x88] sm:$0xff] %vm1421_vm1, %v2655_v13  ;;  %v2458_v35 = vpack.c.bf16 %v3032_v4, %v3014_v3  ;;  %v2449_v38 = vpack.c.bf16 %v2537_v10, %v2537_v10  ;;  %v909_v40 = vpop.f32.mrb[19].mxu1  ;;  %1528 = vadd.xlane.f32.xlu0 %v3022_v7  ;;  %v1848_v21 = vadd.f32 %v2958_v53, %v3026_v8  ;;  %v759_v43 = vpop.f32.mrb[19].mxu0 }
 0x1b1   : > { %1440 = vst.msk [vmem:[#allocation2 + $0x90] sm:$0xff] %vm1421_vm1, %v2655_v13  ;;  %1441 = vst.msk [vmem:[#allocation2 + $0x98] sm:$0xff] %vm1421_vm1, %v2655_v13  ;;  %v1531_v56 = vadd.f32 %v2537_v10, %v2960_v54  ;;  %v1754_v42 = vmul.f32 %v2537_v10, %v2537_v10  ;;  %v2445_v58 = vpack.c.bf16 %v909_v40, %v909_v40  ;;  %1520 = vadd.xlane.f32.xlu1 %v1519_v14 }
 0x1b2   : > { %1442 = vst.msk [vmem:[#allocation2 + $0xa0] sm:$0xff] %vm1421_vm1, %v2655_v13  ;;  %1443 = vst.msk [vmem:[#allocation2 + $0xa8] sm:$0xff] %vm1421_vm1, %v2655_v13  ;;  %v1523_v31 = vadd.f32 %v2938_v28, %v909_v40  ;;  %v1840_v44 = vadd.f32 %v2940_v29, %v1745_v41  ;;  %v1748_v19 = vmul.f32 %v909_v40, %v909_v40 }
 0x1b3   : > { %1444 = vst.msk [vmem:[#allocation2 + $0xb0] sm:$0xff] %vm1421_vm1, %v2655_v13  ;;  %1445 = vst.msk [vmem:[#allocation2 + $0xb8] sm:$0xff] %vm1421_vm1, %v2655_v13  ;;  %v1852_v45 = vadd.f32 %v2968_v59, %v1754_v42  ;;  %v1768_v53 = vmul.f32 %v3032_v4, %v3032_v4  ;;  %v1770_v16 = vmul.f32 %v757_v36, %v757_v36 }
 0x1b4   : > { %1446 = vst.msk [vmem:[#allocation2 + $0xc0] sm:$0xff] %vm1421_vm1, %v2655_v13  ;;  %1447 = vst.msk [vmem:[#allocation2 + $0xc8] sm:$0xff] %vm1421_vm1, %v2655_v13  ;;  %v2460_v54 = vpack.c.bf16 %v759_v43, %v757_v36  ;;  %v1844_v46 = vadd.f32 %v2948_v33, %v1748_v19  ;;  %v1771_v24 = vmul.f32 %v759_v43, %v759_v43  ;;  %1849 = vadd.xlane.f32.xlu0 %v1848_v21 }
 0x1b5   : > { %1448 = vst.msk [vmem:[#allocation2 + $0xd0] sm:$0xff] %vm1421_vm1, %v2655_v13  ;;  %1449 = vst.msk [vmem:[#allocation2 + $0xd8] sm:$0xff] %vm1421_vm1, %v2655_v13  ;;  %v1550_v47 = vadd.f32 %v3032_v4, %v3014_v3  ;;  %v3190_v28 = vadd.f32 %v759_v43, %v757_v36  ;;  %v3194_v29 = vadd.f32 %v1768_v53, %v3030_v25  ;;  %v2540_v59 = vpop.f32.mrb[20].mxu1  ;;  %1532 = vadd.xlane.f32.xlu1 %v1531_v56  ;;  %v763_v39 = vpop.f32.mrb[20].mxu0 }
 0x1b6   : > { %1450 = vst.msk [vmem:[#allocation2 + $0xe0] sm:$0xff] %vm1421_vm1, %v2655_v13  ;;  %1451 = vst.msk [vmem:[#allocation2 + $0xe8] sm:$0xff] %vm1421_vm1, %v2655_v13  ;;  %v3196_v52 = vadd.f32 %v1771_v24, %v1770_v16  ;;  %v2455_v17 = vpack.c.bf16 %v2540_v59, %v2540_v59  ;;  %v922_v61 = vpop.f32.mrb[21].mxu1  ;;  %v1543_v33 = vadd.f32 %v2540_v59, %v2992_v50  ;;  %v765_v3 = vpop.f32.mrb[21].mxu0 }
 0x1b7   : > { %1452 = vst.msk [vmem:[#allocation2 + $0xf0] sm:$0xff] %vm1421_vm1, %v2655_v13  ;;  %1453 = vst.msk [vmem:[#allocation2 + $0xf8] sm:$0xff] %vm1421_vm1, %v2655_v13  ;;  %v1773_v2 = vmul.f32 %v763_v39, %v763_v39  ;;  %v2451_v6 = vpack.c.bf16 %v922_v61, %v922_v61  ;;  %v2541_v7 = vpop.f32.mrb[22].mxu1  ;;  %v3200_v8 = vadd.f32 %v2972_v9, %v922_v61 }
 0x1b8   : > { %1454 = vst.msk [vmem:[#allocation3] sm:$0xff] %vm1421_vm1, %v2655_v13  ;;  %1455 = vst.msk [vmem:[#allocation3 + $0x8] sm:$0xff] %vm1421_vm1, %v2655_v13  ;;  %v2462_v25 = vpack.c.bf16 %v765_v3, %v763_v39  ;;  %v1774_v4 = vmul.f32 %v765_v3, %v765_v3  ;;  %v925_v10 = vpop.f32.mrb[23].mxu1  ;;  %1524 = vadd.xlane.f32.xlu0 %v1523_v31  ;;  %v1547_v50 = vadd.f32 %v2541_v7, %v2998_v62 }
 0x1b9   : > { %1456 = vst.msk [vmem:[#allocation3 + $0x10] sm:$0xff] %vm1421_vm1, %v2655_v13  ;;  %1457 = vst.msk [vmem:[#allocation3 + $0x18] sm:$0xff] %vm1421_vm1, %v2655_v13  ;;  %v1766_v41 = vmul.f32 %v2541_v7, %v2541_v7  ;;  %v2453_v9 = vpack.c.bf16 %v925_v10, %v925_v10  ;;  %1853 = vadd.xlane.f32.xlu1 %v1852_v45  ;;  %v1539_v36 = vadd.f32 %v2978_v18, %v925_v10 }
 0x1ba   : > { %1458 = vst.msk [vmem:[#allocation3 + $0x20] sm:$0xff] %vm1421_vm1, %v2655_v13  ;;  %1459 = vst.msk [vmem:[#allocation3 + $0x28] sm:$0xff] %vm1421_vm1, %v2655_v13  ;;  %v1757_v56 = vmul.f32 %v922_v61, %v922_v61  ;;  %v1760_v42 = vmul.f32 %v925_v10, %v925_v10 }
 0x1bb   : > { %1460 = vst.msk [vmem:[#allocation3 + $0x30] sm:$0xff] %vm1421_vm1, %v2655_v13  ;;  %1461 = vst.msk [vmem:[#allocation3 + $0x38] sm:$0xff] %vm1421_vm1, %v2655_v13  ;;  %v3212_v21 = vadd.f32 %v3008_v0, %v1766_v41 }
 0x1bc   : > { %1462 = vst.msk [vmem:[#allocation3 + $0x40] sm:$0xff] %vm1421_vm1, %v2655_v13  ;;  %1463 = vst.msk [vmem:[#allocation3 + $0x48] sm:$0xff] %vm1421_vm1, %v2655_v13  ;;  %1841 = vadd.xlane.f32.xlu0 %v1840_v44  ;;  %v3217_v31 = vadd.f32 %v2980_v20, %v1757_v56  ;;  %v3220_v18 = vadd.f32 %v2988_v26, %v1760_v42 }
 0x1bd   : > { %1464 = vst.msk [vmem:[#allocation3 + $0x50] sm:$0xff] %vm1421_vm1, %v2655_v13  ;;  %1465 = vst.msk [vmem:[#allocation3 + $0x58] sm:$0xff] %vm1421_vm1, %v2655_v13  ;;  %1845 = vadd.xlane.f32.xlu1 %v1844_v46  ;;  %v2544_v0 = vpop.f32.mrb[24].mxu1 }
 0x1be   : > { %1466 = vst.msk [vmem:[#allocation3 + $0x60] sm:$0xff] %vm1421_vm1, %v2655_v13  ;;  %1467 = vst.msk [vmem:[#allocation3 + $0x68] sm:$0xff] %vm1421_vm1, %v2655_v13  ;;  %v2463_v53 = vpack.c.bf16 %v2544_v0, %v2544_v0  ;;  %v938_v16 = vpop.f32.mrb[25].mxu1 }
 0x1bf   : > { %1468 = vst.msk [vmem:[#allocation3 + $0x70] sm:$0xff] %vm1421_vm1, %v2655_v13  ;;  %1469 = vst.msk [vmem:[#allocation3 + $0x78] sm:$0xff] %vm1421_vm1, %v2655_v13  ;;  %v2459_v44 = vpack.c.bf16 %v938_v16, %v938_v16  ;;  %v3224_v20 = vadd.f32 %v1550_v47, %v938_v16  ;;  %v1769_v10 = vmul.f32 %v938_v16, %v938_v16 }
 0x1c0   : > { %1470 = vst.msk [vmem:[#allocation3 + $0x80] sm:$0xff] %vm1421_vm1, %v2655_v13  ;;  %1471 = vst.msk [vmem:[#allocation3 + $0x88] sm:$0xff] %vm1421_vm1, %v2655_v13  ;;  %1544 = vadd.xlane.f32.xlu0 %v1543_v33 }
 0x1c1   : > { %1472 = vst.msk [vmem:[#allocation3 + $0x90] sm:$0xff] %vm1421_vm1, %v2655_v13  ;;  %1473 = vst.msk [vmem:[#allocation3 + $0x98] sm:$0xff] %vm1421_vm1, %v2655_v13  ;;  %1548 = vadd.xlane.f32.xlu1 %v1547_v50 }
 0x1c2   : > { %1474 = vst.msk [vmem:[#allocation3 + $0xa0] sm:$0xff] %vm1421_vm1, %v2655_v13  ;;  %1475 = vst.msk [vmem:[#allocation3 + $0xa8] sm:$0xff] %vm1421_vm1, %v2655_v13 }
 0x1c3   : > { %1476 = vst.msk [vmem:[#allocation3 + $0xb0] sm:$0xff] %vm1421_vm1, %v2655_v13  ;;  %1477 = vst.msk [vmem:[#allocation3 + $0xb8] sm:$0xff] %vm1421_vm1, %v2655_v13 }
 0x1c4   : > { %1478 = vst.msk [vmem:[#allocation3 + $0xc0] sm:$0xff] %vm1421_vm1, %v2655_v13  ;;  %1479 = vst.msk [vmem:[#allocation3 + $0xc8] sm:$0xff] %vm1421_vm1, %v2655_v13  ;;  %1536 = vadd.xlane.f32.xlu0 %v3200_v8 }
 0x1c5   : > { %1480 = vst.msk [vmem:[#allocation3 + $0xd0] sm:$0xff] %vm1421_vm1, %v2655_v13  ;;  %1481 = vst.msk [vmem:[#allocation3 + $0xd8] sm:$0xff] %vm1421_vm1, %v2655_v13  ;;  %1540 = vadd.xlane.f32.xlu1 %v1539_v36 }
 0x1c6   : > { %1482 = vst.msk [vmem:[#allocation3 + $0xe0] sm:$0xff] %vm1421_vm1, %v2655_v13  ;;  %1483 = vst.msk [vmem:[#allocation3 + $0xe8] sm:$0xff] %vm1421_vm1, %v2655_v13 }
 0x1c7   : > { %1484 = vst.msk [vmem:[#allocation3 + $0xf0] sm:$0xff] %vm1421_vm1, %v2655_v13  ;;  %1485 = vst.msk [vmem:[#allocation3 + $0xf8] sm:$0xff] %vm1421_vm1, %v2655_v13  ;;  %v767_v13 = vpop.f32.mrb[22].mxu0 }
 0x1c8   : > { %1358 = vst [vmem:[%s2930_s10 + $0x20] sm:$0xf] %v2447_v5  ;;  %1354 = vst [vmem:[%s2930_s10 + $0x8] sm:$0xf] %v2443_v48  ;;  %v1763_v5 = vmul.f32 %v2540_v59, %v2540_v59  ;;  %v2457_v48 = vpack.c.bf16 %v2541_v7, %v2541_v7 }
 0x1c9   : > { %1369 = vst [vmem:[%s2930_s10 + $0x60] sm:$0xff] %v2458_v35  ;;  %1360 = vst [vmem:[%s2930_s10 + $0x2c] sm:$0xf] %v2449_v38  ;;  %v769_v35 = vpop.f32.mrb[23].mxu0  ;;  %v1776_v38 = vmul.f32 %v767_v13, %v767_v13  ;;  %1869 = vadd.xlane.f32.xlu1 %v3212_v21 }
 0x1ca   : > { %1356 = vst [vmem:[%s2930_s10 + $0x14] sm:$0xf] %v2445_v58  ;;  %1371 = vst [vmem:[%s2930_s10 + $0x6c] sm:$0xff] %v2460_v54  ;;  %v3205_v14 = vadd.f32 %v3000_v15, %v1763_v5  ;;  %v2464_v40 = vpack.c.bf16 %v769_v35, %v767_v13  ;;  %v1777_v62 = vmul.f32 %v769_v35, %v769_v35  ;;  %v773_v45 = vpop.f32.mrb[24].mxu0 }
 0x1cb   : > { %1366 = vst [vmem:[%s2930_s10 + $0x50] sm:$0xf] %v2455_v17  ;;  %1362 = vst [vmem:[%s2930_s10 + $0x38] sm:$0xf] %v2451_v6  ;;  %v1558_v15 = vadd.f32 %v765_v3, %v763_v39  ;;  %v1562_v43 = vadd.f32 %v769_v35, %v767_v13  ;;  %v1879_v58 = vadd.f32 %v1774_v4, %v1773_v2  ;;  %v775_v59 = vpop.f32.mrb[25].mxu0  ;;  %v2545_v17 = vpop.f32.mrb[26].mxu1 }
 0x1cc   : > { %1373 = vst [vmem:[%s2930_s10 + $0x78] sm:$0xff] %v2462_v25  ;;  %1368 = vst [vmem:[%s2930_s10 + $0x5c] sm:$0xf] %v2457_v48  ;;  %v1883_v19 = vadd.f32 %v1777_v62, %v1776_v38  ;;  %v1779_v24 = vmul.f32 %v773_v45, %v773_v45  ;;  %v1775_v39 = vmul.f32 %v2544_v0, %v2544_v0  ;;  %v777_v2 = vpop.f32.mrb[26].mxu0  ;;  %v941_v5 = vpop.f32.mrb[27].mxu1  ;;  %1865 = vadd.xlane.f32.xlu0 %v3205_v14 }
 0x1cd   : > { %1364 = vst [vmem:[%s2930_s10 + $0x44] sm:$0xf] %v2453_v9  ;;  %1375 = vst [vmem:[%s2930_s10 + $0x84] sm:$0xff] %v2464_v40  ;;  %v3222_v54 = vadd.f32 %v2544_v0, %v1558_v15  ;;  %v2466_v26 = vpack.c.bf16 %v775_v59, %v773_v45  ;;  %v1780_v61 = vmul.f32 %v775_v59, %v775_v59  ;;  %v779_v7 = vpop.f32.mrb[27].mxu0  ;;  %v2548_v56 = vpop.f32.mrb[28].mxu1  ;;  %1861 = vadd.xlane.f32.xlu1 %v3220_v18 }
 0x1ce   : > { %1374 = vst [vmem:[%s2930_s10 + $0x80] sm:$0xf] %v2463_v53  ;;  %v2465_v46 = vpack.c.bf16 %v2545_v17, %v2545_v17  ;;  %v3227_v3 = vadd.f32 %v2545_v17, %v1562_v43  ;;  %v1782_v6 = vmul.f32 %v777_v2, %v777_v2  ;;  %v3229_v25 = vadd.f32 %v1879_v58, %v1775_v39  ;;  %v783_v42 = vpop.f32.mrb[28].mxu0  ;;  %v954_v43 = vpop.f32.mrb[29].mxu1 }
 0x1cf   : > { %1370 = vst [vmem:[%s2930_s10 + $0x68] sm:$0xf] %v2459_v44  ;;  %v2461_v47 = vpack.c.bf16 %v941_v5, %v941_v5  ;;  %1377 = vst [vmem:[%s2930_s10 + $0x90] sm:$0xff] %v2466_v26  ;;  %v3234_v4 = vadd.f32 %v3190_v28, %v941_v5  ;;  %v2468_v13 = vpack.c.bf16 %v779_v7, %v777_v2  ;;  %v785_v0 = vpop.f32.mrb[29].mxu0  ;;  %v2549_v8 = vpop.f32.mrb[30].mxu1 }
 0x1d0   : > { %v1783_v33 = vmul.f32 %v779_v7, %v779_v7  ;;  %1376 = vst [vmem:[%s2930_s10 + $0x8c] sm:$0xf] %v2465_v46  ;;  %v1778_v48 = vmul.f32 %v2545_v17, %v2545_v17  ;;  %v1772_v41 = vmul.f32 %v941_v5, %v941_v5  ;;  %v1566_v35 = vadd.f32 %v775_v59, %v773_v45  ;;  %v957_v36 = vpop.f32.mrb[31].mxu1 }
 0x1d1   : > { %1372 = vst [vmem:[%s2930_s10 + $0x74] sm:$0xf] %v2461_v47  ;;  %1379 = vst [vmem:[%s2930_s10 + $0x9c] sm:$0xff] %v2468_v13  ;;  %v1570_v9 = vadd.f32 %v779_v7, %v777_v2  ;;  %v1887_v38 = vadd.f32 %v1780_v61, %v1779_v24  ;;  %v3243_v62 = vadd.f32 %v3194_v29, %v1769_v10  ;;  %v787_v29 = vpop.f32.mrb[30].mxu0  ;;  %1857 = vadd.xlane.f32.xlu0 %v3217_v31  ;;  %v3270_v10 = vpop.f32.mrb[32].mxu1 }
 0x1d2   : > { %v1891_v40 = vadd.f32 %v1783_v33, %v1782_v6  ;;  %v3240_v50 = vadd.f32 %v1883_v19, %v1778_v48  ;;  %v3246_v28 = vadd.f32 %v3196_v52, %v1772_v41  ;;  %v2471_v15 = vpack.c.bf16 %v2548_v56, %v2548_v56  ;;  %v789_v39 = vpop.f32.mrb[31].mxu0  ;;  %1564 = vadd.xlane.f32.xlu1 %v3227_v3 }
 0x1d3   : > { %v1785_v58 = vmul.f32 %v783_v42, %v783_v42  ;;  %v1787_v45 = vmul.f32 %v2548_v56, %v2548_v56  ;;  %v2467_v53 = vpack.c.bf16 %v954_v43, %v954_v43  ;;  %v2470_v19 = vpack.c.bf16 %v785_v0, %v783_v42  ;;  %v793_v41 = vpop.f32.mrb[32].mxu0 }
 0x1d4   : > { %v1786_v16 = vmul.f32 %v785_v0, %v785_v0  ;;  %v3248_v24 = vadd.f32 %v1566_v35, %v954_v43  ;;  %1382 = vst [vmem:[%s2930_s10 + $0xb0] sm:$0xf] %v2471_v15  ;;  %v2473_v52 = vpack.c.bf16 %v2549_v8, %v2549_v8  ;;  %v1788_v59 = vmul.f32 %v787_v29, %v787_v29  ;;  %v795_v31 = vpop.f32.mrb[33].mxu0 }
 0x1d5   : > { %v1574_v44 = vadd.f32 %v785_v0, %v783_v42  ;;  %v1781_v17 = vmul.f32 %v954_v43, %v954_v43  ;;  %1378 = vst [vmem:[%s2930_s10 + $0x98] sm:$0xf] %v2467_v53  ;;  %v2469_v26 = vpack.c.bf16 %v957_v36, %v957_v36  ;;  %1381 = vst [vmem:[%s2930_s10 + $0xa8] sm:$0xff] %v2470_v19  ;;  %1560 = vadd.xlane.f32.xlu0 %v3222_v54 }
 0x1d6   : > { %v2472_v61 = vpack.c.bf16 %v789_v39, %v787_v29  ;;  %v1789_v2 = vmul.f32 %v789_v39, %v789_v39  ;;  %v3255_v46 = vadd.f32 %v1570_v9, %v957_v36  ;;  %1384 = vst [vmem:[%s2930_s10 + $0xbc] sm:$0xf] %v2473_v52  ;;  %v1578_v5 = vadd.f32 %v789_v39, %v787_v29 }
 0x1d7   : > { %v3258_v14 = vadd.f32 %v2548_v56, %v1574_v44  ;;  %v3260_v6 = vadd.f32 %v1887_v38, %v1781_v17  ;;  %v1784_v7 = vmul.f32 %v957_v36, %v957_v36  ;;  %1380 = vst [vmem:[%s2930_s10 + $0xa4] sm:$0xf] %v2469_v26  ;;  %v1895_v47 = vadd.f32 %v1786_v16, %v1785_v58  ;;  %v970_v56 = vpop.f32.mrb[33].mxu1  ;;  %v797_v58 = vpop.f32.mrb[34].mxu0 }
 0x1d8   : > { %1383 = vst [vmem:[%s2930_s10 + $0xb4] sm:$0xff] %v2472_v61  ;;  %v1790_v13 = vmul.f32 %v2549_v8, %v2549_v8  ;;  %v1899_v33 = vadd.f32 %v1789_v2, %v1788_v59  ;;  %v3265_v21 = vadd.f32 %v2549_v8, %v1578_v5  ;;  %v2479_v38 = vpack.c.bf16 %v3270_v10, %v3270_v10  ;;  %v799_v19 = vpop.f32.mrb[35].mxu0 }
 0x1d9   : > { %v3267_v48 = vadd.f32 %v1891_v40, %v1784_v7  ;;  %v3272_v35 = vadd.f32 %v1895_v47, %v1787_v45  ;;  %v1791_v42 = vmul.f32 %v793_v41, %v793_v41  ;;  %v2475_v15 = vpack.c.bf16 %v970_v56, %v970_v56  ;;  %v3278_v40 = vpop.f32.mrb[34].mxu1  ;;  %1552 = vadd.xlane.f32.xlu0 %v3224_v20  ;;  %v803_v2 = vpop.f32.mrb[36].mxu0 }
 0x1da   : > { %v3274_v9 = vadd.f32 %v1899_v33, %v1790_v13  ;;  %v2474_v18 = vpack.c.bf16 %v795_v31, %v793_v41  ;;  %v1792_v43 = vmul.f32 %v795_v31, %v795_v31  ;;  %v1582_v0 = vadd.f32 %v795_v31, %v793_v41  ;;  %1390 = vst [vmem:[%s2930_s10 + $0xe0] sm:$0xf] %v2479_v38  ;;  %v973_v53 = vpop.f32.mrb[35].mxu1  ;;  %v805_v33 = vpop.f32.mrb[37].mxu0 }
 0x1db   : > { %v2481_v45 = vpack.c.bf16 %v3278_v40, %v3278_v40  ;;  %v1794_v8 = vmul.f32 %v797_v58, %v797_v58  ;;  %v1793_v16 = vmul.f32 %v970_v56, %v970_v56  ;;  %1386 = vst [vmem:[%s2930_s10 + $0xc8] sm:$0xf] %v2475_v15  ;;  %v2477_v29 = vpack.c.bf16 %v973_v53, %v973_v53  ;;  %v3298_v3 = vpop.f32.mrb[36].mxu1 }
 0x1dc   : > { %1385 = vst [vmem:[%s2930_s10 + $0xc0] sm:$0xff] %v2474_v18  ;;  %v2476_v52 = vpack.c.bf16 %v799_v19, %v797_v58  ;;  %v1795_v36 = vmul.f32 %v799_v19, %v799_v19  ;;  %v3287_v59 = vadd.f32 %v1582_v0, %v970_v56  ;;  %v1586_v54 = vadd.f32 %v799_v19, %v797_v58  ;;  %v3304_v47 = vpop.f32.mrb[37].mxu1  ;;  %v807_v56 = vpop.f32.mrb[38].mxu0 }
 0x1dd   : > { %1392 = vst [vmem:[%s2930_s10 + $0xec] sm:$0xf] %v2481_v45  ;;  %v1903_v39 = vadd.f32 %v1792_v43, %v1791_v42  ;;  %v1796_v44 = vmul.f32 %v973_v53, %v973_v53  ;;  %1388 = vst [vmem:[%s2930_s10 + $0xd4] sm:$0xf] %v2477_v29  ;;  %1556 = vadd.xlane.f32.xlu1 %v3234_v4  ;;  %v2487_v7 = vpack.c.bf16 %v3298_v3, %v3298_v3  ;;  %v3308_v41 = vpop.f32.mrb[38].mxu1  ;;  %v809_v43 = vpop.f32.mrb[39].mxu0 }
 0x1de   : > { %1387 = vst [vmem:[%s2930_s10 + $0xcc] sm:$0xff] %v2476_v52  ;;  %v1907_v17 = vadd.f32 %v1795_v36, %v1794_v8  ;;  %v3293_v26 = vadd.f32 %v1586_v54, %v973_v53  ;;  %v1797_v13 = vmul.f32 %v803_v2, %v803_v2  ;;  %v2483_v20 = vpack.c.bf16 %v3304_v47, %v3304_v47  ;;  %v3314_v15 = vpop.f32.mrb[39].mxu1  ;;  %v813_v54 = vpop.f32.mrb[40].mxu0 }
 0x1df   : > { %v3295_v61 = vadd.f32 %v1903_v39, %v1793_v16  ;;  %v2478_v4 = vpack.c.bf16 %v805_v33, %v803_v2  ;;  %v1798_v38 = vmul.f32 %v805_v33, %v805_v33  ;;  %v1590_v42 = vadd.f32 %v805_v33, %v803_v2  ;;  %1881 = vadd.xlane.f32.xlu0 %v3229_v25  ;;  %v2560_v36 = vpop.f32.mrb[40].mxu1 }
 0x1e0   : > { %v3300_v5 = vadd.f32 %v1907_v17, %v1796_v44  ;;  %1398 = vst [vmem:[%s2930_s10 + $0x110] sm:$0xf] %v2487_v7  ;;  %v2489_v31 = vpack.c.bf16 %v3308_v41, %v3308_v41  ;;  %v1800_v18 = vmul.f32 %v807_v56, %v807_v56  ;;  %v1799_v58 = vmul.f32 %v3270_v10, %v3270_v10 }
 0x1e1   : > { %v1802_v0 = vmul.f32 %v3278_v40, %v3278_v40  ;;  %1885 = vadd.xlane.f32.xlu1 %v3240_v50  ;;  %1394 = vst [vmem:[%s2930_s10 + $0xf8] sm:$0xf] %v2483_v20  ;;  %v2485_v25 = vpack.c.bf16 %v3314_v15, %v3314_v15  ;;  %1389 = vst [vmem:[%s2930_s10 + $0xd8] sm:$0xff] %v2478_v4  ;;  %v2480_v45 = vpack.c.bf16 %v809_v43, %v807_v56 }
 0x1e2   : > { %v1801_v53 = vmul.f32 %v809_v43, %v809_v43  ;;  %v3326_v8 = vadd.f32 %v3270_v10, %v1590_v42  ;;  %1400 = vst [vmem:[%s2930_s10 + $0x11c] sm:$0xf] %v2489_v31  ;;  %v1594_v19 = vadd.f32 %v809_v43, %v807_v56  ;;  %v1911_v16 = vadd.f32 %v1798_v38, %v1797_v13 }
 0x1e3   : > { %1396 = vst [vmem:[%s2930_s10 + $0x104] sm:$0xf] %v2485_v25  ;;  %1391 = vst [vmem:[%s2930_s10 + $0xe4] sm:$0xff] %v2480_v45  ;;  %1873 = vadd.xlane.f32.xlu0 %v3243_v62  ;;  %v1805_v39 = vmul.f32 %v3304_v47, %v3304_v47  ;;  %v1808_v44 = vmul.f32 %v3314_v15, %v3314_v15  ;;  %v2495_v17 = vpack.c.bf16 %v2560_v36, %v2560_v36  ;;  %v1002_v62 = vpop.f32.mrb[41].mxu1 }
 0x1e4   : > { %v1915_v29 = vadd.f32 %v1801_v53, %v1800_v18  ;;  %v3333_v50 = vadd.f32 %v3278_v40, %v1594_v19  ;;  %v3335_v52 = vadd.f32 %v1911_v16, %v1799_v58  ;;  %v1803_v2 = vmul.f32 %v813_v54, %v813_v54  ;;  %v815_v40 = vpop.f32.mrb[41].mxu0  ;;  %v2561_v33 = vpop.f32.mrb[42].mxu1 }
 0x1e5   : > { %1877 = vadd.xlane.f32.xlu1 %v3246_v28  ;;  %v3345_v7 = vadd.f32 %v2560_v36, %v2954_v49  ;;  %v1823_v13 = vmul.f32 %v2560_v36, %v2560_v36  ;;  %v2491_v28 = vpack.c.bf16 %v1002_v62, %v1002_v62  ;;  %v2482_v20 = vpack.c.bf16 %v815_v40, %v813_v54  ;;  %v817_v38 = vpop.f32.mrb[42].mxu0  ;;  %v1005_v31 = vpop.f32.mrb[43].mxu1 }
 0x1e6   : > { %v3338_v10 = vadd.f32 %v1915_v29, %v1802_v0  ;;  %v1804_v4 = vmul.f32 %v815_v40, %v815_v40  ;;  %v3348_v56 = vadd.f32 %v2934_v22, %v1002_v62  ;;  %1406 = vst [vmem:[%s2930_s10 + $0x140] sm:$0xf] %v2495_v17  ;;  %v2497_v42 = vpack.c.bf16 %v2561_v33, %v2561_v33  ;;  %v819_v49 = vpop.f32.mrb[43].mxu0 }
 0x1e7   : > { %1568 = vadd.xlane.f32.xlu0 %v3248_v24  ;;  %v1806_v18 = vmul.f32 %v817_v38, %v817_v38  ;;  %v3353_v43 = vadd.f32 %v2561_v33, %v2962_v55  ;;  %v3356_v58 = vadd.f32 %v2964_v57, %v1823_v13  ;;  %1402 = vst [vmem:[%s2930_s10 + $0x128] sm:$0xf] %v2491_v28  ;;  %1393 = vst [vmem:[%s2930_s10 + $0xf0] sm:$0xff] %v2482_v20 }
 0x1e8   : > { %v2493_v0 = vpack.c.bf16 %v1005_v31, %v1005_v31  ;;  %v2484_v22 = vpack.c.bf16 %v819_v49, %v817_v38  ;;  %v1807_v25 = vmul.f32 %v819_v49, %v819_v49  ;;  %v3362_v45 = vadd.f32 %v2942_v30, %v1005_v31  ;;  %1408 = vst [vmem:[%s2930_s10 + $0x14c] sm:$0xf] %v2497_v42 }
 0x1e9   : > { %1572 = vadd.xlane.f32.xlu1 %v3255_v46  ;;  %v1826_v24 = vmul.f32 %v2561_v33, %v2561_v33  ;;  %v1598_v53 = vadd.f32 %v815_v40, %v813_v54  ;;  %v1602_v19 = vadd.f32 %v819_v49, %v817_v38  ;;  %v1817_v16 = vmul.f32 %v1002_v62, %v1002_v62  ;;  %v2564_v62 = vpop.f32.mrb[44].mxu1 }
 0x1ea   : > { %1404 = vst [vmem:[%s2930_s10 + $0x134] sm:$0xf] %v2493_v0  ;;  %1395 = vst [vmem:[%s2930_s10 + $0xfc] sm:$0xff] %v2484_v22  ;;  %v1820_v55 = vmul.f32 %v1005_v31, %v1005_v31  ;;  %v1919_v57 = vadd.f32 %v1804_v4, %v1803_v2  ;;  %v1923_v29 = vadd.f32 %v1807_v25, %v1806_v18  ;;  %v823_v2 = vpop.f32.mrb[44].mxu0  ;;  %v1018_v13 = vpop.f32.mrb[45].mxu1 }
 0x1eb   : > { %v1811_v36 = vmul.f32 %v3298_v3, %v3298_v3  ;;  %1576 = vadd.xlane.f32.xlu0 %v3258_v14  ;;  %v3371_v46 = vadd.f32 %v2970_v60, %v1826_v24  ;;  %v3374_v30 = vadd.f32 %v1598_v53, %v3304_v47  ;;  %v3377_v54 = vadd.f32 %v1602_v19, %v3314_v15  ;;  %v2565_v4 = vpop.f32.mrb[46].mxu1 }
 0x1ec   : > { %v3380_v17 = vadd.f32 %v2944_v32, %v1817_v16  ;;  %v3384_v40 = vadd.f32 %v2950_v34, %v1820_v55  ;;  %v3386_v14 = vadd.f32 %v1919_v57, %v1805_v39  ;;  %v3388_v60 = vadd.f32 %v1923_v29, %v1808_v44  ;;  %v825_v32 = vpop.f32.mrb[45].mxu0  ;;  %v1021_v31 = vpop.f32.mrb[47].mxu1 }
 0x1ed   : > { %1580 = vadd.xlane.f32.xlu1 %v3265_v21  ;;  %v1814_v47 = vmul.f32 %v3308_v41, %v3308_v41  ;;  %v2503_v15 = vpack.c.bf16 %v2564_v62, %v2564_v62  ;;  %v1809_v28 = vmul.f32 %v823_v2, %v823_v2  ;;  %v1639_v33 = vadd.f32 %v2564_v62, %v2994_v51  ;;  %v827_v39 = vpop.f32.mrb[46].mxu0 }
 0x1ee   : > { %v1835_v21 = vmul.f32 %v2564_v62, %v2564_v62  ;;  %v2499_v20 = vpack.c.bf16 %v1018_v13, %v1018_v13  ;;  %v2486_v34 = vpack.c.bf16 %v825_v32, %v823_v2  ;;  %v1810_v38 = vmul.f32 %v825_v32, %v825_v32  ;;  %v829_v49 = vpop.f32.mrb[47].mxu0 }
 0x1ef   : > { %v1631_v44 = vadd.f32 %v2974_v12, %v1018_v13  ;;  %1414 = vst [vmem:[%s2930_s10 + $0x170] sm:$0xf] %v2503_v15  ;;  %v2505_v42 = vpack.c.bf16 %v2565_v4, %v2565_v4  ;;  %1889 = vadd.xlane.f32.xlu0 %v3260_v6  ;;  %v1812_v18 = vmul.f32 %v827_v39, %v827_v39 }
 0x1f0   : > { %v1643_v51 = vadd.f32 %v2565_v4, %v3002_v63  ;;  %v1606_v0 = vadd.f32 %v825_v32, %v823_v2  ;;  %1410 = vst [vmem:[%s2930_s10 + $0x158] sm:$0xf] %v2499_v20  ;;  %v2501_v22 = vpack.c.bf16 %v1021_v31, %v1021_v31  ;;  %v1832_v25 = vmul.f32 %v1021_v31, %v1021_v31 }
 0x1f1   : > { %1893 = vadd.xlane.f32.xlu1 %v3267_v48  ;;  %1397 = vst [vmem:[%s2930_s10 + $0x108] sm:$0xff] %v2486_v34  ;;  %v2488_v12 = vpack.c.bf16 %v829_v49, %v827_v39  ;;  %v1610_v24 = vadd.f32 %v829_v49, %v827_v39  ;;  %1416 = vst [vmem:[%s2930_s10 + $0x17c] sm:$0xf] %v2505_v42  ;;  %v1813_v53 = vmul.f32 %v829_v49, %v829_v49  ;;  %v1717_v49 = vld [vmem:[#allocation3 + $0x30] sm:$0xff] }
 0x1f2   : > { %v1635_v19 = vadd.f32 %v2982_v23, %v1021_v31  ;;  %v1607_v6 = vadd.f32 %v3298_v3, %v1606_v0  ;;  %v1829_v16 = vmul.f32 %v1018_v13, %v1018_v13  ;;  %1412 = vst [vmem:[%s2930_s10 + $0x164] sm:$0xf] %v2501_v22  ;;  %v1956_v55 = vadd.f32 %v2990_v27, %v1832_v25  ;;  %v1486_v27 = vld [vmem:[#allocation2] sm:$0xff]  ;;  %v1493_v13 = vld [vmem:[#allocation2 + $0x38] sm:$0xff] }
 0x1f3   : > { %1399 = vst [vmem:[%s2930_s10 + $0x114] sm:$0xff] %v2488_v12  ;;  %v1611_v63 = vadd.f32 %v3308_v41, %v1610_v24  ;;  %v1927_v57 = vadd.f32 %v1810_v38, %v1809_v28  ;;  %v1960_v29 = vadd.f32 %v3004_v37, %v1835_v21  ;;  %1897 = vadd.xlane.f32.xlu0 %v3272_v35  ;;  %v1491_v38 = vld [vmem:[#allocation2 + $0x28] sm:$0xff]  ;;  %v1718_v0 = vld [vmem:[#allocation3 + $0x38] sm:$0xff] }
 0x1f4   : > { %v1952_v48 = vadd.f32 %v2984_v11, %v1829_v16  ;;  %v1931_v62 = vadd.f32 %v1813_v53, %v1812_v18  ;;  %v1838_v2 = vmul.f32 %v2565_v4, %v2565_v4  ;;  %v1488_v11 = vld [vmem:[#allocation2 + $0x10] sm:$0xff]  ;;  %v1490_v4 = vld [vmem:[#allocation2 + $0x20] sm:$0xff]  ;;  %v1716_v16 = vld [vmem:[#allocation3 + $0x28] sm:$0xff] }
 0x1f5   : > { %1901 = vadd.xlane.f32.xlu1 %v3274_v9  ;;  %v1928_v23 = vadd.f32 %v1927_v57, %v1811_v36 }
 0x1f6   : > { %v1932_v3 = vadd.f32 %v1931_v62, %v1814_v47  ;;  %v1964_v15 = vadd.f32 %v3010_v1, %v1838_v2  ;;  %v1496_v62 = vld [vmem:[#allocation2 + $0x50] sm:$0xff] }
 0x1f7   : > { %1584 = vadd.xlane.f32.xlu0 %v3287_v59  ;;  %v1713_v59 = vld [vmem:[#allocation3 + $0x10] sm:$0xff] }
 0x1f9   : > { %1588 = vadd.xlane.f32.xlu1 %v3293_v26  ;;  %v1489_v26 = vld [vmem:[#allocation2 + $0x18] sm:$0xff] }
 0x1fb   : > { %1905 = vadd.xlane.f32.xlu0 %v3295_v61 }
 0x1fd   : > { %1909 = vadd.xlane.f32.xlu1 %v3300_v5 }
 0x1ff   : > { %1592 = vadd.xlane.f32.xlu0 %v3326_v8 }
 0x201   : > { %1596 = vadd.xlane.f32.xlu1 %v3333_v50  ;;  %v1487_v50 = vld [vmem:[#allocation2 + $0x8] sm:$0xff] }
 0x203   : > { %1913 = vadd.xlane.f32.xlu0 %v3335_v52  ;;  %v1714_v52 = vld [vmem:[#allocation3 + $0x18] sm:$0xff] }
 0x205   : > { %1917 = vadd.xlane.f32.xlu1 %v3338_v10 }
 0x207   : > { %1624 = vadd.xlane.f32.xlu0 %v3345_v7 }
 0x209   : > { %1628 = vadd.xlane.f32.xlu1 %v3353_v43 }
 0x20b   : > { %1616 = vadd.xlane.f32.xlu0 %v3348_v56 }
 0x20d   : > { %1620 = vadd.xlane.f32.xlu1 %v3362_v45  ;;  %v1711_v45 = vld [vmem:[#allocation3] sm:$0xff] }
 0x20f   : > { %1945 = vadd.xlane.f32.xlu0 %v3356_v58 }
 0x211   : > { %1949 = vadd.xlane.f32.xlu1 %v3371_v46  ;;  %v1712_v46 = vld [vmem:[#allocation3 + $0x8] sm:$0xff] }
 0x213   : > { %1600 = vadd.xlane.f32.xlu0 %v3374_v30 }
 0x215   : > { %1604 = vadd.xlane.f32.xlu1 %v3377_v54 }
 0x217   : > { %1937 = vadd.xlane.f32.xlu0 %v3380_v17 }
 0x219   : > { %1941 = vadd.xlane.f32.xlu1 %v3384_v40 }
 0x21b   : > { %1921 = vadd.xlane.f32.xlu0 %v3386_v14 }
 0x21d   : > { %1925 = vadd.xlane.f32.xlu1 %v3388_v60  ;;  %v1492_v60 = vld [vmem:[#allocation2 + $0x30] sm:$0xff] }
 0x21f   : > { %1640 = vadd.xlane.f32.xlu0 %v1639_v33 }
 0x221   : > { %1644 = vadd.xlane.f32.xlu1 %v1643_v51 }
 0x223   : > { %1632 = vadd.xlane.f32.xlu0 %v1631_v44 }
 0x225   : > { %1636 = vadd.xlane.f32.xlu1 %v1635_v19  ;;  %v1715_v19 = vld [vmem:[#allocation3 + $0x20] sm:$0xff] }
 0x227   : > { %1608 = vadd.xlane.f32.xlu0 %v1607_v6 }
 0x229   : > { %1612 = vadd.xlane.f32.xlu1 %v1611_v63 }
 0x22b   : > { %1953 = vadd.xlane.f32.xlu0 %v1952_v48 }
 0x22d   : > { %1957 = vadd.xlane.f32.xlu1 %v1956_v55 }
 0x22f   : > { %1929 = vadd.xlane.f32.xlu0 %v1928_v23  ;;  %v1497_v23 = vld [vmem:[#allocation2 + $0x58] sm:$0xff] }
 0x231   : > { %1933 = vadd.xlane.f32.xlu1 %v1932_v3 }
 0x233   : > { %1961 = vadd.xlane.f32.xlu0 %v1960_v29 }
 0x235   : > { %1965 = vadd.xlane.f32.xlu1 %v1964_v15 }
 0x23d   : > { %v1529_v37 = vpop.xlane.xlu0 %1528 }
 0x23e   : > { %v1648_v1 = vadd.f32 %v1529_v37, %v1488_v11  ;;  %v1521_v35 = vpop.xlane.xlu1 %1520 }
 0x23f   : > { %v1646_v9 = vadd.f32 %v1521_v35, %v1486_v27 }
 0x240   : > { %1681 = vst.msk [vmem:[#allocation2 + $0x10] sm:$0xff] %vm1421_vm1, %v1648_v1  ;;  %v1494_v1 = vld [vmem:[#allocation2 + $0x40] sm:$0xff] }
 0x241   : > { %1679 = vst.msk [vmem:[#allocation2] sm:$0xff] %vm1421_vm1, %v1646_v9  ;;  %v1850_v61 = vpop.xlane.xlu0 %1849  ;;  %v1495_v9 = vld [vmem:[#allocation2 + $0x48] sm:$0xff] }
 0x242   : > { %v1969_v5 = vadd.f32 %v1850_v61, %v1713_v59  ;;  %v1533_v41 = vpop.xlane.xlu1 %1532 }
 0x243   : > { %v1649_v8 = vadd.f32 %v1533_v41, %v1489_v26 }
 0x244   : > { %2001 = vst.msk [vmem:[#allocation3 + $0x10] sm:$0xff] %vm1421_vm1, %v1969_v5 }
 0x245   : > { %1682 = vst.msk [vmem:[#allocation2 + $0x18] sm:$0xff] %vm1421_vm1, %v1649_v8  ;;  %v1525_v10 = vpop.xlane.xlu0 %1524  ;;  %v1721_v8 = vld [vmem:[#allocation3 + $0x50] sm:$0xff] }
 0x246   : > { %v1647_v7 = vadd.f32 %v1525_v10, %v1487_v50  ;;  %v1854_v56 = vpop.xlane.xlu1 %1853 }
 0x247   : > { %v2036_v43 = vld [vmem:[#allocation2 + $0x10] sm:$0xff]  ;;  %v1970_v58 = vadd.f32 %v1854_v56, %v1714_v52  ;;  %v1722_v52 = vld [vmem:[#allocation3 + $0x58] sm:$0xff] }
 0x248   : > { %2068 = vst.msk [vmem:[%s3439_s14 + $0x10] sm:$0xff] %vm1421_vm1, %v2036_v43  ;;  %v2034_v36 = vld [vmem:[#allocation2] sm:$0xff]  ;;  %1680 = vst.msk [vmem:[#allocation2 + $0x8] sm:$0xff] %vm1421_vm1, %v1647_v7 }
 0x249   : > { %2066 = vst.msk [vmem:[%s3439_s14] sm:$0xff] %vm1421_vm1, %v2034_v36  ;;  %2002 = vst.msk [vmem:[#allocation3 + $0x18] sm:$0xff] %vm1421_vm1, %v1970_v58  ;;  %v1842_v30 = vpop.xlane.xlu0 %1841 }
 0x24a   : > { %v1967_v54 = vadd.f32 %v1842_v30, %v1711_v45  ;;  %v1846_v17 = vpop.xlane.xlu1 %1845  ;;  %v1719_v45 = vld [vmem:[#allocation3 + $0x40] sm:$0xff] }
 0x24b   : > { %v2100_v40 = vld [vmem:[#allocation3 + $0x10] sm:$0xff]  ;;  %v1968_v14 = vadd.f32 %v1846_v17, %v1712_v46  ;;  %v1720_v46 = vld [vmem:[#allocation3 + $0x48] sm:$0xff] }
 0x24c   : > { %2132 = vst.msk [vmem:[%s3450_s16 + $0x10] sm:$0xff] %vm1421_vm1, %v2100_v40  ;;  %v2037_v47 = vld [vmem:[#allocation2 + $0x18] sm:$0xff]  ;;  %1999 = vst.msk [vmem:[#allocation3] sm:$0xff] %vm1421_vm1, %v1967_v54 }
 0x24d   : > { %2069 = vst.msk [vmem:[%s3439_s14 + $0x18] sm:$0xff] %vm1421_vm1, %v2037_v47  ;;  %2000 = vst.msk [vmem:[#allocation3 + $0x8] sm:$0xff] %vm1421_vm1, %v1968_v14  ;;  %v1545_v28 = vpop.xlane.xlu0 %1544 }
 0x24e   : > { %v1652_v32 = vadd.f32 %v1545_v28, %v1492_v60  ;;  %v1549_v33 = vpop.xlane.xlu1 %1548  ;;  %v1498_v60 = vld [vmem:[#allocation2 + $0x60] sm:$0xff] }
 0x24f   : > { %v2035_v21 = vld [vmem:[#allocation2 + $0x8] sm:$0xff]  ;;  %v1653_v20 = vadd.f32 %v1549_v33, %v1493_v13 }
 0x250   : > { %2067 = vst.msk [vmem:[%s3439_s14 + $0x8] sm:$0xff] %vm1421_vm1, %v2035_v21  ;;  %v2101_v34 = vld [vmem:[#allocation3 + $0x18] sm:$0xff]  ;;  %1685 = vst.msk [vmem:[#allocation2 + $0x30] sm:$0xff] %vm1421_vm1, %v1652_v32  ;;  %v1499_v13 = vld [vmem:[#allocation2 + $0x68] sm:$0xff] }
 0x251   : > { %2133 = vst.msk [vmem:[%s3450_s16 + $0x18] sm:$0xff] %vm1421_vm1, %v2101_v34  ;;  %1686 = vst.msk [vmem:[#allocation2 + $0x38] sm:$0xff] %vm1421_vm1, %v1653_v20  ;;  %v1537_v39 = vpop.xlane.xlu0 %1536 }
 0x252   : > { %v1650_v44 = vadd.f32 %v1537_v39, %v1490_v4  ;;  %v1541_v42 = vpop.xlane.xlu1 %1540  ;;  %v1500_v4 = vld [vmem:[#allocation2 + $0x70] sm:$0xff] }
 0x253   : > { %v2098_v31 = vld [vmem:[#allocation3] sm:$0xff]  ;;  %v1651_v18 = vadd.f32 %v1541_v42, %v1491_v38  ;;  %v1501_v38 = vld [vmem:[#allocation2 + $0x78] sm:$0xff] }
 0x254   : > { %2130 = vst.msk [vmem:[%s3450_s16] sm:$0xff] %vm1421_vm1, %v2098_v31  ;;  %v2099_v51 = vld [vmem:[#allocation3 + $0x8] sm:$0xff]  ;;  %1683 = vst.msk [vmem:[#allocation2 + $0x20] sm:$0xff] %vm1421_vm1, %v1650_v44 }
 0x255   : > { %2131 = vst.msk [vmem:[%s3450_s16 + $0x8] sm:$0xff] %vm1421_vm1, %v2099_v51  ;;  %1684 = vst.msk [vmem:[#allocation2 + $0x28] sm:$0xff] %vm1421_vm1, %v1651_v18 }
 0x256   : > { %v1870_v12 = vpop.xlane.xlu1 %1869 }
 0x257   : > { %v2040_v24 = vld [vmem:[#allocation2 + $0x30] sm:$0xff]  ;;  %v1974_v53 = vadd.f32 %v1870_v12, %v1718_v0  ;;  %v1724_v0 = vld [vmem:[#allocation3 + $0x68] sm:$0xff] }
 0x258   : > { %2072 = vst.msk [vmem:[%s3439_s14 + $0x30] sm:$0xff] %vm1421_vm1, %v2040_v24  ;;  %v2041_v6 = vld [vmem:[#allocation2 + $0x38] sm:$0xff] }
 0x259   : > { %v1866_v22 = vpop.xlane.xlu0 %1865  ;;  %2073 = vst.msk [vmem:[%s3439_s14 + $0x38] sm:$0xff] %vm1421_vm1, %v2041_v6  ;;  %2006 = vst.msk [vmem:[#allocation3 + $0x38] sm:$0xff] %vm1421_vm1, %v1974_v53 }
 0x25a   : > { %v1973_v25 = vadd.f32 %v1866_v22, %v1717_v49  ;;  %v1862_v57 = vpop.xlane.xlu1 %1861  ;;  %v1723_v49 = vld [vmem:[#allocation3 + $0x60] sm:$0xff] }
 0x25b   : > { %v2038_v29 = vld [vmem:[#allocation2 + $0x20] sm:$0xff]  ;;  %v1972_v48 = vadd.f32 %v1862_v57, %v1716_v16  ;;  %v1726_v16 = vld [vmem:[#allocation3 + $0x78] sm:$0xff] }
 0x25c   : > { %2005 = vst.msk [vmem:[#allocation3 + $0x30] sm:$0xff] %vm1421_vm1, %v1973_v25  ;;  %2070 = vst.msk [vmem:[%s3439_s14 + $0x20] sm:$0xff] %vm1421_vm1, %v2038_v29  ;;  %v2039_v2 = vld [vmem:[#allocation2 + $0x28] sm:$0xff] }
 0x25d   : > { %2071 = vst.msk [vmem:[%s3439_s14 + $0x28] sm:$0xff] %vm1421_vm1, %v2039_v2  ;;  %2004 = vst.msk [vmem:[#allocation3 + $0x28] sm:$0xff] %vm1421_vm1, %v1972_v48 }
 0x25e   : > { %v1858_v63 = vpop.xlane.xlu0 %1857 }
 0x25f   : > { %v1971_v55 = vadd.f32 %v1858_v63, %v1715_v19  ;;  %v1565_v11 = vpop.xlane.xlu1 %1564  ;;  %v1725_v19 = vld [vmem:[#allocation3 + $0x70] sm:$0xff] }
 0x260   : > { %v1657_v37 = vadd.f32 %v1565_v11, %v1497_v23  ;;  %v2105_v35 = vld [vmem:[#allocation3 + $0x38] sm:$0xff]  ;;  %v1503_v23 = vld [vmem:[#allocation2 + $0x88] sm:$0xff] }
 0x261   : > { %2003 = vst.msk [vmem:[#allocation3 + $0x20] sm:$0xff] %vm1421_vm1, %v1971_v55  ;;  %2137 = vst.msk [vmem:[%s3450_s16 + $0x38] sm:$0xff] %vm1421_vm1, %v2105_v35 }
 0x262   : > { %v1561_v3 = vpop.xlane.xlu0 %1560  ;;  %1690 = vst.msk [vmem:[#allocation2 + $0x58] sm:$0xff] %vm1421_vm1, %v1657_v37 }
 0x263   : > { %v1656_v15 = vadd.f32 %v1561_v3, %v1496_v62  ;;  %v2104_v27 = vld [vmem:[#allocation3 + $0x30] sm:$0xff]  ;;  %v1502_v62 = vld [vmem:[#allocation2 + $0x80] sm:$0xff] }
 0x264   : > { %2136 = vst.msk [vmem:[%s3450_s16 + $0x30] sm:$0xff] %vm1421_vm1, %v2104_v27  ;;  %v2103_v50 = vld [vmem:[#allocation3 + $0x28] sm:$0xff] }
 0x265   : > { %1689 = vst.msk [vmem:[#allocation2 + $0x50] sm:$0xff] %vm1421_vm1, %v1656_v15  ;;  %2135 = vst.msk [vmem:[%s3450_s16 + $0x28] sm:$0xff] %vm1421_vm1, %v2103_v50 }
 0x266   : > { %v1553_v59 = vpop.xlane.xlu0 %1552 }
 0x267   : > { %v1654_v26 = vadd.f32 %v1553_v59, %v1494_v1  ;;  %v1727_v1 = vld [vmem:[#allocation3 + $0x80] sm:$0xff] }
 0x268   : > { %v2102_v5 = vld [vmem:[#allocation3 + $0x20] sm:$0xff] }
 0x269   : > { %2134 = vst.msk [vmem:[%s3450_s16 + $0x20] sm:$0xff] %vm1421_vm1, %v2102_v5  ;;  %1687 = vst.msk [vmem:[#allocation2 + $0x40] sm:$0xff] %vm1421_vm1, %v1654_v26  ;;  %v2045_v36 = vld [vmem:[#allocation2 + $0x58] sm:$0xff] }
 0x26a   : > { %v1557_v61 = vpop.xlane.xlu1 %1556  ;;  %2077 = vst.msk [vmem:[%s3439_s14 + $0x58] sm:$0xff] %vm1421_vm1, %v2045_v36 }
 0x26b   : > { %v1655_v41 = vadd.f32 %v1557_v61, %v1495_v9  ;;  %v1728_v9 = vld [vmem:[#allocation3 + $0x88] sm:$0xff] }
 0x26c   : > { %v1882_v10 = vpop.xlane.xlu0 %1881  ;;  %v2044_v43 = vld [vmem:[#allocation2 + $0x50] sm:$0xff] }
 0x26d   : > { %1688 = vst.msk [vmem:[#allocation2 + $0x48] sm:$0xff] %vm1421_vm1, %v1655_v41  ;;  %v1977_v7 = vadd.f32 %v1882_v10, %v1721_v8  ;;  %2076 = vst.msk [vmem:[%s3439_s14 + $0x50] sm:$0xff] %vm1421_vm1, %v2044_v43  ;;  %v1504_v8 = vld [vmem:[#allocation2 + $0x90] sm:$0xff] }
 0x26e   : > { %v1886_v56 = vpop.xlane.xlu1 %1885 }
 0x26f   : > { %v1978_v58 = vadd.f32 %v1886_v56, %v1722_v52  ;;  %2009 = vst.msk [vmem:[#allocation3 + $0x50] sm:$0xff] %vm1421_vm1, %v1977_v7  ;;  %v1505_v52 = vld [vmem:[#allocation2 + $0x98] sm:$0xff] }
 0x270   : > { %v1874_v30 = vpop.xlane.xlu0 %1873  ;;  %v2042_v40 = vld [vmem:[#allocation2 + $0x40] sm:$0xff] }
 0x271   : > { %2010 = vst.msk [vmem:[#allocation3 + $0x58] sm:$0xff] %vm1421_vm1, %v1978_v58  ;;  %v1975_v54 = vadd.f32 %v1874_v30, %v1719_v45  ;;  %2074 = vst.msk [vmem:[%s3439_s14 + $0x40] sm:$0xff] %vm1421_vm1, %v2042_v40  ;;  %v1729_v45 = vld [vmem:[#allocation3 + $0x90] sm:$0xff] }
 0x272   : > { %v1878_v17 = vpop.xlane.xlu1 %1877 }
 0x273   : > { %v1976_v14 = vadd.f32 %v1878_v17, %v1720_v46  ;;  %2007 = vst.msk [vmem:[#allocation3 + $0x40] sm:$0xff] %vm1421_vm1, %v1975_v54  ;;  %v1730_v46 = vld [vmem:[#allocation3 + $0x98] sm:$0xff] }
 0x274   : > { %v2043_v47 = vld [vmem:[#allocation2 + $0x48] sm:$0xff]  ;;  %v1569_v28 = vpop.xlane.xlu0 %1568 }
 0x275   : > { %2075 = vst.msk [vmem:[%s3439_s14 + $0x48] sm:$0xff] %vm1421_vm1, %v2043_v47  ;;  %2008 = vst.msk [vmem:[#allocation3 + $0x48] sm:$0xff] %vm1421_vm1, %v1976_v14  ;;  %v1658_v32 = vadd.f32 %v1569_v28, %v1498_v60  ;;  %v1512_v60 = vld [vmem:[#allocation2 + $0xd0] sm:$0xff] }
 0x276   : > { %v1573_v33 = vpop.xlane.xlu1 %1572  ;;  %v2108_v21 = vld [vmem:[#allocation3 + $0x50] sm:$0xff] }
 0x277   : > { %v1659_v20 = vadd.f32 %v1573_v33, %v1499_v13  ;;  %2140 = vst.msk [vmem:[%s3450_s16 + $0x50] sm:$0xff] %vm1421_vm1, %v2108_v21  ;;  %1691 = vst.msk [vmem:[#allocation2 + $0x60] sm:$0xff] %vm1421_vm1, %v1658_v32  ;;  %v1513_v13 = vld [vmem:[#allocation2 + $0xd8] sm:$0xff] }
 0x278   : > { %v2109_v34 = vld [vmem:[#allocation3 + $0x58] sm:$0xff]  ;;  %v1577_v39 = vpop.xlane.xlu0 %1576 }
 0x279   : > { %2141 = vst.msk [vmem:[%s3450_s16 + $0x58] sm:$0xff] %vm1421_vm1, %v2109_v34  ;;  %1692 = vst.msk [vmem:[#allocation2 + $0x68] sm:$0xff] %vm1421_vm1, %v1659_v20  ;;  %v1660_v44 = vadd.f32 %v1577_v39, %v1500_v4  ;;  %v1510_v4 = vld [vmem:[#allocation2 + $0xc0] sm:$0xff] }
 0x27a   : > { %v1581_v42 = vpop.xlane.xlu1 %1580  ;;  %v2106_v31 = vld [vmem:[#allocation3 + $0x40] sm:$0xff] }
 0x27b   : > { %v1661_v18 = vadd.f32 %v1581_v42, %v1501_v38  ;;  %2138 = vst.msk [vmem:[%s3450_s16 + $0x40] sm:$0xff] %vm1421_vm1, %v2106_v31  ;;  %1693 = vst.msk [vmem:[#allocation2 + $0x70] sm:$0xff] %vm1421_vm1, %v1660_v44  ;;  %v1511_v38 = vld [vmem:[#allocation2 + $0xc8] sm:$0xff] }
 0x27c   : > { %v2107_v51 = vld [vmem:[#allocation3 + $0x48] sm:$0xff]  ;;  %v1890_v22 = vpop.xlane.xlu0 %1889 }
 0x27d   : > { %2139 = vst.msk [vmem:[%s3450_s16 + $0x48] sm:$0xff] %vm1421_vm1, %v2107_v51  ;;  %1694 = vst.msk [vmem:[#allocation2 + $0x78] sm:$0xff] %vm1421_vm1, %v1661_v18  ;;  %v1979_v25 = vadd.f32 %v1890_v22, %v1723_v49  ;;  %v1737_v49 = vld [vmem:[#allocation3 + $0xd0] sm:$0xff] }
 0x27e   : > { %v1894_v12 = vpop.xlane.xlu1 %1893  ;;  %v2046_v24 = vld [vmem:[#allocation2 + $0x60] sm:$0xff] }
 0x27f   : > { %v1980_v53 = vadd.f32 %v1894_v12, %v1724_v0  ;;  %2078 = vst.msk [vmem:[%s3439_s14 + $0x60] sm:$0xff] %vm1421_vm1, %v2046_v24  ;;  %2011 = vst.msk [vmem:[#allocation3 + $0x60] sm:$0xff] %vm1421_vm1, %v1979_v25  ;;  %v1738_v0 = vld [vmem:[#allocation3 + $0xd8] sm:$0xff] }
 0x280   : > { %v2047_v6 = vld [vmem:[#allocation2 + $0x68] sm:$0xff]  ;;  %v1898_v63 = vpop.xlane.xlu0 %1897 }
 0x281   : > { %2079 = vst.msk [vmem:[%s3439_s14 + $0x68] sm:$0xff] %vm1421_vm1, %v2047_v6  ;;  %2012 = vst.msk [vmem:[#allocation3 + $0x68] sm:$0xff] %vm1421_vm1, %v1980_v53  ;;  %v1981_v55 = vadd.f32 %v1898_v63, %v1725_v19  ;;  %v1506_v19 = vld [vmem:[#allocation2 + $0xa0] sm:$0xff] }
 0x282   : > { %v1902_v57 = vpop.xlane.xlu1 %1901  ;;  %v2048_v29 = vld [vmem:[#allocation2 + $0x70] sm:$0xff] }
 0x283   : > { %v1982_v48 = vadd.f32 %v1902_v57, %v1726_v16  ;;  %2080 = vst.msk [vmem:[%s3439_s14 + $0x70] sm:$0xff] %vm1421_vm1, %v2048_v29  ;;  %2013 = vst.msk [vmem:[#allocation3 + $0x70] sm:$0xff] %vm1421_vm1, %v1981_v55  ;;  %v1507_v16 = vld [vmem:[#allocation2 + $0xa8] sm:$0xff] }
 0x284   : > { %v2049_v2 = vld [vmem:[#allocation2 + $0x78] sm:$0xff]  ;;  %v1585_v3 = vpop.xlane.xlu0 %1584 }
 0x285   : > { %2081 = vst.msk [vmem:[%s3439_s14 + $0x78] sm:$0xff] %vm1421_vm1, %v2049_v2  ;;  %2014 = vst.msk [vmem:[#allocation3 + $0x78] sm:$0xff] %vm1421_vm1, %v1982_v48  ;;  %v1662_v15 = vadd.f32 %v1585_v3, %v1502_v62  ;;  %v1735_v62 = vld [vmem:[#allocation3 + $0xc0] sm:$0xff] }
 0x286   : > { %v1589_v11 = vpop.xlane.xlu1 %1588  ;;  %v2110_v27 = vld [vmem:[#allocation3 + $0x60] sm:$0xff] }
 0x287   : > { %v1663_v37 = vadd.f32 %v1589_v11, %v1503_v23  ;;  %2142 = vst.msk [vmem:[%s3450_s16 + $0x60] sm:$0xff] %vm1421_vm1, %v2110_v27  ;;  %1695 = vst.msk [vmem:[#allocation2 + $0x80] sm:$0xff] %vm1421_vm1, %v1662_v15  ;;  %v1736_v23 = vld [vmem:[#allocation3 + $0xc8] sm:$0xff] }
 0x288   : > { %v2111_v35 = vld [vmem:[#allocation3 + $0x68] sm:$0xff]  ;;  %v1906_v59 = vpop.xlane.xlu0 %1905 }
 0x289   : > { %2143 = vst.msk [vmem:[%s3450_s16 + $0x68] sm:$0xff] %vm1421_vm1, %v2111_v35  ;;  %1696 = vst.msk [vmem:[#allocation2 + $0x88] sm:$0xff] %vm1421_vm1, %v1663_v37  ;;  %v1983_v26 = vadd.f32 %v1906_v59, %v1727_v1  ;;  %v1731_v1 = vld [vmem:[#allocation3 + $0xa0] sm:$0xff] }
 0x28a   : > { %v1910_v61 = vpop.xlane.xlu1 %1909  ;;  %v2112_v5 = vld [vmem:[#allocation3 + $0x70] sm:$0xff] }
 0x28b   : > { %v1984_v41 = vadd.f32 %v1910_v61, %v1728_v9  ;;  %2144 = vst.msk [vmem:[%s3450_s16 + $0x70] sm:$0xff] %vm1421_vm1, %v2112_v5  ;;  %2015 = vst.msk [vmem:[#allocation3 + $0x80] sm:$0xff] %vm1421_vm1, %v1983_v26  ;;  %v1732_v9 = vld [vmem:[#allocation3 + $0xa8] sm:$0xff] }
 0x28c   : > { %v2113_v50 = vld [vmem:[#allocation3 + $0x78] sm:$0xff]  ;;  %v1593_v10 = vpop.xlane.xlu0 %1592 }
 0x28d   : > { %2145 = vst.msk [vmem:[%s3450_s16 + $0x78] sm:$0xff] %vm1421_vm1, %v2113_v50  ;;  %2016 = vst.msk [vmem:[#allocation3 + $0x88] sm:$0xff] %vm1421_vm1, %v1984_v41  ;;  %v1664_v7 = vadd.f32 %v1593_v10, %v1504_v8  ;;  %v1516_v8 = vld [vmem:[#allocation2 + $0xf0] sm:$0xff] }
 0x28e   : > { %v1597_v56 = vpop.xlane.xlu1 %1596  ;;  %v2050_v43 = vld [vmem:[#allocation2 + $0x80] sm:$0xff] }
 0x28f   : > { %v1665_v58 = vadd.f32 %v1597_v56, %v1505_v52  ;;  %2082 = vst.msk [vmem:[%s3439_s14 + $0x80] sm:$0xff] %vm1421_vm1, %v2050_v43  ;;  %1697 = vst.msk [vmem:[#allocation2 + $0x90] sm:$0xff] %vm1421_vm1, %v1664_v7  ;;  %v1517_v52 = vld [vmem:[#allocation2 + $0xf8] sm:$0xff] }
 0x290   : > { %v2051_v36 = vld [vmem:[#allocation2 + $0x88] sm:$0xff]  ;;  %v1914_v30 = vpop.xlane.xlu0 %1913 }
 0x291   : > { %2083 = vst.msk [vmem:[%s3439_s14 + $0x88] sm:$0xff] %vm1421_vm1, %v2051_v36  ;;  %1698 = vst.msk [vmem:[#allocation2 + $0x98] sm:$0xff] %vm1421_vm1, %v1665_v58  ;;  %v1985_v54 = vadd.f32 %v1914_v30, %v1729_v45  ;;  %v1514_v45 = vld [vmem:[#allocation2 + $0xe0] sm:$0xff] }
 0x292   : > { %v1918_v17 = vpop.xlane.xlu1 %1917  ;;  %v2114_v40 = vld [vmem:[#allocation3 + $0x80] sm:$0xff] }
 0x293   : > { %v1986_v14 = vadd.f32 %v1918_v17, %v1730_v46  ;;  %2146 = vst.msk [vmem:[%s3450_s16 + $0x80] sm:$0xff] %vm1421_vm1, %v2114_v40  ;;  %2017 = vst.msk [vmem:[#allocation3 + $0x90] sm:$0xff] %vm1421_vm1, %v1985_v54  ;;  %v1515_v46 = vld [vmem:[#allocation2 + $0xe8] sm:$0xff] }
 0x294   : > { %v2115_v47 = vld [vmem:[#allocation3 + $0x88] sm:$0xff]  ;;  %v1625_v28 = vpop.xlane.xlu0 %1624 }
 0x295   : > { %2147 = vst.msk [vmem:[%s3450_s16 + $0x88] sm:$0xff] %vm1421_vm1, %v2115_v47  ;;  %2018 = vst.msk [vmem:[#allocation3 + $0x98] sm:$0xff] %vm1421_vm1, %v1986_v14  ;;  %v1672_v32 = vadd.f32 %v1625_v28, %v1512_v60  ;;  %v1508_v60 = vld [vmem:[#allocation2 + $0xb0] sm:$0xff] }
 0x296   : > { %v1629_v33 = vpop.xlane.xlu1 %1628  ;;  %v2052_v21 = vld [vmem:[#allocation2 + $0x90] sm:$0xff] }
 0x297   : > { %v1673_v20 = vadd.f32 %v1629_v33, %v1513_v13  ;;  %2084 = vst.msk [vmem:[%s3439_s14 + $0x90] sm:$0xff] %vm1421_vm1, %v2052_v21  ;;  %1705 = vst.msk [vmem:[#allocation2 + $0xd0] sm:$0xff] %vm1421_vm1, %v1672_v32  ;;  %v1509_v13 = vld [vmem:[#allocation2 + $0xb8] sm:$0xff] }
 0x298   : > { %v2053_v34 = vld [vmem:[#allocation2 + $0x98] sm:$0xff]  ;;  %v1617_v39 = vpop.xlane.xlu0 %1616 }
 0x299   : > { %2085 = vst.msk [vmem:[%s3439_s14 + $0x98] sm:$0xff] %vm1421_vm1, %v2053_v34  ;;  %1706 = vst.msk [vmem:[#allocation2 + $0xd8] sm:$0xff] %vm1421_vm1, %v1673_v20  ;;  %v1670_v44 = vadd.f32 %v1617_v39, %v1510_v4  ;;  %v1739_v4 = vld [vmem:[#allocation3 + $0xe0] sm:$0xff] }
 0x29a   : > { %v1621_v42 = vpop.xlane.xlu1 %1620  ;;  %v2116_v31 = vld [vmem:[#allocation3 + $0x90] sm:$0xff] }
 0x29b   : > { %v1671_v18 = vadd.f32 %v1621_v42, %v1511_v38  ;;  %2148 = vst.msk [vmem:[%s3450_s16 + $0x90] sm:$0xff] %vm1421_vm1, %v2116_v31  ;;  %1703 = vst.msk [vmem:[#allocation2 + $0xc0] sm:$0xff] %vm1421_vm1, %v1670_v44  ;;  %v1740_v38 = vld [vmem:[#allocation3 + $0xe8] sm:$0xff] }
 0x29c   : > { %v2117_v51 = vld [vmem:[#allocation3 + $0x98] sm:$0xff]  ;;  %v1946_v22 = vpop.xlane.xlu0 %1945 }
 0x29d   : > { %2149 = vst.msk [vmem:[%s3450_s16 + $0x98] sm:$0xff] %vm1421_vm1, %v2117_v51  ;;  %1704 = vst.msk [vmem:[#allocation2 + $0xc8] sm:$0xff] %vm1421_vm1, %v1671_v18  ;;  %v1993_v25 = vadd.f32 %v1946_v22, %v1737_v49  ;;  %v1733_v49 = vld [vmem:[#allocation3 + $0xb0] sm:$0xff] }
 0x29e   : > { %v1950_v12 = vpop.xlane.xlu1 %1949  ;;  %v2060_v24 = vld [vmem:[#allocation2 + $0xd0] sm:$0xff] }
 0x29f   : > { %v1994_v53 = vadd.f32 %v1950_v12, %v1738_v0  ;;  %2092 = vst.msk [vmem:[%s3439_s14 + $0xd0] sm:$0xff] %vm1421_vm1, %v2060_v24  ;;  %2025 = vst.msk [vmem:[#allocation3 + $0xd0] sm:$0xff] %vm1421_vm1, %v1993_v25  ;;  %v1734_v0 = vld [vmem:[#allocation3 + $0xb8] sm:$0xff] }
 0x2a0   : > { %v2061_v6 = vld [vmem:[#allocation2 + $0xd8] sm:$0xff]  ;;  %v1601_v63 = vpop.xlane.xlu0 %1600 }
 0x2a1   : > { %2093 = vst.msk [vmem:[%s3439_s14 + $0xd8] sm:$0xff] %vm1421_vm1, %v2061_v6  ;;  %2026 = vst.msk [vmem:[#allocation3 + $0xd8] sm:$0xff] %vm1421_vm1, %v1994_v53  ;;  %v1666_v55 = vadd.f32 %v1601_v63, %v1506_v19  ;;  %v1741_v19 = vld [vmem:[#allocation3 + $0xf0] sm:$0xff] }
 0x2a2   : > { %v1605_v57 = vpop.xlane.xlu1 %1604  ;;  %v2058_v29 = vld [vmem:[#allocation2 + $0xc0] sm:$0xff] }
 0x2a3   : > { %v1667_v48 = vadd.f32 %v1605_v57, %v1507_v16  ;;  %2090 = vst.msk [vmem:[%s3439_s14 + $0xc0] sm:$0xff] %vm1421_vm1, %v2058_v29  ;;  %1699 = vst.msk [vmem:[#allocation2 + $0xa0] sm:$0xff] %vm1421_vm1, %v1666_v55  ;;  %v1742_v16 = vld [vmem:[#allocation3 + $0xf8] sm:$0xff] }
 0x2a4   : > { %v2059_v2 = vld [vmem:[#allocation2 + $0xc8] sm:$0xff]  ;;  %v1938_v3 = vpop.xlane.xlu0 %1937 }
 0x2a5   : > { %2091 = vst.msk [vmem:[%s3439_s14 + $0xc8] sm:$0xff] %vm1421_vm1, %v2059_v2  ;;  %1700 = vst.msk [vmem:[#allocation2 + $0xa8] sm:$0xff] %vm1421_vm1, %v1667_v48  ;;  %v1991_v15 = vadd.f32 %v1938_v3, %v1735_v62 }
 0x2a6   : > { %v1942_v11 = vpop.xlane.xlu1 %1941  ;;  %v2124_v27 = vld [vmem:[#allocation3 + $0xd0] sm:$0xff] }
 0x2a7   : > { %v1992_v37 = vadd.f32 %v1942_v11, %v1736_v23  ;;  %2156 = vst.msk [vmem:[%s3450_s16 + $0xd0] sm:$0xff] %vm1421_vm1, %v2124_v27  ;;  %2023 = vst.msk [vmem:[#allocation3 + $0xc0] sm:$0xff] %vm1421_vm1, %v1991_v15 }
 0x2a8   : > { %v2125_v35 = vld [vmem:[#allocation3 + $0xd8] sm:$0xff]  ;;  %v1922_v59 = vpop.xlane.xlu0 %1921 }
 0x2a9   : > { %2157 = vst.msk [vmem:[%s3450_s16 + $0xd8] sm:$0xff] %vm1421_vm1, %v2125_v35  ;;  %2024 = vst.msk [vmem:[#allocation3 + $0xc8] sm:$0xff] %vm1421_vm1, %v1992_v37  ;;  %v1987_v26 = vadd.f32 %v1922_v59, %v1731_v1 }
 0x2aa   : > { %v1926_v61 = vpop.xlane.xlu1 %1925  ;;  %v2054_v5 = vld [vmem:[#allocation2 + $0xa0] sm:$0xff] }
 0x2ab   : > { %v1988_v41 = vadd.f32 %v1926_v61, %v1732_v9  ;;  %2086 = vst.msk [vmem:[%s3439_s14 + $0xa0] sm:$0xff] %vm1421_vm1, %v2054_v5  ;;  %2019 = vst.msk [vmem:[#allocation3 + $0xa0] sm:$0xff] %vm1421_vm1, %v1987_v26 }
 0x2ac   : > { %v2055_v50 = vld [vmem:[#allocation2 + $0xa8] sm:$0xff]  ;;  %v1641_v10 = vpop.xlane.xlu0 %1640 }
 0x2ad   : > { %2087 = vst.msk [vmem:[%s3439_s14 + $0xa8] sm:$0xff] %vm1421_vm1, %v2055_v50  ;;  %2020 = vst.msk [vmem:[#allocation3 + $0xa8] sm:$0xff] %vm1421_vm1, %v1988_v41  ;;  %v1676_v7 = vadd.f32 %v1641_v10, %v1516_v8 }
 0x2ae   : > { %v1645_v56 = vpop.xlane.xlu1 %1644  ;;  %v2122_v43 = vld [vmem:[#allocation3 + $0xc0] sm:$0xff] }
 0x2af   : > { %v1677_v58 = vadd.f32 %v1645_v56, %v1517_v52  ;;  %2154 = vst.msk [vmem:[%s3450_s16 + $0xc0] sm:$0xff] %vm1421_vm1, %v2122_v43  ;;  %1709 = vst.msk [vmem:[#allocation2 + $0xf0] sm:$0xff] %vm1421_vm1, %v1676_v7 }
 0x2b0   : > { %v2123_v36 = vld [vmem:[#allocation3 + $0xc8] sm:$0xff]  ;;  %v1633_v30 = vpop.xlane.xlu0 %1632 }
 0x2b1   : > { %2155 = vst.msk [vmem:[%s3450_s16 + $0xc8] sm:$0xff] %vm1421_vm1, %v2123_v36  ;;  %1710 = vst.msk [vmem:[#allocation2 + $0xf8] sm:$0xff] %vm1421_vm1, %v1677_v58  ;;  %v1674_v54 = vadd.f32 %v1633_v30, %v1514_v45 }
 0x2b2   : > { %v1637_v17 = vpop.xlane.xlu1 %1636  ;;  %v2118_v40 = vld [vmem:[#allocation3 + $0xa0] sm:$0xff] }
 0x2b3   : > { %v1675_v14 = vadd.f32 %v1637_v17, %v1515_v46  ;;  %2150 = vst.msk [vmem:[%s3450_s16 + $0xa0] sm:$0xff] %vm1421_vm1, %v2118_v40  ;;  %1707 = vst.msk [vmem:[#allocation2 + $0xe0] sm:$0xff] %vm1421_vm1, %v1674_v54 }
 0x2b4   : > { %v2119_v47 = vld [vmem:[#allocation3 + $0xa8] sm:$0xff]  ;;  %v1609_v28 = vpop.xlane.xlu0 %1608 }
 0x2b5   : > { %2151 = vst.msk [vmem:[%s3450_s16 + $0xa8] sm:$0xff] %vm1421_vm1, %v2119_v47  ;;  %1708 = vst.msk [vmem:[#allocation2 + $0xe8] sm:$0xff] %vm1421_vm1, %v1675_v14  ;;  %v1668_v32 = vadd.f32 %v1609_v28, %v1508_v60 }
 0x2b6   : > { %v1613_v33 = vpop.xlane.xlu1 %1612  ;;  %v2064_v21 = vld [vmem:[#allocation2 + $0xf0] sm:$0xff] }
 0x2b7   : > { %v1669_v20 = vadd.f32 %v1613_v33, %v1509_v13  ;;  %2096 = vst.msk [vmem:[%s3439_s14 + $0xf0] sm:$0xff] %vm1421_vm1, %v2064_v21  ;;  %1701 = vst.msk [vmem:[#allocation2 + $0xb0] sm:$0xff] %vm1421_vm1, %v1668_v32 }
 0x2b8   : > { %v2065_v34 = vld [vmem:[#allocation2 + $0xf8] sm:$0xff]  ;;  %v1954_v39 = vpop.xlane.xlu0 %1953 }
 0x2b9   : > { %2097 = vst.msk [vmem:[%s3439_s14 + $0xf8] sm:$0xff] %vm1421_vm1, %v2065_v34  ;;  %1702 = vst.msk [vmem:[#allocation2 + $0xb8] sm:$0xff] %vm1421_vm1, %v1669_v20  ;;  %v1995_v44 = vadd.f32 %v1954_v39, %v1739_v4 }
 0x2ba   : > { %v1958_v42 = vpop.xlane.xlu1 %1957  ;;  %v2062_v31 = vld [vmem:[#allocation2 + $0xe0] sm:$0xff] }
 0x2bb   : > { %v1996_v18 = vadd.f32 %v1958_v42, %v1740_v38  ;;  %2094 = vst.msk [vmem:[%s3439_s14 + $0xe0] sm:$0xff] %vm1421_vm1, %v2062_v31  ;;  %2027 = vst.msk [vmem:[#allocation3 + $0xe0] sm:$0xff] %vm1421_vm1, %v1995_v44 }
 0x2bc   : > { %v2063_v51 = vld [vmem:[#allocation2 + $0xe8] sm:$0xff]  ;;  %v1930_v22 = vpop.xlane.xlu0 %1929 }
 0x2bd   : > { %2095 = vst.msk [vmem:[%s3439_s14 + $0xe8] sm:$0xff] %vm1421_vm1, %v2063_v51  ;;  %2028 = vst.msk [vmem:[#allocation3 + $0xe8] sm:$0xff] %vm1421_vm1, %v1996_v18  ;;  %v1989_v25 = vadd.f32 %v1930_v22, %v1733_v49 }
 0x2be   : > { %v1934_v12 = vpop.xlane.xlu1 %1933  ;;  %v2056_v24 = vld [vmem:[#allocation2 + $0xb0] sm:$0xff] }
 0x2bf   : > { %v1990_v53 = vadd.f32 %v1934_v12, %v1734_v0  ;;  %2088 = vst.msk [vmem:[%s3439_s14 + $0xb0] sm:$0xff] %vm1421_vm1, %v2056_v24  ;;  %2021 = vst.msk [vmem:[#allocation3 + $0xb0] sm:$0xff] %vm1421_vm1, %v1989_v25 }
 0x2c0   : > { %v2057_v6 = vld [vmem:[#allocation2 + $0xb8] sm:$0xff]  ;;  %v1962_v63 = vpop.xlane.xlu0 %1961 }
 0x2c1   : > { %2089 = vst.msk [vmem:[%s3439_s14 + $0xb8] sm:$0xff] %vm1421_vm1, %v2057_v6  ;;  %2022 = vst.msk [vmem:[#allocation3 + $0xb8] sm:$0xff] %vm1421_vm1, %v1990_v53  ;;  %v1997_v55 = vadd.f32 %v1962_v63, %v1741_v19 }
 0x2c2   : > { %v1966_v57 = vpop.xlane.xlu1 %1965  ;;  %v2126_v29 = vld [vmem:[#allocation3 + $0xe0] sm:$0xff] }
 0x2c3   : > { %v1998_v48 = vadd.f32 %v1966_v57, %v1742_v16  ;;  %2158 = vst.msk [vmem:[%s3450_s16 + $0xe0] sm:$0xff] %vm1421_vm1, %v2126_v29  ;;  %2029 = vst.msk [vmem:[#allocation3 + $0xf0] sm:$0xff] %vm1421_vm1, %v1997_v55 }
 0x2c4   : > { %v2127_v62 = vld [vmem:[#allocation3 + $0xe8] sm:$0xff] }
 0x2c5   : > { %2159 = vst.msk [vmem:[%s3450_s16 + $0xe8] sm:$0xff] %vm1421_vm1, %v2127_v62  ;;  %2030 = vst.msk [vmem:[#allocation3 + $0xf8] sm:$0xff] %vm1421_vm1, %v1998_v48 }
 0x2c6   : > { %v2120_v2 = vld [vmem:[#allocation3 + $0xb0] sm:$0xff] }
 0x2c7   : > { %2152 = vst.msk [vmem:[%s3450_s16 + $0xb0] sm:$0xff] %vm1421_vm1, %v2120_v2 }
 0x2c8   : > { %v2121_v23 = vld [vmem:[#allocation3 + $0xb8] sm:$0xff] }
 0x2c9   : > { %2153 = vst.msk [vmem:[%s3450_s16 + $0xb8] sm:$0xff] %vm1421_vm1, %v2121_v23 }
 0x2ca   : > { %v2128_v3 = vld [vmem:[#allocation3 + $0xf0] sm:$0xff] }
 0x2cb   : > { %2160 = vst.msk [vmem:[%s3450_s16 + $0xf0] sm:$0xff] %vm1421_vm1, %v2128_v3 }
 0x2cc   : > { %v2129_v15 = vld [vmem:[#allocation3 + $0xf8] sm:$0xff] }
 0x2cd   : > { %2161 = vst.msk [vmem:[%s3450_s16 + $0xf8] sm:$0xff] %vm1421_vm1, %v2129_v15 }
 0x2ce PF: > { %s16_s20 = sadd.s32 1, %s2651_s20   ;;  %s3650_s18 = smov %s2647_s19 }
 0x2cf   : > { %p13_p5 = scmp.ge.s32.totalorder %s16_s20, 4   ;;  %s3651_s19 = smov %s3653_s21 }
 0x2d1   :  { %15 = sbr.rel (!%p13_p5) target bundleno = 2 (0x2), region = 94 }

// kernel: backbone_forward.13
= control target key start
LH: loop header
LB: loop body
LE: loop exit
PB: predicated region body
PF: predicated region fallthrough
CT: control target
= control target key end

     0   :  { %7 = vsyncpa [#allocation3], 0  ;;  %s1492_s0 = inlined_call_operand.vmem [shape: bf16[2,128,384], index: 0, kind: input, shape index: {}]   ;;  %s1493_s1 = inlined_call_operand.vmem [shape: f32[128,2], index: 1, kind: input, shape index: {}]   ;;  %s1494_s2 = inlined_call_operand.hbm [shape: f32[2,128,384], index: 2, kind: output, shape index: {}]  }
   0x1   :  { %9 = vsyncpa [#allocation3 + $0x1], 0  ;;  %s923_s9 = smov 0   ;;  %s925_s10 = smov 0  }
   0x2   :  { %s927_s11 = smov 0   ;;  %s929_s12 = smov 0  }
   0x3   :  { %s931_s13 = smov 0   ;;  %s933_s14 = smov 0  }
   0x4 LB: > { %s748_s15 = sadd.s32 4294967295, %s901_s14   ;;  %s749_s16 = sadd.s32 4294967294, %s901_s14   ;;  %s901_s14 = sphi %s933_s14, %s15_s14   ;;  %s897_s13 = sphi %s931_s13, %s1521_s13   ;;  %s893_s12 = sphi %s929_s12, %s1520_s12   ;;  %s889_s11 = sphi %s927_s11, %s1519_s11   ;;  %s885_s10 = sphi %s925_s10, %s1518_s10   ;;  %s881_s9 = sphi %s923_s9, %s1517_s9  }
   0x5   : > { %s27_s17 = sadd.s32 1, %s897_s13  ;;  %s85_s18 = sadd.s32 1, %s889_s11 }
   0x6   : > { %p29_p0 = scmp.ge.s32.totalorder %s27_s17, 2  ;;  %p95_p1 = scmp.ne.s32.totalorder %s889_s11, %s885_s10 }
   0x7   : > { %p96_p2 = scmp.eq.s32.totalorder %s748_s15, 1  ;;  %p101_p3 = scmp.ne.s32.totalorder %s885_s10, %s881_s9 }
   0x8   : > { %s1523_s17 = smov (%p29_p0, %s27_s17), 0  ;;  %p102_p5 = scmp.eq.s32.totalorder %s749_s16, 1 }
   0x9   : > { %p963_p4 = por %p96_p2, %p95_p1  ;;  %s80_s20 = ssub.s32 %s897_s13, %s1523_s17 }
   0xa   : > { %p752_p6 = scmp.ge.s32.totalorder %s901_s14, 1  ;;  %p83_p7 = scmp.eq.s32.totalorder %s80_s20, 0 }
   0xb   : > { %p970_p8 = por %p102_p5, %p101_p3  ;;  %p136_p9 = scmp.lt.s32.totalorder %s901_s14, 3 }
   0xc   : > { %s976_s22 = scalar_select %p83_p7, %s889_s11, %s85_s18  }
   0xd   : > { %p137_p10 = pnand %p752_p6, %p136_p9 }
   0xf   : > { %140 = sbr.rel (%p137_p10) target bundleno = 241 (0xf1), region = 28 }
  0x16   : > { %v175_v0 = vld [vmem:[%s1493_s1 + $0x10] sm:$0xff]  ;;  %v173_v1 = vld [vmem:[%s1493_s1] sm:$0xff]  ;;  %v903_v2 = vmov 0   ;;  %v176_v3 = vld [vmem:[%s1493_s1 + $0x18] sm:$0xff]  ;;  %v904_v17 = vmov 1   ;;  %p163_p11 = scmp.lt.s32.totalorder %s893_s12, 1 }
  0x17   : > { %820 = vset.pattern.permute.xlu1 %v903_v2  ;;  %819 = vset.pattern.permute.xlu0 %v903_v2  ;;  %v174_v4 = vld [vmem:[%s1493_s1 + $0x8] sm:$0xff]  ;;  %v177_v6 = vld [vmem:[%s1493_s1 + $0x20] sm:$0xff]  ;;  %v180_v7 = vld [vmem:[%s1493_s1 + $0x38] sm:$0xff]  ;;  %s159_s24 = sand.u32 1, %s885_s10   ;;  %s759_s27 = smul.u32 6144, %s893_s12 }
  0x18   : > { %281 = vperm.xlu1 %820, %v175_v0   ;;  %271 = vperm.xlu0 %819, %v173_v1   ;;  %v178_v5 = vld [vmem:[%s1493_s1 + $0x28] sm:$0xff]  ;;  %v179_v8 = vld [vmem:[%s1493_s1 + $0x30] sm:$0xff]  ;;  %v181_v10 = vld [vmem:[%s1493_s1 + $0x40] sm:$0xff]  ;;  %s164_s15 = scalar_select %p163_p11, %s893_s12, 1 }
  0x19   : > { %v182_v9 = vld [vmem:[%s1493_s1 + $0x48] sm:$0xff]  ;;  %v184_v11 = vld [vmem:[%s1493_s1 + $0x58] sm:$0xff]  ;;  %v183_v12 = vld [vmem:[%s1493_s1 + $0x50] sm:$0xff]  ;;  %s1306_s25 = smul.u32 384, %s159_s24  ;;  %s1437_s30 = scalar_lea.hbm %s1494_s2, %s759_s27 }
  0x1a   : > { %v186_v13 = vld [vmem:[%s1493_s1 + $0x68] sm:$0xff]  ;;  %v185_v14 = vld [vmem:[%s1493_s1 + $0x60] sm:$0xff]  ;;  %v188_v15 = vld [vmem:[%s1493_s1 + $0x78] sm:$0xff]  ;;  %s758_s16 = smul.u32 192, %s164_s15  ;;  %s1446_s3 = scalar_lea.sflag [#allocation3], %s159_s24 }
  0x1b   : > { %v187_v16 = vld [vmem:[%s1493_s1 + $0x70] sm:$0xff]  ;;  %s1337_s26 = scalar_lea.vmem [#allocation2], %s1306_s25  ;;  %s905_s5 = smov [#allocation2]  }
  0x1c   : > { %286 = vperm.xlu1 %820, %v176_v3   ;;  %276 = vperm.xlu0 %819, %v174_v4   ;;  %s1039_s23 = scalar_lea.vmem %s1492_s0, %s758_s16  ;;  %s669_s28 = sshll.u32 %s1337_s26, 4  ;;  %s1439_s28 = int_to_ptr.vmem [resolvable:$true] %s669_s28 }
  0x1d   : > { %v1042_v22 = vld [vmem:[%s1039_s23 + $0x18] sm:$0xff]  ;;  %v1049_v25 = vld [vmem:[%s1039_s23 + $0x8] ss:$24 sps:$4 sm:$0xff]   ;;  %v1058_v28 = vld [vmem:[%s1039_s23 + $0x14] ss:$24 sps:$4 sm:$0xff]   ;;  %s823_s4 = scalar_lea.vmem %s1439_s28, 6144 }
  0x1e   : > { %v1052_v26 = vld [vmem:[%s1039_s23] sm:$0xff]  ;;  %v1061_v29 = vld [vmem:[%s1039_s23 + $0xc] sm:$0xff]  ;;  %v227_v30 = vunpack.c.l.bf16 %v1042_v22  ;;  %v228_v31 = vunpack.c.h.bf16 %v1042_v22  ;;  %v229_v33 = vunpack.c.h.bf16 %v1049_v25  ;;  %v223_v36 = vunpack.c.l.bf16 %v1049_v25  ;;  %v1087_v45 = vld [vmem:[%s1039_s23 + $0x54] sm:$0xff]  ;;  %p824_p12 = scmp.ne.s32.totalorder %s1439_s28, %s823_s4  ;;  %s827_s6 = sshll.u32 %s905_s5, 4  ;;  %s828_s6 = int_to_ptr.vmem [resolvable:$false] %s827_s6 }
  0x1f   : > { %v1055_v27 = vld [vmem:[%s1039_s23 + $0x24] sm:$0xff]  ;;  %v1066_v32 = vld [vmem:[%s1039_s23 + $0x3c] sm:$0xff]  ;;  %v221_v34 = vunpack.c.l.bf16 %v1052_v26  ;;  %v222_v35 = vunpack.c.h.bf16 %v1052_v26  ;;  %v1076_v38 = vld [vmem:[%s1039_s23 + $0x30] sm:$0xff]  ;;  %v232_v43 = vunpack.c.h.bf16 %v1058_v28  ;;  %s829_s7 = scalar_lea.vmem %s828_s6, 12288  ;;  %p830_p1 = scmp.lt.s32.totalorder %s1439_s28, %s828_s6 }
  0x20   : > { %296 = vperm.xlu1 %820, %v178_v5   ;;  %291 = vperm.xlu0 %819, %v177_v6   ;;  %v1073_v37 = vld [vmem:[%s1039_s23 + $0x38] ss:$12 sps:$4 sm:$0xff]   ;;  %v230_v41 = vunpack.c.l.bf16 %v1055_v27  ;;  %v231_v42 = vunpack.c.h.bf16 %v1055_v27  ;;  %v1090_v46 = vld [vmem:[%s1039_s23 + $0x50] ss:$12 sps:$4 sm:$0xff]   ;;  %v1093_v47 = vld [vmem:[%s1039_s23 + $0x48] sm:$0xff]  ;;  %p825_p13 = pnand %p824_p12, %p963_p4  ;;  %p831_p2 = scmp.lt.s32.totalorder %s829_s7, %s823_s4 }
  0x21   : > { %v1100_v52 = vld [vmem:[%s1039_s23 + $0x6c] sm:$0xff]  ;;  %v1107_v57 = vld [vmem:[%s1039_s23 + $0x68] ss:$12 sps:$4 sm:$0xff]   ;;  %v1110_v58 = vld [vmem:[%s1039_s23 + $0x60] sm:$0xff] }
  0x22   : > { %v1124_v2 = vld [vmem:[%s1039_s23 + $0x80] ss:$12 sps:$4 sm:$0xff]   ;;  %v1151_v62 = vld [vmem:[%s1039_s23 + $0xb4] sm:$0xff]  ;;  %v1154_v61 = vld [vmem:[%s1039_s23 + $0xb0] ss:$12 sps:$4 sm:$0xff]   ;;  %p826_p0 = pneg %p825_p13  ;;  %p832_p3 = por %p831_p2, %p830_p1 }
  0x23   : > { %v1157_v60 = vld [vmem:[%s1039_s23 + $0xa8] sm:$0xff]  ;;  %v253_v56 = vunpack.c.l.bf16 %v1124_v2  ;;  %v266_v49 = vunpack.c.l.bf16 %v1151_v62  ;;  %v267_v48 = vunpack.c.h.bf16 %v1151_v62 }
  0x24   : > { %306 = vperm.xlu1 %820, %v180_v7   ;;  %301 = vperm.xlu0 %819, %v179_v8   ;;  %p833_p5 = pnand %p832_p3, %p826_p0 }
  0x28   : > { %316 = vperm.xlu1 %820, %v182_v9   ;;  %311 = vperm.xlu0 %819, %v181_v10  }
  0x2c   : > { %326 = vperm.xlu1 %820, %v184_v11   ;;  %321 = vperm.xlu0 %819, %v183_v12  }
  0x30   : > { %336 = vperm.xlu1 %820, %v186_v13   ;;  %331 = vperm.xlu0 %819, %v185_v14  }
  0x34   : > { %346 = vperm.xlu1 %820, %v188_v15   ;;  %341 = vperm.xlu0 %819, %v187_v16  }
  0x38   : > { %822 = vset.pattern.permute.xlu1 %v904_v17  ;;  %821 = vset.pattern.permute.xlu0 %v904_v17  ;;  %v256_v17 = vunpack.c.h.bf16 %v1124_v2 }
  0x39   : > { %402 = vperm.xlu1 %822, %v174_v4   ;;  %398 = vperm.xlu0 %821, %v173_v1   ;;  %v1121_v1 = vld [vmem:[%s1039_s23 + $0x84] sm:$0xff]  ;;  %v240_v4 = vunpack.c.h.bf16 %v1093_v47 }
  0x3d   : > { %406 = vperm.xlu1 %822, %v175_v0   ;;  %410 = vperm.xlu0 %821, %v176_v3   ;;  %v1127_v3 = vld [vmem:[%s1039_s23 + $0x78] sm:$0xff] }
  0x3e   : > { %v252_v59 = vunpack.c.h.bf16 %v1127_v3 }
  0x41   : > { %414 = vperm.xlu1 %822, %v177_v6   ;;  %418 = vperm.xlu0 %821, %v178_v5   ;;  %v241_v5 = vunpack.c.l.bf16 %v1090_v46  ;;  %v248_v6 = vunpack.c.l.bf16 %v1100_v52 }
  0x45   : > { %422 = vperm.xlu1 %822, %v179_v8   ;;  %426 = vperm.xlu0 %821, %v180_v7   ;;  %v249_v7 = vunpack.c.h.bf16 %v1100_v52  ;;  %v1134_v8 = vld [vmem:[%s1039_s23 + $0x9c] sm:$0xff]  ;;  %v251_v52 = vunpack.c.l.bf16 %v1127_v3  ;;  %v268_v3 = vunpack.c.h.bf16 %v1154_v61 }
  0x46   : > { %v260_v55 = vunpack.c.l.bf16 %v1134_v8 }
  0x49   : > { %430 = vperm.xlu1 %822, %v181_v10   ;;  %434 = vperm.xlu0 %821, %v182_v9   ;;  %v250_v9 = vunpack.c.h.bf16 %v1107_v57  ;;  %v245_v10 = vunpack.c.l.bf16 %v1110_v58 }
  0x4d   : > { %438 = vperm.xlu1 %822, %v183_v12   ;;  %442 = vperm.xlu0 %821, %v184_v11   ;;  %v246_v11 = vunpack.c.h.bf16 %v1110_v58  ;;  %v247_v12 = vunpack.c.l.bf16 %v1107_v57 }
  0x51   : > { %446 = vperm.xlu1 %822, %v185_v14   ;;  %450 = vperm.xlu0 %821, %v186_v13   ;;  %v1141_v13 = vld [vmem:[%s1039_s23 + $0x98] ss:$12 sps:$4 sm:$0xff]   ;;  %v1144_v14 = vld [vmem:[%s1039_s23 + $0x90] sm:$0xff] }
  0x52   : > { %v262_v54 = vunpack.c.h.bf16 %v1141_v13  ;;  %v257_v53 = vunpack.c.l.bf16 %v1144_v14  ;;  %v258_v51 = vunpack.c.h.bf16 %v1144_v14  ;;  %v259_v50 = vunpack.c.l.bf16 %v1141_v13 }
  0x55   : > { %454 = vperm.xlu1 %822, %v187_v16   ;;  %458 = vperm.xlu0 %821, %v188_v15   ;;  %v254_v15 = vunpack.c.l.bf16 %v1121_v1  ;;  %v255_v16 = vunpack.c.h.bf16 %v1121_v1  ;;  %v261_v1 = vunpack.c.h.bf16 %v1134_v8 }
  0x97   : > { %v1028_v18 = vpop.permute.xlu1 %281  ;;  %v1030_v19 = vpop.permute.xlu0 %271 }
  0x98   : > { %v1174_v8 = vsub.f32 %v227_v30, %v1028_v18  ;;  %v1179_v44 = vsub.f32 %v228_v31, %v1028_v18  ;;  %v1186_v62 = vsub.f32 %v229_v33, %v1028_v18  ;;  %v349_v2 = vsub.f32 %v221_v34, %v1030_v19 }
  0x99   : > { %v350_v30 = vsub.f32 %v222_v35, %v1030_v19  ;;  %v351_v22 = vsub.f32 %v223_v36, %v1030_v19  ;;  %v1497_v19 = vunpack.c.l.bf16 %v1061_v29  ;;  %v1498_v33 = vunpack.c.h.bf16 %v1061_v29 }
  0x9a   : > { %v1499_v35 = vunpack.c.l.bf16 %v1058_v28  ;;  %v1500_v36 = vunpack.c.l.bf16 %v1066_v32  ;;  %v1503_v29 = vunpack.c.l.bf16 %v1076_v38 }
  0x9b   : > { %v1032_v20 = vpop.permute.xlu1 %286  ;;  %v1034_v21 = vpop.permute.xlu0 %276 }
  0x9c   : > { %v1200_v14 = vsub.f32 %v230_v41, %v1032_v20  ;;  %v1205_v18 = vsub.f32 %v231_v42, %v1032_v20  ;;  %v1210_v26 = vsub.f32 %v232_v43, %v1032_v20  ;;  %v352_v25 = vsub.f32 %v1497_v19, %v1034_v21 }
  0x9d   : > { %v353_v34 = vsub.f32 %v1498_v33, %v1034_v21  ;;  %v354_v27 = vsub.f32 %v1499_v35, %v1034_v21  ;;  %v1501_v20 = vunpack.c.h.bf16 %v1066_v32  ;;  %v1502_v43 = vunpack.c.h.bf16 %v1073_v37 }
  0x9e   : > { %v1504_v21 = vunpack.c.h.bf16 %v1076_v38  ;;  %v1505_v32 = vunpack.c.l.bf16 %v1073_v37  ;;  %v1508_v38 = vunpack.c.h.bf16 %v1090_v46  ;;  %v1509_v37 = vunpack.c.l.bf16 %v1093_v47 }
  0x9f   : > { %v1044_v23 = vpop.permute.xlu1 %296  ;;  %v1046_v24 = vpop.permute.xlu0 %291 }
  0xa0   : > { %v1224_v41 = vsub.f32 %v1500_v36, %v1044_v23  ;;  %v1229_v42 = vsub.f32 %v1501_v20, %v1044_v23  ;;  %v1234_v19 = vsub.f32 %v1502_v43, %v1044_v23  ;;  %v1239_v28 = vsub.f32 %v1503_v29, %v1046_v24 }
  0xa1   : > { %v1244_v33 = vsub.f32 %v1504_v21, %v1046_v24  ;;  %v1249_v35 = vsub.f32 %v1505_v32, %v1046_v24  ;;  %v1506_v36 = vunpack.c.l.bf16 %v1087_v45  ;;  %v1507_v20 = vunpack.c.h.bf16 %v1087_v45 }
  0xa3   : > { %v1078_v39 = vpop.permute.xlu1 %306  ;;  %v1080_v40 = vpop.permute.xlu0 %301 }
  0xa4   : > { %v1254_v23 = vsub.f32 %v1506_v36, %v1078_v39  ;;  %v1259_v43 = vsub.f32 %v1507_v20, %v1078_v39  ;;  %v1264_v29 = vsub.f32 %v1508_v38, %v1078_v39  ;;  %v1269_v24 = vsub.f32 %v1509_v37, %v1080_v40 }
  0xa5   : > { %v1273_v36 = vsub.f32 %v240_v4, %v1080_v40  ;;  %v1276_v45 = vsub.f32 %v241_v5, %v1080_v40 }
  0xa7   : > { %v1116_v63 = vpop.permute.xlu1 %316  ;;  %v1118_v0 = vpop.permute.xlu0 %311 }
  0xa8   : > { %v1279_v20 = vsub.f32 %v248_v6, %v1116_v63  ;;  %v1282_v39 = vsub.f32 %v249_v7, %v1116_v63  ;;  %v1285_v46 = vsub.f32 %v250_v9, %v1116_v63  ;;  %v1288_v47 = vsub.f32 %v245_v10, %v1118_v0 }
  0xa9   : > { %v1291_v38 = vsub.f32 %v246_v11, %v1118_v0  ;;  %v1294_v4 = vsub.f32 %v247_v12, %v1118_v0 }
  0xab   : > { %v327_v58 = vpop.permute.xlu1 %326  ;;  %v322_v57 = vpop.permute.xlu0 %321 }
  0xac   : > { %v1296_v40 = vsub.f32 %v254_v15, %v327_v58  ;;  %v1298_v5 = vsub.f32 %v255_v16, %v327_v58  ;;  %v1300_v6 = vsub.f32 %v256_v17, %v327_v58  ;;  %v1302_v7 = vsub.f32 %v251_v52, %v322_v57 }
  0xad   : > { %v1308_v63 = vsub.f32 %v252_v59, %v322_v57  ;;  %v1310_v9 = vsub.f32 %v253_v56, %v322_v57 }
  0xae   : > { %1510 = vst [vmem:[#allocation5_spill] sm:$0xff] %v1300_v6 }
  0xaf   : > { %v337_v31 = vpop.permute.xlu1 %336  ;;  %v332_v13 = vpop.permute.xlu0 %331 }
  0xb0   : > { %v1312_v10 = vsub.f32 %v260_v55, %v337_v31  ;;  %v1314_v11 = vsub.f32 %v261_v1, %v337_v31  ;;  %v1316_v0 = vsub.f32 %v262_v54, %v337_v31  ;;  %v1318_v12 = vsub.f32 %v257_v53, %v332_v13 }
  0xb1   : > { %v1320_v15 = vsub.f32 %v258_v51, %v332_v13  ;;  %v1322_v16 = vsub.f32 %v259_v50, %v332_v13  ;;  %v1512_v50 = vunpack.c.l.bf16 %v1157_v60 }
  0xb3   : > { %v347_v21 = vpop.permute.xlu1 %346  ;;  %v342_v32 = vpop.permute.xlu0 %341 }
  0xb4   : > { %v1324_v56 = vsub.f32 %v266_v49, %v347_v21  ;;  %v1326_v55 = vsub.f32 %v267_v48, %v347_v21  ;;  %v1328_v54 = vsub.f32 %v268_v3, %v347_v21  ;;  %v1332_v13 = vsub.f32 %v1512_v50, %v342_v32 }
  0xb6   : > { %1511 = vst [vmem:[#allocation6_spill] sm:$0xff] %v1326_v55 }
  0xb8   : > { %v403_v17 = vpop.permute.xlu1 %402  ;;  %v399_v52 = vpop.permute.xlu0 %398 }
  0xb9   : > { %v464_v58 = vmul.f32 %v403_v17, %v352_v25  ;;  %v465_v37 = vmul.f32 %v403_v17, %v353_v34  ;;  %v466_v59 = vmul.f32 %v403_v17, %v354_v27  ;;  %v461_v6 = vmul.f32 %v399_v52, %v349_v2 }
  0xba   : > { %v462_v57 = vmul.f32 %v399_v52, %v350_v30  ;;  %v463_v1 = vmul.f32 %v399_v52, %v351_v22 }
  0xbb   : > { %v512_v53 = vmul.f32 0.2, %v464_v58  ;;  %v513_v31 = vmul.f32 0.2, %v465_v37  ;;  %v514_v51 = vmul.f32 0.2, %v466_v59 }
  0xbc   : > { %v509_v25 = vmul.f32 0.2, %v461_v6  ;;  %v510_v34 = vmul.f32 0.2, %v462_v57  ;;  %v511_v27 = vmul.f32 0.2, %v463_v1  ;;  %v407_v2 = vpop.permute.xlu1 %406  ;;  %v411_v49 = vpop.permute.xlu0 %410 }
  0xbd   : > { %v560_v17 = vmax.f32 %v464_v58, %v512_v53  ;;  %v561_v48 = vmax.f32 %v465_v37, %v513_v31  ;;  %v562_v55 = vmax.f32 %v466_v59, %v514_v51  ;;  %v467_v30 = vmul.f32 %v407_v2, %v1174_v8 }
  0xbe   : > { %v557_v3 = vmax.f32 %v461_v6, %v509_v25  ;;  %v558_v22 = vmax.f32 %v462_v57, %v510_v34  ;;  %v559_v21 = vmax.f32 %v463_v1, %v511_v27  ;;  %v468_v52 = vmul.f32 %v407_v2, %v1179_v44 }
  0xbf   : > { %608 = vst [vmem:[%s1337_s26 + $0x18] sm:$0xff] %v560_v17  ;;  %609 = vst [vmem:[%s1337_s26 + $0x20] sm:$0xff] %v561_v48  ;;  %v469_v58 = vmul.f32 %v407_v2, %v1186_v62  ;;  %v515_v37 = vmul.f32 0.2, %v467_v30  ;;  %v470_v8 = vmul.f32 %v411_v49, %v1200_v14  ;;  %v471_v6 = vmul.f32 %v411_v49, %v1205_v18 }
  0xc0   : > { %610 = vst [vmem:[%s1337_s26 + $0x28] sm:$0xff] %v562_v55  ;;  %v1513_v44 = vunpack.c.h.bf16 %v1157_v60  ;;  %v1514_v57 = vunpack.c.l.bf16 %v1154_v61  ;;  %605 = vst [vmem:[%s1337_s26] sm:$0xff] %v557_v3  ;;  %v516_v55 = vmul.f32 0.2, %v468_v52  ;;  %v472_v62 = vmul.f32 %v411_v49, %v1210_v26  ;;  %v415_v53 = vpop.permute.xlu1 %414  ;;  %v419_v14 = vpop.permute.xlu0 %418 }
  0xc1   : > { %606 = vst [vmem:[%s1337_s26 + $0x8] sm:$0xff] %v558_v22  ;;  %607 = vst [vmem:[%s1337_s26 + $0x10] sm:$0xff] %v559_v21  ;;  %v517_v31 = vmul.f32 0.2, %v469_v58  ;;  %v563_v18 = vmax.f32 %v467_v30, %v515_v37  ;;  %v518_v51 = vmul.f32 0.2, %v470_v8  ;;  %v473_v61 = vmul.f32 %v415_v53, %v1239_v28 }
  0xc2   : > { %v1347_v59 = vsub.f32 %v1513_v44, %v342_v32  ;;  %v1351_v1 = vsub.f32 %v1514_v57, %v342_v32  ;;  %v519_v60 = vmul.f32 0.2, %v471_v6  ;;  %v564_v50 = vmax.f32 %v468_v52, %v516_v55 }
  0xc3   : > { %v520_v25 = vmul.f32 0.2, %v472_v62  ;;  %v474_v32 = vmul.f32 %v415_v53, %v1244_v33  ;;  %v565_v34 = vmax.f32 %v469_v58, %v517_v31  ;;  %611 = vst [vmem:[%s1337_s26 + $0x30] sm:$0xff] %v563_v18  ;;  %v566_v27 = vmax.f32 %v470_v8, %v518_v51 }
  0xc4   : > { %v567_v26 = vmax.f32 %v471_v6, %v519_v60  ;;  %v475_v2 = vmul.f32 %v415_v53, %v1249_v35  ;;  %612 = vst [vmem:[%s1337_s26 + $0x38] sm:$0xff] %v564_v50  ;;  %v521_v17 = vmul.f32 0.2, %v473_v61  ;;  %v476_v30 = vmul.f32 %v419_v14, %v1224_v41  ;;  %v423_v3 = vpop.permute.xlu1 %422  ;;  %v427_v22 = vpop.permute.xlu0 %426 }
  0xc5   : > { %v568_v49 = vmax.f32 %v472_v62, %v520_v25  ;;  %v522_v48 = vmul.f32 0.2, %v474_v32  ;;  %613 = vst [vmem:[%s1337_s26 + $0x40] sm:$0xff] %v565_v34  ;;  %614 = vst [vmem:[%s1337_s26 + $0x48] sm:$0xff] %v566_v27  ;;  %v477_v33 = vmul.f32 %v419_v14, %v1229_v42  ;;  %v478_v21 = vmul.f32 %v419_v14, %v1234_v19 }
  0xc6   : > { %615 = vst [vmem:[%s1337_s26 + $0x50] sm:$0xff] %v567_v26  ;;  %v523_v28 = vmul.f32 0.2, %v475_v2  ;;  %v479_v35 = vmul.f32 %v423_v3, %v1269_v24  ;;  %v569_v52 = vmax.f32 %v473_v61, %v521_v17  ;;  %v524_v37 = vmul.f32 0.2, %v476_v30 }
  0xc7   : > { %616 = vst [vmem:[%s1337_s26 + $0x58] sm:$0xff] %v568_v49  ;;  %v570_v58 = vmax.f32 %v474_v32, %v522_v48  ;;  %v480_v41 = vmul.f32 %v423_v3, %v1273_v36  ;;  %v525_v6 = vmul.f32 0.2, %v477_v33  ;;  %v526_v44 = vmul.f32 0.2, %v478_v21 }
  0xc8   : > { %v571_v8 = vmax.f32 %v475_v2, %v523_v28  ;;  %v481_v57 = vmul.f32 %v423_v3, %v1276_v45  ;;  %617 = vst [vmem:[%s1337_s26 + $0x60] sm:$0xff] %v569_v52  ;;  %v572_v42 = vmax.f32 %v476_v30, %v524_v37  ;;  %v527_v19 = vmul.f32 0.2, %v479_v35  ;;  %v431_v62 = vpop.permute.xlu1 %430  ;;  %v435_v53 = vpop.permute.xlu0 %434 }
  0xc9   : > { %618 = vst [vmem:[%s1337_s26 + $0x68] sm:$0xff] %v570_v58  ;;  %v528_v24 = vmul.f32 0.2, %v480_v41  ;;  %v482_v55 = vmul.f32 %v427_v22, %v1254_v23  ;;  %v573_v36 = vmax.f32 %v477_v33, %v525_v6  ;;  %v574_v14 = vmax.f32 %v478_v21, %v526_v44 }
  0xca   : > { %619 = vst [vmem:[%s1337_s26 + $0x70] sm:$0xff] %v571_v8  ;;  %v529_v31 = vmul.f32 0.2, %v481_v57  ;;  %v483_v18 = vmul.f32 %v427_v22, %v1259_v43  ;;  %620 = vst [vmem:[%s1337_s26 + $0x78] sm:$0xff] %v572_v42  ;;  %v575_v45 = vmax.f32 %v479_v35, %v527_v19  ;;  %v484_v60 = vmul.f32 %v427_v22, %v1264_v29  ;;  %v1515_v42 = vld [vmem:[#allocation5_spill] sm:$0xff] }
  0xcb   : > { %v576_v51 = vmax.f32 %v480_v41, %v528_v24  ;;  %v530_v50 = vmul.f32 0.2, %v482_v55  ;;  %621 = vst [vmem:[%s1337_s26 + $0x80] sm:$0xff] %v573_v36  ;;  %622 = vst [vmem:[%s1337_s26 + $0x88] sm:$0xff] %v574_v14  ;;  %v485_v61 = vmul.f32 %v431_v62, %v1288_v47  ;;  %v486_v32 = vmul.f32 %v431_v62, %v1291_v38 }
  0xcc   : > { %v577_v23 = vmax.f32 %v481_v57, %v529_v31  ;;  %v531_v25 = vmul.f32 0.2, %v483_v18  ;;  %623 = vst [vmem:[%s1337_s26 + $0x90] sm:$0xff] %v575_v45  ;;  %v532_v34 = vmul.f32 0.2, %v484_v60  ;;  %v487_v27 = vmul.f32 %v431_v62, %v1294_v4  ;;  %v439_v26 = vpop.permute.xlu1 %438  ;;  %v443_v2 = vpop.permute.xlu0 %442 }
  0xcd   : > { %624 = vst [vmem:[%s1337_s26 + $0x98] sm:$0xff] %v576_v51  ;;  %v578_v43 = vmax.f32 %v482_v55, %v530_v50  ;;  %v488_v29 = vmul.f32 %v435_v53, %v1279_v20  ;;  %v533_v17 = vmul.f32 0.2, %v485_v61  ;;  %v534_v48 = vmul.f32 0.2, %v486_v32 }
  0xce   : > { %625 = vst [vmem:[%s1337_s26 + $0xa0] sm:$0xff] %v577_v23  ;;  %v579_v49 = vmax.f32 %v483_v18, %v531_v25  ;;  %v489_v47 = vmul.f32 %v435_v53, %v1282_v39  ;;  %v580_v30 = vmax.f32 %v484_v60, %v532_v34  ;;  %v535_v38 = vmul.f32 0.2, %v487_v27 }
  0xcf   : > { %626 = vst [vmem:[%s1337_s26 + $0xa8] sm:$0xff] %v578_v43  ;;  %v490_v3 = vmul.f32 %v435_v53, %v1285_v46  ;;  %v536_v22 = vmul.f32 0.2, %v488_v29  ;;  %v581_v4 = vmax.f32 %v485_v61, %v533_v17  ;;  %v582_v20 = vmax.f32 %v486_v32, %v534_v48 }
  0xd0   : > { %627 = vst [vmem:[%s1337_s26 + $0xb0] sm:$0xff] %v579_v49  ;;  %v537_v28 = vmul.f32 0.2, %v489_v47  ;;  %v491_v33 = vmul.f32 %v439_v26, %v1302_v7  ;;  %628 = vst [vmem:[%s1337_s26 + $0xb8] sm:$0xff] %v580_v30  ;;  %v583_v21 = vmax.f32 %v487_v27, %v535_v38  ;;  %v492_v52 = vmul.f32 %v439_v26, %v1308_v63  ;;  %v447_v58 = vpop.permute.xlu1 %446  ;;  %v451_v6 = vpop.permute.xlu0 %450 }
  0xd1   : > { %v538_v35 = vmul.f32 0.2, %v490_v3  ;;  %v584_v39 = vmax.f32 %v488_v29, %v536_v22  ;;  %629 = vst [vmem:[%s1337_s26 + $0xc0] sm:$0xff] %v581_v4  ;;  %630 = vst [vmem:[%s1337_s26 + $0xc8] sm:$0xff] %v582_v20  ;;  %v493_v37 = vmul.f32 %v439_v26, %v1310_v9  ;;  %v494_v8 = vmul.f32 %v443_v2, %v1296_v40 }
  0xd2   : > { %v585_v46 = vmax.f32 %v489_v47, %v537_v28  ;;  %v539_v41 = vmul.f32 0.2, %v491_v33  ;;  %631 = vst [vmem:[%s1337_s26 + $0xd0] sm:$0xff] %v583_v21  ;;  %v540_v44 = vmul.f32 0.2, %v492_v52  ;;  %v495_v57 = vmul.f32 %v443_v2, %v1298_v5  ;;  %v1516_v47 = vld [vmem:[#allocation6_spill] sm:$0xff] }
  0xd3   : > { %v586_v7 = vmax.f32 %v490_v3, %v538_v35  ;;  %632 = vst [vmem:[%s1337_s26 + $0xd8] sm:$0xff] %v584_v39  ;;  %v496_v63 = vmul.f32 %v443_v2, %v1515_v42  ;;  %v541_v19 = vmul.f32 0.2, %v493_v37  ;;  %v542_v55 = vmul.f32 0.2, %v494_v8 }
  0xd4   : > { %633 = vst [vmem:[%s1337_s26 + $0xe0] sm:$0xff] %v585_v46  ;;  %v587_v24 = vmax.f32 %v491_v33, %v539_v41  ;;  %v497_v9 = vmul.f32 %v447_v58, %v1318_v12  ;;  %v588_v40 = vmax.f32 %v492_v52, %v540_v44  ;;  %v543_v62 = vmul.f32 0.2, %v495_v57  ;;  %v455_v45 = vpop.permute.xlu1 %454 }
  0xd5   : > { %634 = vst [vmem:[%s1337_s26 + $0xe8] sm:$0xff] %v586_v7  ;;  %v544_v53 = vmul.f32 0.2, %v496_v63  ;;  %v498_v36 = vmul.f32 %v447_v58, %v1320_v15  ;;  %v589_v14 = vmax.f32 %v493_v37, %v541_v19  ;;  %v590_v5 = vmax.f32 %v494_v8, %v542_v55 }
  0xd6   : > { %635 = vst [vmem:[%s1337_s26 + $0xf0] sm:$0xff] %v587_v24  ;;  %v499_v31 = vmul.f32 %v447_v58, %v1322_v16  ;;  %v545_v18 = vmul.f32 0.2, %v497_v9  ;;  %636 = vst [vmem:[%s1337_s26 + $0xf8] sm:$0xff] %v588_v40  ;;  %v591_v51 = vmax.f32 %v495_v57, %v543_v62  ;;  %v500_v50 = vmul.f32 %v451_v6, %v1312_v10  ;;  %v459_v16 = vpop.permute.xlu0 %458 }
  0xd7   : > { %v592_v12 = vmax.f32 %v496_v63, %v544_v53  ;;  %v546_v60 = vmul.f32 0.2, %v498_v36  ;;  %637 = vst [vmem:[%s1337_s26 + $0x100] sm:$0xff] %v589_v14  ;;  %638 = vst [vmem:[%s1337_s26 + $0x108] sm:$0xff] %v590_v5  ;;  %v501_v25 = vmul.f32 %v451_v6, %v1314_v11  ;;  %v502_v61 = vmul.f32 %v451_v6, %v1316_v0 }
  0xd8   : > { %v547_v23 = vmul.f32 0.2, %v499_v31  ;;  %v593_v15 = vmax.f32 %v497_v9, %v545_v18  ;;  %639 = vst [vmem:[%s1337_s26 + $0x110] sm:$0xff] %v591_v51  ;;  %v548_v34 = vmul.f32 0.2, %v500_v50  ;;  %v503_v43 = vmul.f32 %v455_v45, %v1332_v13 }
  0xd9   : > { %640 = vst [vmem:[%s1337_s26 + $0x118] sm:$0xff] %v592_v12  ;;  %v594_v32 = vmax.f32 %v498_v36, %v546_v60  ;;  %v504_v27 = vmul.f32 %v455_v45, %v1347_v59  ;;  %v549_v29 = vmul.f32 0.2, %v501_v25  ;;  %v550_v26 = vmul.f32 0.2, %v502_v61 }
  0xda   : > { %v595_v10 = vmax.f32 %v499_v31, %v547_v23  ;;  %641 = vst [vmem:[%s1337_s26 + $0x120] sm:$0xff] %v593_v15  ;;  %v505_v11 = vmul.f32 %v455_v45, %v1351_v1  ;;  %v596_v0 = vmax.f32 %v500_v50, %v548_v34  ;;  %v551_v2 = vmul.f32 0.2, %v503_v43 }
  0xdb   : > { %642 = vst [vmem:[%s1337_s26 + $0x128] sm:$0xff] %v594_v32  ;;  %v552_v49 = vmul.f32 0.2, %v504_v27  ;;  %v506_v17 = vmul.f32 %v459_v16, %v1324_v56  ;;  %v597_v13 = vmax.f32 %v501_v25, %v549_v29  ;;  %v598_v59 = vmax.f32 %v502_v61, %v550_v26 }
  0xdc   : > { %643 = vst [vmem:[%s1337_s26 + $0x130] sm:$0xff] %v595_v10  ;;  %v553_v48 = vmul.f32 0.2, %v505_v11  ;;  %v507_v30 = vmul.f32 %v459_v16, %v1516_v47  ;;  %644 = vst [vmem:[%s1337_s26 + $0x138] sm:$0xff] %v596_v0  ;;  %v599_v1 = vmax.f32 %v503_v43, %v551_v2  ;;  %v508_v3 = vmul.f32 %v459_v16, %v1328_v54 }
  0xdd   : > { %v600_v38 = vmax.f32 %v504_v27, %v552_v49  ;;  %v554_v22 = vmul.f32 0.2, %v506_v17  ;;  %645 = vst [vmem:[%s1337_s26 + $0x140] sm:$0xff] %v597_v13  ;;  %646 = vst [vmem:[%s1337_s26 + $0x148] sm:$0xff] %v598_v59 }
  0xde   : > { %v601_v56 = vmax.f32 %v505_v11, %v553_v48  ;;  %v555_v4 = vmul.f32 0.2, %v507_v30  ;;  %647 = vst [vmem:[%s1337_s26 + $0x150] sm:$0xff] %v599_v1  ;;  %v556_v20 = vmul.f32 0.2, %v508_v3 }
  0xdf   : > { %648 = vst [vmem:[%s1337_s26 + $0x158] sm:$0xff] %v600_v38  ;;  %v602_v28 = vmax.f32 %v506_v17, %v554_v22 }
  0xe0   : > { %649 = vst [vmem:[%s1337_s26 + $0x160] sm:$0xff] %v601_v56  ;;  %v603_v33 = vmax.f32 %v507_v30, %v555_v4  ;;  %v604_v54 = vmax.f32 %v508_v3, %v556_v20 }
  0xe1   : > { %650 = vst [vmem:[%s1337_s26 + $0x168] sm:$0xff] %v602_v28 }
  0xe2   : > { %651 = vst [vmem:[%s1337_s26 + $0x170] sm:$0xff] %v603_v33  ;;  %652 = vst [vmem:[%s1337_s26 + $0x178] sm:$0xff] %v604_v54 }
  0xe3   : > { %836 = shalt.err (!%p833_p5)
}
  0xe4   : > { %s837_s8 = scalar_lea.hbm %s1437_s30, 6144  ;;  %s841_s18 = scalar_lea.hbm %s1494_s2, 12288 }
  0xe5   : > { %p838_p6 = scmp.ne.s32.totalorder %s1437_s30, %s837_s8  ;;  %p842_p10 = scmp.lt.u32.totalorder %s1437_s30, %s1494_s2 }
  0xe6   : > { %p843_p11 = scmp.lt.u32.totalorder %s841_s18, %s837_s8  ;;  %p845_p13 = scmp.lt.u32.totalorder %s837_s8, %s1437_s30 }
  0xe7   : > { %p839_p7 = pnand %p838_p6, %p963_p4 }
  0xe8   : > { %p844_p12 = por %p843_p11, %p842_p10 }
  0xe9   : > { %p840_p9 = pneg %p839_p7 }
  0xea   : > { %p846_p0 = por %p845_p13, %p844_p12 }
  0xec   : > { %p847_p1 = pnand %p846_p0, %p840_p9 }
  0xee   : > { %850 = shalt.err (!%p847_p1)
}
  0xef   : > { %s906_s24 = smov 384   ;;  %s907_s25 = smov 24  }
  0xf0   : > { %760 = dma.vmem_to_hbm [thread:$0]  (%p963_p4), %s1439_s28, 6144, %s1437_s30, %s1446_s3, %s906_s24, %s906_s24, %s907_s25  }
  0xf1 PF: > { %p766_p2 = scmp.ge.s32.totalorder %s901_s14, 2  ;;  %s684_s26 = sand.u32 1, %s881_s9  }
  0xf2   : > { %s685_s27 = scalar_lea.sflag [#allocation3], %s684_s26 }
  0xf3   : > { %p763_p3 = pnand %p766_p2, %p970_p8 }
  0xf5   : > { %876 = dma.done.wait (!%p763_p3), %s685_s27, 6144  }
  0xf6   : > { %878 = vsyncadd (!%p763_p3), %s685_s27, 4294961152  ;;  %s15_s14 = sadd.s32 1, %s901_s14   ;;  %s1517_s9 = smov %s885_s10 }
  0xf7   : > { %p12_p5 = scmp.ge.s32.totalorder %s15_s14, 4   ;;  %s1518_s10 = smov %s889_s11 }
  0xf8   : > { %s1519_s11 = smov %s976_s22  ;;  %s1520_s12 = smov %s897_s13 }
  0xf9   : > { %s1521_s13 = smov %s1523_s17  ;;  %14 = sbr.rel (!%p12_p5) target bundleno = 4 (0x4), region = 63 }
 0x100   :  { %690 = vsyncpa [#allocation3], 1 }
 0x101   :  { %692 = vsyncpa [#allocation3 + $0x1], 1 }

// kernel: backbone_forward.12
= control target key start
LH: loop header
LB: loop body
LE: loop exit
PB: predicated region body
PF: predicated region fallthrough
CT: control target
= control target key end

     0   :  { %s2533_s18 = smov 0   ;;  %s2535_s19 = smov 0   ;;  %s3328_s0 = inlined_call_operand.vmem [shape: bf16[2,256,384], index: 0, kind: input, shape index: {}]   ;;  %s3329_s1 = inlined_call_operand.vmem [shape: f32[256,2], index: 1, kind: input, shape index: {}]   ;;  %s3330_s2 = inlined_call_operand.vmem [shape: bf16[128,256], index: 2, kind: input, shape index: {}]   ;;  %s3331_s3 = inlined_call_operand.vmem [shape: bf16[2,128,384], index: 3, kind: output, shape index: {0}]   ;;  %s3332_s4 = inlined_call_operand.vmem [shape: f32[2,128,1], index: 4, kind: output, shape index: {1}]   ;;  %s3333_s5 = inlined_call_operand.vmem [shape: f32[2,128,1], index: 5, kind: output, shape index: {2}]  }
   0x1   :  { %s2537_s20 = smov 0  }
   0x2 LB: > { %s28_s21 = sadd.s32 1, %s2494_s19  ;;  %p2234_p0 = scmp.ge.s32.totalorder %s2498_s20, 1  ;;  %s2498_s20 = sphi %s2537_s20, %s16_s20   ;;  %s2494_s19 = sphi %s2535_s19, %s3356_s19   ;;  %s2490_s18 = sphi %s2533_s18, %s3355_s18  }
   0x3   : > { %p30_p1 = scmp.ge.s32.totalorder %s28_s21, 2  ;;  %p213_p2 = scmp.lt.s32.totalorder %s2498_s20, 3 }
   0x5   : > { %s3358_s21 = smov (%p30_p1, %s28_s21), 0  ;;  %p214_p3 = pnand %p2234_p0, %p213_p2 }
   0x6   : > { %v292_v0 = vld [vmem:[%s3329_s1 + $0x10] sm:$0xff] (!%p214_p3)  ;;  %v290_v1 = vld [vmem:[%s3329_s1] sm:$0xff] (!%p214_p3)  ;;  %v2500_v2 = vmov (!%p214_p3), 1   ;;  %v291_v4 = vld [vmem:[%s3329_s1 + $0x8] sm:$0xff] (!%p214_p3)  ;;  %v3334_v8 = vmov (!%p214_p3), 0   ;;  %p260_p4 = scmp.lt.s32.totalorder (!%p214_p3), %s2490_s18, 1 }
   0x7   : > { %217 = sbr.rel (%p214_p3) target bundleno = 766 (0x2fe), region = 32  ;;  %2420 = vset.pattern.permute.xlu0 (!%p214_p3), %v2500_v2  ;;  %2418 = vset.pattern.permute.xlu1 (!%p214_p3), %v2500_v2  ;;  %v296_v3 = vld [vmem:[%s3329_s1 + $0x30] sm:$0xff] (!%p214_p3)  ;;  %v293_v6 = vld [vmem:[%s3329_s1 + $0x18] sm:$0xff] (!%p214_p3)  ;;  %v294_v10 = vld [vmem:[%s3329_s1 + $0x20] sm:$0xff] (!%p214_p3)  ;;  %vm1704_vm0 = vcmask (!%p214_p3), 7168  }
   0x8   : > { %747 = vperm.xlu0 (!%p214_p3), %2420, %v292_v0   ;;  %739 = vperm.xlu1 (!%p214_p3), %2418, %v290_v1   ;;  %v300_v5 = vld [vmem:[%s3329_s1 + $0x50] sm:$0xff] (!%p214_p3)  ;;  %v295_v13 = vld [vmem:[%s3329_s1 + $0x28] sm:$0xff] (!%p214_p3)  ;;  %v297_v14 = vld [vmem:[%s3329_s1 + $0x38] sm:$0xff] (!%p214_p3) }
   0x9   : > { %v304_v7 = vld [vmem:[%s3329_s1 + $0x70] sm:$0xff] (!%p214_p3)  ;;  %v298_v15 = vld [vmem:[%s3329_s1 + $0x40] sm:$0xff] (!%p214_p3)  ;;  %v299_v16 = vld [vmem:[%s3329_s1 + $0x48] sm:$0xff] (!%p214_p3) }
   0xa   : > { %v308_v9 = vld [vmem:[%s3329_s1 + $0x90] sm:$0xff] (!%p214_p3)  ;;  %v303_v17 = vld [vmem:[%s3329_s1 + $0x68] sm:$0xff] (!%p214_p3)  ;;  %v301_v18 = vld [vmem:[%s3329_s1 + $0x58] sm:$0xff] (!%p214_p3) }
   0xb   : > { %v312_v11 = vld [vmem:[%s3329_s1 + $0xb0] sm:$0xff] (!%p214_p3)  ;;  %v307_v19 = vld [vmem:[%s3329_s1 + $0x88] sm:$0xff] (!%p214_p3)  ;;  %v302_v20 = vld [vmem:[%s3329_s1 + $0x60] sm:$0xff] (!%p214_p3) }
   0xc   : > { %763 = vperm.xlu0 (!%p214_p3), %2420, %v296_v3   ;;  %743 = vperm.xlu1 (!%p214_p3), %2418, %v291_v4   ;;  %v316_v12 = vld [vmem:[%s3329_s1 + $0xd0] sm:$0xff] (!%p214_p3)  ;;  %v311_v21 = vld [vmem:[%s3329_s1 + $0xa8] sm:$0xff] (!%p214_p3)  ;;  %v305_v23 = vld [vmem:[%s3329_s1 + $0x78] sm:$0xff] (!%p214_p3) }
   0xd   : > { %v315_v22 = vld [vmem:[%s3329_s1 + $0xc8] sm:$0xff] (!%p214_p3)  ;;  %v306_v25 = vld [vmem:[%s3329_s1 + $0x80] sm:$0xff] (!%p214_p3)  ;;  %v320_v26 = vld [vmem:[%s3329_s1 + $0xf0] sm:$0xff] (!%p214_p3) }
   0xe   : > { %v2639_v24 = vld [vmem:[%s3329_s1 + $0xe8] sm:$0xff]  ;;  %v309_v27 = vld [vmem:[%s3329_s1 + $0x98] sm:$0xff]  ;;  %v310_v28 = vld [vmem:[%s3329_s1 + $0xa0] sm:$0xff]  ;;  %s3360_s18 = smov (!%p260_p4, %s2490_s18), 1 }
   0xf   : > { %v313_v29 = vld [vmem:[%s3329_s1 + $0xb8] sm:$0xff]  ;;  %v314_v36 = vld [vmem:[%s3329_s1 + $0xc0] sm:$0xff]  ;;  %s2389_s13 = smul.u32 384, %s3360_s18  ;;  %s2291_s17 = sshll.u32 %s3360_s18, 7 }
  0x10   : > { %779 = vperm.xlu0 %2420, %v300_v5   ;;  %2419 = vset.pattern.permute.xlu1 %v3334_v8  ;;  %v317_v45 = vld [vmem:[%s3329_s1 + $0xd8] sm:$0xff]  ;;  %s3219_s24 = scalar_lea.vmem %s3332_s4, %s2291_s17  ;;  %s3227_s26 = scalar_lea.vmem %s3333_s5, %s2291_s17 }
  0x11   : > { %499 = vperm.xlu1 %2419, %v293_v6   ;;  %s2697_s16 = scalar_lea.vmem %s3328_s0, %s2389_s13  ;;  %s2390_s13 = smul.u32 192, %s3360_s18 }
  0x12   : > { %v328_v42 = vld [vmem:[%s2697_s16 + $0x24] sm:$0xff]  ;;  %v330_v43 = vld [vmem:[%s2697_s16 + $0x30] sm:$0xff]  ;;  %v2723_v53 = vld [vmem:[%s2697_s16 + $0x20] ss:$60 sps:$4 sm:$0xff]  }
  0x13   : > { %v322_v44 = vld [vmem:[%s2697_s16] sm:$0xff]  ;;  %v2710_v46 = vld [vmem:[%s2697_s16 + $0x8] ss:$12 sps:$4 sm:$0xff]   ;;  %v2713_v47 = vld [vmem:[%s2697_s16 + $0xc] sm:$0xff]  ;;  %v395_v48 = vunpack.c.l.bf16 %v328_v42  ;;  %v396_v49 = vunpack.c.h.bf16 %v328_v42  ;;  %v398_v55 = vunpack.c.l.bf16 %v330_v43  ;;  %v399_v56 = vunpack.c.h.bf16 %v330_v43 }
  0x14   : > { %795 = vperm.xlu0 %2420, %v304_v7   ;;  %v2720_v52 = vld [vmem:[%s2697_s16 + $0x54] sm:$0xff]  ;;  %v386_v57 = vunpack.c.l.bf16 %v322_v44  ;;  %v387_v58 = vunpack.c.h.bf16 %v322_v44  ;;  %v2730_v59 = vld [vmem:[%s2697_s16 + $0x3c] sm:$0xff]  ;;  %v388_v60 = vunpack.c.l.bf16 %v2710_v46  ;;  %v389_v61 = vunpack.c.l.bf16 %v2713_v47 }
  0x15   : > { %2421 = vset.pattern.permute.xlu1 %v2500_v2  ;;  %v2726_v54 = vld [vmem:[%s2697_s16 + $0x18] sm:$0xff]  ;;  %v390_v62 = vunpack.c.h.bf16 %v2713_v47 }
  0x16   : > { %751 = vperm.xlu1 %2421, %v293_v6   ;;  %v392_v6 = vunpack.c.l.bf16 %v2726_v54 }
  0x18   : > { %811 = vperm.xlu0 %2420, %v308_v9  }
  0x1a   : > { %2422 = vset.pattern.permute.xlu1 %v3334_v8 }
  0x1b   : > { %504 = vperm.xlu1 %2422, %v294_v10  }
  0x1c   : > { %827 = vperm.xlu0 %2420, %v312_v11  }
  0x1f   : > { %2423 = vset.pattern.permute.xlu1 %v2500_v2 }
  0x20   : > { %843 = vperm.xlu0 %2420, %v316_v12   ;;  %755 = vperm.xlu1 %2423, %v294_v10   ;;  %v393_v10 = vunpack.c.h.bf16 %v2726_v54 }
  0x24   : > { %2445 = vset.pattern.permute.xlu0 %v3334_v8  ;;  %759 = vperm.xlu1 %2423, %v295_v13  }
  0x25   : > { %484 = vperm.xlu0 %2445, %v290_v1   ;;  %v2740_v1 = vld [vmem:[%s2697_s16 + $0x60] sm:$0xff] }
  0x28   : > { %2424 = vset.pattern.permute.xlu1 %v3334_v8 }
  0x29   : > { %489 = vperm.xlu0 %2445, %v291_v4   ;;  %519 = vperm.xlu1 %2424, %v297_v14   ;;  %v408_v4 = vunpack.c.h.bf16 %v2720_v52 }
  0x2d   : > { %494 = vperm.xlu0 %2445, %v292_v0   ;;  %2425 = vset.pattern.permute.xlu1 %v2500_v2  ;;  %v2737_v0 = vld [vmem:[%s2697_s16 + $0x44] ss:$36 sps:$4 sm:$0xff]  }
  0x2e   : > { %767 = vperm.xlu1 %2425, %v297_v14  }
  0x31   : > { %509 = vperm.xlu0 %2445, %v295_v13  }
  0x32   : > { %2426 = vset.pattern.permute.xlu1 %v3334_v8 }
  0x33   : > { %524 = vperm.xlu1 %2426, %v298_v15  }
  0x35   : > { %514 = vperm.xlu0 %2445, %v296_v3  }
  0x37   : > { %2427 = vset.pattern.permute.xlu1 %v2500_v2 }
  0x38   : > { %771 = vperm.xlu1 %2427, %v298_v15  }
  0x39   : > { %529 = vperm.xlu0 %2445, %v299_v16  }
  0x3c   : > { %775 = vperm.xlu1 %2427, %v299_v16  }
  0x3d   : > { %534 = vperm.xlu0 %2445, %v300_v5   ;;  %v409_v5 = vunpack.c.h.bf16 %v2723_v53 }
  0x40   : > { %2428 = vset.pattern.permute.xlu1 %v3334_v8 }
  0x41   : > { %549 = vperm.xlu0 %2445, %v303_v17   ;;  %539 = vperm.xlu1 %2428, %v301_v18  }
  0x45   : > { %554 = vperm.xlu0 %2445, %v304_v7   ;;  %2429 = vset.pattern.permute.xlu1 %v2500_v2  ;;  %v2747_v7 = vld [vmem:[%s2697_s16 + $0x48] sm:$0xff] }
  0x46   : > { %783 = vperm.xlu1 %2429, %v301_v18  }
  0x49   : > { %569 = vperm.xlu0 %2445, %v307_v19  }
  0x4a   : > { %2430 = vset.pattern.permute.xlu1 %v3334_v8 }
  0x4b   : > { %544 = vperm.xlu1 %2430, %v302_v20  }
  0x4d   : > { %574 = vperm.xlu0 %2445, %v308_v9  }
  0x4f   : > { %2431 = vset.pattern.permute.xlu1 %v2500_v2 }
  0x50   : > { %787 = vperm.xlu1 %2431, %v302_v20   ;;  %v2765_v20 = vld [vmem:[%s2697_s16 + $0x6c] sm:$0xff] }
  0x51   : > { %589 = vperm.xlu0 %2445, %v311_v21  }
  0x54   : > { %791 = vperm.xlu1 %2431, %v303_v17  }
  0x55   : > { %594 = vperm.xlu0 %2445, %v312_v11   ;;  %v394_v11 = vunpack.c.l.bf16 %v2723_v53 }
  0x58   : > { %2432 = vset.pattern.permute.xlu1 %v3334_v8 }
  0x59   : > { %609 = vperm.xlu0 %2445, %v315_v22   ;;  %559 = vperm.xlu1 %2432, %v305_v23  }
  0x5d   : > { %614 = vperm.xlu0 %2445, %v316_v12   ;;  %2433 = vset.pattern.permute.xlu1 %v2500_v2  ;;  %v401_v12 = vunpack.c.l.bf16 %v2730_v59 }
  0x5e   : > { %799 = vperm.xlu1 %2433, %v305_v23  }
  0x61   : > { %629 = vperm.xlu0 %2445, %v2639_v24  }
  0x62   : > { %2434 = vset.pattern.permute.xlu1 %v3334_v8 }
  0x63   : > { %564 = vperm.xlu1 %2434, %v306_v25  }
  0x65   : > { %634 = vperm.xlu0 %2445, %v320_v26  }
  0x67   : > { %2435 = vset.pattern.permute.xlu1 %v2500_v2 }
  0x68   : > { %803 = vperm.xlu1 %2435, %v306_v25  }
  0x69   : > { %2450 = vset.pattern.permute.xlu0 %v2500_v2 }
  0x6a   : > { %859 = vperm.xlu0 %2450, %v320_v26  }
  0x6c   : > { %807 = vperm.xlu1 %2435, %v307_v19   ;;  %v2762_v19 = vld [vmem:[%s2697_s16 + $0x50] ss:$36 sps:$4 sm:$0xff]  }
  0x70   : > { %2436 = vset.pattern.permute.xlu1 %v3334_v8 }
  0x71   : > { %579 = vperm.xlu1 %2436, %v309_v27  }
  0x75   : > { %2437 = vset.pattern.permute.xlu1 %v2500_v2 }
  0x76   : > { %815 = vperm.xlu1 %2437, %v309_v27  }
  0x7a   : > { %2438 = vset.pattern.permute.xlu1 %v3334_v8 }
  0x7b   : > { %584 = vperm.xlu1 %2438, %v310_v28  }
  0x7f   : > { %2439 = vset.pattern.permute.xlu1 %v2500_v2 }
  0x80   : > { %819 = vperm.xlu1 %2439, %v310_v28  }
  0x84   : > { %823 = vperm.xlu1 %2439, %v311_v21  }
  0x87   : > { %v2664_v30 = vpop.permute.xlu1 %739  ;;  %v2666_v31 = vpop.permute.xlu0 %747 }
  0x88   : > { %2440 = vset.pattern.permute.xlu1 %v3334_v8 }
  0x89   : > { %599 = vperm.xlu1 %2440, %v313_v29  }
  0x8b   : > { %v2669_v32 = vpop.permute.xlu1 %743  ;;  %v2671_v33 = vpop.permute.xlu0 %763 }
  0x8d   : > { %2441 = vset.pattern.permute.xlu1 %v2500_v2 }
  0x8e   : > { %831 = vperm.xlu1 %2441, %v313_v29  }
  0x8f   : > { %v2675_v34 = vpop.permute.xlu0 %779 }
  0x90   : > { %v2677_v35 = vpop.permute.xlu1 %499 }
  0x91   : > { %v651_v21 = vsub.f32 %v395_v48, %v2677_v35  ;;  %v2786_v48 = vld [vmem:[%s2697_s16 + $0x80] ss:$36 sps:$4 sm:$0xff]  }
  0x92   : > { %2442 = vset.pattern.permute.xlu1 %v3334_v8 }
  0x93   : > { %604 = vperm.xlu1 %2442, %v314_v36   ;;  %v2686_v37 = vpop.permute.xlu0 %795 }
  0x95   : > { %v2689_v38 = vpop.permute.xlu1 %751 }
  0x96   : > { %v2792_v53 = vmul.f32 %v2689_v38, %v651_v21 }
  0x97   : > { %2443 = vset.pattern.permute.xlu1 %v2500_v2  ;;  %v2692_v39 = vpop.permute.xlu0 %811 }
  0x98   : > { %835 = vperm.xlu1 %2443, %v314_v36   ;;  %v2777_v36 = vld [vmem:[%s2697_s16 + $0x78] sm:$0xff]  ;;  %v2822_v47 = vmul.f32 0.2, %v2792_v53 }
  0x9a   : > { %v2699_v40 = vpop.permute.xlu1 %504 }
  0x9b   : > { %v2701_v41 = vpop.permute.xlu0 %827  ;;  %v654_v26 = vsub.f32 %v398_v55, %v2699_v40  ;;  %v655_v27 = vsub.f32 %v399_v56, %v2699_v40 }
  0x9c   : > { %839 = vperm.xlu1 %2443, %v315_v22   ;;  %v652_v22 = vsub.f32 %v396_v49, %v2677_v35  ;;  %v2789_v49 = vld [vmem:[%s2697_s16 + $0x84] sm:$0xff] }
  0x9e   : > { %v2780_v42 = vmul.f32 %v2689_v38, %v652_v22 }
  0x9f   : > { %v2715_v50 = vpop.permute.xlu1 %755  ;;  %v2717_v51 = vpop.permute.xlu0 %843 }
  0xa0   : > { %2444 = vset.pattern.permute.xlu1 %v3334_v8  ;;  %v2798_v54 = vmul.f32 %v2715_v50, %v655_v27 }
  0xa1   : > { %619 = vperm.xlu1 %2444, %v317_v45  }
  0xa3   : > { %v2749_v9 = vpop.permute.xlu1 %759 }
  0xa4   : > { %v2755_v14 = vpop.permute.xlu0 %484 }
  0xa5   : > { %2446 = vset.pattern.permute.xlu1 %v2500_v2  ;;  %v642_v28 = vsub.f32 %v386_v57, %v2755_v14  ;;  %v643_v29 = vsub.f32 %v387_v58, %v2755_v14  ;;  %v318_v57 = vld [vmem:[%s3329_s1 + $0xe0] sm:$0xff]  ;;  %v2816_v58 = vmul.f32 0.2, %v2780_v42 }
  0xa6   : > { %847 = vperm.xlu1 %2446, %v317_v45   ;;  %v2795_v45 = vmul.f32 %v2715_v50, %v654_v26 }
  0xa7   : > { %v867_v27 = vmul.f32 %v2664_v30, %v643_v29  ;;  %v866_v16 = vmul.f32 %v2664_v30, %v642_v28  ;;  %v2828_v28 = vmul.f32 0.2, %v2798_v54 }
  0xa8   : > { %v2800_v55 = vpop.permute.xlu0 %489  ;;  %v520_v56 = vpop.permute.xlu1 %519  ;;  %v2825_v29 = vmul.f32 0.2, %v2795_v45 }
  0xa9   : > { %v645_v22 = vsub.f32 %v389_v61, %v2800_v55  ;;  %v646_v21 = vsub.f32 %v390_v62, %v2800_v55  ;;  %v665_v17 = vsub.f32 %v409_v5, %v520_v56  ;;  %v962_v26 = vmul.f32 0.2, %v866_v16 }
  0xaa   : > { %2447 = vset.pattern.permute.xlu1 %v3334_v8  ;;  %v1068_v5 = vmax.f32 %v2780_v42, %v2816_v58 }
  0xab   : > { %624 = vperm.xlu1 %2447, %v318_v57   ;;  %v870_v61 = vmul.f32 %v2669_v32, %v646_v21  ;;  %v869_v62 = vmul.f32 %v2669_v32, %v645_v22  ;;  %v963_v22 = vmul.f32 0.2, %v867_v27  ;;  %v1058_v58 = vmax.f32 %v866_v16, %v962_v26 }
  0xac   : > { %v495_v44 = vpop.permute.xlu0 %494 }
  0xad   : > { %v648_v8 = vsub.f32 %v392_v6, %v495_v44  ;;  %v649_v63 = vsub.f32 %v393_v10, %v495_v44  ;;  %v650_v43 = vsub.f32 %v394_v11, %v495_v44  ;;  %v768_v18 = vpop.permute.xlu1 %767  ;;  %v966_v21 = vmul.f32 0.2, %v870_v61 }
  0xae   : > { %v2830_v25 = vmul.f32 %v768_v18, %v665_v17  ;;  %v965_v23 = vmul.f32 0.2, %v869_v62  ;;  %v1067_v17 = vmax.f32 %v2792_v53, %v2822_v47  ;;  %v3335_v44 = vunpack.c.h.bf16 %v2730_v59 }
  0xaf   : > { %v2833_v15 = vmul.f32 %v2666_v31, %v648_v8  ;;  %v873_v3 = vmul.f32 %v2666_v31, %v649_v63  ;;  %v2837_v13 = vmul.f32 %v2666_v31, %v650_v43  ;;  %2448 = vset.pattern.permute.xlu1 %v2500_v2  ;;  %v1062_v10 = vmax.f32 %v870_v61, %v966_v21 }
  0xb0   : > { %v510_v6 = vpop.permute.xlu0 %509  ;;  %851 = vperm.xlu1 %2448, %v318_v57   ;;  %v1061_v11 = vmax.f32 %v869_v62, %v965_v23  ;;  %v1071_v8 = vmax.f32 %v2798_v54, %v2828_v28  ;;  %v2849_v31 = vsub.f32 %v388_v60, %v2755_v14  ;;  %v664_v63 = vsub.f32 %v408_v4, %v520_v56 }
  0xb1   : > { %v657_v42 = vsub.f32 %v401_v12, %v510_v6  ;;  %v969_v43 = vmul.f32 0.2, %v873_v3  ;;  %v658_v47 = vsub.f32 %v3335_v44, %v510_v6  ;;  %v1059_v57 = vmax.f32 %v867_v27, %v963_v22 }
  0xb2   : > { %v525_v53 = vpop.permute.xlu1 %524  ;;  %v3336_v61 = vunpack.c.l.bf16 %v2720_v52  ;;  %v968_v14 = vmul.f32 0.2, %v2833_v15  ;;  %v3337_v4 = vunpack.c.l.bf16 %v2737_v0  ;;  %v2867_v21 = vmul.f32 %v768_v18, %v664_v63 }
  0xb3   : > { %v2865_v12 = vmul.f32 %v2749_v9, %v657_v42  ;;  %v882_v23 = vmul.f32 %v2749_v9, %v658_v47  ;;  %v1171_v59 = vpack.c.bf16 %v1062_v10, %v1059_v57  ;;  %v1170_v16 = vpack.c.bf16 %v1061_v11, %v1058_v58 }
  0xb4   : > { %v663_v60 = vsub.f32 %v3336_v61, %v520_v56  ;;  %v659_v62 = vsub.f32 %v3337_v4, %v510_v6  ;;  %v515_v44 = vpop.permute.xlu0 %514  ;;  %855 = vperm.xlu1 %2448, %v2639_v24   ;;  %v3338_v56 = vunpack.c.l.bf16 %v2747_v7  ;;  %v3339_v22 = vunpack.c.h.bf16 %v2747_v7 }
  0xb5   : > { %v977_v63 = vmul.f32 0.2, %v2865_v12  ;;  %v3340_v42 = vunpack.c.h.bf16 %v2737_v0  ;;  %1298 = vmatprep.subr.bf16.mxu0 %v1171_v59  ;;  %v3341_v24 = vunpack.c.l.bf16 %v2762_v19  ;;  %v3342_v47 = vunpack.c.h.bf16 %v2710_v46 }
  0xb6   : > { %v2871_v26 = vmul.f32 %v768_v18, %v663_v60  ;;  %v2874_v52 = vmul.f32 %v2749_v9, %v659_v62  ;;  %v660_v27 = vsub.f32 %v3338_v56, %v515_v44  ;;  %v661_v6 = vsub.f32 %v3339_v22, %v515_v44  ;;  %v321_v9 = vld [vmem:[%s3329_s1 + $0xf8] sm:$0xff]  ;;  %1299 = vmatpush1.bf16.msra.mxu0 %v1170_v16 }
  0xb7   : > { %v668_v10 = vsub.f32 %v3340_v42, %v525_v53  ;;  %v662_v11 = vsub.f32 %v3341_v24, %v515_v44  ;;  %v1065_v18 = vmax.f32 %v873_v3, %v969_v43  ;;  %v2891_v57 = vsub.f32 %v3342_v47, %v2800_v55  ;;  %v772_v0 = vpop.permute.xlu1 %771 }
  0xb8   : > { %v978_v7 = vmul.f32 0.2, %v882_v23  ;;  %v885_v58 = vmul.f32 %v2671_v33, %v661_v6  ;;  %v1064_v61 = vmax.f32 %v2833_v15, %v968_v14  ;;  %v984_v60 = vmul.f32 0.2, %v2867_v21  ;;  %v530_v46 = vpop.permute.xlu0 %529 }
  0xb9   : > { %v3343_v3 = vunpack.c.h.bf16 %v2740_v1  ;;  %v2899_v4 = vmul.f32 %v2671_v33, %v662_v11  ;;  %v2901_v62 = vmul.f32 %v772_v0, %v668_v10  ;;  %v3344_v55 = vmov 0  }
  0xba   : > { %2449 = vset.pattern.permute.xlu1 %v3344_v55  ;;  %v2905_v59 = vmul.f32 0.2, %v2871_v26  ;;  %v2908_v44 = vmul.f32 %v2671_v33, %v660_v27  ;;  %v1174_v15 = vpack.c.bf16 %v1068_v5, %v1065_v18  ;;  %v3345_v14 = vunpack.c.l.bf16 %v2765_v20 }
  0xbb   : > { %v667_v43 = vsub.f32 %v3343_v3, %v525_v53  ;;  %639 = vperm.xlu1 %2449, %v321_v9   ;;  %v3346_v56 = vunpack.c.l.bf16 %v2740_v1  ;;  %v3347_v42 = vunpack.c.h.bf16 %v2765_v20  ;;  %v1073_v24 = vmax.f32 %v2865_v12, %v977_v63  ;;  %v776_v18 = vpop.permute.xlu1 %775 }
  0xbc   : > { %v669_v16 = vsub.f32 %v3345_v14, %v530_v46  ;;  %v981_v11 = vmul.f32 0.2, %v885_v58  ;;  %1300 = vmatprep.subr.bf16.mxu0 %v1174_v15  ;;  %v3348_v33 = vunpack.c.h.bf16 %v2762_v19  ;;  %v1173_v5 = vpack.c.bf16 %v1067_v17, %v1064_v61  ;;  %v535_v55 = vpop.permute.xlu0 %534  ;;  %v2935_v15 = vld [vmem:[%s2697_s16 + $0x98] ss:$60 sps:$4 sm:$0xff]  }
  0xbd   : > { %v666_v22 = vsub.f32 %v3346_v56, %v525_v53  ;;  %v891_v6 = vmul.f32 %v772_v0, %v667_v43  ;;  %v670_v10 = vsub.f32 %v3347_v42, %v530_v46  ;;  %v1074_v47 = vmax.f32 %v882_v23, %v978_v7  ;;  %v345_v23 = vld [vmem:[%s2697_s16 + $0x8c] ss:$36 sps:$4 sm:$0xff]  }
  0xbe   : > { %v671_v27 = vsub.f32 %v3348_v33, %v530_v46  ;;  %v1080_v3 = vmax.f32 %v2867_v21, %v984_v60  ;;  %v893_v53 = vmul.f32 %v776_v18, %v669_v16  ;;  %v980_v20 = vmul.f32 0.2, %v2908_v44  ;;  %1301 = vmatpush1.bf16.msra.mxu0 %v1173_v5 }
  0xbf   : > { %v890_v1 = vmul.f32 %v772_v0, %v666_v22  ;;  %v894_v43 = vmul.f32 %v776_v18, %v670_v10  ;;  %v1177_v19 = vpack.c.bf16 %v1074_v47, %v1071_v8  ;;  %v3349_v17 = vunpack.c.l.bf16 %v2777_v36  ;;  %2451 = vset.pattern.permute.xlu1 %v2500_v2 }
  0xc0   : > { %v2921_v12 = vmul.f32 %v776_v18, %v671_v27  ;;  %v987_v7 = vmul.f32 0.2, %v891_v6  ;;  %v3350_v0 = vunpack.c.h.bf16 %v2777_v36  ;;  %v3351_v60 = vunpack.c.l.bf16 %v2786_v48  ;;  %863 = vperm.xlu1 %2451, %v321_v9   ;;  %v2947_v2 = vpop.permute.xlu0 %549  ;;  %v540_v42 = vpop.permute.xlu1 %539 }
  0xc1   : > { %v672_v63 = vsub.f32 %v3349_v17, %v535_v55  ;;  %v990_v21 = vmul.f32 0.2, %v894_v43  ;;  %v989_v14 = vmul.f32 0.2, %v893_v53  ;;  %1302 = vmatprep.subr.bf16.mxu0 %v1177_v19  ;;  %v3352_v28 = vmax.f32 %v2795_v45, %v2825_v29 }
  0xc2   : > { %v673_v61 = vsub.f32 %v3350_v0, %v535_v55  ;;  %v674_v46 = vsub.f32 %v3351_v60, %v535_v55  ;;  %v1077_v16 = vmax.f32 %v885_v58, %v981_v11  ;;  %v421_v10 = vunpack.c.l.bf16 %v345_v23  ;;  %v346_v60 = vld [vmem:[%s2697_s16 + $0x90] sm:$0xff] }
  0xc3   : > { %v2938_v54 = vmul.f32 %v2675_v34, %v672_v63  ;;  %v1176_v8 = vpack.c.bf16 %v1073_v24, %v3352_v28  ;;  %v1086_v36 = vmax.f32 %v894_v43, %v990_v21  ;;  %v986_v33 = vmul.f32 0.2, %v890_v1  ;;  %v348_v21 = vld [vmem:[%s2697_s16 + $0x9c] sm:$0xff] }
  0xc4   : > { %v897_v56 = vmul.f32 %v2675_v34, %v673_v61  ;;  %v2945_v22 = vmul.f32 %v2675_v34, %v674_v46  ;;  %v1180_v27 = vpack.c.bf16 %v1080_v3, %v1077_v16  ;;  %v430_v5 = vunpack.c.h.bf16 %v345_v23 }
  0xc5   : > { %1303 = vmatpush1.bf16.msra.mxu0 %v1176_v8  ;;  %v424_v18 = vunpack.c.l.bf16 %v2935_v15  ;;  %v1079_v45 = vmax.f32 %v2871_v26, %v2905_v59  ;;  %v1083_v29 = vmax.f32 %v891_v6, %v987_v7  ;;  %v868_v9 = vmul.f32 %v2664_v30, %v2849_v31  ;;  %v2962_v6 = vpop.permute.xlu0 %554  ;;  %v784_v19 = vpop.permute.xlu1 %783 }
  0xc6   : > { %v871_v34 = vmul.f32 %v2669_v32, %v2891_v57  ;;  %v1085_v58 = vmax.f32 %v893_v53, %v989_v14  ;;  %v992_v24 = vmul.f32 0.2, %v2938_v54  ;;  %v993_v11 = vmul.f32 0.2, %v897_v56  ;;  %1304 = vmatprep.subr.bf16.mxu0 %v1180_v27 }
  0xc7   : > { %v1076_v47 = vmax.f32 %v2908_v44, %v980_v20  ;;  %v3353_v3 = vunpack.c.l.bf16 %v2789_v49  ;;  %v3354_v55 = vunpack.c.h.bf16 %v2789_v49  ;;  %v677_v59 = vsub.f32 %v421_v10, %v540_v42  ;;  %v2454_v10 = vld [vmem:[%s3330_s2 + $0x4] ss:$8 sps:$4 sm:$0xff]  }
  0xc8   : > { %v1183_v30 = vpack.c.bf16 %v1086_v36, %v1083_v29  ;;  %v1082_v31 = vmax.f32 %v890_v1, %v986_v33  ;;  %v991_v32 = vmul.f32 0.2, %v2921_v12  ;;  %v686_v53 = vsub.f32 %v430_v5, %v2962_v6  ;;  %1330 = vmatprep.mubr.bf16.mxu0 %v2454_v10  ;;  %1443 = vmatprep.mubr.bf16.mxu1 %v2454_v10 }
  0xc9   : > { %v675_v43 = vsub.f32 %v3353_v3, %v540_v42  ;;  %v676_v26 = vsub.f32 %v3354_v55, %v540_v42  ;;  %v1179_v57 = vpack.c.bf16 %v1079_v45, %v1076_v47  ;;  %v2966_v17 = vmul.f32 %v784_v19, %v677_v59 }
  0xca   : > { %v967_v63 = vmul.f32 0.2, %v871_v34  ;;  %v988_v49 = vmul.f32 0.2, %v2901_v62  ;;  %v2970_v23 = vmul.f32 %v2686_v37, %v686_v53  ;;  %v1182_v7 = vpack.c.bf16 %v1085_v58, %v1082_v31  ;;  %v545_v42 = vpop.permute.xlu1 %544 }
  0xcb   : > { %v899_v44 = vmul.f32 %v784_v19, %v675_v43  ;;  %v900_v20 = vmul.f32 %v784_v19, %v676_v26  ;;  %1305 = vmatpush1.bf16.msra.mxu0 %v1179_v57  ;;  %v964_v1 = vmul.f32 0.2, %v868_v9  ;;  %v1089_v46 = vmax.f32 %v897_v56, %v993_v11  ;;  %v350_v56 = vld [vmem:[%s2697_s16 + $0xa8] sm:$0xff] }
  0xcc   : > { %1306 = vmatprep.subr.bf16.mxu0 %v1183_v30  ;;  %v1088_v14 = vmax.f32 %v2938_v54, %v992_v24  ;;  %v1063_v28 = vmax.f32 %v871_v34, %v967_v63  ;;  %v1087_v8 = vmax.f32 %v2921_v12, %v991_v32  ;;  %v425_v33 = vunpack.c.l.bf16 %v348_v21 }
  0xcd   : > { %v995_v0 = vmul.f32 0.2, %v899_v44  ;;  %v996_v61 = vmul.f32 0.2, %v900_v20  ;;  %v423_v27 = vunpack.c.h.bf16 %v346_v60  ;;  %v680_v5 = vsub.f32 %v424_v18, %v545_v42 }
  0xce   : > { %v1060_v45 = vmax.f32 %v868_v9, %v964_v1  ;;  %v1084_v29 = vmax.f32 %v2901_v62, %v988_v49  ;;  %v422_v58 = vunpack.c.l.bf16 %v346_v60  ;;  %v426_v12 = vunpack.c.h.bf16 %v348_v21  ;;  %v352_v1 = vld [vmem:[%s2697_s16 + $0xb4] sm:$0xff]  ;;  %v2999_v60 = vld [vmem:[%s2697_s16 + $0xbc] ss:$132 sps:$4 sm:$0xff]  }
  0xcf   : > { %v1091_v16 = vmax.f32 %v899_v44, %v995_v0  ;;  %v1092_v36 = vmax.f32 %v900_v20, %v996_v61  ;;  %1307 = vmatpush1.bf16.msra.mxu0 %v1182_v7  ;;  %v427_v24 = vunpack.c.h.bf16 %v2786_v48  ;;  %v982_v47 = vmul.f32 0.2, %v2899_v4  ;;  %v788_v43 = vpop.permute.xlu1 %787 }
  0xd0   : > { %v2982_v11 = vpack.c.bf16 %v1063_v28, %v1060_v45  ;;  %v2985_v3 = vpack.c.bf16 %v1087_v8, %v1084_v29  ;;  %v985_v18 = vmul.f32 0.2, %v2830_v25  ;;  %v428_v9 = vunpack.c.l.bf16 %v350_v56 }
  0xd1   : > { %v1186_v54 = vpack.c.bf16 %v1092_v36, %v1089_v46  ;;  %v1185_v34 = vpack.c.bf16 %v1091_v16, %v1088_v14  ;;  %v679_v62 = vsub.f32 %v423_v27, %v545_v42  ;;  %v681_v55 = vsub.f32 %v425_v33, %v2947_v2 }
  0xd2   : > { %v429_v26 = vunpack.c.h.bf16 %v350_v56  ;;  %v678_v59 = vsub.f32 %v422_v58, %v545_v42  ;;  %v904_v48 = vmul.f32 %v788_v43, %v680_v5  ;;  %v682_v30 = vsub.f32 %v426_v12, %v2947_v2 }
  0xd3   : > { %1308 = vmatprep.subr.bf16.mxu0 %v1186_v54  ;;  %v683_v31 = vsub.f32 %v427_v24, %v2947_v2  ;;  %v903_v32 = vmul.f32 %v788_v43, %v679_v62  ;;  %v1078_v53 = vmax.f32 %v2899_v4, %v982_v47  ;;  %v1081_v19 = vmax.f32 %v2830_v25, %v985_v18  ;;  %v792_v44 = vpop.permute.xlu1 %791 }
  0xd4   : > { %1309 = vmatpush1.bf16.msra.mxu0 %v1185_v34  ;;  %v902_v57 = vmul.f32 %v788_v43, %v678_v59  ;;  %v994_v20 = vmul.f32 0.2, %v2945_v22  ;;  %v684_v63 = vsub.f32 %v428_v9, %v2962_v6  ;;  %v685_v49 = vsub.f32 %v429_v26, %v2962_v6  ;;  %v354_v59 = vld [vmem:[%s2697_s16 + $0xc0] sm:$0xff] }
  0xd5   : > { %v905_v7 = vmul.f32 %v792_v44, %v681_v55  ;;  %v997_v21 = vmul.f32 0.2, %v2966_v17  ;;  %v999_v0 = vmul.f32 0.2, %v903_v32  ;;  %v906_v61 = vmul.f32 %v792_v44, %v682_v30  ;;  %v356_v30 = vld [vmem:[%s2697_s16 + $0xcc] sm:$0xff] }
  0xd6   : > { %v907_v2 = vmul.f32 %v792_v44, %v683_v31  ;;  %v998_v46 = vmul.f32 0.2, %v902_v57  ;;  %v3001_v14 = vpack.c.bf16 %v1081_v19, %v1078_v53  ;;  %v431_v8 = vunpack.c.l.bf16 %v352_v1  ;;  %v3013_v31 = vld [vmem:[%s2697_s16 + $0xc8] ss:$156 sps:$4 sm:$0xff]  }
  0xd7   : > { %v1001_v4 = vmul.f32 0.2, %v905_v7  ;;  %v1002_v25 = vmul.f32 0.2, %v906_v61  ;;  %v432_v16 = vunpack.c.h.bf16 %v352_v1  ;;  %v908_v36 = vmul.f32 %v2686_v37, %v684_v63 }
  0xd8   : > { %v1003_v28 = vmul.f32 0.2, %v907_v2  ;;  %v909_v6 = vmul.f32 %v2686_v37, %v685_v49  ;;  %v560_v10 = vpop.permute.xlu1 %559  ;;  %v433_v33 = vunpack.c.l.bf16 %v2999_v60  ;;  %v1093_v27 = vmax.f32 %v2966_v17, %v997_v21 }
  0xd9   : > { %v1097_v42 = vmax.f32 %v905_v7, %v1001_v4  ;;  %v1095_v5 = vmax.f32 %v903_v32, %v999_v0  ;;  %v1098_v45 = vmax.f32 %v906_v61, %v1002_v25  ;;  %v1090_v29 = vmax.f32 %v2945_v22, %v994_v20 }
  0xda   : > { %v1000_v56 = vmul.f32 0.2, %v904_v48  ;;  %v1094_v58 = vmax.f32 %v902_v57, %v998_v46  ;;  %v1099_v54 = vmax.f32 %v907_v2, %v1003_v28  ;;  %v687_v12 = vsub.f32 %v431_v8, %v560_v10  ;;  %v570_v8 = vpop.permute.xlu0 %569 }
  0xdb   : > { %v1189_v34 = vpack.c.bf16 %v1098_v45, %v1095_v5  ;;  %v688_v24 = vsub.f32 %v432_v16, %v560_v10  ;;  %v689_v37 = vsub.f32 %v433_v33, %v560_v10  ;;  %v1004_v18 = vmul.f32 0.2, %v908_v36  ;;  %v358_v16 = vld [vmem:[%s2697_s16 + $0xd8] sm:$0xff] }
  0xdc   : > { %v1188_v47 = vpack.c.bf16 %v1097_v42, %v1094_v58  ;;  %v1005_v9 = vmul.f32 0.2, %v909_v6  ;;  %v3008_v17 = vpack.c.bf16 %v1093_v27, %v1090_v29  ;;  %v1096_v43 = vmax.f32 %v904_v48, %v1000_v56  ;;  %v3022_v42 = vld [vmem:[%s2697_s16 + $0xe0] ss:$36 sps:$4 sm:$0xff]   ;;  %v3026_v45 = vld [vmem:[%s2697_s16 + $0x2c] ss:$12 sps:$4 sm:$0xff]  }
  0xdd   : > { %1310 = vmatprep.subr.bf16.mxu0 %v1189_v34  ;;  %v800_v62 = vpop.permute.xlu1 %799  ;;  %v1006_v44 = vmul.f32 0.2, %v2970_v23  ;;  %v434_v20 = vunpack.c.l.bf16 %v354_v59  ;;  %v435_v63 = vunpack.c.h.bf16 %v354_v59  ;;  %v1100_v21 = vmax.f32 %v908_v36, %v1004_v18  ;;  %v360_v18 = vld [vmem:[%s2697_s16 + $0xe4] sm:$0xff] }
  0xde   : > { %v911_v55 = vmul.f32 %v800_v62, %v687_v12  ;;  %v912_v22 = vmul.f32 %v800_v62, %v688_v24  ;;  %v913_v26 = vmul.f32 %v800_v62, %v689_v37  ;;  %1311 = vmatpush1.bf16.msra.mxu0 %v1188_v47  ;;  %v3015_v19 = vpack.c.bf16 %v1099_v54, %v1096_v43 }
  0xdf   : > { %v1101_v1 = vmax.f32 %v909_v6, %v1005_v9  ;;  %v437_v0 = vunpack.c.l.bf16 %v356_v30  ;;  %v436_v61 = vunpack.c.l.bf16 %v3013_v31  ;;  %v438_v2 = vunpack.c.h.bf16 %v356_v30  ;;  %v575_v9 = vpop.permute.xlu0 %574 }
  0xe0   : > { %v1007_v32 = vmul.f32 0.2, %v911_v55  ;;  %v1008_v57 = vmul.f32 0.2, %v912_v22  ;;  %v1009_v53 = vmul.f32 0.2, %v913_v26  ;;  %v439_v28 = vunpack.c.h.bf16 %v2935_v15 }
  0xe1   : > { %v1102_v6 = vmax.f32 %v2970_v23, %v1006_v44  ;;  %v693_v36 = vsub.f32 %v437_v0, %v570_v8  ;;  %v694_v29 = vsub.f32 %v438_v2, %v570_v8  ;;  %v441_v34 = vunpack.c.h.bf16 %v358_v16 }
  0xe2   : > { %v1103_v48 = vmax.f32 %v911_v55, %v1007_v32  ;;  %v1104_v49 = vmax.f32 %v912_v22, %v1008_v57  ;;  %v565_v7 = vpop.permute.xlu1 %564  ;;  %v1105_v46 = vmax.f32 %v913_v26, %v1009_v53  ;;  %v695_v54 = vsub.f32 %v439_v28, %v570_v8  ;;  %v3034_v26 = vld [vmem:[%s2697_s16 + $0xec] ss:$132 sps:$4 sm:$0xff]  }
  0xe3   : > { %v690_v10 = vsub.f32 %v434_v20, %v565_v7  ;;  %v691_v33 = vsub.f32 %v435_v63, %v565_v7  ;;  %v692_v27 = vsub.f32 %v436_v61, %v565_v7  ;;  %v442_v12 = vunpack.c.l.bf16 %v3022_v42 }
  0xe4   : > { %v1192_v4 = vpack.c.bf16 %v1104_v49, %v1101_v1  ;;  %v1191_v25 = vpack.c.bf16 %v1103_v48, %v1100_v21  ;;  %v3028_v58 = vpack.c.bf16 %v1105_v46, %v1102_v6  ;;  %v440_v37 = vunpack.c.l.bf16 %v358_v16 }
  0xe5   : > { %v397_v23 = vunpack.c.l.bf16 %v3026_v45  ;;  %v697_v59 = vsub.f32 %v441_v34, %v575_v9  ;;  %v698_v30 = vsub.f32 %v442_v12, %v575_v9  ;;  %v443_v63 = vunpack.c.l.bf16 %v360_v18 }
  0xe6   : > { %1312 = vmatprep.subr.bf16.mxu0 %v1192_v4  ;;  %v696_v53 = vsub.f32 %v440_v37, %v575_v9  ;;  %v444_v49 = vunpack.c.h.bf16 %v360_v18  ;;  %v445_v7 = vunpack.c.l.bf16 %v3034_v26 }
  0xe7   : > { %v804_v5 = vpop.permute.xlu1 %803  ;;  %1313 = vmatpush1.bf16.msra.mxu0 %v1191_v25  ;;  %v653_v48 = vsub.f32 %v397_v23, %v2677_v35  ;;  %v921_v4 = vmul.f32 %v2692_v39, %v697_v59  ;;  %v922_v25 = vmul.f32 %v2692_v39, %v698_v30  ;;  %v3046_v23 = vld [vmem:[%s2697_s16 + $0xf8] ss:$36 sps:$4 sm:$0xff]  }
  0xe8   : > { %v914_v56 = vmul.f32 %v804_v5, %v690_v10  ;;  %v915_v15 = vmul.f32 %v804_v5, %v691_v33  ;;  %v916_v24 = vmul.f32 %v804_v5, %v692_v27  ;;  %v920_v16 = vmul.f32 %v2692_v39, %v696_v53  ;;  %v364_v53 = vld [vmem:[%s2697_s16 + $0xfc] sm:$0xff] }
  0xe9   : > { %v877_v35 = vmul.f32 %v2689_v38, %v653_v48  ;;  %v362_v38 = vld [vmem:[%s2697_s16 + $0xf0] sm:$0xff]  ;;  %v400_v48 = vunpack.c.h.bf16 %v3026_v45 }
  0xea   : > { %v1010_v62 = vmul.f32 0.2, %v914_v56  ;;  %v1011_v43 = vmul.f32 0.2, %v915_v15  ;;  %v1012_v57 = vmul.f32 0.2, %v916_v24 }
  0xeb   : > { %v808_v47 = vpop.permute.xlu1 %807  ;;  %v1016_v34 = vmul.f32 0.2, %v920_v16  ;;  %v973_v37 = vmul.f32 0.2, %v877_v35  ;;  %v656_v45 = vsub.f32 %v400_v48, %v2699_v40 }
  0xec   : > { %v917_v55 = vmul.f32 %v808_v47, %v693_v36  ;;  %v918_v22 = vmul.f32 %v808_v47, %v694_v29  ;;  %v919_v32 = vmul.f32 %v808_v47, %v695_v54  ;;  %v1106_v21 = vmax.f32 %v914_v56, %v1010_v62 }
  0xed   : > { %v1107_v0 = vmax.f32 %v915_v15, %v1011_v43  ;;  %v1108_v28 = vmax.f32 %v916_v24, %v1012_v57  ;;  %v970_v29 = vmul.f32 0.2, %v2837_v13  ;;  %v1017_v56 = vmul.f32 0.2, %v921_v4 }
  0xee   : > { %v1013_v44 = vmul.f32 0.2, %v917_v55  ;;  %v1014_v20 = vmul.f32 0.2, %v918_v22  ;;  %v1015_v1 = vmul.f32 0.2, %v919_v32  ;;  %v446_v62 = vunpack.c.l.bf16 %v362_v38 }
  0xef   : > { %v1018_v15 = vmul.f32 0.2, %v922_v25  ;;  %v1113_v43 = vmax.f32 %v921_v4, %v1017_v56  ;;  %v450_v4 = vunpack.c.h.bf16 %v364_v53 }
  0xf0   : > { %v1109_v61 = vmax.f32 %v917_v55, %v1013_v44  ;;  %v1110_v2 = vmax.f32 %v918_v22, %v1014_v20  ;;  %v580_v46 = vpop.permute.xlu1 %579  ;;  %v1111_v8 = vmax.f32 %v919_v32, %v1015_v1  ;;  %v1066_v22 = vmax.f32 %v2837_v13, %v970_v29 }
  0xf1   : > { %v699_v36 = vsub.f32 %v443_v63, %v580_v46  ;;  %v700_v27 = vsub.f32 %v444_v49, %v580_v46  ;;  %v701_v5 = vsub.f32 %v445_v7, %v580_v46  ;;  %v1114_v55 = vmax.f32 %v922_v25, %v1018_v15 }
  0xf2   : > { %v1195_v10 = vpack.c.bf16 %v1110_v2, %v1107_v0  ;;  %v1194_v33 = vpack.c.bf16 %v1109_v61, %v1106_v21  ;;  %v1196_v6 = vpack.c.bf16 %v1111_v8, %v1108_v28  ;;  %v447_v44 = vunpack.c.h.bf16 %v362_v38  ;;  %v590_v21 = vpop.permute.xlu0 %589  ;;  %v366_v0 = vld [vmem:[%s2697_s16 + $0x108] sm:$0xff]  ;;  %v3054_v61 = vld [vmem:[%s2697_s16 + $0x110] ss:$36 sps:$4 sm:$0xff]  }
  0xf3   : > { %v448_v20 = vunpack.c.l.bf16 %v3046_v23  ;;  %v1069_v63 = vmax.f32 %v877_v35, %v973_v37  ;;  %v449_v2 = vunpack.c.l.bf16 %v364_v53  ;;  %v451_v25 = vunpack.c.h.bf16 %v3022_v42 }
  0xf4   : > { %1314 = vmatprep.subr.bf16.mxu0 %v1195_v10  ;;  %2325 = vmatprep.subr.bf16.mxu1 %v1196_v6  ;;  %v453_v10 = vunpack.c.h.bf16 %v366_v0  ;;  %v452_v29 = vunpack.c.l.bf16 %v366_v0  ;;  %v979_v42 = vmul.f32 0.2, %v2874_v52  ;;  %v706_v56 = vsub.f32 %v450_v4, %v590_v21 }
  0xf5   : > { %v816_v54 = vpop.permute.xlu1 %815  ;;  %1315 = vmatpush1.bf16.msra.mxu0 %v1194_v33  ;;  %2326 = vmatpush3.bf16.msra.mxu1 %v2982_v11  ;;  %v1112_v11 = vmax.f32 %v920_v16, %v1016_v34  ;;  %v1175_v13 = vpack.c.bf16 %v1069_v63, %v1066_v22  ;;  %v454_v33 = vunpack.c.l.bf16 %v3054_v61  ;;  %v707_v15 = vsub.f32 %v451_v25, %v590_v21 }
  0xf6   : > { %v923_v39 = vmul.f32 %v816_v54, %v699_v36  ;;  %v924_v12 = vmul.f32 %v816_v54, %v700_v27  ;;  %v925_v24 = vmul.f32 %v816_v54, %v701_v5  ;;  %v880_v27 = vmul.f32 %v2715_v50, %v656_v45  ;;  %v595_v54 = vpop.permute.xlu0 %594 }
  0xf7   : > { %v705_v5 = vsub.f32 %v449_v2, %v590_v21  ;;  %v709_v40 = vsub.f32 %v453_v10, %v595_v54 }
  0xf8   : > { %v1019_v47 = vmul.f32 0.2, %v923_v39  ;;  %v1020_v18 = vmul.f32 0.2, %v924_v12  ;;  %v1021_v9 = vmul.f32 0.2, %v925_v24 }
  0xf9   : > { %v976_v50 = vmul.f32 0.2, %v880_v27 }
  0xfa   : > { %v1115_v59 = vmax.f32 %v923_v39, %v1019_v47  ;;  %v1116_v30 = vmax.f32 %v924_v12, %v1020_v18  ;;  %v1117_v32 = vmax.f32 %v925_v24, %v1021_v9  ;;  %v585_v57 = vpop.permute.xlu1 %584  ;;  %v368_v39 = vld [vmem:[%s2697_s16 + $0x114] sm:$0xff]  ;;  %v457_v12 = vunpack.c.h.bf16 %v3046_v23 }
  0xfb   : > { %v702_v46 = vsub.f32 %v446_v62, %v585_v57  ;;  %v703_v28 = vsub.f32 %v447_v44, %v585_v57  ;;  %v704_v8 = vsub.f32 %v448_v20, %v585_v57  ;;  %v710_v24 = vsub.f32 %v454_v33, %v595_v54 }
  0xfc   : > { %v1198_v49 = vpack.c.bf16 %v1116_v30, %v1113_v43  ;;  %v1199_v7 = vpack.c.bf16 %v1117_v32, %v1114_v55  ;;  %v1197_v1 = vpack.c.bf16 %v1115_v59, %v1112_v11  ;;  %v708_v43 = vsub.f32 %v452_v29, %v595_v54 }
  0xfd   : > { %v455_v22 = vunpack.c.l.bf16 %v368_v39  ;;  %v456_v32 = vunpack.c.h.bf16 %v368_v39  ;;  %v1075_v57 = vmax.f32 %v2874_v52, %v979_v42  ;;  %v933_v11 = vmul.f32 %v2701_v41, %v709_v40  ;;  %v610_v40 = vpop.permute.xlu0 %609 }
  0xfe   : > { %1316 = vmatprep.subr.bf16.mxu0 %v1198_v49  ;;  %2327 = vmatprep.subr.bf16.mxu1 %v1199_v7  ;;  %v934_v23 = vmul.f32 %v2701_v41, %v710_v24  ;;  %v1072_v0 = vmax.f32 %v880_v27, %v976_v50  ;;  %v372_v24 = vld [vmem:[%s2697_s16 + $0x12c] sm:$0xff] }
  0xff   : > { %v820_v16 = vpop.permute.xlu1 %819  ;;  %1317 = vmatpush1.bf16.msra.mxu0 %v1197_v1  ;;  %2328 = vmatpush3.bf16.msra.mxu1 %v1175_v13  ;;  %v932_v1 = vmul.f32 %v2701_v41, %v708_v43  ;;  %v370_v41 = vld [vmem:[%s2697_s16 + $0x120] sm:$0xff]  ;;  %v461_v50 = vunpack.c.l.bf16 %v372_v24 }
 0x100   : > { %v926_v35 = vmul.f32 %v820_v16, %v702_v46  ;;  %v927_v6 = vmul.f32 %v820_v16, %v703_v28  ;;  %v928_v36 = vmul.f32 %v820_v16, %v704_v8  ;;  %v1178_v25 = vpack.c.bf16 %v1075_v57, %v1072_v0 }
 0x101   : > { %v1029_v28 = vmul.f32 0.2, %v933_v11  ;;  %v1030_v8 = vmul.f32 0.2, %v934_v23  ;;  %v1028_v45 = vmul.f32 0.2, %v932_v1  ;;  %v458_v29 = vunpack.c.l.bf16 %v370_v41 }
 0x102   : > { %v1022_v38 = vmul.f32 0.2, %v926_v35  ;;  %v1023_v47 = vmul.f32 0.2, %v927_v6  ;;  %v1024_v18 = vmul.f32 0.2, %v928_v36 }
 0x103   : > { %v824_v34 = vpop.permute.xlu1 %823  ;;  %v1125_v42 = vmax.f32 %v933_v11, %v1029_v28  ;;  %v466_v11 = vunpack.c.h.bf16 %v2999_v60 }
 0x104   : > { %v929_v37 = vmul.f32 %v824_v34, %v705_v5  ;;  %v930_v9 = vmul.f32 %v824_v34, %v706_v56  ;;  %v931_v62 = vmul.f32 %v824_v34, %v707_v15  ;;  %v1118_v53 = vmax.f32 %v926_v35, %v1022_v38 }
 0x105   : > { %v1119_v63 = vmax.f32 %v927_v6, %v1023_v47  ;;  %v1120_v48 = vmax.f32 %v928_v36, %v1024_v18  ;;  %v3069_v6 = vld [vmem:[%s2697_s16 + $0x128] ss:$36 sps:$4 sm:$0xff]   ;;  %v1126_v56 = vmax.f32 %v934_v23, %v1030_v8  ;;  %v459_v38 = vunpack.c.h.bf16 %v370_v41 }
 0x106   : > { %v1025_v55 = vmul.f32 0.2, %v929_v37  ;;  %v1026_v59 = vmul.f32 0.2, %v930_v9  ;;  %v1027_v30 = vmul.f32 0.2, %v931_v62  ;;  %v469_v28 = vunpack.c.h.bf16 %v3069_v6 }
 0x108   : > { %v1121_v44 = vmax.f32 %v929_v37, %v1025_v55  ;;  %v600_v20 = vpop.permute.xlu1 %599  ;;  %v1122_v49 = vmax.f32 %v930_v9, %v1026_v59  ;;  %v1123_v7 = vmax.f32 %v931_v62, %v1027_v30  ;;  %v460_v37 = vunpack.c.l.bf16 %v3069_v6  ;;  %v374_v62 = vld [vmem:[%s2697_s16 + $0x138] sm:$0xff] }
 0x109   : > { %v711_v46 = vsub.f32 %v455_v22, %v600_v20  ;;  %v712_v52 = vsub.f32 %v456_v32, %v600_v20  ;;  %v713_v4 = vsub.f32 %v457_v12, %v600_v20  ;;  %v1124_v12 = vmax.f32 %v932_v1, %v1028_v45 }
 0x10a   : > { %v1200_v21 = vpack.c.bf16 %v1121_v44, %v1118_v53  ;;  %v1201_v13 = vpack.c.bf16 %v1122_v49, %v1119_v63  ;;  %v1202_v2 = vpack.c.bf16 %v1123_v7, %v1120_v48  ;;  %v462_v55 = vunpack.c.h.bf16 %v372_v24  ;;  %v615_v53 = vpop.permute.xlu0 %614 }
 0x10b   : > { %v463_v22 = vunpack.c.h.bf16 %v3054_v61  ;;  %v465_v57 = vunpack.c.h.bf16 %v374_v62  ;;  %v717_v63 = vsub.f32 %v461_v50, %v610_v40  ;;  %v464_v48 = vunpack.c.l.bf16 %v374_v62  ;;  %v3085_v50 = vld [vmem:[%s2697_s16 + $0x158] ss:$36 sps:$4 sm:$0xff]  }
 0x10c   : > { %1318 = vmatprep.subr.bf16.mxu0 %v1201_v13  ;;  %2329 = vmatprep.subr.bf16.mxu1 %v1202_v2  ;;  %v718_v49 = vsub.f32 %v462_v55, %v610_v40  ;;  %v376_v2 = vld [vmem:[%s2697_s16 + $0x144] sm:$0xff] }
 0x10d   : > { %v832_v16 = vpop.permute.xlu1 %831  ;;  %1319 = vmatpush1.bf16.msra.mxu0 %v1200_v21  ;;  %2330 = vmatpush3.bf16.msra.mxu1 %v1178_v25  ;;  %v719_v7 = vsub.f32 %v463_v22, %v610_v40  ;;  %v721_v61 = vsub.f32 %v465_v57, %v615_v53  ;;  %v722_v21 = vsub.f32 %v466_v11, %v615_v53  ;;  %v467_v45 = vunpack.c.l.bf16 %v376_v2 }
 0x10e   : > { %v935_v10 = vmul.f32 %v832_v16, %v711_v46  ;;  %v936_v33 = vmul.f32 %v832_v16, %v712_v52  ;;  %v937_v35 = vmul.f32 %v832_v16, %v713_v4  ;;  %v720_v25 = vsub.f32 %v464_v48, %v615_v53 }
 0x110   : > { %v1031_v36 = vmul.f32 0.2, %v935_v10  ;;  %v1032_v27 = vmul.f32 0.2, %v936_v33  ;;  %v1033_v5 = vmul.f32 0.2, %v937_v35 }
 0x112   : > { %v1127_v15 = vmax.f32 %v935_v10, %v1031_v36  ;;  %v1128_v54 = vmax.f32 %v936_v33, %v1032_v27  ;;  %v1129_v34 = vmax.f32 %v937_v35, %v1033_v5  ;;  %v605_v39 = vpop.permute.xlu1 %604  ;;  %v468_v10 = vunpack.c.h.bf16 %v376_v2  ;;  %v382_v2 = vld [vmem:[%s2697_s16 + $0x168] sm:$0xff] }
 0x113   : > { %v714_v43 = vsub.f32 %v458_v29, %v605_v39  ;;  %v715_v59 = vsub.f32 %v459_v38, %v605_v39  ;;  %v716_v30 = vsub.f32 %v460_v37, %v605_v39  ;;  %v945_v33 = vmul.f32 %v2717_v51, %v721_v61 }
 0x114   : > { %v1204_v47 = vpack.c.bf16 %v1128_v54, %v1125_v42  ;;  %v1205_v18 = vpack.c.bf16 %v1129_v34, %v1126_v56  ;;  %v1203_v9 = vpack.c.bf16 %v1127_v15, %v1124_v12  ;;  %v946_v35 = vmul.f32 %v2717_v51, %v722_v21 }
 0x115   : > { %v944_v15 = vmul.f32 %v2717_v51, %v720_v25  ;;  %v1041_v24 = vmul.f32 0.2, %v945_v33  ;;  %v378_v51 = vld [vmem:[%s2697_s16 + $0x150] sm:$0xff] }
 0x116   : > { %1320 = vmatprep.subr.bf16.mxu0 %v1204_v47  ;;  %2331 = vmatprep.subr.bf16.mxu1 %v1205_v18  ;;  %v1042_v38 = vmul.f32 0.2, %v946_v35  ;;  %v471_v48 = vunpack.c.h.bf16 %v378_v51 }
 0x117   : > { %v836_v32 = vpop.permute.xlu1 %835  ;;  %1321 = vmatpush1.bf16.msra.mxu0 %v1203_v9  ;;  %2332 = vmatpush3.bf16.msra.mxu1 %v3001_v14  ;;  %v1040_v47 = vmul.f32 0.2, %v944_v15 }
 0x118   : > { %v938_v23 = vmul.f32 %v836_v32, %v714_v43  ;;  %v939_v44 = vmul.f32 %v836_v32, %v715_v59  ;;  %v940_v20 = vmul.f32 %v836_v32, %v716_v30  ;;  %v470_v59 = vunpack.c.l.bf16 %v378_v51 }
 0x119   : > { %v1137_v30 = vmax.f32 %v945_v33, %v1041_v24  ;;  %v1138_v32 = vmax.f32 %v946_v35, %v1042_v38  ;;  %v478_v35 = vunpack.c.h.bf16 %v3034_v26 }
 0x11a   : > { %v1034_v0 = vmul.f32 0.2, %v938_v23  ;;  %v1035_v46 = vmul.f32 0.2, %v939_v44  ;;  %v1036_v14 = vmul.f32 0.2, %v940_v20 }
 0x11b   : > { %v840_v1 = vpop.permute.xlu1 %839 }
 0x11c   : > { %v941_v13 = vmul.f32 %v840_v1, %v717_v63  ;;  %v942_v52 = vmul.f32 %v840_v1, %v718_v49  ;;  %v943_v4 = vmul.f32 %v840_v1, %v719_v7  ;;  %v1130_v41 = vmax.f32 %v938_v23, %v1034_v0  ;;  %v380_v63 = vld [vmem:[%s2697_s16 + $0x15c] sm:$0xff] }
 0x11d   : > { %v1131_v5 = vmax.f32 %v939_v44, %v1035_v46  ;;  %v1132_v29 = vmax.f32 %v940_v20, %v1036_v14  ;;  %v1136_v44 = vmax.f32 %v944_v15, %v1040_v47  ;;  %v630_v20 = vpop.permute.xlu0 %629  ;;  %v473_v61 = vunpack.c.l.bf16 %v380_v63 }
 0x11e   : > { %v1037_v60 = vmul.f32 0.2, %v941_v13  ;;  %v1038_v8 = vmul.f32 0.2, %v942_v52  ;;  %v1039_v16 = vmul.f32 0.2, %v943_v4  ;;  %v474_v0 = vunpack.c.h.bf16 %v380_v63 }
 0x11f   : > { %v481_v47 = vunpack.c.h.bf16 %v3085_v50 }
 0x120   : > { %v1133_v36 = vmax.f32 %v941_v13, %v1037_v60  ;;  %v620_v27 = vpop.permute.xlu1 %619  ;;  %v1134_v42 = vmax.f32 %v942_v52, %v1038_v8  ;;  %v1135_v56 = vmax.f32 %v943_v4, %v1039_v16  ;;  %v475_v13 = vunpack.c.h.bf16 %v3013_v31 }
 0x121   : > { %v723_v39 = vsub.f32 %v467_v45, %v620_v27  ;;  %v724_v12 = vsub.f32 %v468_v10, %v620_v27  ;;  %v725_v40 = vsub.f32 %v469_v28, %v620_v27  ;;  %v635_v25 = vpop.permute.xlu0 %634  ;;  %v729_v8 = vsub.f32 %v473_v61, %v630_v20  ;;  %v384_v27 = vld [vmem:[%s2697_s16 + $0x174] sm:$0xff]  ;;  %s3178_s16 = scalar_lea.vmem %s3331_s3, %s2390_s13 }
 0x122   : > { %v1206_v54 = vpack.c.bf16 %v1133_v36, %v1130_v41  ;;  %v1207_v34 = vpack.c.bf16 %v1134_v42, %v1131_v5  ;;  %v1208_v6 = vpack.c.bf16 %v1135_v56, %v1132_v29  ;;  %v476_v16 = vunpack.c.l.bf16 %v382_v2 }
 0x123   : > { %v477_v45 = vunpack.c.h.bf16 %v382_v2  ;;  %v730_v10 = vsub.f32 %v474_v0, %v630_v20  ;;  %v731_v33 = vsub.f32 %v475_v13, %v630_v20  ;;  %v480_v26 = vunpack.c.h.bf16 %v384_v27 }
 0x124   : > { %1322 = vmatprep.subr.bf16.mxu0 %v1207_v34  ;;  %2333 = vmatprep.subr.bf16.mxu1 %v1208_v6  ;;  %v734_v34 = vsub.f32 %v478_v35, %v635_v25  ;;  %v2469_v35 = vld [vmem:[%s3330_s2 + $0x50] ss:$8 sps:$4 sm:$0xff]  }
 0x125   : > { %v848_v37 = vpop.permute.xlu1 %847  ;;  %1323 = vmatpush1.bf16.msra.mxu0 %v1206_v54  ;;  %2334 = vmatpush3.bf16.msra.mxu1 %v2985_v3  ;;  %v472_v3 = vunpack.c.l.bf16 %v3085_v50  ;;  %v733_v15 = vsub.f32 %v477_v45, %v635_v25  ;;  %v860_v6 = vpop.permute.xlu0 %859  ;;  %v2464_v45 = vld [vmem:[%s3330_s2 + $0x44] ss:$8 sps:$4 sm:$0xff]  }
 0x126   : > { %v947_v18 = vmul.f32 %v848_v37, %v723_v39  ;;  %v948_v9 = vmul.f32 %v848_v37, %v724_v12  ;;  %v949_v62 = vmul.f32 %v848_v37, %v725_v40  ;;  %v479_v40 = vunpack.c.l.bf16 %v384_v27  ;;  %v2475_v27 = vld [vmem:[%s3330_s2 + $0x70] ss:$8 sps:$4 sm:$0xff]  }
 0x128   : > { %v1043_v43 = vmul.f32 0.2, %v947_v18  ;;  %v1044_v55 = vmul.f32 0.2, %v948_v9  ;;  %v1045_v22 = vmul.f32 0.2, %v949_v62 }
 0x12a   : > { %v1139_v57 = vmax.f32 %v947_v18, %v1043_v43  ;;  %v1140_v11 = vmax.f32 %v948_v9, %v1044_v55  ;;  %v1141_v23 = vmax.f32 %v949_v62, %v1045_v22  ;;  %v625_v53 = vpop.permute.xlu1 %624  ;;  %v957_v55 = vmul.f32 %v860_v6, %v733_v15 }
 0x12b   : > { %v726_v21 = vsub.f32 %v470_v59, %v625_v53  ;;  %v727_v46 = vsub.f32 %v471_v48, %v625_v53  ;;  %v728_v14 = vsub.f32 %v472_v3, %v625_v53  ;;  %v958_v59 = vmul.f32 %v860_v6, %v734_v34 }
 0x12c   : > { %v1210_v49 = vpack.c.bf16 %v1140_v11, %v1137_v30  ;;  %v1211_v7 = vpack.c.bf16 %v1141_v23, %v1138_v32  ;;  %v1209_v1 = vpack.c.bf16 %v1139_v57, %v1136_v44  ;;  %v1053_v44 = vmul.f32 0.2, %v957_v55 }
 0x12d   : > { %v1054_v50 = vmul.f32 0.2, %v958_v59 }
 0x12e   : > { %1324 = vmatprep.subr.bf16.mxu0 %v1210_v49  ;;  %2335 = vmatprep.subr.bf16.mxu1 %v1211_v7 }
 0x12f   : > { %v852_v52 = vpop.permute.xlu1 %851  ;;  %1325 = vmatpush1.bf16.msra.mxu0 %v1209_v1  ;;  %2336 = vmatpush3.bf16.msra.mxu1 %v3008_v17  ;;  %v732_v17 = vsub.f32 %v476_v16, %v635_v25  ;;  %v1150_v0 = vmax.f32 %v958_v59, %v1054_v50  ;;  %v2455_v25 = vld [vmem:[%s3330_s2 + $0x14] ss:$8 sps:$4 sm:$0xff]   ;;  %v2463_v16 = vld [vmem:[%s3330_s2 + $0x30] ss:$8 sps:$4 sm:$0xff]  }
 0x130   : > { %v950_v4 = vmul.f32 %v852_v52, %v726_v21  ;;  %v951_v60 = vmul.f32 %v852_v52, %v727_v46  ;;  %v952_v28 = vmul.f32 %v852_v52, %v728_v14  ;;  %v1149_v21 = vmax.f32 %v957_v55, %v1053_v44 }
 0x131   : > { %v956_v43 = vmul.f32 %v860_v6, %v732_v17 }
 0x132   : > { %v1046_v41 = vmul.f32 0.2, %v950_v4  ;;  %v1047_v5 = vmul.f32 0.2, %v951_v60  ;;  %v1048_v29 = vmul.f32 0.2, %v952_v28 }
 0x133   : > { %v856_v31 = vpop.permute.xlu1 %855  ;;  %v1052_v53 = vmul.f32 0.2, %v956_v43 }
 0x134   : > { %v953_v36 = vmul.f32 %v856_v31, %v729_v8  ;;  %v954_v42 = vmul.f32 %v856_v31, %v730_v10  ;;  %v955_v56 = vmul.f32 %v856_v31, %v731_v33  ;;  %v1142_v24 = vmax.f32 %v950_v4, %v1046_v41  ;;  %v2461_v8 = vld [vmem:[%s3330_s2 + $0x34] ss:$8 sps:$4 sm:$0xff]   ;;  %v2466_v10 = vld [vmem:[%s3330_s2 + $0x40] ss:$8 sps:$4 sm:$0xff]   ;;  %v2470_v31 = vld [vmem:[%s3330_s2 + $0x64] ss:$8 sps:$4 sm:$0xff]  }
 0x135   : > { %v1143_v18 = vmax.f32 %v951_v60, %v1047_v5  ;;  %v1144_v9 = vmax.f32 %v952_v28, %v1048_v29  ;;  %v1148_v61 = vmax.f32 %v956_v43, %v1052_v53  ;;  %v2457_v60 = vld [vmem:[%s3330_s2 + $0x10] ss:$8 sps:$4 sm:$0xff]   ;;  %v2458_v28 = vld [vmem:[%s3330_s2 + $0x24] ss:$8 sps:$4 sm:$0xff]   ;;  %v2467_v33 = vld [vmem:[%s3330_s2 + $0x54] ss:$8 sps:$4 sm:$0xff]  }
 0x136   : > { %v1049_v54 = vmul.f32 0.2, %v953_v36  ;;  %v1050_v39 = vmul.f32 0.2, %v954_v42  ;;  %v1051_v12 = vmul.f32 0.2, %v955_v56 }
 0x137   : > { %v2472_v41 = vld [vmem:[%s3330_s2 + $0x60] ss:$8 sps:$4 sm:$0xff]   ;;  %v2502_v5 = vmov 0.0  }
 0x138   : > { %v1145_v38 = vmax.f32 %v953_v36, %v1049_v54  ;;  %v1146_v62 = vmax.f32 %v954_v42, %v1050_v39  ;;  %v1147_v51 = vmax.f32 %v955_v56, %v1051_v12  ;;  %v2473_v36 = vld [vmem:[%s3330_s2 + $0x74] ss:$8 sps:$4 sm:$0xff]   ;;  %1705 = vst.msk [vmem:[#allocation2] sm:$0xff] %vm1704_vm0, %v2502_v5  ;;  %1706 = vst.msk [vmem:[#allocation2 + $0x8] sm:$0xff] %vm1704_vm0, %v2502_v5 }
 0x139   : > { %1707 = vst.msk [vmem:[#allocation2 + $0x10] sm:$0xff] %vm1704_vm0, %v2502_v5  ;;  %1708 = vst.msk [vmem:[#allocation2 + $0x18] sm:$0xff] %vm1704_vm0, %v2502_v5 }
 0x13a   : > { %v640_v37 = vpop.permute.xlu1 %639  ;;  %v1212_v22 = vpack.c.bf16 %v1145_v38, %v1142_v24  ;;  %v1213_v30 = vpack.c.bf16 %v1146_v62, %v1143_v18  ;;  %v1214_v32 = vpack.c.bf16 %v1147_v51, %v1144_v9  ;;  %1709 = vst.msk [vmem:[#allocation2 + $0x20] sm:$0xff] %vm1704_vm0, %v2502_v5  ;;  %1710 = vst.msk [vmem:[#allocation2 + $0x28] sm:$0xff] %vm1704_vm0, %v2502_v5 }
 0x13b   : > { %v735_v57 = vsub.f32 %v479_v40, %v640_v37  ;;  %v736_v11 = vsub.f32 %v480_v26, %v640_v37  ;;  %v737_v23 = vsub.f32 %v481_v47, %v640_v37  ;;  %1711 = vst.msk [vmem:[#allocation2 + $0x30] sm:$0xff] %vm1704_vm0, %v2502_v5  ;;  %1712 = vst.msk [vmem:[#allocation2 + $0x38] sm:$0xff] %vm1704_vm0, %v2502_v5 }
 0x13c   : > { %1326 = vmatprep.subr.bf16.mxu0 %v1213_v30  ;;  %2337 = vmatprep.subr.bf16.mxu1 %v1214_v32  ;;  %1713 = vst.msk [vmem:[#allocation2 + $0x40] sm:$0xff] %vm1704_vm0, %v2502_v5  ;;  %1714 = vst.msk [vmem:[#allocation2 + $0x48] sm:$0xff] %vm1704_vm0, %v2502_v5 }
 0x13d   : > { %1327 = vmatpush1.bf16.msra.mxu0 %v1212_v22  ;;  %2338 = vmatpush3.bf16.msra.mxu1 %v3015_v19  ;;  %v2452_v19 = vld [vmem:[%s3330_s2] ss:$8 sps:$4 sm:$0xff]   ;;  %1715 = vst.msk [vmem:[#allocation2 + $0x50] sm:$0xff] %vm1704_vm0, %v2502_v5  ;;  %1716 = vst.msk [vmem:[#allocation2 + $0x58] sm:$0xff] %vm1704_vm0, %v2502_v5 }
 0x13e   : > { %1717 = vst.msk [vmem:[#allocation2 + $0x60] sm:$0xff] %vm1704_vm0, %v2502_v5  ;;  %1718 = vst.msk [vmem:[#allocation2 + $0x68] sm:$0xff] %vm1704_vm0, %v2502_v5 }
 0x13f   : > { %v864_v20 = vpop.permute.xlu1 %863  ;;  %1719 = vst.msk [vmem:[#allocation2 + $0x70] sm:$0xff] %vm1704_vm0, %v2502_v5  ;;  %1720 = vst.msk [vmem:[#allocation2 + $0x78] sm:$0xff] %vm1704_vm0, %v2502_v5 }
 0x140   : > { %v959_v63 = vmul.f32 %v864_v20, %v735_v57  ;;  %v960_v48 = vmul.f32 %v864_v20, %v736_v11  ;;  %v961_v3 = vmul.f32 %v864_v20, %v737_v23  ;;  %1721 = vst.msk [vmem:[#allocation3] sm:$0xff] %vm1704_vm0, %v2502_v5  ;;  %1722 = vst.msk [vmem:[#allocation3 + $0x8] sm:$0xff] %vm1704_vm0, %v2502_v5 }
 0x141   : > { %1723 = vst.msk [vmem:[#allocation3 + $0x10] sm:$0xff] %vm1704_vm0, %v2502_v5  ;;  %1724 = vst.msk [vmem:[#allocation3 + $0x18] sm:$0xff] %vm1704_vm0, %v2502_v5 }
 0x142   : > { %v1055_v49 = vmul.f32 0.2, %v959_v63  ;;  %v1056_v7 = vmul.f32 0.2, %v960_v48  ;;  %v1057_v1 = vmul.f32 0.2, %v961_v3 }
 0x143   : > { %1725 = vst.msk [vmem:[#allocation3 + $0x20] sm:$0xff] %vm1704_vm0, %v2502_v5  ;;  %1726 = vst.msk [vmem:[#allocation3 + $0x28] sm:$0xff] %vm1704_vm0, %v2502_v5 }
 0x144   : > { %v1151_v13 = vmax.f32 %v959_v63, %v1055_v49  ;;  %v1152_v2 = vmax.f32 %v960_v48, %v1056_v7  ;;  %v1153_v46 = vmax.f32 %v961_v3, %v1057_v1  ;;  %1727 = vst.msk [vmem:[#allocation3 + $0x30] sm:$0xff] %vm1704_vm0, %v2502_v5  ;;  %1728 = vst.msk [vmem:[#allocation3 + $0x38] sm:$0xff] %vm1704_vm0, %v2502_v5 }
 0x145   : > { %1729 = vst.msk [vmem:[#allocation3 + $0x40] sm:$0xff] %vm1704_vm0, %v2502_v5  ;;  %1730 = vst.msk [vmem:[#allocation3 + $0x48] sm:$0xff] %vm1704_vm0, %v2502_v5 }
 0x146   : > { %v1216_v14 = vpack.c.bf16 %v1152_v2, %v1149_v21  ;;  %v1217_v52 = vpack.c.bf16 %v1153_v46, %v1150_v0  ;;  %v1215_v4 = vpack.c.bf16 %v1151_v13, %v1148_v61  ;;  %1731 = vst.msk [vmem:[#allocation3 + $0x50] sm:$0xff] %vm1704_vm0, %v2502_v5  ;;  %1732 = vst.msk [vmem:[#allocation3 + $0x58] sm:$0xff] %vm1704_vm0, %v2502_v5 }
 0x147   : > { %1733 = vst.msk [vmem:[#allocation3 + $0x60] sm:$0xff] %vm1704_vm0, %v2502_v5  ;;  %1734 = vst.msk [vmem:[#allocation3 + $0x68] sm:$0xff] %vm1704_vm0, %v2502_v5 }
 0x148   : > { %1328 = vmatprep.subr.bf16.mxu0 %v1216_v14  ;;  %2339 = vmatprep.subr.bf16.mxu1 %v1217_v52  ;;  %1735 = vst.msk [vmem:[#allocation3 + $0x70] sm:$0xff] %vm1704_vm0, %v2502_v5  ;;  %1736 = vst.msk [vmem:[#allocation3 + $0x78] sm:$0xff] %vm1704_vm0, %v2502_v5 }
 0x149   : > { %1329 = vmatpush1.bf16.msra.mxu0 %v1215_v4  ;;  %2340 = vmatpush3.bf16.msra.mxu1 %v3028_v58  ;;  %v2460_v58 = vld [vmem:[%s3330_s2 + $0x20] ss:$8 sps:$4 sm:$0xff]  }
 0x14c   : > { %1331 = vmatmul.mubr.bf16.vlgmr.msra.gmra.mrb[0].mxu0 %v2452_v19  ;;  %1444 = vmatmul.mubr.bf16.vlgmr.msra.gmra.mrb[0].mxu1 %v2452_v19 }
 0x14d   : > { %1340 = vmatprep.mubr.bf16.mxu0 %v2455_v25  ;;  %1451 = vmatprep.mubr.bf16.mxu1 %v2455_v25 }
 0x154   : > { %1341 = vmatmul.mubr.bf16.gmra.mrb[4].mxu0 %v2457_v60  ;;  %1452 = vmatmul.mubr.bf16.gmra.mrb[4].mxu1 %v2457_v60 }
 0x155   : > { %1350 = vmatprep.mubr.bf16.mxu0 %v2458_v28  ;;  %1459 = vmatprep.mubr.bf16.mxu1 %v2458_v28 }
 0x15c   : > { %1351 = vmatmul.mubr.bf16.gmra.mrb[8].mxu0 %v2460_v58  ;;  %1460 = vmatmul.mubr.bf16.gmra.mrb[8].mxu1 %v2460_v58 }
 0x15d   : > { %1360 = vmatprep.mubr.bf16.mxu0 %v2461_v8  ;;  %1467 = vmatprep.mubr.bf16.mxu1 %v2461_v8 }
 0x164   : > { %1361 = vmatmul.mubr.bf16.gmra.mrb[12].mxu0 %v2463_v16  ;;  %1468 = vmatmul.mubr.bf16.gmra.mrb[12].mxu1 %v2463_v16 }
 0x165   : > { %1370 = vmatprep.mubr.bf16.mxu0 %v2464_v45  ;;  %1475 = vmatprep.mubr.bf16.mxu1 %v2464_v45 }
 0x16c   : > { %1371 = vmatmul.mubr.bf16.gmra.mrb[16].mxu0 %v2466_v10  ;;  %1476 = vmatmul.mubr.bf16.gmra.mrb[16].mxu1 %v2466_v10 }
 0x16d   : > { %1380 = vmatprep.mubr.bf16.mxu0 %v2467_v33  ;;  %1483 = vmatprep.mubr.bf16.mxu1 %v2467_v33 }
 0x174   : > { %1381 = vmatmul.mubr.bf16.gmra.mrb[20].mxu0 %v2469_v35  ;;  %1484 = vmatmul.mubr.bf16.gmra.mrb[20].mxu1 %v2469_v35 }
 0x175   : > { %1390 = vmatprep.mubr.bf16.mxu0 %v2470_v31  ;;  %1491 = vmatprep.mubr.bf16.mxu1 %v2470_v31 }
 0x17c   : > { %1391 = vmatmul.mubr.bf16.gmra.mrb[24].mxu0 %v2472_v41  ;;  %1492 = vmatmul.mubr.bf16.gmra.mrb[24].mxu1 %v2472_v41 }
 0x17d   : > { %1400 = vmatprep.mubr.bf16.mxu0 %v2473_v36  ;;  %1499 = vmatprep.mubr.bf16.mxu1 %v2473_v36 }
 0x184   : > { %1401 = vmatmul.mubr.bf16.gmra.mrb[28].mxu0 %v2475_v27  ;;  %1500 = vmatmul.mubr.bf16.gmra.mrb[28].mxu1 %v2475_v27 }
 0x21f   : > { %v1332_v29 = vpop.f32.mrb[0].mxu0  ;;  %v2341_v42 = vpop.f32.mrb[0].mxu1 }
 0x220   : > { %v1866_v56 = vmul.f32 %v1332_v29, %v1332_v29  ;;  %v1334_v17 = vpop.f32.mrb[1].mxu0  ;;  %v2342_v15 = vpop.f32.mrb[1].mxu1 }
 0x221   : > { %v2293_v54 = vpack.c.bf16 %v1334_v17, %v1332_v29  ;;  %v1867_v34 = vmul.f32 %v1334_v17, %v1334_v17  ;;  %v2343_v6 = vadd.f32 %v2342_v15, %v2341_v42  ;;  %v1336_v39 = vpop.f32.mrb[2].mxu0  ;;  %v2344_v12 = vpop.f32.mrb[2].mxu1  ;;  %v1753_v40 = vadd.f32 %v1334_v17, %v1332_v29 }
 0x222   : > { %v1869_v24 = vmul.f32 %v1336_v39, %v1336_v39  ;;  %v1338_v38 = vpop.f32.mrb[3].mxu0  ;;  %v2345_v37 = vpop.f32.mrb[3].mxu1 }
 0x223   : > { %1668 = vst [vmem:[%s3178_s16] sm:$0xff] %v2293_v54  ;;  %v2294_v26 = vpack.c.bf16 %v2343_v6, %v2343_v6  ;;  %v2295_v47 = vpack.c.bf16 %v1338_v38, %v1336_v39  ;;  %v1870_v18 = vmul.f32 %v1338_v38, %v1338_v38  ;;  %v2346_v9 = vadd.f32 %v2345_v37, %v2344_v12 }
 0x224   : > { %v1754_v62 = vadd.f32 %v2343_v6, %v1753_v40  ;;  %v1757_v51 = vadd.f32 %v1338_v38, %v1336_v39  ;;  %v1868_v43 = vmul.f32 %v2343_v6, %v2343_v6  ;;  %v1914_v55 = vadd.f32 %v1867_v34, %v1866_v56 }
 0x225   : > { %1669 = vst [vmem:[%s3178_s16 + $0x8] sm:$0xf] %v2294_v26  ;;  %1670 = vst [vmem:[%s3178_s16 + $0xc] sm:$0xff] %v2295_v47  ;;  %v2296_v22 = vpack.c.bf16 %v2346_v9, %v2346_v9  ;;  %v1871_v59 = vmul.f32 %v2346_v9, %v2346_v9  ;;  %v1918_v30 = vadd.f32 %v1870_v18, %v1869_v24 }
 0x226   : > { %1755 = vadd.xlane.f32.xlu1 %v1754_v62  ;;  %v1758_v32 = vadd.f32 %v2346_v9, %v1757_v51  ;;  %v1915_v57 = vadd.f32 %v1914_v55, %v1868_v43 }
 0x227   : > { %1671 = vst [vmem:[%s3178_s16 + $0x14] sm:$0xf] %v2296_v22  ;;  %v2347_v11 = vpop.f32.mrb[4].mxu1  ;;  %v1342_v23 = vpop.f32.mrb[4].mxu0  ;;  %v1919_v53 = vadd.f32 %v1918_v30, %v1871_v59 }
 0x228   : > { %1759 = vadd.xlane.f32.xlu0 %v1758_v32  ;;  %v1872_v44 = vmul.f32 %v1342_v23, %v1342_v23  ;;  %v1344_v20 = vpop.f32.mrb[5].mxu0  ;;  %v2348_v50 = vpop.f32.mrb[5].mxu1 }
 0x229   : > { %v2297_v63 = vpack.c.bf16 %v1344_v20, %v1342_v23  ;;  %v1873_v48 = vmul.f32 %v1344_v20, %v1344_v20  ;;  %v2349_v3 = vadd.f32 %v2348_v50, %v2347_v11  ;;  %v2350_v49 = vpop.f32.mrb[6].mxu1  ;;  %v1346_v7 = vpop.f32.mrb[6].mxu0  ;;  %v1761_v1 = vadd.f32 %v1344_v20, %v1342_v23 }
 0x22a   : > { %1920 = vadd.xlane.f32.xlu1 %v1919_v53  ;;  %v1875_v61 = vmul.f32 %v1346_v7, %v1346_v7  ;;  %v1348_v21 = vpop.f32.mrb[7].mxu0  ;;  %v2351_v0 = vpop.f32.mrb[7].mxu1 }
 0x22b   : > { %1672 = vst [vmem:[%s3178_s16 + $0x18] sm:$0xff] %v2297_v63  ;;  %v2298_v13 = vpack.c.bf16 %v2349_v3, %v2349_v3  ;;  %v2299_v2 = vpack.c.bf16 %v1348_v21, %v1346_v7  ;;  %v1876_v46 = vmul.f32 %v1348_v21, %v1348_v21  ;;  %v2352_v14 = vadd.f32 %v2351_v0, %v2350_v49 }
 0x22c   : > { %1916 = vadd.xlane.f32.xlu0 %v1915_v57  ;;  %v1762_v52 = vadd.f32 %v2349_v3, %v1761_v1  ;;  %v1765_v4 = vadd.f32 %v1348_v21, %v1346_v7  ;;  %v1874_v19 = vmul.f32 %v2349_v3, %v2349_v3  ;;  %v1922_v25 = vadd.f32 %v1873_v48, %v1872_v44 }
 0x22d   : > { %1673 = vst [vmem:[%s3178_s16 + $0x20] sm:$0xf] %v2298_v13  ;;  %1674 = vst [vmem:[%s3178_s16 + $0x24] sm:$0xff] %v2299_v2  ;;  %v2300_v60 = vpack.c.bf16 %v2352_v14, %v2352_v14  ;;  %v1877_v28 = vmul.f32 %v2352_v14, %v2352_v14  ;;  %v1926_v58 = vadd.f32 %v1876_v46, %v1875_v61 }
 0x22e   : > { %v1766_v8 = vadd.f32 %v2352_v14, %v1765_v4  ;;  %v1923_v16 = vadd.f32 %v1922_v25, %v1874_v19 }
 0x22f   : > { %1675 = vst [vmem:[%s3178_s16 + $0x2c] sm:$0xf] %v2300_v60  ;;  %v2353_v45 = vpop.f32.mrb[8].mxu1  ;;  %v1352_v10 = vpop.f32.mrb[8].mxu0  ;;  %v1927_v33 = vadd.f32 %v1926_v58, %v1877_v28 }
 0x230   : > { %1763 = vadd.xlane.f32.xlu0 %v1762_v52  ;;  %1767 = vadd.xlane.f32.xlu1 %v1766_v8  ;;  %v1878_v35 = vmul.f32 %v1352_v10, %v1352_v10  ;;  %v1354_v31 = vpop.f32.mrb[9].mxu0  ;;  %v2354_v41 = vpop.f32.mrb[9].mxu1 }
 0x231   : > { %v2301_v36 = vpack.c.bf16 %v1354_v31, %v1352_v10  ;;  %v1879_v27 = vmul.f32 %v1354_v31, %v1354_v31  ;;  %v2355_v5 = vadd.f32 %v2354_v41, %v2353_v45  ;;  %v1356_v29 = vpop.f32.mrb[10].mxu0  ;;  %v2356_v42 = vpop.f32.mrb[10].mxu1  ;;  %v1769_v56 = vadd.f32 %v1354_v31, %v1352_v10 }
 0x232   : > { %v1881_v17 = vmul.f32 %v1356_v29, %v1356_v29  ;;  %v1358_v15 = vpop.f32.mrb[11].mxu0  ;;  %v2357_v54 = vpop.f32.mrb[11].mxu1 }
 0x233   : > { %1676 = vst [vmem:[%s3178_s16 + $0x30] sm:$0xff] %v2301_v36  ;;  %v2302_v34 = vpack.c.bf16 %v2355_v5, %v2355_v5  ;;  %v2303_v6 = vpack.c.bf16 %v1358_v15, %v1356_v29  ;;  %v1882_v39 = vmul.f32 %v1358_v15, %v1358_v15  ;;  %v2358_v12 = vadd.f32 %v2357_v54, %v2356_v42 }
 0x234   : > { %1924 = vadd.xlane.f32.xlu0 %v1923_v16  ;;  %1928 = vadd.xlane.f32.xlu1 %v1927_v33  ;;  %v1770_v40 = vadd.f32 %v2355_v5, %v1769_v56  ;;  %v1773_v24 = vadd.f32 %v1358_v15, %v1356_v29  ;;  %v1880_v38 = vmul.f32 %v2355_v5, %v2355_v5 }
 0x235   : > { %1677 = vst [vmem:[%s3178_s16 + $0x38] sm:$0xf] %v2302_v34  ;;  %1678 = vst [vmem:[%s3178_s16 + $0x3c] sm:$0xff] %v2303_v6  ;;  %v2304_v37 = vpack.c.bf16 %v2358_v12, %v2358_v12  ;;  %v1930_v26 = vadd.f32 %v1879_v27, %v1878_v35  ;;  %v1883_v47 = vmul.f32 %v2358_v12, %v2358_v12 }
 0x236   : > { %v1934_v18 = vadd.f32 %v1882_v39, %v1881_v17  ;;  %v1774_v9 = vadd.f32 %v2358_v12, %v1773_v24 }
 0x237   : > { %1679 = vst [vmem:[%s3178_s16 + $0x44] sm:$0xf] %v2304_v37  ;;  %v2359_v62 = vpop.f32.mrb[12].mxu1  ;;  %v1362_v51 = vpop.f32.mrb[12].mxu0  ;;  %v1931_v43 = vadd.f32 %v1930_v26, %v1880_v38 }
 0x238   : > { %v1935_v55 = vadd.f32 %v1934_v18, %v1883_v47  ;;  %1771 = vadd.xlane.f32.xlu0 %v1770_v40  ;;  %1775 = vadd.xlane.f32.xlu1 %v1774_v9  ;;  %v1884_v22 = vmul.f32 %v1362_v51, %v1362_v51  ;;  %v1364_v59 = vpop.f32.mrb[13].mxu0  ;;  %v2360_v30 = vpop.f32.mrb[13].mxu1 }
 0x239   : > { %v2305_v32 = vpack.c.bf16 %v1364_v59, %v1362_v51  ;;  %v1885_v57 = vmul.f32 %v1364_v59, %v1364_v59  ;;  %v2361_v11 = vadd.f32 %v2360_v30, %v2359_v62  ;;  %v1366_v23 = vpop.f32.mrb[14].mxu0  ;;  %v2362_v53 = vpop.f32.mrb[14].mxu1  ;;  %v1777_v44 = vadd.f32 %v1364_v59, %v1362_v51 }
 0x23a   : > { %v1887_v20 = vmul.f32 %v1366_v23, %v1366_v23  ;;  %v1368_v50 = vpop.f32.mrb[15].mxu0  ;;  %v2363_v63 = vpop.f32.mrb[15].mxu1 }
 0x23b   : > { %1680 = vst [vmem:[%s3178_s16 + $0x48] sm:$0xff] %v2305_v32  ;;  %v2306_v48 = vpack.c.bf16 %v2361_v11, %v2361_v11  ;;  %v2307_v3 = vpack.c.bf16 %v1368_v50, %v1366_v23  ;;  %v1888_v49 = vmul.f32 %v1368_v50, %v1368_v50  ;;  %v2364_v7 = vadd.f32 %v2363_v63, %v2362_v53 }
 0x23c   : > { %1932 = vadd.xlane.f32.xlu0 %v1931_v43  ;;  %1936 = vadd.xlane.f32.xlu1 %v1935_v55  ;;  %v1778_v1 = vadd.f32 %v2361_v11, %v1777_v44  ;;  %v1781_v61 = vadd.f32 %v1368_v50, %v1366_v23  ;;  %v1886_v21 = vmul.f32 %v2361_v11, %v2361_v11 }
 0x23d   : > { %1681 = vst [vmem:[%s3178_s16 + $0x50] sm:$0xf] %v2306_v48  ;;  %1682 = vst [vmem:[%s3178_s16 + $0x54] sm:$0xff] %v2307_v3  ;;  %v2308_v0 = vpack.c.bf16 %v2364_v7, %v2364_v7  ;;  %v1938_v13 = vadd.f32 %v1885_v57, %v1884_v22  ;;  %v1889_v2 = vmul.f32 %v2364_v7, %v2364_v7 }
 0x23e   : > { %v1942_v46 = vadd.f32 %v1888_v49, %v1887_v20  ;;  %v1782_v14 = vadd.f32 %v2364_v7, %v1781_v61 }
 0x23f   : > { %1683 = vst [vmem:[%s3178_s16 + $0x5c] sm:$0xf] %v2308_v0  ;;  %v2365_v52 = vpop.f32.mrb[16].mxu1  ;;  %v1372_v4 = vpop.f32.mrb[16].mxu0  ;;  %v1939_v19 = vadd.f32 %v1938_v13, %v1886_v21 }
 0x240   : > { %v1943_v25 = vadd.f32 %v1942_v46, %v1889_v2  ;;  %1779 = vadd.xlane.f32.xlu0 %v1778_v1  ;;  %1783 = vadd.xlane.f32.xlu1 %v1782_v14  ;;  %v1890_v60 = vmul.f32 %v1372_v4, %v1372_v4  ;;  %v1374_v28 = vpop.f32.mrb[17].mxu0  ;;  %v2366_v58 = vpop.f32.mrb[17].mxu1 }
 0x241   : > { %v2309_v8 = vpack.c.bf16 %v1374_v28, %v1372_v4  ;;  %v1891_v16 = vmul.f32 %v1374_v28, %v1374_v28  ;;  %v2367_v45 = vadd.f32 %v2366_v58, %v2365_v52  ;;  %v1376_v10 = vpop.f32.mrb[18].mxu0  ;;  %v2368_v33 = vpop.f32.mrb[18].mxu1  ;;  %v1785_v35 = vadd.f32 %v1374_v28, %v1372_v4 }
 0x242   : > { %v1893_v31 = vmul.f32 %v1376_v10, %v1376_v10  ;;  %v1378_v41 = vpop.f32.mrb[19].mxu0  ;;  %v2369_v36 = vpop.f32.mrb[19].mxu1 }
 0x243   : > { %1684 = vst [vmem:[%s3178_s16 + $0x60] sm:$0xff] %v2309_v8  ;;  %v2310_v27 = vpack.c.bf16 %v2367_v45, %v2367_v45  ;;  %v2311_v5 = vpack.c.bf16 %v1378_v41, %v1376_v10  ;;  %v1894_v29 = vmul.f32 %v1378_v41, %v1378_v41  ;;  %v2370_v42 = vadd.f32 %v2369_v36, %v2368_v33 }
 0x244   : > { %1940 = vadd.xlane.f32.xlu0 %v1939_v19  ;;  %1944 = vadd.xlane.f32.xlu1 %v1943_v25  ;;  %v1786_v56 = vadd.f32 %v2367_v45, %v1785_v35  ;;  %v1789_v17 = vadd.f32 %v1378_v41, %v1376_v10  ;;  %v1892_v15 = vmul.f32 %v2367_v45, %v2367_v45 }
 0x245   : > { %1685 = vst [vmem:[%s3178_s16 + $0x68] sm:$0xf] %v2310_v27  ;;  %1686 = vst [vmem:[%s3178_s16 + $0x6c] sm:$0xff] %v2311_v5  ;;  %v2312_v54 = vpack.c.bf16 %v2370_v42, %v2370_v42  ;;  %v1946_v34 = vadd.f32 %v1891_v16, %v1890_v60  ;;  %v1895_v6 = vmul.f32 %v2370_v42, %v2370_v42 }
 0x246   : > { %v1950_v39 = vadd.f32 %v1894_v29, %v1893_v31  ;;  %v1790_v12 = vadd.f32 %v2370_v42, %v1789_v17 }
 0x247   : > { %1687 = vst [vmem:[%s3178_s16 + $0x74] sm:$0xf] %v2312_v54  ;;  %v2371_v40 = vpop.f32.mrb[20].mxu1  ;;  %v1382_v24 = vpop.f32.mrb[20].mxu0  ;;  %v1947_v38 = vadd.f32 %v1946_v34, %v1892_v15 }
 0x248   : > { %v1951_v37 = vadd.f32 %v1950_v39, %v1895_v6  ;;  %1787 = vadd.xlane.f32.xlu0 %v1786_v56  ;;  %1791 = vadd.xlane.f32.xlu1 %v1790_v12  ;;  %v1896_v26 = vmul.f32 %v1382_v24, %v1382_v24  ;;  %v1384_v47 = vpop.f32.mrb[21].mxu0  ;;  %v2372_v18 = vpop.f32.mrb[21].mxu1 }
 0x249   : > { %v2313_v9 = vpack.c.bf16 %v1384_v47, %v1382_v24  ;;  %v1897_v62 = vmul.f32 %v1384_v47, %v1384_v47  ;;  %v2373_v51 = vadd.f32 %v2372_v18, %v2371_v40  ;;  %v1386_v43 = vpop.f32.mrb[22].mxu0  ;;  %v2374_v55 = vpop.f32.mrb[22].mxu1  ;;  %v1793_v22 = vadd.f32 %v1384_v47, %v1382_v24 }
 0x24a   : > { %v1899_v59 = vmul.f32 %v1386_v43, %v1386_v43  ;;  %v1388_v30 = vpop.f32.mrb[23].mxu0  ;;  %v2375_v32 = vpop.f32.mrb[23].mxu1 }
 0x24b   : > { %1688 = vst [vmem:[%s3178_s16 + $0x78] sm:$0xff] %v2313_v9  ;;  %v2314_v57 = vpack.c.bf16 %v2373_v51, %v2373_v51  ;;  %v2315_v11 = vpack.c.bf16 %v1388_v30, %v1386_v43  ;;  %v1797_v23 = vadd.f32 %v1388_v30, %v1386_v43  ;;  %v1900_v53 = vmul.f32 %v1388_v30, %v1388_v30 }
 0x24c   : > { %v2376_v44 = vadd.f32 %v2375_v32, %v2374_v55  ;;  %1948 = vadd.xlane.f32.xlu0 %v1947_v38  ;;  %1952 = vadd.xlane.f32.xlu1 %v1951_v37  ;;  %v1794_v20 = vadd.f32 %v2373_v51, %v1793_v22  ;;  %v1898_v50 = vmul.f32 %v2373_v51, %v2373_v51 }
 0x24d   : > { %1689 = vst [vmem:[%s3178_s16 + $0x80] sm:$0xf] %v2314_v57  ;;  %1690 = vst [vmem:[%s3178_s16 + $0x84] sm:$0xff] %v2315_v11  ;;  %v1958_v63 = vadd.f32 %v1900_v53, %v1899_v59  ;;  %v1954_v48 = vadd.f32 %v1897_v62, %v1896_v26 }
 0x24e   : > { %v2316_v3 = vpack.c.bf16 %v2376_v44, %v2376_v44  ;;  %v1901_v49 = vmul.f32 %v2376_v44, %v2376_v44  ;;  %v1798_v7 = vadd.f32 %v2376_v44, %v1797_v23 }
 0x24f   : > { %v2377_v1 = vpop.f32.mrb[24].mxu1  ;;  %v1392_v61 = vpop.f32.mrb[24].mxu0  ;;  %v1955_v21 = vadd.f32 %v1954_v48, %v1898_v50  ;;  %v1737_v50 = vld [vmem:[#allocation2] sm:$0xff]  ;;  %v1738_v48 = vld [vmem:[#allocation2 + $0x8] sm:$0xff] }
 0x250   : > { %1691 = vst [vmem:[%s3178_s16 + $0x8c] sm:$0xf] %v2316_v3  ;;  %1795 = vadd.xlane.f32.xlu0 %v1794_v20  ;;  %1799 = vadd.xlane.f32.xlu1 %v1798_v7  ;;  %v1902_v0 = vmul.f32 %v1392_v61, %v1392_v61  ;;  %v1394_v13 = vpop.f32.mrb[25].mxu0  ;;  %v2378_v2 = vpop.f32.mrb[25].mxu1  ;;  %v1959_v46 = vadd.f32 %v1958_v63, %v1901_v49  ;;  %v1851_v7 = vld [vmem:[#allocation3 + $0x8] sm:$0xff] }
 0x251   : > { %v2317_v14 = vpack.c.bf16 %v1394_v13, %v1392_v61  ;;  %v1903_v52 = vmul.f32 %v1394_v13, %v1394_v13  ;;  %v2379_v4 = vadd.f32 %v2378_v2, %v2377_v1  ;;  %v1396_v19 = vpop.f32.mrb[26].mxu0  ;;  %v2380_v25 = vpop.f32.mrb[26].mxu1  ;;  %v1801_v60 = vadd.f32 %v1394_v13, %v1392_v61 }
 0x252   : > { %v1905_v28 = vmul.f32 %v1396_v19, %v1396_v19  ;;  %v1398_v58 = vpop.f32.mrb[27].mxu0  ;;  %v2381_v8 = vpop.f32.mrb[27].mxu1 }
 0x253   : > { %1692 = vst [vmem:[%s3178_s16 + $0x90] sm:$0xff] %v2317_v14  ;;  %v2318_v16 = vpack.c.bf16 %v2379_v4, %v2379_v4  ;;  %v2319_v45 = vpack.c.bf16 %v1398_v58, %v1396_v19  ;;  %v1805_v10 = vadd.f32 %v1398_v58, %v1396_v19  ;;  %v1906_v33 = vmul.f32 %v1398_v58, %v1398_v58  ;;  %v1740_v14 = vld [vmem:[#allocation2 + $0x18] sm:$0xff]  ;;  %v1852_v58 = vld [vmem:[#allocation3 + $0x10] sm:$0xff] }
 0x254   : > { %v2382_v35 = vadd.f32 %v2381_v8, %v2380_v25  ;;  %1956 = vadd.xlane.f32.xlu0 %v1955_v21  ;;  %1960 = vadd.xlane.f32.xlu1 %v1959_v46  ;;  %v1802_v31 = vadd.f32 %v2379_v4, %v1801_v60  ;;  %v1904_v41 = vmul.f32 %v2379_v4, %v2379_v4  ;;  %v1850_v21 = vld [vmem:[#allocation3] sm:$0xff]  ;;  %v1739_v46 = vld [vmem:[#allocation2 + $0x10] sm:$0xff]  ;;  %v1853_v8 = vld [vmem:[#allocation3 + $0x18] sm:$0xff] }
 0x255   : > { %1693 = vst [vmem:[%s3178_s16 + $0x98] sm:$0xf] %v2318_v16  ;;  %1694 = vst [vmem:[%s3178_s16 + $0x9c] sm:$0xff] %v2319_v45  ;;  %v1966_v36 = vadd.f32 %v1906_v33, %v1905_v28  ;;  %v1962_v27 = vadd.f32 %v1903_v52, %v1902_v0 }
 0x256   : > { %v2320_v5 = vpack.c.bf16 %v2382_v35, %v2382_v35  ;;  %v1907_v29 = vmul.f32 %v2382_v35, %v2382_v35  ;;  %v1806_v42 = vadd.f32 %v2382_v35, %v1805_v10 }
 0x257   : > { %v2383_v56 = vpop.f32.mrb[28].mxu1  ;;  %v1402_v17 = vpop.f32.mrb[28].mxu0  ;;  %v1963_v15 = vadd.f32 %v1962_v27, %v1904_v41  ;;  %v1741_v41 = vld [vmem:[#allocation2 + $0x20] sm:$0xff] }
 0x258   : > { %1695 = vst [vmem:[%s3178_s16 + $0xa4] sm:$0xf] %v2320_v5  ;;  %1803 = vadd.xlane.f32.xlu0 %v1802_v31  ;;  %1807 = vadd.xlane.f32.xlu1 %v1806_v42  ;;  %v1908_v54 = vmul.f32 %v1402_v17, %v1402_v17  ;;  %v1404_v34 = vpop.f32.mrb[29].mxu0  ;;  %v2384_v6 = vpop.f32.mrb[29].mxu1  ;;  %v1967_v39 = vadd.f32 %v1966_v36, %v1907_v29  ;;  %v1742_v36 = vld [vmem:[#allocation2 + $0x28] sm:$0xff] }
 0x259   : > { %v2321_v12 = vpack.c.bf16 %v1404_v34, %v1402_v17  ;;  %v1909_v40 = vmul.f32 %v1404_v34, %v1404_v34  ;;  %v2385_v24 = vadd.f32 %v2384_v6, %v2383_v56  ;;  %v1406_v38 = vpop.f32.mrb[30].mxu0  ;;  %v2386_v37 = vpop.f32.mrb[30].mxu1  ;;  %v1809_v26 = vadd.f32 %v1404_v34, %v1402_v17  ;;  %v1854_v56 = vld [vmem:[#allocation3 + $0x20] sm:$0xff] }
 0x25a   : > { %v1911_v47 = vmul.f32 %v1406_v38, %v1406_v38  ;;  %v1408_v18 = vpop.f32.mrb[31].mxu0  ;;  %v2387_v9 = vpop.f32.mrb[31].mxu1 }
 0x25b   : > { %1696 = vst [vmem:[%s3178_s16 + $0xa8] sm:$0xff] %v2321_v12  ;;  %v2322_v62 = vpack.c.bf16 %v2385_v24, %v2385_v24  ;;  %v2323_v51 = vpack.c.bf16 %v1408_v18, %v1406_v38  ;;  %v1813_v43 = vadd.f32 %v1408_v18, %v1406_v38  ;;  %v1912_v55 = vmul.f32 %v1408_v18, %v1408_v18 }
 0x25c   : > { %v2388_v22 = vadd.f32 %v2387_v9, %v2386_v37  ;;  %1964 = vadd.xlane.f32.xlu0 %v1963_v15  ;;  %1968 = vadd.xlane.f32.xlu1 %v1967_v39  ;;  %v1810_v59 = vadd.f32 %v2385_v24, %v1809_v26  ;;  %v1910_v30 = vmul.f32 %v2385_v24, %v2385_v24  ;;  %v1744_v37 = vld [vmem:[#allocation2 + $0x38] sm:$0xff] }
 0x25d   : > { %1697 = vst [vmem:[%s3178_s16 + $0xb0] sm:$0xf] %v2322_v62  ;;  %1698 = vst [vmem:[%s3178_s16 + $0xb4] sm:$0xff] %v2323_v51  ;;  %v1974_v32 = vadd.f32 %v1912_v55, %v1911_v47  ;;  %v1970_v57 = vadd.f32 %v1909_v40, %v1908_v54  ;;  %v1855_v54 = vld [vmem:[#allocation3 + $0x28] sm:$0xff]  ;;  %v1743_v40 = vld [vmem:[#allocation2 + $0x30] sm:$0xff] }
 0x25e   : > { %v2324_v11 = vpack.c.bf16 %v2388_v22, %v2388_v22  ;;  %v1913_v23 = vmul.f32 %v2388_v22, %v2388_v22  ;;  %v1814_v53 = vadd.f32 %v2388_v22, %v1813_v43  ;;  %v1856_v62 = vld [vmem:[#allocation3 + $0x30] sm:$0xff]  ;;  %v1857_v55 = vld [vmem:[#allocation3 + $0x38] sm:$0xff] }
 0x25f   : > { %v1971_v44 = vadd.f32 %v1970_v57, %v1910_v30  ;;  %v1745_v57 = vld [vmem:[#allocation2 + $0x40] sm:$0xff] }
 0x260   : > { %1699 = vst [vmem:[%s3178_s16 + $0xbc] sm:$0xf] %v2324_v11  ;;  %1811 = vadd.xlane.f32.xlu0 %v1810_v59  ;;  %1815 = vadd.xlane.f32.xlu1 %v1814_v53  ;;  %v1975_v20 = vadd.f32 %v1974_v32, %v1913_v23  ;;  %v1746_v53 = vld [vmem:[#allocation2 + $0x48] sm:$0xff] }
 0x264   : > { %1972 = vadd.xlane.f32.xlu0 %v1971_v44  ;;  %1976 = vadd.xlane.f32.xlu1 %v1975_v20 }
 0x2b3   : > { %v1756_v63 = vpop.xlane.xlu1 %1755 }
 0x2b4   : > { %v1817_v3 = vadd.f32 %v1756_v63, %v1737_v50 }
 0x2b5   : > { %v1760_v49 = vpop.xlane.xlu0 %1759 }
 0x2b6   : > { %1834 = vst.msk [vmem:[#allocation2] sm:$0xff] %vm1704_vm0, %v1817_v3  ;;  %v1818_v1 = vadd.f32 %v1760_v49, %v1738_v48  ;;  %v1858_v48 = vld [vmem:[#allocation3 + $0x40] sm:$0xff] }
 0x2b7   : > { %v1921_v61 = vpop.xlane.xlu1 %1920 }
 0x2b8   : > { %1835 = vst.msk [vmem:[#allocation2 + $0x8] sm:$0xff] %vm1704_vm0, %v1818_v1  ;;  %v1979_v0 = vadd.f32 %v1921_v61, %v1851_v7  ;;  %v1859_v7 = vld [vmem:[#allocation3 + $0x48] sm:$0xff] }
 0x2b9   : > { %v1917_v13 = vpop.xlane.xlu0 %1916 }
 0x2ba   : > { %1995 = vst.msk [vmem:[#allocation3 + $0x8] sm:$0xff] %vm1704_vm0, %v1979_v0  ;;  %v1978_v2 = vadd.f32 %v1917_v13, %v1850_v21  ;;  %v1747_v13 = vld [vmem:[#allocation2 + $0x50] sm:$0xff] }
 0x2bc   : > { %1994 = vst.msk [vmem:[#allocation3] sm:$0xff] %vm1704_vm0, %v1978_v2 }
 0x2bd   : > { %v2013_v52 = vld [vmem:[#allocation2] sm:$0xff]  ;;  %v1764_v4 = vpop.xlane.xlu0 %1763  ;;  %v1768_v19 = vpop.xlane.xlu1 %1767 }
 0x2be   : > { %2029 = vst.msk [vmem:[%s3219_s24] sm:$0xff] %vm1704_vm0, %v2013_v52  ;;  %v1819_v25 = vadd.f32 %v1764_v4, %v1739_v46  ;;  %v1820_v60 = vadd.f32 %v1768_v19, %v1740_v14  ;;  %v1748_v14 = vld [vmem:[#allocation2 + $0x58] sm:$0xff] }
 0x2bf   : > { %v2014_v28 = vld [vmem:[#allocation2 + $0x8] sm:$0xff] }
 0x2c0   : > { %2030 = vst.msk [vmem:[%s3219_s24 + $0x8] sm:$0xff] %vm1704_vm0, %v2014_v28  ;;  %1836 = vst.msk [vmem:[#allocation2 + $0x10] sm:$0xff] %vm1704_vm0, %v1819_v25 }
 0x2c1   : > { %1837 = vst.msk [vmem:[#allocation2 + $0x18] sm:$0xff] %vm1704_vm0, %v1820_v60  ;;  %v2046_v16 = vld [vmem:[#allocation3 + $0x8] sm:$0xff]  ;;  %v1925_v45 = vpop.xlane.xlu0 %1924  ;;  %v1929_v10 = vpop.xlane.xlu1 %1928  ;;  %v1860_v60 = vld [vmem:[#allocation3 + $0x50] sm:$0xff] }
 0x2c2   : > { %2062 = vst.msk [vmem:[%s3227_s26 + $0x8] sm:$0xff] %vm1704_vm0, %v2046_v16  ;;  %v1980_v33 = vadd.f32 %v1925_v45, %v1852_v58  ;;  %v1981_v35 = vadd.f32 %v1929_v10, %v1853_v8  ;;  %v1861_v8 = vld [vmem:[#allocation3 + $0x58] sm:$0xff] }
 0x2c3   : > { %v2045_v31 = vld [vmem:[#allocation3] sm:$0xff] }
 0x2c4   : > { %2061 = vst.msk [vmem:[%s3227_s26] sm:$0xff] %vm1704_vm0, %v2045_v31  ;;  %1996 = vst.msk [vmem:[#allocation3 + $0x10] sm:$0xff] %vm1704_vm0, %v1980_v33 }
 0x2c5   : > { %1997 = vst.msk [vmem:[#allocation3 + $0x18] sm:$0xff] %vm1704_vm0, %v1981_v35  ;;  %v1772_v27 = vpop.xlane.xlu0 %1771  ;;  %v1776_v5 = vpop.xlane.xlu1 %1775  ;;  %v1749_v35 = vld [vmem:[#allocation2 + $0x60] sm:$0xff] }
 0x2c6   : > { %v1821_v29 = vadd.f32 %v1772_v27, %v1741_v41  ;;  %v1822_v42 = vadd.f32 %v1776_v5, %v1742_v36  ;;  %v1750_v36 = vld [vmem:[#allocation2 + $0x68] sm:$0xff] }
 0x2c7   : > { %v2015_v17 = vld [vmem:[#allocation2 + $0x10] sm:$0xff] }
 0x2c8   : > { %v2016_v15 = vld [vmem:[#allocation2 + $0x18] sm:$0xff]  ;;  %2031 = vst.msk [vmem:[%s3219_s24 + $0x10] sm:$0xff] %vm1704_vm0, %v2015_v17  ;;  %1838 = vst.msk [vmem:[#allocation2 + $0x20] sm:$0xff] %vm1704_vm0, %v1821_v29 }
 0x2c9   : > { %2032 = vst.msk [vmem:[%s3219_s24 + $0x18] sm:$0xff] %vm1704_vm0, %v2016_v15  ;;  %1839 = vst.msk [vmem:[#allocation2 + $0x28] sm:$0xff] %vm1704_vm0, %v1822_v42  ;;  %v1933_v34 = vpop.xlane.xlu0 %1932  ;;  %v1937_v6 = vpop.xlane.xlu1 %1936 }
 0x2ca   : > { %v1982_v39 = vadd.f32 %v1933_v34, %v1854_v56  ;;  %v1983_v12 = vadd.f32 %v1937_v6, %v1855_v54  ;;  %v1862_v56 = vld [vmem:[#allocation3 + $0x60] sm:$0xff]  ;;  %v1863_v54 = vld [vmem:[#allocation3 + $0x68] sm:$0xff] }
 0x2cb   : > { %v2047_v24 = vld [vmem:[#allocation3 + $0x10] sm:$0xff] }
 0x2cc   : > { %v2048_v38 = vld [vmem:[#allocation3 + $0x18] sm:$0xff]  ;;  %2063 = vst.msk [vmem:[%s3227_s26 + $0x10] sm:$0xff] %vm1704_vm0, %v2047_v24  ;;  %1998 = vst.msk [vmem:[#allocation3 + $0x20] sm:$0xff] %vm1704_vm0, %v1982_v39 }
 0x2cd   : > { %2064 = vst.msk [vmem:[%s3227_s26 + $0x18] sm:$0xff] %vm1704_vm0, %v2048_v38  ;;  %1999 = vst.msk [vmem:[#allocation3 + $0x28] sm:$0xff] %vm1704_vm0, %v1983_v12  ;;  %v1780_v26 = vpop.xlane.xlu0 %1779  ;;  %v1784_v47 = vpop.xlane.xlu1 %1783 }
 0x2ce   : > { %v1823_v18 = vadd.f32 %v1780_v26, %v1743_v40  ;;  %v1824_v9 = vadd.f32 %v1784_v47, %v1744_v37  ;;  %v1751_v40 = vld [vmem:[#allocation2 + $0x70] sm:$0xff]  ;;  %v1752_v37 = vld [vmem:[#allocation2 + $0x78] sm:$0xff] }
 0x2cf   : > { %v2017_v51 = vld [vmem:[#allocation2 + $0x20] sm:$0xff] }
 0x2d0   : > { %v2018_v43 = vld [vmem:[#allocation2 + $0x28] sm:$0xff]  ;;  %2033 = vst.msk [vmem:[%s3219_s24 + $0x20] sm:$0xff] %vm1704_vm0, %v2017_v51  ;;  %1840 = vst.msk [vmem:[#allocation2 + $0x30] sm:$0xff] %vm1704_vm0, %v1823_v18 }
 0x2d1   : > { %2034 = vst.msk [vmem:[%s3219_s24 + $0x28] sm:$0xff] %vm1704_vm0, %v2018_v43  ;;  %1841 = vst.msk [vmem:[#allocation2 + $0x38] sm:$0xff] %vm1704_vm0, %v1824_v9  ;;  %v1941_v22 = vpop.xlane.xlu0 %1940  ;;  %v1945_v59 = vpop.xlane.xlu1 %1944 }
 0x2d2   : > { %v1984_v30 = vadd.f32 %v1941_v22, %v1856_v62  ;;  %v1985_v32 = vadd.f32 %v1945_v59, %v1857_v55  ;;  %v1864_v62 = vld [vmem:[#allocation3 + $0x70] sm:$0xff]  ;;  %v1865_v55 = vld [vmem:[#allocation3 + $0x78] sm:$0xff] }
 0x2d3   : > { %v2049_v11 = vld [vmem:[#allocation3 + $0x20] sm:$0xff] }
 0x2d4   : > { %v2050_v23 = vld [vmem:[#allocation3 + $0x28] sm:$0xff]  ;;  %2065 = vst.msk [vmem:[%s3227_s26 + $0x20] sm:$0xff] %vm1704_vm0, %v2049_v11  ;;  %2000 = vst.msk [vmem:[#allocation3 + $0x30] sm:$0xff] %vm1704_vm0, %v1984_v30 }
 0x2d5   : > { %2066 = vst.msk [vmem:[%s3227_s26 + $0x28] sm:$0xff] %vm1704_vm0, %v2050_v23  ;;  %2001 = vst.msk [vmem:[#allocation3 + $0x38] sm:$0xff] %vm1704_vm0, %v1985_v32  ;;  %v1788_v44 = vpop.xlane.xlu0 %1787  ;;  %v1792_v20 = vpop.xlane.xlu1 %1791 }
 0x2d6   : > { %v1825_v50 = vadd.f32 %v1788_v44, %v1745_v57  ;;  %v1826_v63 = vadd.f32 %v1792_v20, %v1746_v53 }
 0x2d7   : > { %v2019_v3 = vld [vmem:[#allocation2 + $0x30] sm:$0xff] }
 0x2d8   : > { %v2020_v49 = vld [vmem:[#allocation2 + $0x38] sm:$0xff]  ;;  %2035 = vst.msk [vmem:[%s3219_s24 + $0x30] sm:$0xff] %vm1704_vm0, %v2019_v3  ;;  %1842 = vst.msk [vmem:[#allocation2 + $0x40] sm:$0xff] %vm1704_vm0, %v1825_v50 }
 0x2d9   : > { %2036 = vst.msk [vmem:[%s3219_s24 + $0x38] sm:$0xff] %vm1704_vm0, %v2020_v49  ;;  %1843 = vst.msk [vmem:[#allocation2 + $0x48] sm:$0xff] %vm1704_vm0, %v1826_v63  ;;  %v1949_v1 = vpop.xlane.xlu0 %1948  ;;  %v1953_v61 = vpop.xlane.xlu1 %1952 }
 0x2da   : > { %v1986_v21 = vadd.f32 %v1949_v1, %v1858_v48  ;;  %v1987_v0 = vadd.f32 %v1953_v61, %v1859_v7 }
 0x2db   : > { %v2051_v2 = vld [vmem:[#allocation3 + $0x30] sm:$0xff] }
 0x2dc   : > { %v2052_v46 = vld [vmem:[#allocation3 + $0x38] sm:$0xff]  ;;  %2067 = vst.msk [vmem:[%s3227_s26 + $0x30] sm:$0xff] %vm1704_vm0, %v2051_v2  ;;  %2002 = vst.msk [vmem:[#allocation3 + $0x40] sm:$0xff] %vm1704_vm0, %v1986_v21 }
 0x2dd   : > { %2068 = vst.msk [vmem:[%s3227_s26 + $0x38] sm:$0xff] %vm1704_vm0, %v2052_v46  ;;  %2003 = vst.msk [vmem:[#allocation3 + $0x48] sm:$0xff] %vm1704_vm0, %v1987_v0  ;;  %v1796_v52 = vpop.xlane.xlu0 %1795  ;;  %v1800_v4 = vpop.xlane.xlu1 %1799 }
 0x2de   : > { %v1827_v19 = vadd.f32 %v1796_v52, %v1747_v13  ;;  %v1828_v25 = vadd.f32 %v1800_v4, %v1748_v14 }
 0x2df   : > { %v2021_v28 = vld [vmem:[#allocation2 + $0x40] sm:$0xff] }
 0x2e0   : > { %v2022_v58 = vld [vmem:[#allocation2 + $0x48] sm:$0xff]  ;;  %2037 = vst.msk [vmem:[%s3219_s24 + $0x40] sm:$0xff] %vm1704_vm0, %v2021_v28  ;;  %1844 = vst.msk [vmem:[#allocation2 + $0x50] sm:$0xff] %vm1704_vm0, %v1827_v19 }
 0x2e1   : > { %2038 = vst.msk [vmem:[%s3219_s24 + $0x48] sm:$0xff] %vm1704_vm0, %v2022_v58  ;;  %1845 = vst.msk [vmem:[#allocation2 + $0x58] sm:$0xff] %vm1704_vm0, %v1828_v25  ;;  %v1957_v16 = vpop.xlane.xlu0 %1956  ;;  %v1961_v45 = vpop.xlane.xlu1 %1960 }
 0x2e2   : > { %v1988_v10 = vadd.f32 %v1957_v16, %v1860_v60  ;;  %v1989_v33 = vadd.f32 %v1961_v45, %v1861_v8 }
 0x2e3   : > { %v2053_v31 = vld [vmem:[#allocation3 + $0x40] sm:$0xff] }
 0x2e4   : > { %v2054_v41 = vld [vmem:[#allocation3 + $0x48] sm:$0xff]  ;;  %2069 = vst.msk [vmem:[%s3227_s26 + $0x40] sm:$0xff] %vm1704_vm0, %v2053_v31  ;;  %2004 = vst.msk [vmem:[#allocation3 + $0x50] sm:$0xff] %vm1704_vm0, %v1988_v10 }
 0x2e5   : > { %2070 = vst.msk [vmem:[%s3227_s26 + $0x48] sm:$0xff] %vm1704_vm0, %v2054_v41  ;;  %2005 = vst.msk [vmem:[#allocation3 + $0x58] sm:$0xff] %vm1704_vm0, %v1989_v33  ;;  %v1804_v27 = vpop.xlane.xlu0 %1803  ;;  %v1808_v5 = vpop.xlane.xlu1 %1807 }
 0x2e6   : > { %v1829_v29 = vadd.f32 %v1804_v27, %v1749_v35  ;;  %v1830_v42 = vadd.f32 %v1808_v5, %v1750_v36 }
 0x2e7   : > { %v2023_v17 = vld [vmem:[#allocation2 + $0x50] sm:$0xff] }
 0x2e8   : > { %v2024_v15 = vld [vmem:[#allocation2 + $0x58] sm:$0xff]  ;;  %2039 = vst.msk [vmem:[%s3219_s24 + $0x50] sm:$0xff] %vm1704_vm0, %v2023_v17  ;;  %1846 = vst.msk [vmem:[#allocation2 + $0x60] sm:$0xff] %vm1704_vm0, %v1829_v29 }
 0x2e9   : > { %2040 = vst.msk [vmem:[%s3219_s24 + $0x58] sm:$0xff] %vm1704_vm0, %v2024_v15  ;;  %1847 = vst.msk [vmem:[#allocation2 + $0x68] sm:$0xff] %vm1704_vm0, %v1830_v42  ;;  %v1965_v34 = vpop.xlane.xlu0 %1964  ;;  %v1969_v6 = vpop.xlane.xlu1 %1968 }
 0x2ea   : > { %v1990_v39 = vadd.f32 %v1965_v34, %v1862_v56  ;;  %v1991_v12 = vadd.f32 %v1969_v6, %v1863_v54 }
 0x2eb   : > { %v2055_v24 = vld [vmem:[#allocation3 + $0x50] sm:$0xff] }
 0x2ec   : > { %v2056_v38 = vld [vmem:[#allocation3 + $0x58] sm:$0xff]  ;;  %2071 = vst.msk [vmem:[%s3227_s26 + $0x50] sm:$0xff] %vm1704_vm0, %v2055_v24  ;;  %2006 = vst.msk [vmem:[#allocation3 + $0x60] sm:$0xff] %vm1704_vm0, %v1990_v39 }
 0x2ed   : > { %2072 = vst.msk [vmem:[%s3227_s26 + $0x58] sm:$0xff] %vm1704_vm0, %v2056_v38  ;;  %2007 = vst.msk [vmem:[#allocation3 + $0x68] sm:$0xff] %vm1704_vm0, %v1991_v12  ;;  %v1812_v26 = vpop.xlane.xlu0 %1811  ;;  %v1816_v47 = vpop.xlane.xlu1 %1815 }
 0x2ee   : > { %v1831_v18 = vadd.f32 %v1812_v26, %v1751_v40  ;;  %v1832_v9 = vadd.f32 %v1816_v47, %v1752_v37 }
 0x2ef   : > { %v2025_v51 = vld [vmem:[#allocation2 + $0x60] sm:$0xff] }
 0x2f0   : > { %v2026_v43 = vld [vmem:[#allocation2 + $0x68] sm:$0xff]  ;;  %2041 = vst.msk [vmem:[%s3219_s24 + $0x60] sm:$0xff] %vm1704_vm0, %v2025_v51  ;;  %1848 = vst.msk [vmem:[#allocation2 + $0x70] sm:$0xff] %vm1704_vm0, %v1831_v18 }
 0x2f1   : > { %2042 = vst.msk [vmem:[%s3219_s24 + $0x68] sm:$0xff] %vm1704_vm0, %v2026_v43  ;;  %1849 = vst.msk [vmem:[#allocation2 + $0x78] sm:$0xff] %vm1704_vm0, %v1832_v9  ;;  %v1973_v22 = vpop.xlane.xlu0 %1972  ;;  %v1977_v59 = vpop.xlane.xlu1 %1976 }
 0x2f2   : > { %v1992_v30 = vadd.f32 %v1973_v22, %v1864_v62  ;;  %v1993_v32 = vadd.f32 %v1977_v59, %v1865_v55 }
 0x2f3   : > { %v2057_v57 = vld [vmem:[#allocation3 + $0x60] sm:$0xff] }
 0x2f4   : > { %v2058_v11 = vld [vmem:[#allocation3 + $0x68] sm:$0xff]  ;;  %2073 = vst.msk [vmem:[%s3227_s26 + $0x60] sm:$0xff] %vm1704_vm0, %v2057_v57  ;;  %2008 = vst.msk [vmem:[#allocation3 + $0x70] sm:$0xff] %vm1704_vm0, %v1992_v30 }
 0x2f5   : > { %2074 = vst.msk [vmem:[%s3227_s26 + $0x68] sm:$0xff] %vm1704_vm0, %v2058_v11  ;;  %2009 = vst.msk [vmem:[#allocation3 + $0x78] sm:$0xff] %vm1704_vm0, %v1993_v32 }
 0x2f7   : > { %v2027_v23 = vld [vmem:[#allocation2 + $0x70] sm:$0xff] }
 0x2f8   : > { %v2028_v53 = vld [vmem:[#allocation2 + $0x78] sm:$0xff]  ;;  %2043 = vst.msk [vmem:[%s3219_s24 + $0x70] sm:$0xff] %vm1704_vm0, %v2027_v23 }
 0x2f9   : > { %2044 = vst.msk [vmem:[%s3219_s24 + $0x78] sm:$0xff] %vm1704_vm0, %v2028_v53 }
 0x2fb   : > { %v2059_v44 = vld [vmem:[#allocation3 + $0x70] sm:$0xff] }
 0x2fc   : > { %v2060_v20 = vld [vmem:[#allocation3 + $0x78] sm:$0xff]  ;;  %2075 = vst.msk [vmem:[%s3227_s26 + $0x70] sm:$0xff] %vm1704_vm0, %v2059_v44 }
 0x2fd   : > { %2076 = vst.msk [vmem:[%s3227_s26 + $0x78] sm:$0xff] %vm1704_vm0, %v2060_v20 }
 0x2fe PF: > { %s16_s20 = sadd.s32 1, %s2498_s20   ;;  %s3355_s18 = smov %s2494_s19 }
 0x2ff   : > { %p13_p5 = scmp.ge.s32.totalorder %s16_s20, 4   ;;  %s3356_s19 = smov %s3358_s21 }
 0x301   :  { %15 = sbr.rel (!%p13_p5) target bundleno = 2 (0x2), region = 94 }

</bundles_post_ra>
